<compile_context>
chip_gen: v5e
topology: v5e:2x2
jax: 0.10.0
libtpu: 0.0.40
codegen_flags: <defaults>
</compile_context>

<pallas_src>
import jax
import jax.numpy as jnp
import numpy as np
from jax.experimental import pallas as pl
from jax.experimental.pallas import tpu as pltpu


# ----------------------------------------------------------------------------
# Pallas kernel
# ----------------------------------------------------------------------------
def _attlayer2_kernel(x_ref, w1_ref, bw_ref, o_ref):
    """Additive-attention pooling for TB independent sequences.

    x_ref  : (TB, S, D)  input tile
    w1_ref : (D, D)      first Linear weight (resident)
    bw_ref : (2, D)      row 0 = b1 (first Linear bias), row 1 = w2 (D->1 weight)
    o_ref  : (TB, D)     pooled output (lane-dense store)
    """
    tb, s, d = x_ref.shape
    x = x_ref[...]                                  # (TB, S, D)
    w1 = w1_ref[...]                                # (D, D)
    bw = bw_ref[...]                                # (2, D)
    b1 = bw[0:1, :]                                 # (1, D)
    w2 = bw[1:2, :]                                 # (1, D)

    # Linear(D,D) + tanh over all TB*S tokens.
    if s % 8 == 0:
        # (TB,S,D)->(TB*S,D) is a free leading-dim merge when S is a sublane
        # multiple: one large-M MXU matmul.
        a = jnp.tanh(
            jnp.dot(x.reshape(tb * s, d), w1,
                    preferred_element_type=jnp.float32) + b1)
        a = a.reshape(tb, s, d)
    else:
        # Keep 3-D to avoid a tile-crossing reshape copy.
        a = jnp.tanh(
            jax.lax.dot_general(x, w1, (((2,), (0,)), ((), ())),
                                preferred_element_type=jnp.float32) + b1)

    # Linear(D,1,bias=False): per-token score, in dense (TB, S) layout.
    e = jnp.sum(a * w2, axis=-1)                    # (TB, S)

    # Numerically-stable softmax over the sequence axis (dim=1), exact divide.
    e = e - jnp.max(e, axis=1, keepdims=True)
    p = jnp.exp(e)                                  # (TB, S)
    w = p / jnp.sum(p, axis=1, keepdims=True)       # attention weights

    # Weighted sum over the sequence axis -> (TB, D), lane-dense store.
    o_ref[...] = jnp.sum(x * w[:, :, None], axis=1)


# ----------------------------------------------------------------------------
# Block-size selection
# ----------------------------------------------------------------------------
def _default_target_steps():
    """>=4 grid steps on 2-TensorCore chips (v7x); 2 is enough on 1-TC chips."""
    try:
        kind = jax.devices()[0].device_kind.lower()
        if "7" in kind:          # v7x: 2 TensorCores -> 2 parallel steps each
            return 4
        return 2                 # v5e / v6e: single TC, just keep pipelining
    except Exception:
        return 4                 # unknown: 4 is safe everywhere


def _choose_block_rows(n, s, d, target_steps, max_block_bytes=4 << 20):
    """Largest divisor of n (multiple of 8, or n itself) with the x block
    under max_block_bytes and, if possible, at least target_steps grid steps."""
    bytes_per_row = s * d * 4
    divisors = [t for t in range(1, n + 1) if n % t == 0]
    ok = [t for t in divisors
          if (t % 8 == 0 or t == n) and t * bytes_per_row <= max_block_bytes]
    if not ok:
        ok = [t for t in divisors if (t % 8 == 0 or t == n)]
    preferred = [t for t in ok if n // t >= target_steps]
    return max(preferred) if preferred else max(ok)


# ----------------------------------------------------------------------------
# Wrapper
# ----------------------------------------------------------------------------
def attlayer2_pallas(x, w1, b1, w2, *, block_rows=None, target_steps=None):
    """x: (N, S, D) float32 -> (N, D) float32."""
    n, s, d = x.shape
    if target_steps is None:
        target_steps = _default_target_steps()
    tb = block_rows if block_rows is not None else _choose_block_rows(
        n, s, d, target_steps)
    assert n % tb == 0, "block_rows must divide the batch size (no padding copy)"

    # Pack the two tiny constants into one resident (2, D) block.
    bw = jnp.concatenate([b1.reshape(1, d), w2.reshape(1, d)], axis=0)

    grid = (n // tb,)
    cost = pl.CostEstimate(
        flops=2 * n * s * d * d + 8 * n * s * d,
        transcendentals=n * s * (d + 1),
        bytes_accessed=4 * (n * s * d + n * d + d * d + 2 * d),
    )

    return pl.pallas_call(
        _attlayer2_kernel,
        out_shape=jax.ShapeDtypeStruct((n, d), jnp.float32),
        grid=grid,
        in_specs=[
            pl.BlockSpec((tb, s, d), lambda i: (i, 0, 0)),   # batched seq tile
            pl.BlockSpec((d, d), lambda i: (0, 0)),          # w1 (resident)
            pl.BlockSpec((2, d), lambda i: (0, 0)),          # [b1; w2] (resident)
        ],
        out_specs=pl.BlockSpec((tb, d), lambda i: (i, 0)),
        compiler_params=pltpu.CompilerParams(
            dimension_semantics=("parallel",)),
        cost_estimate=cost,
    )(x, w1, bw)


# ----------------------------------------------------------------------------
# Pure-JAX reference (mirrors PyTorch AttLayer2.forward)
# ----------------------------------------------------------------------------
def attlayer2_ref(x, w1, b1, w2):
    e = jnp.tanh(x @ w1 + b1) @ w2.T                # (N, S, 1)
    w = jax.nn.softmax(e, axis=1)
    return jnp.sum(x * w, axis=1)                   # (N, D)


# ----------------------------------------------------------------------------
if __name__ == "__main__":
    # Small shapes: N=128 sequences, seq len S=16, hidden D=128.
    # D=128 keeps every vector store lane-dense; S=16 keeps the merged-M
    # reshape free; block_rows is picked automatically (divides N, no pad).
    N, S, D = 128, 16, 128

    key = jax.random.PRNGKey(0)
    kx, kw1, kb1, kw2 = jax.random.split(key, 4)
    lim = 1.0 / np.sqrt(D)                          # PyTorch nn.Linear init bounds
    x = jax.random.normal(kx, (N, S, D), jnp.float32)
    w1 = jax.random.uniform(kw1, (D, D), jnp.float32, -lim, lim)
    b1 = jax.random.uniform(kb1, (1, D), jnp.float32, -lim, lim)
    w2 = jax.random.uniform(kw2, (1, D), jnp.float32, -lim, lim)  # Linear(D,1,bias=False)

    out = jax.block_until_ready(jax.jit(attlayer2_pallas)(x, w1, b1, w2))

    expected = jax.block_until_ready(attlayer2_ref(x, w1, b1, w2))
    np.testing.assert_allclose(np.asarray(out), np.asarray(expected),
                               rtol=1e-4, atol=1e-5)
    print("KERNEL_OK")
</pallas_src>

<mosaic_0001>
module attributes {stable_mosaic.version = 11 : i64} {
  func.func @_attlayer2_kernel(%arg0: i32, %arg1: memref<64x16x128xf32, #tpu.memory_space<vmem>>, %arg2: memref<128x128xf32, #tpu.memory_space<vmem>>, %arg3: memref<2x128xf32, #tpu.memory_space<vmem>>, %arg4: memref<64x128xf32, #tpu.memory_space<vmem>>) attributes {dimension_semantics = [#tpu.dimension_semantics<parallel>], iteration_bounds = array<i64: 2>, scalar_prefetch = 0 : i64, scratch_operands = 0 : i64, tpu.core_type = #tpu.core_type<tc>, window_params = [{transform_indices = @transform_0, window_bounds = array<i64: 64, 16, 128>}, {pipeline_mode = #tpu.pipeline_mode<synchronous>, transform_indices = @transform_1, window_bounds = array<i64: 128, 128>}, {pipeline_mode = #tpu.pipeline_mode<synchronous>, transform_indices = @transform_2, window_bounds = array<i64: 2, 128>}, {transform_indices = @transform_3, window_bounds = array<i64: 64, 128>}]} {
    %c0 = arith.constant 0 : index
    %c0_0 = arith.constant 0 : index
    %c0_1 = arith.constant 0 : index
    %0 = vector.load %arg1[%c0, %c0_0, %c0_1] : memref<64x16x128xf32, #tpu.memory_space<vmem>>, vector<64x16x128xf32>
    %c0_2 = arith.constant 0 : index
    %c0_3 = arith.constant 0 : index
    %1 = vector.load %arg2[%c0_2, %c0_3] : memref<128x128xf32, #tpu.memory_space<vmem>>, vector<128x128xf32>
    %c0_4 = arith.constant 0 : index
    %c0_5 = arith.constant 0 : index
    %2 = vector.load %arg3[%c0_4, %c0_5] : memref<2x128xf32, #tpu.memory_space<vmem>>, vector<2x128xf32>
    %3 = vector.extract_strided_slice %2 {offsets = [0, 0], sizes = [1, 128], strides = [1, 1]} : vector<2x128xf32> to vector<1x128xf32>
    %4 = vector.extract_strided_slice %2 {offsets = [1, 0], sizes = [1, 128], strides = [1, 1]} : vector<2x128xf32> to vector<1x128xf32>
    %5 = vector.shape_cast %0 : vector<64x16x128xf32> to vector<1024x128xf32>
    %cst = arith.constant dense<0.000000e+00> : vector<1024x128xf32>
    %6 = tpu.matmul %5, %1, %cst {dimension_numbers = #tpu.dot_dimension_numbers<[1], [0], [0], [1], [0, 0, 1, 1], [], []>} : vector<1024x128xf32>, vector<128x128xf32>, vector<1024x128xf32> -> vector<1024x128xf32>
    %7 = vector.broadcast %3 : vector<1x128xf32> to vector<1024x128xf32>
    %8 = arith.addf %6, %7 : vector<1024x128xf32>
    %9 = math.tanh %8 : vector<1024x128xf32>
    %10 = vector.shape_cast %9 : vector<1024x128xf32> to vector<64x16x128xf32>
    %11 = vector.shape_cast %4 : vector<1x128xf32> to vector<1x1x128xf32>
    %12 = vector.broadcast %11 : vector<1x1x128xf32> to vector<64x16x128xf32>
    %13 = arith.mulf %10, %12 : vector<64x16x128xf32>
    %cst_6 = arith.constant dense<0.000000e+00> : vector<64x16xf32>
    %14 = vector.multi_reduction <add>, %13, %cst_6 [2] : vector<64x16x128xf32> to vector<64x16xf32>
    %cst_7 = arith.constant dense<0xFF800000> : vector<64xf32>
    %15 = vector.multi_reduction <maximumf>, %14, %cst_7 [1] : vector<64x16xf32> to vector<64xf32>
    %16 = vector.shape_cast %15 : vector<64xf32> to vector<64x1xf32>
    %17 = vector.broadcast %16 : vector<64x1xf32> to vector<64x16xf32>
    %18 = arith.subf %14, %17 : vector<64x16xf32>
    %19 = math.exp %18 : vector<64x16xf32>
    %cst_8 = arith.constant dense<0.000000e+00> : vector<64xf32>
    %20 = vector.multi_reduction <add>, %19, %cst_8 [1] : vector<64x16xf32> to vector<64xf32>
    %21 = vector.shape_cast %20 : vector<64xf32> to vector<64x1xf32>
    %22 = vector.broadcast %21 : vector<64x1xf32> to vector<64x16xf32>
    %23 = arith.divf %19, %22 : vector<64x16xf32>
    %24 = vector.shape_cast %23 : vector<64x16xf32> to vector<64x16x1xf32>
    %25 = vector.broadcast %24 : vector<64x16x1xf32> to vector<64x16x128xf32>
    %26 = arith.mulf %0, %25 : vector<64x16x128xf32>
    %cst_9 = arith.constant dense<0.000000e+00> : vector<64x128xf32>
    %27 = vector.multi_reduction <add>, %26, %cst_9 [1] : vector<64x16x128xf32> to vector<64x128xf32>
    %c0_10 = arith.constant 0 : index
    %c0_11 = arith.constant 0 : index
    %28 = vector.load %arg4[%c0_10, %c0_11] : memref<64x128xf32, #tpu.memory_space<vmem>>, vector<64x128xf32>
    tpu.vector_store %arg4[%c0_10, %c0_11], %27 {strides = array<i32>} : memref<64x128xf32, #tpu.memory_space<vmem>>, vector<64x128xf32>,
    return
  }
  func.func @transform_0(%arg0: i32) -> (i32, i32, i32) {
    %c0_i32 = arith.constant 0 : i32
    %c0_i32_0 = arith.constant 0 : i32
    %c0_i32_1 = arith.constant 0 : i32
    return %arg0, %c0_i32, %c0_i32_0 : i32, i32, i32
  }
  func.func @transform_1(%arg0: i32) -> (i32, i32) {
    %c0_i32 = arith.constant 0 : i32
    %c0_i32_0 = arith.constant 0 : i32
    %c0_i32_1 = arith.constant 0 : i32
    return %c0_i32, %c0_i32_0 : i32, i32
  }
  func.func @transform_2(%arg0: i32) -> (i32, i32) {
    %c0_i32 = arith.constant 0 : i32
    %c0_i32_0 = arith.constant 0 : i32
    %c0_i32_1 = arith.constant 0 : i32
    return %c0_i32, %c0_i32_0 : i32, i32
  }
  func.func @transform_3(%arg0: i32) -> (i32, i32) {
    %c0_i32 = arith.constant 0 : i32
    %c0_i32_0 = arith.constant 0 : i32
    return %arg0, %c0_i32 : i32, i32
  }
}

</mosaic_0001>

<bundles_post_ra>
// kernel: attlayer2_pallas.1
= control target key start
LH: loop header
LB: loop body
LE: loop exit
PB: predicated region body
PF: predicated region fallthrough
CT: control target
= control target key end

     0   :  { %8 = vsyncpa [#allocation3], 0  ;;  %s11446_s0 = inlined_call_operand.hbm [shape: f32[128,16,128], index: 0, kind: input, shape index: {}]   ;;  %s11447_s1 = inlined_call_operand.hbm [shape: f32[128,128], index: 1, kind: input, shape index: {}]   ;;  %s11448_s2 = inlined_call_operand.vmem [shape: f32[2,128], index: 2, kind: input, shape index: {}]   ;;  %s11449_s3 = inlined_call_operand.hbm [shape: f32[128,128], index: 3, kind: output, shape index: {}]  }
   0x1   :  { %10 = vsyncpa [#allocation3 + $0x1], 0 }
   0x2   :  { %11 = vsyncpa [#allocation6], 0 }
   0x3   :  { %12 = vsyncpa [#allocation4], 0 }
   0x4   :  { %14 = vsyncpa [#allocation4 + $0x1], 0  ;;  %s6673_s12 = smov 0   ;;  %s6675_s13 = smov 0  }
   0x5   :  { %s6677_s14 = smov 0   ;;  %s6679_s15 = smov 0  }
   0x6 LB: > { %s6694_s16 = sadd.s32 4294967295, %s6645_s15   ;;  %s5614_s17 = sadd.s32 4294967294, %s6645_s15   ;;  %s6645_s15 = sphi %s6679_s15, %s12647_s15   ;;  %s6641_s14 = sphi %s6677_s14, %s12646_s14   ;;  %s6637_s13 = sphi %s6675_s13, %s12645_s13   ;;  %s6633_s12 = sphi %s6673_s12, %s12644_s12  }
   0x7   : > { %p40_p0 = scmp.ne.s32.totalorder %s6637_s13, %s6633_s12  ;;  %p41_p1 = scmp.eq.s32.totalorder %s6694_s16, 0 }
   0x8   : > { %p106_p2 = scmp.eq.s32.totalorder %s6694_s16, 1  ;;  %p112_p3 = scmp.eq.s32.totalorder %s5614_s17, 1 }
   0x9   : > { %p6703_p4 = por %p41_p1, %p40_p0  ;;  %p5615_p5 = scmp.ge.s32.totalorder %s6645_s15, 1 }
   0xa   : > { %p6708_p6 = por %p112_p3, %p40_p0  ;;  %p119_p7 = scmp.lt.s32.totalorder %s6645_s15, 3 }
   0xb   : > { %s130_s22 = sshll.u32 %s11447_s1, 4  ;;  %s6647_s24 = smov [#allocation5]   ;;  %s131_s22 = int_to_ptr.hbm [resolvable:$true] %s130_s22 }
   0xc   : > { %p6716_p8 = pnand %p5615_p5, %p119_p7  ;;  %s132_s25 = sshll.u32 %s6647_s24, 4  ;;  %s133_s25 = int_to_ptr.vmem [resolvable:$true] %s132_s25 }
   0xd   : > { %s6726_s26 = sadd.s32 1, %s6645_s15   ;;  %s6648_s27 = smov 128  }
   0xe   : > { %p5690_p9 = pneg %p6716_p8  ;;  %s6649_s28 = smov 8  }
   0xf   : > { %s24_s29 = ssub.s32 %s6645_s15, %s6726_s26  ;;  %s27_s30 = sadd.s32 1, %s6641_s14 }
  0x10   : > { %p5691_p10 = pnand %p5690_p9, %p41_p1  ;;  %p25_p12 = scmp.eq.s32.totalorder %s24_s29, 0 }
  0x11   : > { %p34_p13 = scmp.ne.s32.totalorder %s6641_s14, %s6637_s13  ;;  %p35_p0 = scmp.eq.s32.totalorder %s6645_s15, 0 }
  0x12   : > { %5693 = dma.hbm_to_vmem [thread:$0]  (!%p5691_p10), %s131_s22, 2048, %s133_s25, [#allocation6], %s6648_s27, %s6648_s27, %s6649_s28  }
  0x13   : > { %s6738_s4 = scalar_select %p25_p12, %s6641_s14, %s27_s30  }
  0x14   : > { %p6742_p3 = por %p106_p2, %p34_p13  ;;  %p5703_p5 = scmp.lt.s32.totalorder %s6645_s15, 2 }
  0x15   : > { %s149_s6 = sand.u32 1, %s6641_s14   ;;  %s5632_s7 = sshll.u32 %s6645_s15, 10 }
  0x16   : > { %p36_p7 = por %p35_p0, %p34_p13  ;;  %s5618_s8 = sshll.u32 %s149_s6, 10 }
  0x17   : > { %s159_s11 = scalar_lea.hbm %s11446_s0, %s5632_s7  ;;  %s153_s20 = scalar_lea.vmem [#allocation2], %s5618_s8 }
  0x18   : > { %s160_s17 = sshll.u32 %s159_s11, 4  ;;  %s162_s21 = sshll.u32 %s153_s20, 4  ;;  %s161_s17 = int_to_ptr.hbm [resolvable:$true] %s160_s17  ;;  %s163_s21 = int_to_ptr.vmem [resolvable:$true] %s162_s21 }
  0x19   : > { %p6752_p9 = pnand %p5703_p5, %p36_p7  ;;  %s150_s24 = scalar_lea.sflag [#allocation3], %s149_s6 }
  0x1a   : > { %s6545_s25 = sshra.s32 %s161_s17, 4  ;;  %s6552_s8 = scalar_lea.hbm %s11446_s0, 2048  ;;  %s6546_s25 = int_to_ptr.hbm [resolvable:$true] %s6545_s25 }
  0x1b   : > { %s6547_s29 = scalar_lea.hbm %s6546_s25, 1024  ;;  %p6549_p10 = pneg %p6752_p9 }
  0x1c   : > { %p6548_p2 = scmp.ne.s32.totalorder %s6546_s25, %s6547_s29  ;;  %p6553_p0 = scmp.lt.s32.totalorder %s6546_s25, %s11446_s0 }
  0x1d   : > { %p6554_p5 = scmp.lt.s32.totalorder %s6552_s8, %s6547_s29 }
  0x1e   : > { %p6550_p12 = pnand %p6549_p10, %p6548_p2 }
  0x1f   : > { %p6555_p7 = por %p6554_p5, %p6553_p0 }
  0x20   : > { %p6551_p13 = pneg %p6550_p12 }
  0x22   : > { %p6556_p11 = pnand %p6555_p7, %p6551_p13 }
  0x24   : > { %6559 = shalt.err (!%p6556_p11)
}
  0x25   : > { %5697 = dma.hbm_to_vmem [thread:$0]  (!%p6752_p9), %s161_s17, 16384, %s163_s21, %s150_s24, %s6648_s27, %s6648_s27, %s6649_s28  }
  0x26   : > { %174 = sbr.rel (%p6716_p8) target bundleno = 1740 (0x6cc), region = 32 }
  0x2b   : > { %s6772_s6 = sand.u32 1, %s6637_s13  }
  0x2c   : > { %s5623_s11 = sshll.u32 %s6772_s6, 10  ;;  %s177_s20 = scalar_lea.sflag [#allocation3], %s6772_s6 }
  0x2d   : > { %s6776_s25 = scalar_lea.vmem [#allocation2], %s5623_s11 }
  0x2e   : > { %6620 = dma.done.wait (%p6703_p4), %s177_s20, 16384  }
  0x2f   : > { %6622 = vsyncadd (%p6703_p4), %s177_s20, 4294950912 }
  0x30   : > { %6624 = dma.done.wait (%p41_p1), [#allocation6], 2048  }
  0x31   : > { %6626 = vsyncadd (%p41_p1), [#allocation6], 4294965248  ;;  %v354_v0 = vld [vmem:[#allocation5 + $0x78] sm:$0xff]  ;;  %v353_v1 = vld [vmem:[#allocation5 + $0x70] sm:$0xff]  ;;  %vm1404_vm0 = vcmask 130112   ;;  %vm1595_vm1 = vcmask 1041409  }
  0x32   : > { %357 = vmatpush.msra.mxu0 %v354_v0  ;;  %5635 = vmatpush.msra.mxu2 %v354_v0  ;;  %v352_v2 = vld [vmem:[#allocation5 + $0x68] sm:$0xff]  ;;  %v351_v3 = vld [vmem:[#allocation5 + $0x60] sm:$0xff]  ;;  %v350_v4 = vld [vmem:[#allocation5 + $0x58] sm:$0xff]  ;;  %vm1597_vm2 = vcmask 1042434   ;;  %vm1599_vm3 = vcmask 1043459   ;;  %vm1601_vm4 = vcmask 1044484  }
  0x33   : > { %5636 = vmatpush.msra.mxu3 %v354_v0  ;;  %5634 = vmatpush.msra.mxu1 %v354_v0  ;;  %v349_v5 = vld [vmem:[#allocation5 + $0x50] sm:$0xff]  ;;  %v348_v6 = vld [vmem:[#allocation5 + $0x48] sm:$0xff]  ;;  %v347_v7 = vld [vmem:[#allocation5 + $0x40] sm:$0xff]  ;;  %vm1603_vm5 = vcmask 1045509   ;;  %vm1605_vm6 = vcmask 1046534   ;;  %vm11705_vm7 = vcmask 1047559  }
  0x34   : > { %358 = vmatpush.msra.mxu0 %v353_v1  ;;  %5638 = vmatpush.msra.mxu2 %v353_v1  ;;  %v346_v8 = vld [vmem:[#allocation5 + $0x38] sm:$0xff]  ;;  %v345_v9 = vld [vmem:[#allocation5 + $0x30] sm:$0xff]  ;;  %v344_v10 = vld [vmem:[#allocation5 + $0x28] sm:$0xff]  ;;  %vm1666_vm8 = vcmask 130048   ;;  %s5625_s27 = sshll.u32 %s6772_s6, 6  ;;  %s5633_s17 = sshll.u32 %s6694_s16, 6 }
  0x35   : > { %5639 = vmatpush.msra.mxu3 %v353_v1  ;;  %5637 = vmatpush.msra.mxu1 %v353_v1  ;;  %v343_v11 = vld [vmem:[#allocation5 + $0x20] sm:$0xff]  ;;  %v342_v12 = vld [vmem:[#allocation5 + $0x18] sm:$0xff]  ;;  %v341_v13 = vld [vmem:[#allocation5 + $0x10] sm:$0xff]  ;;  %s10475_s28 = scalar_lea.vmem [#allocation7], %s5625_s27  ;;  %s5527_s24 = scalar_lea.hbm %s11449_s3, %s5633_s17 }
  0x36   : > { %359 = vmatpush.msra.mxu0 %v352_v2  ;;  %5641 = vmatpush.msra.mxu2 %v352_v2  ;;  %v340_v14 = vld [vmem:[#allocation5 + $0x8] sm:$0xff]  ;;  %v339_v15 = vld [vmem:[#allocation5] sm:$0xff]  ;;  %v213_v24 = vld [vmem:[%s6776_s25 + $0x10] sm:$0xff]  ;;  %s5528_s16 = sshll.u32 %s10475_s28, 4  ;;  %s5530_s29 = sshll.u32 %s5527_s24, 4  ;;  %s5529_s16 = int_to_ptr.vmem [resolvable:$true] %s5528_s16  ;;  %s5531_s29 = int_to_ptr.hbm [resolvable:$true] %s5530_s29 }
  0x37   : > { %5642 = vmatpush.msra.mxu3 %v352_v2  ;;  %5640 = vmatpush.msra.mxu1 %v352_v2  ;;  %v211_v16 = vld [vmem:[%s6776_s25] sm:$0xff]  ;;  %v212_v20 = vld [vmem:[%s6776_s25 + $0x8] sm:$0xff]  ;;  %v309_v25 = vld [vmem:[%s6776_s25 + $0x310] sm:$0xff]  ;;  %s5516_s30 = scalar_lea.sflag [#allocation4], %s6772_s6  ;;  %s6589_s7 = sshra.s32 %s5531_s29, 4  ;;  %s6590_s7 = int_to_ptr.hbm [resolvable:$true] %s6589_s7 }
  0x38   : > { %360 = vmatpush.msra.mxu0 %v351_v3  ;;  %5644 = vmatpush.msra.mxu2 %v351_v3  ;;  %v275_v17 = vld [vmem:[%s6776_s25 + $0x200] sm:$0xff]  ;;  %v276_v21 = vld [vmem:[%s6776_s25 + $0x208] sm:$0xff]  ;;  %v277_v26 = vld [vmem:[%s6776_s25 + $0x210] sm:$0xff]  ;;  %s6591_s8 = scalar_lea.hbm %s6590_s7, 64  ;;  %s6595_s11 = scalar_lea.hbm %s11449_s3, 128 }
  0x39   : > { %5645 = vmatpush.msra.mxu3 %v351_v3  ;;  %5643 = vmatpush.msra.mxu1 %v351_v3  ;;  %v307_v18 = vld [vmem:[%s6776_s25 + $0x300] sm:$0xff]  ;;  %v308_v22 = vld [vmem:[%s6776_s25 + $0x308] sm:$0xff]  ;;  %v245_v27 = vld [vmem:[%s6776_s25 + $0x110] sm:$0xff]  ;;  %p6592_p1 = scmp.ne.s32.totalorder %s6590_s7, %s6591_s8  ;;  %p6596_p11 = scmp.lt.s32.totalorder %s6590_s7, %s11449_s3 }
  0x3a   : > { %361 = vmatpush.msra.mxu0 %v350_v4  ;;  %5647 = vmatpush.msra.mxu2 %v350_v4  ;;  %v243_v19 = vld [vmem:[%s6776_s25 + $0x100] sm:$0xff]  ;;  %v244_v23 = vld [vmem:[%s6776_s25 + $0x108] sm:$0xff]  ;;  %v214_v28 = vld [vmem:[%s6776_s25 + $0x18] sm:$0xff]  ;;  %p6597_p9 = scmp.lt.s32.totalorder %s6595_s11, %s6591_s8 }
  0x3b   : > { %5648 = vmatpush.msra.mxu3 %v350_v4  ;;  %5646 = vmatpush.msra.mxu1 %v350_v4  ;;  %v278_v29 = vld [vmem:[%s6776_s25 + $0x218] sm:$0xff]  ;;  %v215_v32 = vld [vmem:[%s6776_s25 + $0x20] sm:$0xff]  ;;  %v216_v36 = vld [vmem:[%s6776_s25 + $0x28] sm:$0xff]  ;;  %p6593_p4 = pnand %p6592_p1, %p6742_p3 }
  0x3c   : > { %362 = vmatpush.msra.mxu0 %v349_v5  ;;  %5650 = vmatpush.msra.mxu2 %v349_v5  ;;  %v310_v30 = vld [vmem:[%s6776_s25 + $0x318] sm:$0xff]  ;;  %v279_v33 = vld [vmem:[%s6776_s25 + $0x220] sm:$0xff]  ;;  %v280_v37 = vld [vmem:[%s6776_s25 + $0x228] sm:$0xff]  ;;  %p6598_p2 = por %p6597_p9, %p6596_p11 }
  0x3d   : > { %5651 = vmatpush.msra.mxu3 %v349_v5  ;;  %5649 = vmatpush.msra.mxu1 %v349_v5  ;;  %v246_v31 = vld [vmem:[%s6776_s25 + $0x118] sm:$0xff]  ;;  %v311_v34 = vld [vmem:[%s6776_s25 + $0x320] sm:$0xff]  ;;  %v312_v38 = vld [vmem:[%s6776_s25 + $0x328] sm:$0xff]  ;;  %p6594_p8 = pneg %p6593_p4 }
  0x3e   : > { %363 = vmatpush.msra.mxu0 %v348_v6  ;;  %5653 = vmatpush.msra.mxu2 %v348_v6  ;;  %v247_v35 = vld [vmem:[%s6776_s25 + $0x120] sm:$0xff]  ;;  %v248_v39 = vld [vmem:[%s6776_s25 + $0x128] sm:$0xff]  ;;  %v217_v40 = vld [vmem:[%s6776_s25 + $0x30] sm:$0xff] }
  0x3f   : > { %5654 = vmatpush.msra.mxu3 %v348_v6  ;;  %5652 = vmatpush.msra.mxu1 %v348_v6  ;;  %v281_v41 = vld [vmem:[%s6776_s25 + $0x230] sm:$0xff]  ;;  %v218_v44 = vld [vmem:[%s6776_s25 + $0x38] sm:$0xff]  ;;  %v219_v48 = vld [vmem:[%s6776_s25 + $0x40] sm:$0xff]  ;;  %p6599_p10 = pnand %p6598_p2, %p6594_p8 }
  0x40   : > { %364 = vmatpush.msra.mxu0 %v347_v7  ;;  %5656 = vmatpush.msra.mxu2 %v347_v7  ;;  %v313_v42 = vld [vmem:[%s6776_s25 + $0x330] sm:$0xff]  ;;  %v282_v45 = vld [vmem:[%s6776_s25 + $0x238] sm:$0xff]  ;;  %v283_v49 = vld [vmem:[%s6776_s25 + $0x240] sm:$0xff] }
  0x41   : > { %5657 = vmatpush.msra.mxu3 %v347_v7  ;;  %5655 = vmatpush.msra.mxu1 %v347_v7  ;;  %v249_v43 = vld [vmem:[%s6776_s25 + $0x130] sm:$0xff]  ;;  %v314_v46 = vld [vmem:[%s6776_s25 + $0x338] sm:$0xff]  ;;  %v315_v50 = vld [vmem:[%s6776_s25 + $0x340] sm:$0xff] }
  0x42   : > { %365 = vmatpush.msra.mxu0 %v346_v8  ;;  %5659 = vmatpush.msra.mxu2 %v346_v8  ;;  %v250_v47 = vld [vmem:[%s6776_s25 + $0x138] sm:$0xff]  ;;  %v251_v51 = vld [vmem:[%s6776_s25 + $0x140] sm:$0xff]  ;;  %v220_v52 = vld [vmem:[%s6776_s25 + $0x48] sm:$0xff] }
  0x43   : > { %5660 = vmatpush.msra.mxu3 %v346_v8  ;;  %5658 = vmatpush.msra.mxu1 %v346_v8  ;;  %v284_v53 = vld [vmem:[%s6776_s25 + $0x248] sm:$0xff]  ;;  %v221_v56 = vld [vmem:[%s6776_s25 + $0x50] sm:$0xff]  ;;  %v222_v60 = vld [vmem:[%s6776_s25 + $0x58] sm:$0xff] }
  0x44   : > { %366 = vmatpush.msra.mxu0 %v345_v9  ;;  %5662 = vmatpush.msra.mxu2 %v345_v9  ;;  %v316_v54 = vld [vmem:[%s6776_s25 + $0x348] sm:$0xff]  ;;  %v285_v57 = vld [vmem:[%s6776_s25 + $0x250] sm:$0xff]  ;;  %v286_v61 = vld [vmem:[%s6776_s25 + $0x258] sm:$0xff] }
  0x45   : > { %5663 = vmatpush.msra.mxu3 %v345_v9  ;;  %5661 = vmatpush.msra.mxu1 %v345_v9  ;;  %v252_v55 = vld [vmem:[%s6776_s25 + $0x148] sm:$0xff]  ;;  %v317_v58 = vld [vmem:[%s6776_s25 + $0x350] sm:$0xff]  ;;  %v318_v62 = vld [vmem:[%s6776_s25 + $0x358] sm:$0xff] }
  0x46   : > { %367 = vmatpush.msra.mxu0 %v344_v10  ;;  %5665 = vmatpush.msra.mxu2 %v344_v10  ;;  %v253_v59 = vld [vmem:[%s6776_s25 + $0x150] sm:$0xff]  ;;  %v254_v63 = vld [vmem:[%s6776_s25 + $0x158] sm:$0xff]  ;;  %v223_v0 = vld [vmem:[%s6776_s25 + $0x60] sm:$0xff] }
  0x47   : > { %5666 = vmatpush.msra.mxu3 %v344_v10  ;;  %5664 = vmatpush.msra.mxu1 %v344_v10  ;;  %v287_v1 = vld [vmem:[%s6776_s25 + $0x260] sm:$0xff]  ;;  %v288_v4 = vld [vmem:[%s6776_s25 + $0x268] sm:$0xff]  ;;  %v289_v8 = vld [vmem:[%s6776_s25 + $0x270] sm:$0xff] }
  0x48   : > { %368 = vmatpush.msra.mxu0 %v343_v11  ;;  %5668 = vmatpush.msra.mxu2 %v343_v11  ;;  %v319_v2 = vld [vmem:[%s6776_s25 + $0x360] sm:$0xff]  ;;  %v224_v5 = vld [vmem:[%s6776_s25 + $0x68] sm:$0xff]  ;;  %v225_v10 = vld [vmem:[%s6776_s25 + $0x70] sm:$0xff] }
  0x49   : > { %5669 = vmatpush.msra.mxu3 %v343_v11  ;;  %5667 = vmatpush.msra.mxu1 %v343_v11  ;;  %v255_v3 = vld [vmem:[%s6776_s25 + $0x160] sm:$0xff]  ;;  %v256_v6 = vld [vmem:[%s6776_s25 + $0x168] sm:$0xff]  ;;  %v321_v11 = vld [vmem:[%s6776_s25 + $0x370] sm:$0xff] }
  0x4a   : > { %369 = vmatpush.msra.mxu0 %v342_v12  ;;  %5671 = vmatpush.msra.mxu2 %v342_v12  ;;  %v320_v7 = vld [vmem:[%s6776_s25 + $0x368] sm:$0xff]  ;;  %v355_v9 = vld [vmem:[%s11448_s2] sm:$0x3] }
  0x4b   : > { %5672 = vmatpush.msra.mxu3 %v342_v12  ;;  %5670 = vmatpush.msra.mxu1 %v342_v12  ;;  %v6848_v12 = vperm.slane %v355_v9, 0 }
  0x4c   : > { %370 = vmatpush.msra.mxu0 %v341_v13  ;;  %5674 = vmatpush.msra.mxu2 %v341_v13 }
  0x4d   : > { %5675 = vmatpush.msra.mxu3 %v341_v13  ;;  %5673 = vmatpush.msra.mxu1 %v341_v13  ;;  %v257_v13 = vld [vmem:[%s6776_s25 + $0x170] sm:$0xff] }
  0x4e   : > { %371 = vmatpush.msra.mxu0 %v340_v14  ;;  %5677 = vmatpush.msra.mxu2 %v340_v14 }
  0x4f   : > { %5678 = vmatpush.msra.mxu3 %v340_v14  ;;  %5676 = vmatpush.msra.mxu1 %v340_v14 }
  0x50   : > { %372 = vmatpush.msra.mxu0 %v339_v15  ;;  %5680 = vmatpush.msra.mxu2 %v339_v15 }
  0x51   : > { %5681 = vmatpush.msra.mxu3 %v339_v15  ;;  %373 = vmatmul.f32.vlgmr.msra.gmra.mxu0 %v211_v16 }
  0x52   : > { %565 = vmatmul.f32.vlgmr.msra.gmra.mxu2 %v275_v17  ;;  %661 = vmatmul.f32.vlgmr.msra.gmra.mxu3 %v307_v18  ;;  %v226_v18 = vld [vmem:[%s6776_s25 + $0x78] sm:$0xff] }
  0x53   : > { %5679 = vmatpush.msra.mxu1 %v339_v15 }
  0x54   : > { %469 = vmatmul.f32.vlgmr.msra.gmra.mxu1 %v243_v19  ;;  %v290_v19 = vld [vmem:[%s6776_s25 + $0x278] sm:$0xff] }
  0x59   : > { %376 = vmatmul.f32.gmra.mxu0 %v212_v20  ;;  %v322_v20 = vld [vmem:[%s6776_s25 + $0x378] sm:$0xff] }
  0x5a   : > { %568 = vmatmul.f32.gmra.mxu2 %v276_v21  ;;  %664 = vmatmul.f32.gmra.mxu3 %v308_v22  ;;  %v258_v21 = vld [vmem:[%s6776_s25 + $0x178] sm:$0xff]  ;;  %v6857_v22 = vperm.slane %v355_v9, 1 }
  0x5c   : > { %472 = vmatmul.f32.gmra.mxu1 %v244_v23 }
  0x61   : > { %379 = vmatmul.f32.gmra.mxu0 %v213_v24 }
  0x62   : > { %667 = vmatmul.f32.gmra.mxu3 %v309_v25  ;;  %571 = vmatmul.f32.gmra.mxu2 %v277_v26 }
  0x64   : > { %475 = vmatmul.f32.gmra.mxu1 %v245_v27 }
  0x69   : > { %382 = vmatmul.f32.gmra.mxu0 %v214_v28 }
  0x6a   : > { %574 = vmatmul.f32.gmra.mxu2 %v278_v29  ;;  %670 = vmatmul.f32.gmra.mxu3 %v310_v30 }
  0x6c   : > { %478 = vmatmul.f32.gmra.mxu1 %v246_v31 }
  0x71   : > { %385 = vmatmul.f32.gmra.mxu0 %v215_v32  ;;  %v291_v32 = vld [vmem:[%s6776_s25 + $0x280] sm:$0xff] }
  0x72   : > { %577 = vmatmul.f32.gmra.mxu2 %v279_v33  ;;  %673 = vmatmul.f32.gmra.mxu3 %v311_v34  ;;  %v227_v33 = vld [vmem:[%s6776_s25 + $0x80] sm:$0xff] }
  0x74   : > { %481 = vmatmul.f32.gmra.mxu1 %v247_v35 }
  0x79   : > { %388 = vmatmul.f32.gmra.mxu0 %v216_v36 }
  0x7a   : > { %580 = vmatmul.f32.gmra.mxu2 %v280_v37  ;;  %676 = vmatmul.f32.gmra.mxu3 %v312_v38 }
  0x7c   : > { %484 = vmatmul.f32.gmra.mxu1 %v248_v39 }
  0x81   : > { %391 = vmatmul.f32.gmra.mxu0 %v217_v40 }
  0x82   : > { %583 = vmatmul.f32.gmra.mxu2 %v281_v41  ;;  %679 = vmatmul.f32.gmra.mxu3 %v313_v42 }
  0x84   : > { %487 = vmatmul.f32.gmra.mxu1 %v249_v43 }
  0x89   : > { %394 = vmatmul.f32.gmra.mxu0 %v218_v44 }
  0x8a   : > { %586 = vmatmul.f32.gmra.mxu2 %v282_v45  ;;  %682 = vmatmul.f32.gmra.mxu3 %v314_v46 }
  0x8c   : > { %490 = vmatmul.f32.gmra.mxu1 %v250_v47  ;;  %v259_v47 = vld [vmem:[%s6776_s25 + $0x180] sm:$0xff] }
  0x91   : > { %397 = vmatmul.f32.gmra.mxu0 %v219_v48  ;;  %v323_v48 = vld [vmem:[%s6776_s25 + $0x380] sm:$0xff] }
  0x92   : > { %589 = vmatmul.f32.gmra.mxu2 %v283_v49  ;;  %685 = vmatmul.f32.gmra.mxu3 %v315_v50  ;;  %v292_v49 = vld [vmem:[%s6776_s25 + $0x288] sm:$0xff] }
  0x94   : > { %493 = vmatmul.f32.gmra.mxu1 %v251_v51  ;;  %v228_v51 = vld [vmem:[%s6776_s25 + $0x88] sm:$0xff] }
  0x99   : > { %400 = vmatmul.f32.gmra.mxu0 %v220_v52 }
  0x9a   : > { %592 = vmatmul.f32.gmra.mxu2 %v284_v53  ;;  %688 = vmatmul.f32.gmra.mxu3 %v316_v54 }
  0x9c   : > { %496 = vmatmul.f32.gmra.mxu1 %v252_v55 }
  0xa1   : > { %403 = vmatmul.f32.gmra.mxu0 %v221_v56 }
  0xa2   : > { %595 = vmatmul.f32.gmra.mxu2 %v285_v57  ;;  %691 = vmatmul.f32.gmra.mxu3 %v317_v58 }
  0xa4   : > { %499 = vmatmul.f32.gmra.mxu1 %v253_v59 }
  0xa9   : > { %406 = vmatmul.f32.gmra.mxu0 %v222_v60 }
  0xaa   : > { %598 = vmatmul.f32.gmra.mxu2 %v286_v61  ;;  %694 = vmatmul.f32.gmra.mxu3 %v318_v62 }
  0xac   : > { %502 = vmatmul.f32.gmra.mxu1 %v254_v63 }
  0xb1   : > { %409 = vmatmul.f32.gmra.mxu0 %v223_v0 }
  0xb2   : > { %601 = vmatmul.f32.gmra.mxu2 %v287_v1  ;;  %697 = vmatmul.f32.gmra.mxu3 %v319_v2  ;;  %v324_v1 = vld [vmem:[%s6776_s25 + $0x388] sm:$0xff] }
  0xb3   : > { %v260_v2 = vld [vmem:[%s6776_s25 + $0x188] sm:$0xff] }
  0xb4   : > { %505 = vmatmul.f32.gmra.mxu1 %v255_v3 }
  0xb9   : > { %412 = vmatmul.f32.gmra.mxu0 %v224_v5 }
  0xba   : > { %604 = vmatmul.f32.gmra.mxu2 %v288_v4  ;;  %700 = vmatmul.f32.gmra.mxu3 %v320_v7 }
  0xbc   : > { %508 = vmatmul.f32.gmra.mxu1 %v256_v6 }
  0xc1   : > { %415 = vmatmul.f32.gmra.mxu0 %v225_v10 }
  0xc2   : > { %607 = vmatmul.f32.gmra.mxu2 %v289_v8  ;;  %703 = vmatmul.f32.gmra.mxu3 %v321_v11 }
  0xc4   : > { %511 = vmatmul.f32.gmra.mxu1 %v257_v13 }
  0xc9   : > { %418 = vmatmul.f32.gmra.mxu0 %v226_v18  ;;  %v293_v18 = vld [vmem:[%s6776_s25 + $0x290] sm:$0xff] }
  0xca   : > { %610 = vmatmul.f32.gmra.mxu2 %v290_v19  ;;  %706 = vmatmul.f32.gmra.mxu3 %v322_v20  ;;  %v325_v19 = vld [vmem:[%s6776_s25 + $0x390] sm:$0xff] }
  0xcc   : > { %514 = vmatmul.f32.gmra.mxu1 %v258_v21  ;;  %v261_v21 = vld [vmem:[%s6776_s25 + $0x190] sm:$0xff] }
  0xce   : > { %v374_v14 = vpop.f32.mrf.mxu0 }
  0xcf   : > { %v375_v15 = vadd.f32 %v374_v14, %v6848_v12 }
  0xd1   : > { %5747 = vtanh.f32 %v375_v15  ;;  %v470_v16 = vpop.f32.mrf.mxu1  ;;  %421 = vmatmul.f32.gmra.mxu0 %v227_v33  ;;  %v294_v33 = vld [vmem:[%s6776_s25 + $0x298] sm:$0xff] }
  0xd2   : > { %v471_v17 = vadd.f32 %v470_v16, %v6848_v12  ;;  %613 = vmatmul.f32.gmra.mxu2 %v291_v32  ;;  %709 = vmatmul.f32.gmra.mxu3 %v323_v48 }
  0xd4   : > { %5749 = vtanh.f32 %v471_v17  ;;  %517 = vmatmul.f32.gmra.mxu1 %v259_v47  ;;  %v229_v17 = vld [vmem:[%s6776_s25 + $0x90] sm:$0xff] }
  0xd5   : > { %v566_v23 = vpop.f32.mrf.mxu2  ;;  %v662_v24 = vpop.f32.mrf.mxu3 }
  0xd6   : > { %v567_v25 = vadd.f32 %v566_v23, %v6848_v12  ;;  %v663_v26 = vadd.f32 %v662_v24, %v6848_v12  ;;  %v377_v27 = vpop.f32.mrf.mxu0 }
  0xd7   : > { %v5748_v28 = vpop.eup %5747  ;;  %v378_v34 = vadd.f32 %v377_v27, %v6848_v12 }
  0xd8   : > { %5751 = vtanh.f32 %v567_v25  ;;  %v887_v29 = vmul.f32 %v5748_v28, %v6857_v22 }
  0xd9   : > { %5753 = vtanh.f32 %v663_v26  ;;  %v473_v30 = vpop.f32.mrf.mxu1  ;;  %424 = vmatmul.f32.gmra.mxu0 %v228_v51  ;;  %v295_v51 = vld [vmem:[%s6776_s25 + $0x2a0] sm:$0xff] }
  0xda   : > { %v5750_v31 = vpop.eup %5749  ;;  %1015 = vadd.xlane.f32.xlu0 %v887_v29  ;;  %5755 = vtanh.f32 %v378_v34  ;;  %v474_v50 = vadd.f32 %v473_v30, %v6848_v12  ;;  %616 = vmatmul.f32.gmra.mxu2 %v292_v49  ;;  %v230_v34 = vld [vmem:[%s6776_s25 + $0x98] sm:$0xff] }
  0xdb   : > { %v919_v35 = vmul.f32 %v5750_v31, %v6857_v22  ;;  %712 = vmatmul.f32.gmra.mxu3 %v324_v1  ;;  %v262_v49 = vld [vmem:[%s6776_s25 + $0x198] sm:$0xff]  ;;  %v327_v1 = vld [vmem:[%s6776_s25 + $0x3a0] sm:$0xff] }
  0xdc   : > { %520 = vmatmul.f32.gmra.mxu1 %v260_v2  ;;  %v263_v2 = vld [vmem:[%s6776_s25 + $0x1a0] sm:$0xff] }
  0xdd   : > { %v569_v36 = vpop.f32.mrf.mxu2  ;;  %v665_v37 = vpop.f32.mrf.mxu3  ;;  %1079 = vadd.xlane.f32.xlu2 %v919_v35 }
  0xde   : > { %v5752_v38 = vpop.eup %5751  ;;  %v570_v39 = vadd.f32 %v569_v36, %v6848_v12  ;;  %v666_v40 = vadd.f32 %v665_v37, %v6848_v12  ;;  %v380_v41 = vpop.f32.mrf.mxu0 }
  0xdf   : > { %v5754_v42 = vpop.eup %5753  ;;  %v951_v43 = vmul.f32 %v5752_v38, %v6857_v22  ;;  %v381_v45 = vadd.f32 %v380_v41, %v6848_v12 }
  0xe0   : > { %5757 = vtanh.f32 %v570_v39  ;;  %v983_v44 = vmul.f32 %v5754_v42, %v6857_v22  ;;  %v5756_v52 = vpop.eup %5755 }
  0xe1   : > { %5759 = vtanh.f32 %v666_v40  ;;  %1143 = vadd.xlane.f32.xlu1 %v951_v43  ;;  %v476_v46 = vpop.f32.mrf.mxu1  ;;  %v888_v61 = vmul.f32 %v5756_v52, %v6857_v22  ;;  %427 = vmatmul.f32.gmra.mxu0 %v229_v17  ;;  %v232_v17 = vld [vmem:[%s6776_s25 + $0xa8] sm:$0xff] }
  0xe2   : > { %1207 = vadd.xlane.f32.xlu0 %v983_v44  ;;  %5761 = vtanh.f32 %v381_v45  ;;  %v477_v63 = vadd.f32 %v476_v46, %v6848_v12  ;;  %619 = vmatmul.f32.gmra.mxu2 %v293_v18  ;;  %v296_v18 = vld [vmem:[%s6776_s25 + $0x2a8] sm:$0xff] }
  0xe3   : > { %5763 = vtanh.f32 %v474_v50  ;;  %715 = vmatmul.f32.gmra.mxu3 %v325_v19  ;;  %v326_v50 = vld [vmem:[%s6776_s25 + $0x398] sm:$0xff]  ;;  %v328_v19 = vld [vmem:[%s6776_s25 + $0x3a8] sm:$0xff] }
  0xe4   : > { %523 = vmatmul.f32.gmra.mxu1 %v261_v21  ;;  %v264_v21 = vld [vmem:[%s6776_s25 + $0x1a8] sm:$0xff] }
  0xe5   : > { %v668_v53 = vpop.f32.mrf.mxu3  ;;  %v572_v54 = vpop.f32.mrf.mxu2 }
  0xe6   : > { %v5758_v55 = vpop.eup %5757  ;;  %v669_v56 = vadd.f32 %v668_v53, %v6848_v12  ;;  %v383_v57 = vpop.f32.mrf.mxu0  ;;  %v573_v4 = vadd.f32 %v572_v54, %v6848_v12  ;;  %v231_v53 = vld [vmem:[%s6776_s25 + $0xa0] sm:$0xff] }
  0xe7   : > { %v5760_v58 = vpop.eup %5759  ;;  %v952_v59 = vmul.f32 %v5758_v55, %v6857_v22  ;;  %v384_v20 = vadd.f32 %v383_v57, %v6848_v12 }
  0xe8   : > { %5765 = vtanh.f32 %v669_v56  ;;  %v984_v60 = vmul.f32 %v5760_v58, %v6857_v22  ;;  %v5762_v3 = vpop.eup %5761 }
  0xe9   : > { %1145 = vadd.xlane.f32.xlu2 %v952_v59  ;;  %v479_v62 = vpop.f32.mrf.mxu1  ;;  %v5764_v5 = vpop.eup %5763  ;;  %v889_v8 = vmul.f32 %v5762_v3, %v6857_v22  ;;  %430 = vmatmul.f32.gmra.mxu0 %v230_v34  ;;  %v233_v34 = vld [vmem:[%s6776_s25 + $0xb0] sm:$0xff] }
  0xea   : > { %1209 = vadd.xlane.f32.xlu1 %v984_v60  ;;  %1017 = vadd.xlane.f32.xlu0 %v888_v61  ;;  %v480_v0 = vadd.f32 %v479_v62, %v6848_v12  ;;  %v920_v13 = vmul.f32 %v5764_v5, %v6857_v22 }
  0xeb   : > { %622 = vmatmul.f32.gmra.mxu2 %v294_v33  ;;  %718 = vmatmul.f32.gmra.mxu3 %v326_v50  ;;  %v297_v33 = vld [vmem:[%s6776_s25 + $0x2b0] sm:$0xff]  ;;  %v298_v50 = vld [vmem:[%s6776_s25 + $0x2b8] sm:$0xff] }
  0xec   : > { %5767 = vtanh.f32 %v480_v0  ;;  %526 = vmatmul.f32.gmra.mxu1 %v262_v49  ;;  %v329_v49 = vld [vmem:[%s6776_s25 + $0x3b0] sm:$0xff] }
  0xed   : > { %v575_v6 = vpop.f32.mrf.mxu2  ;;  %5769 = vtanh.f32 %v477_v63  ;;  %v671_v10 = vpop.f32.mrf.mxu3 }
  0xee   : > { %v5766_v7 = vpop.eup %5765  ;;  %v386_v9 = vpop.f32.mrf.mxu0  ;;  %5771 = vtanh.f32 %v573_v4  ;;  %v672_v15 = vadd.f32 %v671_v10, %v6848_v12  ;;  %v576_v36 = vadd.f32 %v575_v6, %v6848_v12 }
  0xef   : > { %v985_v11 = vmul.f32 %v5766_v7, %v6857_v22  ;;  %v387_v14 = vadd.f32 %v386_v9, %v6848_v12 }
  0xf1   : > { %1211 = vadd.xlane.f32.xlu2 %v985_v11  ;;  %5773 = vtanh.f32 %v387_v14  ;;  %v482_v27 = vpop.f32.mrf.mxu1  ;;  %433 = vmatmul.f32.gmra.mxu0 %v231_v53 }
  0xf2   : > { %v5768_v16 = vpop.eup %5767  ;;  %1019 = vadd.xlane.f32.xlu1 %v889_v8  ;;  %1081 = vadd.xlane.f32.xlu0 %v920_v13  ;;  %5775 = vtanh.f32 %v672_v15  ;;  %v483_v31 = vadd.f32 %v482_v27, %v6848_v12 }
  0xf3   : > { %v5770_v23 = vpop.eup %5769  ;;  %v922_v25 = vmul.f32 %v5768_v16, %v6857_v22  ;;  %5777 = vtanh.f32 %v384_v20  ;;  %625 = vmatmul.f32.gmra.mxu2 %v295_v51  ;;  %721 = vmatmul.f32.gmra.mxu3 %v327_v1 }
  0xf4   : > { %v5772_v24 = vpop.eup %5771  ;;  %v921_v28 = vmul.f32 %v5770_v23, %v6857_v22  ;;  %529 = vmatmul.f32.gmra.mxu1 %v263_v2 }
  0xf5   : > { %v578_v26 = vpop.f32.mrf.mxu2  ;;  %v953_v29 = vmul.f32 %v5772_v24, %v6857_v22  ;;  %v674_v37 = vpop.f32.mrf.mxu3 }
  0xf6   : > { %v579_v30 = vadd.f32 %v578_v26, %v6848_v12  ;;  %v389_v38 = vpop.f32.mrf.mxu0  ;;  %v675_v45 = vadd.f32 %v674_v37, %v6848_v12 }
  0xf7   : > { %v5774_v32 = vpop.eup %5773  ;;  %v390_v43 = vadd.f32 %v389_v38, %v6848_v12 }
  0xf8   : > { %v5776_v35 = vpop.eup %5775  ;;  %5779 = vtanh.f32 %v579_v30  ;;  %v891_v40 = vmul.f32 %v5774_v32, %v6857_v22 }
  0xf9   : > { %1085 = vadd.xlane.f32.xlu2 %v922_v25  ;;  %v5778_v39 = vpop.eup %5777  ;;  %5781 = vtanh.f32 %v483_v31  ;;  %v986_v41 = vmul.f32 %v5776_v35, %v6857_v22  ;;  %v485_v48 = vpop.f32.mrf.mxu1  ;;  %436 = vmatmul.f32.gmra.mxu0 %v232_v17  ;;  %v331_v17 = vld [vmem:[%s6776_s25 + $0x3c0] sm:$0xff] }
  0xfa   : > { %1083 = vadd.xlane.f32.xlu1 %v921_v28  ;;  %1147 = vadd.xlane.f32.xlu0 %v953_v29  ;;  %5783 = vtanh.f32 %v576_v36  ;;  %v890_v44 = vmul.f32 %v5778_v39, %v6857_v22  ;;  %v486_v59 = vadd.f32 %v485_v48, %v6848_v12  ;;  %v265_v48 = vld [vmem:[%s6776_s25 + $0x1b0] sm:$0xff] }
  0xfb   : > { %5785 = vtanh.f32 %v390_v43  ;;  %628 = vmatmul.f32.gmra.mxu2 %v296_v18  ;;  %724 = vmatmul.f32.gmra.mxu3 %v328_v19 }
  0xfc   : > { %5787 = vtanh.f32 %v675_v45  ;;  %532 = vmatmul.f32.gmra.mxu1 %v264_v21 }
  0xfd   : > { %v581_v42 = vpop.f32.mrf.mxu2  ;;  %v677_v56 = vpop.f32.mrf.mxu3 }
  0xfe   : > { %v582_v46 = vadd.f32 %v581_v42, %v6848_v12  ;;  %v5780_v47 = vpop.eup %5779  ;;  %v392_v58 = vpop.f32.mrf.mxu0  ;;  %v678_v61 = vadd.f32 %v677_v56, %v6848_v12 }
  0xff   : > { %v5782_v52 = vpop.eup %5781  ;;  %v955_v55 = vmul.f32 %v5780_v47, %v6857_v22  ;;  %v393_v63 = vadd.f32 %v392_v58, %v6848_v12 }
 0x100   : > { %v5784_v54 = vpop.eup %5783  ;;  %5789 = vtanh.f32 %v582_v46  ;;  %v923_v57 = vmul.f32 %v5782_v52, %v6857_v22  ;;  %v234_v52 = vld [vmem:[%s6776_s25 + $0xb8] sm:$0xff] }
 0x101   : > { %1023 = vadd.xlane.f32.xlu2 %v891_v40  ;;  %v954_v60 = vmul.f32 %v5784_v54, %v6857_v22  ;;  %v5786_v62 = vpop.eup %5785  ;;  %5791 = vtanh.f32 %v486_v59  ;;  %v488_v5 = vpop.f32.mrf.mxu1  ;;  %439 = vmatmul.f32.gmra.mxu0 %v233_v34 }
 0x102   : > { %1021 = vadd.xlane.f32.xlu1 %v890_v44  ;;  %1213 = vadd.xlane.f32.xlu0 %v986_v41  ;;  %v5788_v0 = vpop.eup %5787  ;;  %5793 = vtanh.f32 %v678_v61  ;;  %v892_v6 = vmul.f32 %v5786_v62, %v6857_v22  ;;  %v489_v10 = vadd.f32 %v488_v5, %v6848_v12 }
 0x103   : > { %5795 = vtanh.f32 %v393_v63  ;;  %v987_v7 = vmul.f32 %v5788_v0, %v6857_v22  ;;  %631 = vmatmul.f32.gmra.mxu2 %v297_v33  ;;  %727 = vmatmul.f32.gmra.mxu3 %v329_v49  ;;  %v330_v63 = vld [vmem:[%s6776_s25 + $0x3b8] sm:$0xff] }
 0x104   : > { %5797 = vtanh.f32 %v489_v10  ;;  %535 = vmatmul.f32.gmra.mxu1 %v265_v48 }
 0x105   : > { %v584_v4 = vpop.f32.mrf.mxu2  ;;  %v680_v9 = vpop.f32.mrf.mxu3 }
 0x106   : > { %v5790_v3 = vpop.eup %5789  ;;  %v585_v11 = vadd.f32 %v584_v4, %v6848_v12  ;;  %v681_v14 = vadd.f32 %v680_v9, %v6848_v12  ;;  %v395_v16 = vpop.f32.mrf.mxu0 }
 0x107   : > { %v956_v8 = vmul.f32 %v5790_v3, %v6857_v22  ;;  %v5792_v13 = vpop.eup %5791  ;;  %v396_v28 = vadd.f32 %v395_v16, %v6848_v12  ;;  %v299_v16 = vld [vmem:[%s6776_s25 + $0x2c0] sm:$0xff] }
 0x108   : > { %v5794_v15 = vpop.eup %5793  ;;  %5799 = vtanh.f32 %v585_v11  ;;  %v924_v25 = vmul.f32 %v5792_v13, %v6857_v22 }
 0x109   : > { %1151 = vadd.xlane.f32.xlu2 %v955_v55  ;;  %v5796_v20 = vpop.eup %5795  ;;  %5801 = vtanh.f32 %v681_v14  ;;  %v988_v23 = vmul.f32 %v5794_v15, %v6857_v22  ;;  %v491_v27 = vpop.f32.mrf.mxu1  ;;  %442 = vmatmul.f32.gmra.mxu0 %v234_v52  ;;  %v235_v15 = vld [vmem:[%s6776_s25 + $0xc0] sm:$0xff] }
 0x10a   : > { %1149 = vadd.xlane.f32.xlu1 %v954_v60  ;;  %1087 = vadd.xlane.f32.xlu0 %v923_v57  ;;  %v893_v26 = vmul.f32 %v5796_v20, %v6857_v22  ;;  %v5798_v30 = vpop.eup %5797  ;;  %v492_v31 = vadd.f32 %v491_v27, %v6848_v12  ;;  %5803 = vtanh.f32 %v396_v28 }
 0x10b   : > { %v925_v38 = vmul.f32 %v5798_v30, %v6857_v22  ;;  %634 = vmatmul.f32.gmra.mxu2 %v298_v50  ;;  %730 = vmatmul.f32.gmra.mxu3 %v330_v63 }
 0x10d   : > { %v587_v24 = vpop.f32.mrf.mxu2  ;;  %v683_v36 = vpop.f32.mrf.mxu3 }
 0x10e   : > { %v588_v29 = vadd.f32 %v587_v24, %v6848_v12  ;;  %v5800_v32 = vpop.eup %5799  ;;  %v398_v37 = vpop.f32.mrf.mxu0  ;;  %v684_v43 = vadd.f32 %v683_v36, %v6848_v12 }
 0x10f   : > { %v5802_v35 = vpop.eup %5801  ;;  %v957_v39 = vmul.f32 %v5800_v32, %v6857_v22  ;;  %v399_v42 = vadd.f32 %v398_v37, %v6848_v12 }
 0x110   : > { %5805 = vtanh.f32 %v588_v29  ;;  %v989_v40 = vmul.f32 %v5802_v35, %v6857_v22  ;;  %v5804_v44 = vpop.eup %5803 }
 0x111   : > { %1025 = vadd.xlane.f32.xlu2 %v892_v6  ;;  %5807 = vtanh.f32 %v492_v31  ;;  %v494_v47 = vpop.f32.mrf.mxu1  ;;  %v894_v55 = vmul.f32 %v5804_v44, %v6857_v22  ;;  %445 = vmatmul.f32.gmra.mxu0 %v235_v15  ;;  %v300_v31 = vld [vmem:[%s6776_s25 + $0x2c8] sm:$0xff]  ;;  %v238_v15 = vld [vmem:[%s6776_s25 + $0xd8] sm:$0xff] }
 0x112   : > { %1215 = vadd.xlane.f32.xlu1 %v987_v7  ;;  %1153 = vadd.xlane.f32.xlu0 %v956_v8  ;;  %5809 = vtanh.f32 %v399_v42  ;;  %v495_v58 = vadd.f32 %v494_v47, %v6848_v12  ;;  %v266_v7 = vld [vmem:[%s6776_s25 + $0x1b8] sm:$0xff]  ;;  %v301_v47 = vld [vmem:[%s6776_s25 + $0x2d0] sm:$0xff] }
 0x113   : > { %5811 = vtanh.f32 %v684_v43  ;;  %538 = vmatmul.f32.gmra.mxu1 %v266_v7  ;;  %637 = vmatmul.f32.gmra.mxu2 %v299_v16  ;;  %v302_v16 = vld [vmem:[%s6776_s25 + $0x2d8] sm:$0xff] }
 0x114   : > { %733 = vmatmul.f32.gmra.mxu3 %v331_v17  ;;  %v334_v17 = vld [vmem:[%s6776_s25 + $0x3d8] sm:$0xff] }
 0x115   : > { %v590_v41 = vpop.f32.mrf.mxu2  ;;  %v686_v54 = vpop.f32.mrf.mxu3 }
 0x116   : > { %v591_v45 = vadd.f32 %v590_v41, %v6848_v12  ;;  %v5806_v46 = vpop.eup %5805  ;;  %v401_v57 = vpop.f32.mrf.mxu0  ;;  %v687_v59 = vadd.f32 %v686_v54, %v6848_v12  ;;  %v236_v41 = vld [vmem:[%s6776_s25 + $0xc8] sm:$0xff] }
 0x117   : > { %v5808_v51 = vpop.eup %5807  ;;  %v958_v53 = vmul.f32 %v5806_v46, %v6857_v22  ;;  %v402_v61 = vadd.f32 %v401_v57, %v6848_v12  ;;  %v332_v46 = vld [vmem:[%s6776_s25 + $0x3c8] sm:$0xff]  ;;  %v237_v57 = vld [vmem:[%s6776_s25 + $0xd0] sm:$0xff] }
 0x118   : > { %5813 = vtanh.f32 %v591_v45  ;;  %v926_v56 = vmul.f32 %v5808_v51, %v6857_v22  ;;  %v5810_v60 = vpop.eup %5809  ;;  %v268_v45 = vld [vmem:[%s6776_s25 + $0x1c8] sm:$0xff] }
 0x119   : > { %1217 = vadd.xlane.f32.xlu2 %v988_v23  ;;  %v5812_v62 = vpop.eup %5811  ;;  %5815 = vtanh.f32 %v495_v58  ;;  %v497_v2 = vpop.f32.mrf.mxu1  ;;  %v895_v3 = vmul.f32 %v5810_v60, %v6857_v22  ;;  %448 = vmatmul.f32.gmra.mxu0 %v236_v41 }
 0x11a   : > { %1089 = vadd.xlane.f32.xlu1 %v924_v25  ;;  %1027 = vadd.xlane.f32.xlu0 %v893_v26  ;;  %5817 = vtanh.f32 %v687_v59  ;;  %v990_v4 = vmul.f32 %v5812_v62, %v6857_v22  ;;  %v498_v8 = vadd.f32 %v497_v2, %v6848_v12  ;;  %v267_v25 = vld [vmem:[%s6776_s25 + $0x1c0] sm:$0xff] }
 0x11b   : > { %5819 = vtanh.f32 %v402_v61  ;;  %541 = vmatmul.f32.gmra.mxu1 %v267_v25  ;;  %640 = vmatmul.f32.gmra.mxu2 %v300_v31  ;;  %v333_v61 = vld [vmem:[%s6776_s25 + $0x3d0] sm:$0xff] }
 0x11c   : > { %5821 = vtanh.f32 %v498_v8  ;;  %736 = vmatmul.f32.gmra.mxu3 %v332_v46  ;;  %v269_v8 = vld [vmem:[%s6776_s25 + $0x1d0] sm:$0xff]  ;;  %v239_v46 = vld [vmem:[%s6776_s25 + $0xe0] sm:$0xff] }
 0x11d   : > { %v593_v1 = vpop.f32.mrf.mxu2  ;;  %v689_v6 = vpop.f32.mrf.mxu3 }
 0x11e   : > { %v5814_v0 = vpop.eup %5813  ;;  %v594_v9 = vadd.f32 %v593_v1, %v6848_v12  ;;  %v690_v11 = vadd.f32 %v689_v6, %v6848_v12  ;;  %v404_v14 = vpop.f32.mrf.mxu0 }
 0x11f   : > { %v959_v5 = vmul.f32 %v5814_v0, %v6857_v22  ;;  %v5816_v10 = vpop.eup %5815  ;;  %v405_v26 = vadd.f32 %v404_v14, %v6848_v12 }
 0x120   : > { %v5818_v13 = vpop.eup %5817  ;;  %5823 = vtanh.f32 %v594_v9  ;;  %v927_v21 = vmul.f32 %v5816_v10, %v6857_v22 }
 0x121   : > { %1091 = vadd.xlane.f32.xlu2 %v925_v38  ;;  %v5820_v18 = vpop.eup %5819  ;;  %5825 = vtanh.f32 %v690_v11  ;;  %v991_v19 = vmul.f32 %v5818_v13, %v6857_v22  ;;  %v500_v24 = vpop.f32.mrf.mxu1  ;;  %451 = vmatmul.f32.gmra.mxu0 %v237_v57 }
 0x122   : > { %1155 = vadd.xlane.f32.xlu1 %v957_v39  ;;  %1219 = vadd.xlane.f32.xlu0 %v989_v40  ;;  %v896_v23 = vmul.f32 %v5820_v18, %v6857_v22  ;;  %v5822_v28 = vpop.eup %5821  ;;  %v501_v29 = vadd.f32 %v500_v24, %v6848_v12  ;;  %5827 = vtanh.f32 %v405_v26 }
 0x123   : > { %v928_v35 = vmul.f32 %v5822_v28, %v6857_v22  ;;  %544 = vmatmul.f32.gmra.mxu1 %v268_v45  ;;  %643 = vmatmul.f32.gmra.mxu2 %v301_v47 }
 0x124   : > { %739 = vmatmul.f32.gmra.mxu3 %v333_v61 }
 0x125   : > { %v596_v20 = vpop.f32.mrf.mxu2  ;;  %v692_v33 = vpop.f32.mrf.mxu3 }
 0x126   : > { %v597_v27 = vadd.f32 %v596_v20, %v6848_v12  ;;  %v5824_v30 = vpop.eup %5823  ;;  %v407_v34 = vpop.f32.mrf.mxu0  ;;  %v693_v40 = vadd.f32 %v692_v33, %v6848_v12 }
 0x127   : > { %v5826_v32 = vpop.eup %5825  ;;  %v960_v36 = vmul.f32 %v5824_v30, %v6857_v22  ;;  %v408_v39 = vadd.f32 %v407_v34, %v6848_v12  ;;  %v303_v34 = vld [vmem:[%s6776_s25 + $0x2e0] sm:$0xff] }
 0x128   : > { %5829 = vtanh.f32 %v597_v27  ;;  %v992_v37 = vmul.f32 %v5826_v32, %v6857_v22  ;;  %v5828_v42 = vpop.eup %5827 }
 0x129   : > { %1157 = vadd.xlane.f32.xlu2 %v958_v53  ;;  %5831 = vtanh.f32 %v501_v29  ;;  %v503_v49 = vpop.f32.mrf.mxu1  ;;  %v897_v52 = vmul.f32 %v5828_v42, %v6857_v22  ;;  %454 = vmatmul.f32.gmra.mxu0 %v238_v15  ;;  %v270_v29 = vld [vmem:[%s6776_s25 + $0x1d8] sm:$0xff] }
 0x12a   : > { %1029 = vadd.xlane.f32.xlu1 %v894_v55  ;;  %1093 = vadd.xlane.f32.xlu0 %v926_v56  ;;  %5833 = vtanh.f32 %v408_v39  ;;  %v504_v55 = vadd.f32 %v503_v49, %v6848_v12 }
 0x12b   : > { %5835 = vtanh.f32 %v693_v40  ;;  %547 = vmatmul.f32.gmra.mxu1 %v269_v8  ;;  %646 = vmatmul.f32.gmra.mxu2 %v302_v16 }
 0x12c   : > { %742 = vmatmul.f32.gmra.mxu3 %v334_v17 }
 0x12d   : > { %v599_v38 = vpop.f32.mrf.mxu2  ;;  %v695_v51 = vpop.f32.mrf.mxu3 }
 0x12e   : > { %v600_v43 = vadd.f32 %v599_v38, %v6848_v12  ;;  %v5830_v44 = vpop.eup %5829  ;;  %v410_v54 = vpop.f32.mrf.mxu0  ;;  %v696_v56 = vadd.f32 %v695_v51, %v6848_v12  ;;  %v271_v51 = vld [vmem:[%s6776_s25 + $0x1e0] sm:$0xff] }
 0x12f   : > { %v5832_v48 = vpop.eup %5831  ;;  %v961_v50 = vmul.f32 %v5830_v44, %v6857_v22  ;;  %v411_v59 = vadd.f32 %v410_v54, %v6848_v12 }
 0x130   : > { %5837 = vtanh.f32 %v600_v43  ;;  %v929_v53 = vmul.f32 %v5832_v48, %v6857_v22  ;;  %v5834_v58 = vpop.eup %5833 }
 0x131   : > { %1031 = vadd.xlane.f32.xlu2 %v895_v3  ;;  %v5836_v60 = vpop.eup %5835  ;;  %5839 = vtanh.f32 %v504_v55  ;;  %v898_v1 = vmul.f32 %v5834_v58, %v6857_v22  ;;  %v506_v2 = vpop.f32.mrf.mxu1  ;;  %457 = vmatmul.f32.gmra.mxu0 %v239_v46 }
 0x132   : > { %1221 = vadd.xlane.f32.xlu1 %v990_v4  ;;  %1159 = vadd.xlane.f32.xlu0 %v959_v5  ;;  %5841 = vtanh.f32 %v696_v56  ;;  %v993_v3 = vmul.f32 %v5836_v60, %v6857_v22  ;;  %v507_v7 = vadd.f32 %v506_v2, %v6848_v12  ;;  %v240_v2 = vld [vmem:[%s6776_s25 + $0xe8] sm:$0xff] }
 0x133   : > { %5843 = vtanh.f32 %v411_v59  ;;  %550 = vmatmul.f32.gmra.mxu1 %v270_v29  ;;  %649 = vmatmul.f32.gmra.mxu2 %v303_v34  ;;  %v241_v29 = vld [vmem:[%s6776_s25 + $0xf0] sm:$0xff] }
 0x135   : > { %v602_v63 = vpop.f32.mrf.mxu2  ;;  %v698_v5 = vpop.f32.mrf.mxu3 }
 0x136   : > { %v5838_v62 = vpop.eup %5837  ;;  %v603_v6 = vadd.f32 %v602_v63, %v6848_v12  ;;  %v699_v10 = vadd.f32 %v698_v5, %v6848_v12  ;;  %v413_v14 = vpop.f32.mrf.mxu0 }
 0x137   : > { %v962_v4 = vmul.f32 %v5838_v62, %v6857_v22  ;;  %v5840_v9 = vpop.eup %5839  ;;  %v414_v27 = vadd.f32 %v413_v14, %v6848_v12 }
 0x138   : > { %v5842_v11 = vpop.eup %5841  ;;  %5845 = vtanh.f32 %v603_v6  ;;  %v930_v24 = vmul.f32 %v5840_v9, %v6857_v22 }
 0x139   : > { %1223 = vadd.xlane.f32.xlu2 %v991_v19  ;;  %v5844_v18 = vpop.eup %5843  ;;  %5847 = vtanh.f32 %v507_v7  ;;  %v509_v26 = vpop.f32.mrf.mxu1  ;;  %460 = vmatmul.f32.gmra.mxu0 %v240_v2  ;;  %v336_v7 = vld [vmem:[%s6776_s25 + $0x3e8] sm:$0xff] }
 0x13a   : > { %1095 = vadd.xlane.f32.xlu1 %v927_v21  ;;  %1033 = vadd.xlane.f32.xlu0 %v896_v23  ;;  %5849 = vtanh.f32 %v699_v10  ;;  %v994_v21 = vmul.f32 %v5842_v11, %v6857_v22  ;;  %v899_v25 = vmul.f32 %v5844_v18, %v6857_v22  ;;  %v510_v31 = vadd.f32 %v509_v26, %v6848_v12 }
 0x13b   : > { %5851 = vtanh.f32 %v414_v27  ;;  %553 = vmatmul.f32.gmra.mxu1 %v271_v51 }
 0x13d   : > { %v605_v23 = vpop.f32.mrf.mxu2  ;;  %v701_v33 = vpop.f32.mrf.mxu3 }
 0x13e   : > { %v606_v28 = vadd.f32 %v605_v23, %v6848_v12  ;;  %v5846_v30 = vpop.eup %5845  ;;  %v702_v45 = vadd.f32 %v701_v33, %v6848_v12 }
 0x13f   : > { %v5848_v32 = vpop.eup %5847  ;;  %v963_v41 = vmul.f32 %v5846_v30, %v6857_v22  ;;  %v337_v30 = vld [vmem:[%s6776_s25 + $0x3f0] sm:$0xff] }
 0x140   : > { %5853 = vtanh.f32 %v606_v28  ;;  %v931_v40 = vmul.f32 %v5848_v32, %v6857_v22 }
 0x141   : > { %1097 = vadd.xlane.f32.xlu2 %v928_v35  ;;  %v5850_v35 = vpop.eup %5849  ;;  %5855 = vtanh.f32 %v510_v31  ;;  %463 = vmatmul.f32.gmra.mxu0 %v241_v29 }
 0x142   : > { %1161 = vadd.xlane.f32.xlu1 %v960_v36  ;;  %1225 = vadd.xlane.f32.xlu0 %v992_v37  ;;  %v416_v37 = vpop.f32.mrf.mxu0  ;;  %v995_v42 = vmul.f32 %v5850_v35, %v6857_v22  ;;  %v5852_v47 = vpop.eup %5851 }
 0x143   : > { %v417_v44 = vadd.f32 %v416_v37, %v6848_v12  ;;  %v900_v60 = vmul.f32 %v5852_v47, %v6857_v22 }
 0x145   : > { %v608_v43 = vpop.f32.mrf.mxu2  ;;  %5857 = vtanh.f32 %v417_v44  ;;  %v704_v56 = vpop.f32.mrf.mxu3 }
 0x146   : > { %v609_v48 = vadd.f32 %v608_v43, %v6848_v12  ;;  %v5854_v49 = vpop.eup %5853  ;;  %5859 = vtanh.f32 %v702_v45  ;;  %v273_v43 = vld [vmem:[%s6776_s25 + $0x1f0] sm:$0xff] }
 0x147   : > { %v5856_v54 = vpop.eup %5855  ;;  %v964_v59 = vmul.f32 %v5854_v49, %v6857_v22 }
 0x148   : > { %5861 = vtanh.f32 %v609_v48  ;;  %v932_v61 = vmul.f32 %v5856_v54, %v6857_v22 }
 0x149   : > { %1163 = vadd.xlane.f32.xlu2 %v961_v50  ;;  %v512_v50 = vpop.f32.mrf.mxu1 }
 0x14a   : > { %1035 = vadd.xlane.f32.xlu1 %v897_v52  ;;  %1099 = vadd.xlane.f32.xlu0 %v929_v53  ;;  %v335_v52 = vld [vmem:[%s6776_s25 + $0x3e0] sm:$0xff]  ;;  %v304_v53 = vld [vmem:[%s6776_s25 + $0x2e8] sm:$0xff]  ;;  %v419_v62 = vpop.f32.mrf.mxu0  ;;  %v513_v63 = vadd.f32 %v512_v50, %v6848_v12  ;;  %v305_v50 = vld [vmem:[%s6776_s25 + $0x2f0] sm:$0xff] }
 0x14b   : > { %745 = vmatmul.f32.gmra.mxu3 %v335_v52  ;;  %652 = vmatmul.f32.gmra.mxu2 %v304_v53 }
 0x14c   : > { %5863 = vtanh.f32 %v513_v63 }
 0x14d   : > { %v6992_v0 = vpop.xlane.xlu0 %1015  ;;  %v611_v6 = vpop.f32.mrf.mxu2 }
 0x14e   : > { %11792 = vst [vmem:[#allocation11_spill] sm:$0xff] %v6992_v0  ;;  %v707_v18 = vpop.f32.mrf.mxu3  ;;  %v612_v23 = vadd.f32 %v611_v6, %v6848_v12 }
 0x14f   : > { %v708_v26 = vadd.f32 %v707_v18, %v6848_v12 }
 0x150   : > { %v7001_v13 = vpop.xlane.xlu2 %1079 }
 0x151   : > { %1037 = vadd.xlane.f32.xlu2 %v898_v1  ;;  %11793 = vst [vmem:[#allocation12_spill] sm:$0xff] %v7001_v13  ;;  %v705_v1 = vadd.f32 %v704_v56, %v6848_v12  ;;  %v515_v10 = vpop.f32.mrf.mxu1 }
 0x152   : > { %1227 = vadd.xlane.f32.xlu1 %v993_v3  ;;  %1165 = vadd.xlane.f32.xlu0 %v962_v4  ;;  %v5858_v3 = vpop.eup %5857  ;;  %v420_v4 = vadd.f32 %v419_v62, %v6848_v12  ;;  %v422_v28 = vpop.f32.mrf.mxu0 }
 0x153   : > { %v5860_v5 = vpop.eup %5859  ;;  %748 = vmatmul.f32.gmra.mxu3 %v336_v7  ;;  %5865 = vtanh.f32 %v705_v1  ;;  %v901_v15 = vmul.f32 %v5858_v3, %v6857_v22  ;;  %v423_v44 = vadd.f32 %v422_v28, %v6848_v12  ;;  %655 = vmatmul.f32.gmra.mxu2 %v305_v50 }
 0x154   : > { %v7006_v19 = vpop.xlane.xlu1 %1143  ;;  %v5862_v8 = vpop.eup %5861  ;;  %5867 = vtanh.f32 %v420_v4  ;;  %v996_v16 = vmul.f32 %v5860_v5, %v6857_v22 }
 0x155   : > { %11794 = vst [vmem:[#allocation13_spill] sm:$0xff] %v7006_v19  ;;  %v7008_v20 = vpop.xlane.xlu0 %1207  ;;  %v965_v17 = vmul.f32 %v5862_v8, %v6857_v22  ;;  %v614_v33 = vpop.f32.mrf.mxu2 }
 0x156   : > { %11795 = vst [vmem:[#allocation14_spill] sm:$0xff] %v7008_v20  ;;  %v615_v45 = vadd.f32 %v614_v33, %v6848_v12  ;;  %v710_v49 = vpop.f32.mrf.mxu3  ;;  %v338_v33 = vld [vmem:[%s6776_s25 + $0x3f8] sm:$0xff] }
 0x157   : > { %v711_v1 = vadd.f32 %v710_v49, %v6848_v12 }
 0x159   : > { %1229 = vadd.xlane.f32.xlu2 %v994_v21  ;;  %v516_v21 = vadd.f32 %v515_v10, %v6848_v12 }
 0x15a   : > { %1101 = vadd.xlane.f32.xlu1 %v930_v24  ;;  %1039 = vadd.xlane.f32.xlu0 %v899_v25  ;;  %v272_v24 = vld [vmem:[%s6776_s25 + $0x1e8] sm:$0xff]  ;;  %v5864_v25 = vpop.eup %5863  ;;  %v425_v53 = vpop.f32.mrf.mxu0 }
 0x15b   : > { %556 = vmatmul.f32.gmra.mxu1 %v272_v24  ;;  %v5866_v27 = vpop.eup %5865  ;;  %5869 = vtanh.f32 %v516_v21  ;;  %751 = vmatmul.f32.gmra.mxu3 %v337_v30  ;;  %v426_v63 = vadd.f32 %v425_v53, %v6848_v12  ;;  %v274_v30 = vld [vmem:[%s6776_s25 + $0x1f8] sm:$0xff] }
 0x15c   : > { %v7018_v36 = vpop.xlane.xlu2 %1145  ;;  %v5868_v31 = vpop.eup %5867  ;;  %5871 = vtanh.f32 %v612_v23  ;;  %v997_v37 = vmul.f32 %v5866_v27, %v6857_v22 }
 0x15d   : > { %11796 = vst [vmem:[#allocation15_spill] sm:$0xff] %v7018_v36  ;;  %v7020_v38 = vpop.xlane.xlu1 %1209  ;;  %v7022_v39 = vpop.xlane.xlu0 %1017  ;;  %5873 = vtanh.f32 %v708_v26 }
 0x15e   : > { %11797 = vst [vmem:[#allocation16_spill] sm:$0xff] %v7020_v38  ;;  %5875 = vtanh.f32 %v423_v44  ;;  %v617_v62 = vpop.f32.mrf.mxu2  ;;  %v713_v8 = vpop.f32.mrf.mxu3 }
 0x15f   : > { %11798 = vst [vmem:[#allocation17_spill] sm:$0xff] %v7022_v39  ;;  %5877 = vtanh.f32 %v615_v45  ;;  %v618_v3 = vadd.f32 %v617_v62, %v6848_v12  ;;  %v714_v24 = vadd.f32 %v713_v8, %v6848_v12 }
 0x161   : > { %1103 = vadd.xlane.f32.xlu2 %v931_v40  ;;  %v933_v40 = vmul.f32 %v5864_v25, %v6857_v22  ;;  %v5870_v46 = vpop.eup %5869  ;;  %v242_v25 = vld [vmem:[%s6776_s25 + $0xf8] sm:$0xff] }
 0x162   : > { %1167 = vadd.xlane.f32.xlu1 %v963_v41  ;;  %1231 = vadd.xlane.f32.xlu0 %v995_v42  ;;  %v902_v41 = vmul.f32 %v5868_v31, %v6857_v22  ;;  %v518_v42 = vpop.f32.mrf.mxu1  ;;  %v5872_v48 = vpop.eup %5871  ;;  %v306_v31 = vld [vmem:[%s6776_s25 + $0x2f8] sm:$0xff] }
 0x163   : > { %v519_v47 = vadd.f32 %v518_v42, %v6848_v12  ;;  %559 = vmatmul.f32.gmra.mxu1 %v273_v43  ;;  %v5874_v51 = vpop.eup %5873  ;;  %v428_v21 = vpop.f32.mrf.mxu0  ;;  %466 = vmatmul.f32.gmra.mxu0 %v242_v25 }
 0x164   : > { %v7034_v55 = vpop.xlane.xlu2 %1211  ;;  %v5876_v2 = vpop.eup %5875  ;;  %v429_v27 = vadd.f32 %v428_v21, %v6848_v12  ;;  %658 = vmatmul.f32.gmra.mxu2 %v306_v31  ;;  %754 = vmatmul.f32.gmra.mxu3 %v338_v33 }
 0x165   : > { %11799 = vst [vmem:[#allocation18_spill] sm:$0xff] %v7034_v55  ;;  %v7036_v57 = vpop.xlane.xlu1 %1019  ;;  %v7038_v58 = vpop.xlane.xlu0 %1081  ;;  %5879 = vtanh.f32 %v519_v47 }
 0x166   : > { %11800 = vst [vmem:[#allocation19_spill] sm:$0xff] %v7036_v57  ;;  %v5878_v4 = vpop.eup %5877  ;;  %5881 = vtanh.f32 %v426_v63  ;;  %v620_v29 = vpop.f32.mrf.mxu2 }
 0x167   : > { %11801 = vst [vmem:[#allocation20_spill] sm:$0xff] %v7038_v58  ;;  %5883 = vtanh.f32 %v711_v1  ;;  %v716_v47 = vpop.f32.mrf.mxu3  ;;  %v621_v49 = vadd.f32 %v620_v29, %v6848_v12 }
 0x168   : > { %5885 = vtanh.f32 %v618_v3 }
 0x169   : > { %1169 = vadd.xlane.f32.xlu2 %v964_v59  ;;  %v934_v59 = vmul.f32 %v5870_v46, %v6857_v22 }
 0x16a   : > { %1041 = vadd.xlane.f32.xlu1 %v900_v60  ;;  %1105 = vadd.xlane.f32.xlu0 %v932_v61  ;;  %v966_v60 = vmul.f32 %v5872_v48, %v6857_v22  ;;  %v998_v61 = vmul.f32 %v5874_v51, %v6857_v22  ;;  %v521_v5 = vpop.f32.mrf.mxu1  ;;  %v717_v51 = vadd.f32 %v716_v47, %v6848_v12 }
 0x16b   : > { %v5880_v6 = vpop.eup %5879  ;;  %v522_v23 = vadd.f32 %v521_v5, %v6848_v12  ;;  %562 = vmatmul.f32.gmra.mxu1 %v274_v30 }
 0x16c   : > { %v7048_v9 = vpop.xlane.xlu2 %1085  ;;  %v935_v18 = vmul.f32 %v5880_v6, %v6857_v22  ;;  %v5882_v26 = vpop.eup %5881 }
 0x16d   : > { %11802 = vst [vmem:[#allocation21_spill] sm:$0xff] %v7048_v9  ;;  %v7050_v11 = vpop.xlane.xlu1 %1083  ;;  %v7052_v14 = vpop.xlane.xlu0 %1147  ;;  %5887 = vtanh.f32 %v522_v23  ;;  %v904_v44 = vmul.f32 %v5882_v26, %v6857_v22 }
 0x16e   : > { %11803 = vst [vmem:[#allocation22_spill] sm:$0xff] %v7050_v11  ;;  %v5884_v28 = vpop.eup %5883  ;;  %5889 = vtanh.f32 %v714_v24  ;;  %v623_v62 = vpop.f32.mrf.mxu2 }
 0x16f   : > { %11804 = vst [vmem:[#allocation23_spill] sm:$0xff] %v7052_v14  ;;  %5891 = vtanh.f32 %v429_v27  ;;  %v999_v45 = vmul.f32 %v5884_v28, %v6857_v22  ;;  %v624_v8 = vadd.f32 %v623_v62, %v6848_v12  ;;  %v719_v21 = vpop.f32.mrf.mxu3 }
 0x171   : > { %1043 = vadd.xlane.f32.xlu2 %v901_v15 }
 0x172   : > { %1233 = vadd.xlane.f32.xlu1 %v996_v16  ;;  %1171 = vadd.xlane.f32.xlu0 %v965_v17  ;;  %v967_v16 = vmul.f32 %v5878_v4, %v6857_v22  ;;  %v903_v17 = vmul.f32 %v5876_v2, %v6857_v22 }
 0x174   : > { %v7063_v32 = vpop.xlane.xlu2 %1023 }
 0x175   : > { %v7065_v34 = vpop.xlane.xlu1 %1021  ;;  %v7067_v35 = vpop.xlane.xlu0 %1213 }
 0x176   : > { %11805 = vst [vmem:[#allocation24_spill] sm:$0xff] %v7065_v34  ;;  %v626_v31 = vpop.f32.mrf.mxu2 }
 0x177   : > { %11806 = vst [vmem:[#allocation25_spill] sm:$0xff] %v7067_v35 }
 0x179   : > { %1235 = vadd.xlane.f32.xlu2 %v997_v37  ;;  %v5886_v37 = vpop.eup %5885 }
 0x17a   : > { %1107 = vadd.xlane.f32.xlu1 %v933_v40  ;;  %1045 = vadd.xlane.f32.xlu0 %v902_v41  ;;  %v524_v41 = vpop.f32.mrf.mxu1  ;;  %v968_v46 = vmul.f32 %v5886_v37, %v6857_v22  ;;  %v5888_v50 = vpop.eup %5887  ;;  %v720_v37 = vadd.f32 %v719_v21, %v6848_v12 }
 0x17b   : > { %v525_v48 = vadd.f32 %v524_v41, %v6848_v12  ;;  %v5890_v53 = vpop.eup %5889  ;;  %v936_v3 = vmul.f32 %v5888_v50, %v6857_v22 }
 0x17c   : > { %v7077_v52 = vpop.xlane.xlu2 %1151  ;;  %v1000_v2 = vmul.f32 %v5890_v53, %v6857_v22 }
 0x17d   : > { %11807 = vst [vmem:[#allocation26_spill] sm:$0xff] %v7077_v52  ;;  %v7079_v54 = vpop.xlane.xlu1 %1149  ;;  %v7081_v56 = vpop.xlane.xlu0 %1087  ;;  %5893 = vtanh.f32 %v525_v48 }
 0x17e   : > { %11808 = vst [vmem:[#allocation27_spill] sm:$0xff] %v7079_v54  ;;  %5895 = vtanh.f32 %v621_v49  ;;  %v722_v49 = vpop.f32.mrf.mxu3 }
 0x17f   : > { %5897 = vtanh.f32 %v717_v51 }
 0x181   : > { %1109 = vadd.xlane.f32.xlu2 %v934_v59  ;;  %v431_v59 = vpop.f32.mrf.mxu0 }
 0x182   : > { %1173 = vadd.xlane.f32.xlu1 %v966_v60  ;;  %1237 = vadd.xlane.f32.xlu0 %v998_v61  ;;  %v5892_v60 = vpop.eup %5891  ;;  %v527_v5 = vpop.f32.mrf.mxu1  ;;  %v432_v6 = vadd.f32 %v431_v59, %v6848_v12 }
 0x183   : > { %v905_v4 = vmul.f32 %v5892_v60, %v6857_v22 }
 0x184   : > { %v7089_v7 = vpop.xlane.xlu2 %1025  ;;  %5899 = vtanh.f32 %v432_v6 }
 0x185   : > { %v7091_v10 = vpop.xlane.xlu1 %1215  ;;  %v7093_v15 = vpop.xlane.xlu0 %1153  ;;  %5901 = vtanh.f32 %v624_v8 }
 0x186   : > { %11809 = vst [vmem:[#allocation28_spill] sm:$0xff] %v7091_v10  ;;  %v629_v8 = vpop.f32.mrf.mxu2 }
 0x187   : > { %11810 = vst [vmem:[#allocation29_spill] sm:$0xff] %v7093_v15 }
 0x189   : > { %1175 = vadd.xlane.f32.xlu2 %v967_v16  ;;  %v5894_v16 = vpop.eup %5893  ;;  %v434_v25 = vpop.f32.mrf.mxu0 }
 0x18a   : > { %1047 = vadd.xlane.f32.xlu1 %v903_v17  ;;  %1111 = vadd.xlane.f32.xlu0 %v935_v18  ;;  %v528_v17 = vadd.f32 %v527_v5, %v6848_v12  ;;  %v5896_v18 = vpop.eup %5895  ;;  %v937_v28 = vmul.f32 %v5894_v16, %v6857_v22  ;;  %v435_v33 = vadd.f32 %v434_v25, %v6848_v12 }
 0x18b   : > { %v5898_v23 = vpop.eup %5897  ;;  %v969_v29 = vmul.f32 %v5896_v18, %v6857_v22 }
 0x18c   : > { %v7105_v40 = vpop.xlane.xlu2 %1217  ;;  %5903 = vtanh.f32 %v528_v17  ;;  %v1001_v30 = vmul.f32 %v5898_v23, %v6857_v22  ;;  %v5900_v41 = vpop.eup %5899 }
 0x18d   : > { %11811 = vst [vmem:[#allocation30_spill] sm:$0xff] %v7105_v40  ;;  %v7107_v42 = vpop.xlane.xlu1 %1089  ;;  %v7109_v43 = vpop.xlane.xlu0 %1027  ;;  %5905 = vtanh.f32 %v435_v33  ;;  %v906_v59 = vmul.f32 %v5900_v41, %v6857_v22  ;;  %v630_v33 = vadd.f32 %v629_v8, %v6848_v12 }
 0x18e   : > { %5907 = vtanh.f32 %v720_v37 }
 0x191   : > { %1049 = vadd.xlane.f32.xlu2 %v904_v44  ;;  %v627_v44 = vadd.f32 %v626_v31, %v6848_v12  ;;  %v437_v62 = vpop.f32.mrf.mxu0 }
 0x192   : > { %1239 = vadd.xlane.f32.xlu1 %v999_v45  ;;  %1177 = vadd.xlane.f32.xlu0 %v968_v46  ;;  %v5902_v45 = vpop.eup %5901  ;;  %v530_v46 = vpop.f32.mrf.mxu1  ;;  %v438_v5 = vadd.f32 %v437_v62, %v6848_v12 }
 0x193   : > { %v5904_v47 = vpop.eup %5903  ;;  %5909 = vtanh.f32 %v627_v44  ;;  %v970_v53 = vmul.f32 %v5902_v45, %v6857_v22 }
 0x194   : > { %v7117_v61 = vpop.xlane.xlu2 %1091  ;;  %v938_v60 = vmul.f32 %v5904_v47, %v6857_v22 }
 0x195   : > { %v7119_v63 = vpop.xlane.xlu1 %1155  ;;  %v7121_v1 = vpop.xlane.xlu0 %1219 }
 0x196   : > { %11812 = vst [vmem:[#allocation31_spill] sm:$0xff] %v7119_v63 }
 0x197   : > { %11813 = vst [vmem:[#allocation32_spill] sm:$0xff] %v7121_v1 }
 0x199   : > { %1241 = vadd.xlane.f32.xlu2 %v1000_v2  ;;  %v531_v2 = vadd.f32 %v530_v46, %v6848_v12  ;;  %v440_v45 = vpop.f32.mrf.mxu0 }
 0x19a   : > { %1113 = vadd.xlane.f32.xlu1 %v936_v3  ;;  %1051 = vadd.xlane.f32.xlu0 %v905_v4  ;;  %v723_v3 = vadd.f32 %v722_v49, %v6848_v12  ;;  %v5906_v4 = vpop.eup %5905  ;;  %v533_v18 = vpop.f32.mrf.mxu1 }
 0x19b   : > { %v5908_v6 = vpop.eup %5907  ;;  %5911 = vtanh.f32 %v531_v2  ;;  %v907_v25 = vmul.f32 %v5906_v4, %v6857_v22  ;;  %v534_v31 = vadd.f32 %v533_v18, %v6848_v12  ;;  %v632_v49 = vpop.f32.mrf.mxu2  ;;  %v441_v4 = vadd.f32 %v440_v45, %v6848_v12 }
 0x19c   : > { %v7129_v24 = vpop.xlane.xlu2 %1157  ;;  %v5910_v16 = vpop.eup %5909  ;;  %5913 = vtanh.f32 %v723_v3 }
 0x19d   : > { %11814 = vst [vmem:[#allocation33_spill] sm:$0xff] %v7129_v24  ;;  %v7131_v26 = vpop.xlane.xlu1 %1029  ;;  %v7133_v27 = vpop.xlane.xlu0 %1093  ;;  %5915 = vtanh.f32 %v438_v5  ;;  %v633_v5 = vadd.f32 %v632_v49, %v6848_v12 }
 0x19e   : > { %5917 = vtanh.f32 %v534_v31 }
 0x19f   : > { %5919 = vtanh.f32 %v630_v33 }
 0x1a1   : > { %1115 = vadd.xlane.f32.xlu2 %v937_v28  ;;  %v1002_v28 = vmul.f32 %v5908_v6, %v6857_v22  ;;  %v5912_v37 = vpop.eup %5911 }
 0x1a2   : > { %1179 = vadd.xlane.f32.xlu1 %v969_v29  ;;  %1243 = vadd.xlane.f32.xlu0 %v1001_v30  ;;  %v971_v29 = vmul.f32 %v5910_v16, %v6857_v22  ;;  %v725_v30 = vpop.f32.mrf.mxu3  ;;  %v5914_v44 = vpop.eup %5913  ;;  %v939_v62 = vmul.f32 %v5912_v37, %v6857_v22 }
 0x1a3   : > { %v726_v41 = vadd.f32 %v725_v30, %v6848_v12  ;;  %v5916_v46 = vpop.eup %5915  ;;  %v536_v3 = vpop.f32.mrf.mxu1 }
 0x1a4   : > { %v7141_v48 = vpop.xlane.xlu2 %1031  ;;  %v908_v2 = vmul.f32 %v5916_v46, %v6857_v22  ;;  %v5918_v6 = vpop.eup %5917  ;;  %v537_v8 = vadd.f32 %v536_v3, %v6848_v12 }
 0x1a5   : > { %v7143_v50 = vpop.xlane.xlu1 %1221  ;;  %v7145_v51 = vpop.xlane.xlu0 %1159  ;;  %5921 = vtanh.f32 %v726_v41  ;;  %v940_v33 = vmul.f32 %v5918_v6, %v6857_v22 }
 0x1a6   : > { %11815 = vst [vmem:[#allocation34_spill] sm:$0xff] %v7143_v50  ;;  %v5920_v16 = vpop.eup %5919  ;;  %5923 = vtanh.f32 %v441_v4 }
 0x1a7   : > { %11816 = vst [vmem:[#allocation35_spill] sm:$0xff] %v7145_v51  ;;  %5925 = vtanh.f32 %v633_v5  ;;  %v972_v37 = vmul.f32 %v5920_v16, %v6857_v22 }
 0x1a8   : > { %5927 = vtanh.f32 %v537_v8 }
 0x1a9   : > { %1181 = vadd.xlane.f32.xlu2 %v970_v53 }
 0x1aa   : > { %1053 = vadd.xlane.f32.xlu1 %v906_v59  ;;  %1117 = vadd.xlane.f32.xlu0 %v938_v60  ;;  %v1003_v60 = vmul.f32 %v5914_v44, %v6857_v22  ;;  %v728_v18 = vpop.f32.mrf.mxu3  ;;  %v635_v44 = vpop.f32.mrf.mxu2 }
 0x1ab   : > { %v729_v46 = vadd.f32 %v728_v18, %v6848_v12 }
 0x1ac   : > { %v7153_v17 = vpop.xlane.xlu2 %1223 }
 0x1ad   : > { %11817 = vst [vmem:[#allocation36_spill] sm:$0xff] %v7153_v17  ;;  %v7155_v21 = vpop.xlane.xlu1 %1095  ;;  %v7157_v23 = vpop.xlane.xlu0 %1033 }
 0x1b1   : > { %1055 = vadd.xlane.f32.xlu2 %v907_v25  ;;  %v5922_v25 = vpop.eup %5921 }
 0x1b2   : > { %1245 = vadd.xlane.f32.xlu1 %v1002_v28  ;;  %1183 = vadd.xlane.f32.xlu0 %v971_v29  ;;  %v443_v29 = vpop.f32.mrf.mxu0  ;;  %v1004_v41 = vmul.f32 %v5922_v25, %v6857_v22  ;;  %v5924_v49 = vpop.eup %5923 }
 0x1b3   : > { %v444_v45 = vadd.f32 %v443_v29, %v6848_v12  ;;  %v731_v5 = vpop.f32.mrf.mxu3  ;;  %v909_v18 = vmul.f32 %v5924_v49, %v6857_v22 }
 0x1b4   : > { %v7165_v47 = vpop.xlane.xlu2 %1097 }
 0x1b5   : > { %v7167_v53 = vpop.xlane.xlu1 %1161  ;;  %v7169_v59 = vpop.xlane.xlu0 %1225  ;;  %5929 = vtanh.f32 %v444_v45 }
 0x1b6   : > { %11818 = vst [vmem:[#allocation37_spill] sm:$0xff] %v7167_v53  ;;  %5931 = vtanh.f32 %v729_v46  ;;  %v638_v46 = vpop.f32.mrf.mxu2 }
 0x1b7   : > { %11819 = vst [vmem:[#allocation38_spill] sm:$0xff] %v7169_v59 }
 0x1b9   : > { %1247 = vadd.xlane.f32.xlu2 %v1003_v60  ;;  %v636_v60 = vadd.f32 %v635_v44, %v6848_v12 }
 0x1ba   : > { %1119 = vadd.xlane.f32.xlu1 %v939_v62  ;;  %1057 = vadd.xlane.f32.xlu0 %v908_v2  ;;  %v5926_v62 = vpop.eup %5925  ;;  %v539_v2 = vpop.f32.mrf.mxu1 }
 0x1bb   : > { %v5928_v3 = vpop.eup %5927  ;;  %5933 = vtanh.f32 %v636_v60  ;;  %v973_v16 = vmul.f32 %v5926_v62, %v6857_v22  ;;  %v446_v29 = vpop.f32.mrf.mxu0 }
 0x1bc   : > { %v7177_v28 = vpop.xlane.xlu2 %1163  ;;  %v941_v25 = vmul.f32 %v5928_v3, %v6857_v22  ;;  %v447_v44 = vadd.f32 %v446_v29, %v6848_v12  ;;  %v639_v29 = vadd.f32 %v638_v46, %v6848_v12 }
 0x1bd   : > { %11820 = vst [vmem:[#allocation39_spill] sm:$0xff] %v7177_v28  ;;  %v7179_v30 = vpop.xlane.xlu1 %1035  ;;  %v7181_v31 = vpop.xlane.xlu0 %1099 }
 0x1be   : > { %11821 = vst [vmem:[#allocation40_spill] sm:$0xff] %v7179_v30 }
 0x1c1   : > { %1121 = vadd.xlane.f32.xlu2 %v940_v33  ;;  %v540_v33 = vadd.f32 %v539_v2, %v6848_v12 }
 0x1c2   : > { %1185 = vadd.xlane.f32.xlu1 %v972_v37  ;;  %1249 = vadd.xlane.f32.xlu0 %v1004_v41  ;;  %v732_v37 = vadd.f32 %v731_v5, %v6848_v12  ;;  %v5930_v41 = vpop.eup %5929  ;;  %v542_v49 = vpop.f32.mrf.mxu1 }
 0x1c3   : > { %v5932_v45 = vpop.eup %5931  ;;  %5935 = vtanh.f32 %v540_v33  ;;  %v910_v2 = vmul.f32 %v5930_v41, %v6857_v22  ;;  %v449_v59 = vpop.f32.mrf.mxu0 }
 0x1c4   : > { %v7189_v4 = vpop.xlane.xlu2 %1037  ;;  %v5934_v60 = vpop.eup %5933  ;;  %5937 = vtanh.f32 %v732_v37  ;;  %v1005_v5 = vmul.f32 %v5932_v45, %v6857_v22 }
 0x1c5   : > { %11822 = vst [vmem:[#allocation41_spill] sm:$0xff] %v7189_v4  ;;  %v7191_v6 = vpop.xlane.xlu1 %1227  ;;  %v7193_v8 = vpop.xlane.xlu0 %1165  ;;  %5939 = vtanh.f32 %v447_v44 }
 0x1c6   : > { %11823 = vst [vmem:[#allocation42_spill] sm:$0xff] %v7191_v6  ;;  %v641_v45 = vpop.f32.mrf.mxu2 }
 0x1c7   : > { %11824 = vst [vmem:[#allocation43_spill] sm:$0xff] %v7193_v8 }
 0x1c9   : > { %1187 = vadd.xlane.f32.xlu2 %v973_v16  ;;  %v974_v16 = vmul.f32 %v5934_v60, %v6857_v22  ;;  %v5936_v33 = vpop.eup %5935 }
 0x1ca   : > { %1059 = vadd.xlane.f32.xlu1 %v909_v18  ;;  %1123 = vadd.xlane.f32.xlu0 %v941_v25  ;;  %v734_v18 = vpop.f32.mrf.mxu3  ;;  %v543_v25 = vadd.f32 %v542_v49, %v6848_v12  ;;  %v942_v49 = vmul.f32 %v5936_v33, %v6857_v22 }
 0x1cb   : > { %v735_v37 = vadd.f32 %v734_v18, %v6848_v12  ;;  %v642_v18 = vadd.f32 %v641_v45, %v6848_v12  ;;  %v452_v33 = vpop.f32.mrf.mxu0 }
 0x1cc   : > { %v7201_v62 = vpop.xlane.xlu2 %1229  ;;  %5941 = vtanh.f32 %v543_v25 }
 0x1cd   : > { %11825 = vst [vmem:[#allocation44_spill] sm:$0xff] %v7201_v62  ;;  %v7203_v3 = vpop.xlane.xlu1 %1101  ;;  %v7205_v6 = vpop.xlane.xlu0 %1039  ;;  %5943 = vtanh.f32 %v639_v29 }
 0x1ce   : > { %11826 = vst [vmem:[#allocation45_spill] sm:$0xff] %v7205_v6  ;;  %v5938_v62 = vpop.eup %5937  ;;  %5945 = vtanh.f32 %v735_v37 }
 0x1cf   : > { %v5940_v44 = vpop.eup %5939  ;;  %v1006_v46 = vmul.f32 %v5938_v62, %v6857_v22 }
 0x1d1   : > { %1061 = vadd.xlane.f32.xlu2 %v910_v2  ;;  %v911_v2 = vmul.f32 %v5940_v44, %v6857_v22 }
 0x1d2   : > { %1251 = vadd.xlane.f32.xlu1 %v1005_v5  ;;  %1189 = vadd.xlane.f32.xlu0 %v974_v16  ;;  %v545_v5 = vpop.f32.mrf.mxu1  ;;  %v450_v16 = vadd.f32 %v449_v59, %v6848_v12  ;;  %v5942_v25 = vpop.eup %5941 }
 0x1d3   : > { %v546_v29 = vadd.f32 %v545_v5, %v6848_v12  ;;  %v5944_v30 = vpop.eup %5943  ;;  %v943_v59 = vmul.f32 %v5942_v25, %v6857_v22 }
 0x1d4   : > { %v7213_v41 = vpop.xlane.xlu2 %1103  ;;  %v5946_v37 = vpop.eup %5945  ;;  %5947 = vtanh.f32 %v450_v16  ;;  %v975_v45 = vmul.f32 %v5944_v30, %v6857_v22 }
 0x1d5   : > { %v7215_v60 = vpop.xlane.xlu1 %1167  ;;  %v7217_v6 = vpop.xlane.xlu0 %1231  ;;  %5949 = vtanh.f32 %v642_v18 }
 0x1d6   : > { %11827 = vst [vmem:[#allocation46_spill] sm:$0xff] %v7215_v60  ;;  %5951 = vtanh.f32 %v546_v29 }
 0x1d7   : > { %11828 = vst [vmem:[#allocation47_spill] sm:$0xff] %v7217_v6  ;;  %v737_v6 = vpop.f32.mrf.mxu3 }
 0x1d8   : > { %v738_v5 = vadd.f32 %v737_v6, %v6848_v12 }
 0x1d9   : > { %1253 = vadd.xlane.f32.xlu2 %v1006_v46  ;;  %v1007_v46 = vmul.f32 %v5946_v37, %v6857_v22 }
 0x1da   : > { %1125 = vadd.xlane.f32.xlu1 %v942_v49  ;;  %1063 = vadd.xlane.f32.xlu0 %v911_v2  ;;  %v644_v49 = vpop.f32.mrf.mxu2  ;;  %v453_v2 = vadd.f32 %v452_v33, %v6848_v12  ;;  %v5948_v16 = vpop.eup %5947 }
 0x1db   : > { %v645_v18 = vadd.f32 %v644_v49, %v6848_v12  ;;  %v912_v33 = vmul.f32 %v5948_v16, %v6857_v22 }
 0x1dc   : > { %v7225_v62 = vpop.xlane.xlu2 %1169  ;;  %5953 = vtanh.f32 %v453_v2 }
 0x1dd   : > { %11829 = vst [vmem:[#allocation48_spill] sm:$0xff] %v7225_v62  ;;  %v7227_v44 = vpop.xlane.xlu1 %1041  ;;  %v7229_v60 = vpop.xlane.xlu0 %1105  ;;  %5955 = vtanh.f32 %v738_v5 }
 0x1de   : > { %11830 = vst [vmem:[#allocation49_spill] sm:$0xff] %v7227_v44  ;;  %v5950_v62 = vpop.eup %5949  ;;  %v548_v44 = vpop.f32.mrf.mxu1  ;;  %5957 = vtanh.f32 %v645_v18 }
 0x1df   : > { %v5952_v29 = vpop.eup %5951  ;;  %v740_v30 = vpop.f32.mrf.mxu3  ;;  %v976_v6 = vmul.f32 %v5950_v62, %v6857_v22 }
 0x1e0   : > { %v741_v49 = vadd.f32 %v740_v30, %v6848_v12 }
 0x1e1   : > { %1127 = vadd.xlane.f32.xlu2 %v943_v59  ;;  %v944_v59 = vmul.f32 %v5952_v29, %v6857_v22 }
 0x1e2   : > { %1191 = vadd.xlane.f32.xlu1 %v975_v45  ;;  %1255 = vadd.xlane.f32.xlu0 %v1007_v46  ;;  %v455_v45 = vpop.f32.mrf.mxu0  ;;  %v549_v46 = vadd.f32 %v548_v44, %v6848_v12  ;;  %v5954_v2 = vpop.eup %5953 }
 0x1e3   : > { %v456_v5 = vadd.f32 %v455_v45, %v6848_v12  ;;  %v913_v44 = vmul.f32 %v5954_v2, %v6857_v22 }
 0x1e4   : > { %v7237_v25 = vpop.xlane.xlu2 %1043  ;;  %5959 = vtanh.f32 %v549_v46 }
 0x1e5   : > { %11831 = vst [vmem:[#allocation50_spill] sm:$0xff] %v7237_v25  ;;  %v7239_v37 = vpop.xlane.xlu1 %1233  ;;  %v7241_v8 = vpop.xlane.xlu0 %1171  ;;  %5961 = vtanh.f32 %v741_v49 }
 0x1e6   : > { %11832 = vst [vmem:[#allocation51_spill] sm:$0xff] %v7239_v37  ;;  %v5956_v25 = vpop.eup %5955  ;;  %v647_v37 = vpop.f32.mrf.mxu2  ;;  %5963 = vtanh.f32 %v456_v5 }
 0x1e7   : > { %11833 = vst [vmem:[#allocation52_spill] sm:$0xff] %v7241_v8  ;;  %v5958_v18 = vpop.eup %5957  ;;  %v551_v16 = vpop.f32.mrf.mxu1  ;;  %v1008_v30 = vmul.f32 %v5956_v25, %v6857_v22  ;;  %v648_v45 = vadd.f32 %v647_v37, %v6848_v12 }
 0x1e9   : > { %1193 = vadd.xlane.f32.xlu2 %v976_v6  ;;  %v977_v6 = vmul.f32 %v5958_v18, %v6857_v22 }
 0x1ea   : > { %1065 = vadd.xlane.f32.xlu1 %v912_v33  ;;  %1129 = vadd.xlane.f32.xlu0 %v944_v59  ;;  %v743_v33 = vpop.f32.mrf.mxu3  ;;  %v552_v59 = vadd.f32 %v551_v16, %v6848_v12  ;;  %v5960_v46 = vpop.eup %5959  ;;  %v1399_v16 = vlaneseq }
 0x1eb   : > { %v744_v49 = vadd.f32 %v743_v33, %v6848_v12 }
 0x1ec   : > { %v7249_v62 = vpop.xlane.xlu2 %1235  ;;  %5965 = vtanh.f32 %v552_v59 }
 0x1ed   : > { %11834 = vst [vmem:[#allocation53_spill] sm:$0xff] %v7249_v62  ;;  %v7251_v29 = vpop.xlane.xlu1 %1107  ;;  %v7253_v8 = vpop.xlane.xlu0 %1045  ;;  %5967 = vtanh.f32 %v648_v45 }
 0x1ee   : > { %11835 = vst [vmem:[#allocation54_spill] sm:$0xff] %v7251_v29  ;;  %v5962_v62 = vpop.eup %5961  ;;  %v650_v25 = vpop.f32.mrf.mxu2  ;;  %5969 = vtanh.f32 %v744_v49  ;;  %v7273_v29 = vand.u32 127, %v1399_v16 }
 0x1ef   : > { %11836 = vst [vmem:[#allocation55_spill] sm:$0xff] %v7253_v8  ;;  %v458_v8 = vpop.f32.mrf.mxu0  ;;  %v5964_v5 = vpop.eup %5963  ;;  %v1009_v37 = vmul.f32 %v5962_v62, %v6857_v22  ;;  %v651_v59 = vadd.f32 %v650_v25, %v6848_v12 }
 0x1f0   : > { %v459_v33 = vadd.f32 %v458_v8, %v6848_v12  ;;  %11840 = vst [vmem:[#allocation59_spill] sm:$0xff] %v7273_v29 }
 0x1f1   : > { %1067 = vadd.xlane.f32.xlu2 %v913_v44  ;;  %v945_v44 = vmul.f32 %v5960_v46, %v6857_v22  ;;  %v7276_v46 = vadd.s32 4294967288, %v7273_v29 }
 0x1f2   : > { %1257 = vadd.xlane.f32.xlu1 %v1008_v30  ;;  %1195 = vadd.xlane.f32.xlu0 %v977_v6  ;;  %v914_v30 = vmul.f32 %v5964_v5, %v6857_v22  ;;  %v554_v6 = vpop.f32.mrf.mxu1  ;;  %v5966_v28 = vpop.eup %5965  ;;  %5971 = vtanh.f32 %v459_v33 }
 0x1f3   : > { %v555_v45 = vadd.f32 %v554_v6, %v6848_v12  ;;  %v746_v62 = vpop.f32.mrf.mxu3  ;;  %11841 = vst [vmem:[#allocation60_spill] sm:$0xff] %v7276_v46  ;;  %5973 = vtanh.f32 %v651_v59  ;;  %v946_v16 = vmul.f32 %v5966_v28, %v6857_v22  ;;  %v1500_v59 = vperm.slane %v7018_v36, %v7276_v46 }
 0x1f4   : > { %v7261_v2 = vpop.xlane.xlu2 %1109  ;;  %v1499_v28 = vperm.slane %v7006_v19, %v7273_v29  ;;  %v1407_v36 = vperm.slane %v7065_v34, %v7276_v46 }
 0x1f5   : > { %11837 = vst [vmem:[#allocation56_spill] sm:$0xff] %v7261_v2  ;;  %v7263_v18 = vpop.xlane.xlu1 %1173  ;;  %v7265_v4 = vpop.xlane.xlu0 %1237  ;;  %5975 = vtanh.f32 %v555_v45  ;;  %v1548_v45 = vperm.slane %v7020_v38, %v7276_v46  ;;  %v1551_v38 = vperm.slane %v7067_v35, %v7276_v46 }
 0x1f6   : > { %11838 = vst [vmem:[#allocation57_spill] sm:$0xff] %v7263_v18  ;;  %v5968_v18 = vpop.eup %5967  ;;  %v653_v6 = vpop.f32.mrf.mxu2 }
 0x1f7   : > { %11839 = vst [vmem:[#allocation58_spill] sm:$0xff] %v7265_v4  ;;  %v5970_v49 = vpop.eup %5969  ;;  %v461_v8 = vpop.f32.mrf.mxu0  ;;  %v1401_v4 = vperm.slane %v6992_v0, %v7273_v29  ;;  %v1455_v0 = vperm.slane %v7048_v9, %v7276_v46  ;;  %v7313_v9 = vsel %vm1404_vm0, %v1500_v59, %v1499_v28 }
 0x1f8   : > { %v462_v33 = vadd.f32 %v461_v8, %v6848_v12 }
 0x1f9   : > { %1259 = vadd.xlane.f32.xlu2 %v1009_v37 }
 0x1fa   : > { %1131 = vadd.xlane.f32.xlu1 %v945_v44  ;;  %1069 = vadd.xlane.f32.xlu0 %v914_v30  ;;  %v978_v44 = vmul.f32 %v5968_v18, %v6857_v22  ;;  %v1010_v30 = vmul.f32 %v5970_v49, %v6857_v22  ;;  %v1451_v18 = vperm.slane %v7001_v13, %v7273_v29  ;;  %v557_v19 = vpop.f32.mrf.mxu1  ;;  %5977 = vtanh.f32 %v462_v33 }
 0x1fb   : > { %v654_v49 = vadd.f32 %v653_v6, %v6848_v12  ;;  %v1403_v6 = vperm.slane %v7022_v39, %v7276_v46  ;;  %v1550_v39 = vperm.slane %v7034_v55, %v7273_v29  ;;  %v1503_v55 = vperm.slane %v7079_v54, %v7276_v46  ;;  %v11868_v54 = vld [vmem:[#allocation50_spill] sm:$0xff] }
 0x1fc   : > { %v7278_v5 = vpop.xlane.xlu2 %1175 }
 0x1fd   : > { %11842 = vst [vmem:[#allocation61_spill] sm:$0xff] %v7278_v5  ;;  %v7280_v25 = vpop.xlane.xlu1 %1047  ;;  %v7282_v37 = vpop.xlane.xlu0 %1111  ;;  %v747_v5 = vadd.f32 %v746_v62, %v6848_v12  ;;  %v1454_v62 = vperm.slane %v7050_v11, %v7273_v29  ;;  %v1406_v11 = vperm.slane %v7036_v57, %v7273_v29 }
 0x1fe   : > { %11843 = vst [vmem:[#allocation62_spill] sm:$0xff] %v7280_v25 }
 0x1ff   : > { %11844 = vst [vmem:[#allocation63_spill] sm:$0xff] %v7282_v37  ;;  %v5972_v37 = vpop.eup %5971  ;;  %5979 = vtanh.f32 %v747_v5  ;;  %v1456_v28 = vsel %vm1404_vm0, %v1455_v0, %v1454_v62  ;;  %v464_v25 = vpop.f32.mrf.mxu0  ;;  %v1502_v0 = vperm.slane %v7052_v14, %v7273_v29  ;;  %v1505_v62 = vperm.slane %v7077_v52, %v7273_v29 }
 0x200   : > { %v5974_v8 = vpop.eup %5973  ;;  %5981 = vtanh.f32 %v654_v49  ;;  %v915_v57 = vmul.f32 %v5972_v37, %v6857_v22  ;;  %v558_v49 = vadd.f32 %v557_v19, %v6848_v12  ;;  %v465_v19 = vadd.f32 %v464_v25, %v6848_v12 }
 0x201   : > { %1133 = vadd.xlane.f32.xlu2 %v946_v16  ;;  %v5976_v13 = vpop.eup %5975  ;;  %v1547_v16 = vperm.slane %v7008_v20, %v7273_v29  ;;  %v749_v20 = vpop.f32.mrf.mxu3  ;;  %v979_v59 = vmul.f32 %v5974_v8, %v6857_v22  ;;  %v1458_v25 = vperm.slane %v7107_v42, %v7276_v46 }
 0x202   : > { %1197 = vadd.xlane.f32.xlu1 %v978_v44  ;;  %1261 = vadd.xlane.f32.xlu0 %v1010_v30  ;;  %v1452_v44 = vperm.slane %v7038_v58, %v7276_v46  ;;  %v1408_v58 = vsel %vm1404_vm0, %v1407_v36, %v1406_v11  ;;  %v947_v5 = vmul.f32 %v5976_v13, %v6857_v22  ;;  %v5978_v11 = vpop.eup %5977  ;;  %5983 = vtanh.f32 %v558_v49 }
 0x203   : > { %v1549_v34 = vsel %vm1404_vm0, %v1548_v45, %v1547_v16  ;;  %v1405_v45 = vsel %vm1404_vm0, %v1403_v6, %v1401_v4  ;;  %v1552_v16 = vsel %vm1404_vm0, %v1551_v38, %v1550_v39  ;;  %v1410_v36 = vperm.slane %v7089_v7, %v7276_v46 }
 0x204   : > { %v7319_v30 = vpop.xlane.xlu2 %1049  ;;  %v1453_v8 = vsel %vm1404_vm0, %v1452_v44, %v1451_v18  ;;  %v750_v13 = vadd.f32 %v749_v20, %v6848_v12  ;;  %v1409_v38 = vperm.slane %v7063_v32, %v7273_v29  ;;  %v1596_v39 = vsel %vm1595_vm1, %v1408_v58, %v1405_v45 }
 0x205   : > { %11845 = vst [vmem:[#allocation64_spill] sm:$0xff] %v7319_v30  ;;  %v7324_v35 = vpop.xlane.xlu1 %1239  ;;  %v7326_v33 = vpop.xlane.xlu0 %1177  ;;  %v1616_v4 = vsel %vm1595_vm1, %v1456_v28, %v1453_v8  ;;  %v7350_v18 = vsel %vm1595_vm1, %v1552_v16, %v1549_v34  ;;  %v1457_v20 = vperm.slane %v7081_v56, %v7273_v29  ;;  %v1504_v44 = vsel %vm1404_vm0, %v1503_v55, %v1502_v0 }
 0x206   : > { %11846 = vst [vmem:[#allocation65_spill] sm:$0xff] %v7324_v35  ;;  %v5980_v37 = vpop.eup %5979  ;;  %v1506_v58 = vperm.slane %v7093_v15, %v7276_v46  ;;  %v1411_v34 = vsel %vm1404_vm0, %v1410_v36, %v1409_v38  ;;  %v1413_v28 = vperm.slane %v7131_v26, %v7276_v46  ;;  %5985 = vtanh.f32 %v750_v13  ;;  %v11865_v35 = vld [vmem:[#allocation45_spill] sm:$0xff] }
 0x207   : > { %11847 = vst [vmem:[#allocation66_spill] sm:$0xff] %v7326_v33  ;;  %v5982_v6 = vpop.eup %5981  ;;  %v1554_v55 = vperm.slane %v7105_v40, %v7276_v46  ;;  %v1461_v45 = vperm.slane %v7133_v27, %v7276_v46  ;;  %5987 = vtanh.f32 %v465_v19  ;;  %v916_v8 = vmul.f32 %v5978_v11, %v6857_v22 }
 0x208   : > { %v1412_v0 = vperm.slane %v7109_v43, %v7273_v29  ;;  %v1508_v36 = vperm.slane %v7119_v63, %v7273_v29  ;;  %v1011_v13 = vmul.f32 %v5980_v37, %v6857_v22  ;;  %v980_v38 = vmul.f32 %v5982_v6, %v6857_v22  ;;  %v5984_v33 = vpop.eup %5983 }
 0x209   : > { %1199 = vadd.xlane.f32.xlu2 %v979_v59  ;;  %v1509_v59 = vperm.slane %v7129_v24, %v7276_v46  ;;  %v752_v40 = vpop.f32.mrf.mxu3  ;;  %v1507_v24 = vsel %vm1404_vm0, %v1506_v58, %v1505_v62  ;;  %v1459_v52 = vsel %vm1404_vm0, %v1458_v25, %v1457_v20  ;;  %v1460_v19 = vperm.slane %v7117_v61, %v7273_v29 }
 0x20a   : > { %1071 = vadd.xlane.f32.xlu1 %v915_v57  ;;  %1135 = vadd.xlane.f32.xlu0 %v947_v5  ;;  %v560_v5 = vpop.f32.mrf.mxu1  ;;  %v1553_v11 = vperm.slane %v7091_v10, %v7273_v29  ;;  %v1414_v14 = vsel %vm1404_vm0, %v1413_v28, %v1412_v0  ;;  %v1630_v6 = vsel %vm1595_vm1, %v1504_v44, %v7313_v9 }
 0x20b   : > { %v1510_v15 = vsel %vm1404_vm0, %v1509_v59, %v1508_v36  ;;  %v561_v37 = vadd.f32 %v560_v5, %v6848_v12  ;;  %v1598_v62 = vsel %vm1597_vm2, %v1411_v34, %v1596_v39  ;;  %v1462_v20 = vsel %vm1404_vm0, %v1461_v45, %v1460_v19 }
 0x20c   : > { %v7366_v57 = vpop.xlane.xlu2 %1241  ;;  %v753_v58 = vadd.f32 %v752_v40, %v6848_v12  ;;  %v5986_v25 = vpop.eup %5985  ;;  %v1631_v10 = vsel %vm1597_vm2, %v1507_v24, %v1630_v6  ;;  %v7399_v59 = vsel %vm1404_vm0, %v1554_v55, %v1553_v11  ;;  %v1617_v28 = vsel %vm1597_vm2, %v1459_v52, %v1616_v4 }
 0x20d   : > { %11848 = vst [vmem:[#allocation67_spill] sm:$0xff] %v7366_v57  ;;  %v7372_v16 = vpop.xlane.xlu1 %1113  ;;  %v7374_v49 = vpop.xlane.xlu0 %1051  ;;  %v1556_v9 = vperm.slane %v7121_v1, %v7273_v29  ;;  %v7405_v39 = vsel %vm1599_vm3, %v1510_v15, %v1631_v10  ;;  %v7408_v40 = vsel %vm1599_vm3, %v1414_v14, %v1598_v62  ;;  %v1464_v24 = vperm.slane %v7165_v47, %v7276_v46 }
 0x20e   : > { %11849 = vst [vmem:[#allocation68_spill] sm:$0xff] %v7372_v16  ;;  %v5988_v5 = vpop.eup %5987  ;;  %v1618_v44 = vsel %vm1599_vm3, %v1462_v20, %v1617_v28  ;;  %v1557_v52 = vperm.slane %v7143_v50, %v7276_v46  ;;  %v1463_v4 = vperm.slane %v7155_v21, %v7273_v29  ;;  %5989 = vtanh.f32 %v561_v37 }
 0x20f   : > { %11850 = vst [vmem:[#allocation69_spill] sm:$0xff] %v7374_v49  ;;  %v1416_v10 = vperm.slane %v7157_v23, %v7276_v46  ;;  %v1467_v14 = vperm.slane %v7203_v3, %v7276_v46  ;;  %5991 = vtanh.f32 %v753_v58  ;;  %v1012_v45 = vmul.f32 %v5986_v25, %v6857_v22 }
 0x210   : > { %v1470_v0 = vperm.slane %v7229_v60, %v7276_v46  ;;  %v948_v36 = vmul.f32 %v5984_v33, %v6857_v22  ;;  %v1415_v19 = vperm.slane %v7141_v48, %v7273_v29  ;;  %v1465_v11 = vsel %vm1404_vm0, %v1464_v24, %v1463_v4 }
 0x211   : > { %1073 = vadd.xlane.f32.xlu2 %v916_v8  ;;  %v1512_v8 = vperm.slane %v7167_v53, %v7276_v46  ;;  %v1466_v37 = vperm.slane %v7181_v31, %v7273_v29  ;;  %v1473_v6 = vperm.slane %v7261_v2, %v7276_v46  ;;  %v7442_v62 = vsel %vm1404_vm0, %v1557_v52, %v1556_v9  ;;  %v11870_v2 = vld [vmem:[#allocation38_spill] sm:$0xff] }
 0x212   : > { %1263 = vadd.xlane.f32.xlu1 %v1011_v13  ;;  %1201 = vadd.xlane.f32.xlu0 %v980_v38  ;;  %v917_v13 = vmul.f32 %v5988_v5, %v6857_v22  ;;  %v656_v38 = vpop.f32.mrf.mxu2  ;;  %v1511_v33 = vperm.slane %v7145_v51, %v7273_v29  ;;  %v1469_v58 = vperm.slane %v7213_v41, %v7273_v29  ;;  %v11854_v5 = vld [vmem:[#allocation54_spill] sm:$0xff]  ;;  %v563_v63 = vpop.f32.mrf.mxu1 }
 0x213   : > { %v1417_v25 = vsel %vm1404_vm0, %v1416_v10, %v1415_v19  ;;  %v1468_v28 = vsel %vm1404_vm0, %v1467_v14, %v1466_v37  ;;  %v1472_v24 = vperm.slane %v11854_v5, %v7273_v29  ;;  %v657_v9 = vadd.f32 %v656_v38, %v6848_v12  ;;  %v11855_v10 = vld [vmem:[#allocation39_spill] sm:$0xff]  ;;  %v11856_v19 = vld [vmem:[#allocation41_spill] sm:$0xff] }
 0x214   : > { %v7417_v34 = vpop.xlane.xlu2 %1115  ;;  %v5990_v52 = vpop.eup %5989  ;;  %v1513_v4 = vsel %vm1404_vm0, %v1512_v8, %v1511_v33  ;;  %v1471_v20 = vsel %vm1404_vm0, %v1470_v0, %v1469_v58  ;;  %v1619_v1 = vsel %vm1601_vm4, %v1465_v11, %v1618_v44  ;;  %v1514_v14 = vperm.slane %v11855_v10, %v7273_v29  ;;  %v11858_v8 = vld [vmem:[#allocation40_spill] sm:$0xff]  ;;  %v11860_v11 = vld [vmem:[#allocation49_spill] sm:$0xff] }
 0x215   : > { %11851 = vst [vmem:[#allocation70_spill] sm:$0xff] %v7417_v34  ;;  %v7423_v15 = vpop.xlane.xlu1 %1179  ;;  %v7425_v55 = vpop.xlane.xlu0 %1243  ;;  %v1419_v37 = vperm.slane %v11856_v19, %v7276_v46  ;;  %v1474_v51 = vsel %vm1404_vm0, %v1473_v6, %v1472_v24  ;;  %v1620_v44 = vsel %vm1603_vm5, %v1468_v28, %v1619_v1  ;;  %v1422_v33 = vperm.slane %v11860_v11, %v7276_v46 }
 0x216   : > { %11852 = vst [vmem:[#allocation71_spill] sm:$0xff] %v7423_v15  ;;  %v5992_v50 = vpop.eup %5991  ;;  %v467_v0 = vpop.f32.mrf.mxu0  ;;  %5993 = vtanh.f32 %v657_v9  ;;  %v949_v6 = vmul.f32 %v5990_v52, %v6857_v22  ;;  %v1621_v24 = vsel %vm1605_vm6, %v1471_v20, %v1620_v44  ;;  %v1421_v52 = vperm.slane %v11865_v35, %v7273_v29  ;;  %v11866_v20 = vld [vmem:[#allocation57_spill] sm:$0xff] }
 0x217   : > { %11853 = vst [vmem:[#allocation72_spill] sm:$0xff] %v7425_v55  ;;  %v1622_v1 = vsel %vm11705_vm7, %v1474_v51, %v1621_v24  ;;  %v1013_v28 = vmul.f32 %v5992_v50, %v6857_v22  ;;  %v1521_v44 = vperm.slane %v11866_v20, %v7276_v46  ;;  %v1424_v5 = vperm.slane %v11868_v54, %v7273_v29  ;;  %v11869_v51 = vld [vmem:[#allocation52_spill] sm:$0xff] }
 0x218   : > { %v468_v50 = vadd.f32 %v467_v0, %v6848_v12  ;;  %v1602_v20 = vsel %vm1601_vm4, %v1417_v25, %v7408_v40  ;;  %v11873_v25 = vld [vmem:[#allocation51_spill] sm:$0xff] }
 0x219   : > { %1265 = vadd.xlane.f32.xlu2 %v1012_v45  ;;  %v11857_v45 = vld [vmem:[#allocation43_spill] sm:$0xff] }
 0x21a   : > { %1137 = vadd.xlane.f32.xlu1 %v948_v36  ;;  %1075 = vadd.xlane.f32.xlu0 %v917_v13  ;;  %v1515_v38 = vperm.slane %v11857_v45, %v7276_v46  ;;  %v1418_v36 = vperm.slane %v11858_v8, %v7273_v29  ;;  %v11863_v45 = vld [vmem:[#allocation48_spill] sm:$0xff]  ;;  %5995 = vtanh.f32 %v468_v50  ;;  %v11877_v50 = vld [vmem:[#allocation58_spill] sm:$0xff] }
 0x21b   : > { %v1518_v15 = vperm.slane %v11863_v45, %v7276_v46  ;;  %v11867_v45 = vld [vmem:[#allocation46_spill] sm:$0xff] }
 0x21c   : > { %v7467_v13 = vpop.xlane.xlu2 %1181  ;;  %v1420_v55 = vsel %vm1404_vm0, %v1419_v37, %v1418_v36  ;;  %v1516_v9 = vsel %vm1404_vm0, %v1515_v38, %v1514_v14  ;;  %v1517_v57 = vperm.slane %v11867_v45, %v7273_v29  ;;  %v1520_v37 = vperm.slane %v11869_v51, %v7273_v29  ;;  %v5994_v0 = vpop.eup %5993 }
 0x21d   : > { %11859 = vst [vmem:[#allocation41_spill] sm:$0xff] %v7467_v13  ;;  %v7472_v58 = vpop.xlane.xlu1 %1053  ;;  %v7474_v10 = vpop.xlane.xlu0 %1117  ;;  %v11864_v13 = vld [vmem:[#allocation55_spill] sm:$0xff]  ;;  %v1673_v14 = vsel %vm1666_vm8, %v1622_v1, -inf  ;;  %v564_v38 = vadd.f32 %v563_v63, %v6848_v12  ;;  %v1423_v36 = vsel %vm1404_vm0, %v1422_v33, %v1421_v52  ;;  %v1560_v51 = vperm.slane %v11870_v2, %v7276_v46  ;;  %v11871_v33 = vld [vmem:[#allocation44_spill] sm:$0xff] }
 0x21e   : > { %11861 = vst [vmem:[#allocation40_spill] sm:$0xff] %v7472_v58  ;;  %v1425_v53 = vperm.slane %v11864_v13, %v7276_v46  ;;  %v1519_v45 = vsel %vm1404_vm0, %v1518_v15, %v1517_v57  ;;  %v1522_v1 = vsel %vm1404_vm0, %v1521_v44, %v1520_v37  ;;  %v1633_v63 = vsel %vm1601_vm4, %v1513_v4, %v7405_v39  ;;  %v659_v15 = vpop.f32.mrf.mxu2 }
 0x21f   : > { %11862 = vst [vmem:[#allocation49_spill] sm:$0xff] %v7474_v10  ;;  %v1634_v57 = vsel %vm1603_vm5, %v1516_v9, %v1633_v63  ;;  %5997 = vtanh.f32 %v564_v38  ;;  %v1569_v37 = vperm.slane %v11877_v50, %v7276_v46  ;;  %v981_v9 = vmul.f32 %v5994_v0, %v6857_v22 }
 0x220   : > { %v1426_v24 = vsel %vm1404_vm0, %v1425_v53, %v1424_v5  ;;  %v1566_v5 = vperm.slane %v11873_v25, %v7276_v46  ;;  %v1635_v4 = vsel %vm1605_vm6, %v1519_v45, %v1634_v57  ;;  %v11878_v38 = vperm.slane %v7153_v17, %v7273_v29  ;;  %v11880_v57 = vld [vmem:[#allocation53_spill] sm:$0xff] }
 0x221   : > { %1139 = vadd.xlane.f32.xlu2 %v949_v6  ;;  %v1604_v6 = vsel %vm1603_vm5, %v1420_v55, %v1602_v20  ;;  %v11876_v20 = vld [vmem:[#allocation42_spill] sm:$0xff]  ;;  %v1568_v0 = vperm.slane %v11880_v57, %v7273_v29 }
 0x222   : > { %1674 = vmax.xlane.f32.xlu1 %v1673_v14  ;;  %1267 = vadd.xlane.f32.xlu0 %v1013_v28  ;;  %v1563_v28 = vperm.slane %v11871_v33, %v7276_v46  ;;  %v1606_v40 = vsel %vm1605_vm6, %v1423_v36, %v1604_v6  ;;  %v1562_v44 = vperm.slane %v11876_v20, %v7273_v29  ;;  %v755_v36 = vpop.f32.mrf.mxu3  ;;  %v5996_v33 = vpop.eup %5995 }
 0x223   : > { %v1608_v39 = vsel %vm11705_vm7, %v1426_v24, %v1606_v40  ;;  %v1636_v14 = vsel %vm11705_vm7, %v1522_v1, %v1635_v4  ;;  %v1645_v6 = vsel %vm1597_vm2, %v7399_v59, %v7350_v18  ;;  %v1561_v45 = vsel %vm1404_vm0, %v1560_v51, %v11878_v38  ;;  %v11879_v24 = vld [vmem:[#allocation47_spill] sm:$0xff] }
 0x224   : > { %v7512_v53 = vpop.xlane.xlu2 %1055  ;;  %v1565_v63 = vperm.slane %v11879_v24, %v7273_v29  ;;  %v1564_v40 = vsel %vm1404_vm0, %v1563_v28, %v1562_v44  ;;  %v1667_v1 = vsel %vm1666_vm8, %v1608_v39, -inf  ;;  %v660_v4 = vadd.f32 %v659_v15, %v6848_v12 }
 0x225   : > { %11872 = vst [vmem:[#allocation55_spill] sm:$0xff] %v7512_v53  ;;  %v7518_v55 = vpop.xlane.xlu1 %1245  ;;  %v7520_v52 = vpop.xlane.xlu0 %1183  ;;  %v1646_v18 = vsel %vm1599_vm3, %v7442_v62, %v1645_v6  ;;  %v1679_v59 = vsel %vm1666_vm8, %v1636_v14, -inf  ;;  %v756_v51 = vadd.f32 %v755_v36, %v6848_v12  ;;  %v1570_v28 = vsel %vm1404_vm0, %v1569_v37, %v1568_v0 }
 0x226   : > { %11874 = vst [vmem:[#allocation45_spill] sm:$0xff] %v7518_v55  ;;  %v1567_v38 = vsel %vm1404_vm0, %v1566_v5, %v1565_v63  ;;  %v1647_v44 = vsel %vm1601_vm4, %v1561_v45, %v1646_v18  ;;  %v5998_v39 = vpop.eup %5997  ;;  %5999 = vtanh.f32 %v660_v4 }
 0x227   : > { %11875 = vst [vmem:[#allocation50_spill] sm:$0xff] %v7520_v52  ;;  %v1648_v15 = vsel %vm1603_vm5, %v1564_v40, %v1647_v44  ;;  %6001 = vtanh.f32 %v756_v51  ;;  %v950_v37 = vmul.f32 %v5998_v39, %v6857_v22 }
 0x228   : > { %v1649_v62 = vsel %vm1605_vm6, %v1567_v38, %v1648_v15 }
 0x229   : > { %1668 = vmax.xlane.f32.xlu2 %v1667_v1  ;;  %v1650_v5 = vsel %vm11705_vm7, %v1570_v28, %v1649_v62 }
 0x22a   : > { %1203 = vadd.xlane.f32.xlu1 %v981_v9  ;;  %1680 = vmax.xlane.f32.xlu0 %v1679_v59  ;;  %v918_v9 = vmul.f32 %v5996_v33, %v6857_v22  ;;  %v1685_v36 = vsel %vm1666_vm8, %v1650_v5, -inf }
 0x22c   : > { %v7552_v57 = vpop.xlane.xlu2 %1247  ;;  %v6000_v6 = vpop.eup %5999 }
 0x22d   : > { %11881 = vst [vmem:[#allocation73_spill] sm:$0xff] %v7552_v57  ;;  %v7555_v14 = vpop.xlane.xlu1 %1119  ;;  %v7557_v12 = vpop.xlane.xlu0 %1057  ;;  %v982_v1 = vmul.f32 %v6000_v6, %v6857_v22 }
 0x22e   : > { %11882 = vst [vmem:[#allocation74_spill] sm:$0xff] %v7557_v12  ;;  %v6002_v45 = vpop.eup %6001 }
 0x22f   : > { %v1014_v4 = vmul.f32 %v6002_v45, %v6857_v22 }
 0x231   : > { %1686 = vmax.xlane.f32.xlu2 %v1685_v36 }
 0x232   : > { %1077 = vadd.xlane.f32.xlu1 %v918_v9  ;;  %1141 = vadd.xlane.f32.xlu0 %v950_v37 }
 0x234   : > { %v7563_v63 = vpop.xlane.xlu2 %1121 }
 0x235   : > { %11883 = vst [vmem:[#allocation75_spill] sm:$0xff] %v7563_v63  ;;  %v7565_v40 = vpop.xlane.xlu1 %1185  ;;  %v7567_v0 = vpop.xlane.xlu0 %1249 }
 0x236   : > { %11884 = vst [vmem:[#allocation76_spill] sm:$0xff] %v7565_v40 }
 0x237   : > { %11885 = vst [vmem:[#allocation77_spill] sm:$0xff] %v7567_v0 }
 0x239   : > { %1205 = vadd.xlane.f32.xlu2 %v982_v1 }
 0x23a   : > { %1269 = vadd.xlane.f32.xlu1 %v1014_v4 }
 0x23c   : > { %v7571_v33 = vpop.xlane.xlu2 %1187 }
 0x23d   : > { %11886 = vst [vmem:[#allocation78_spill] sm:$0xff] %v7571_v33  ;;  %v7573_v18 = vpop.xlane.xlu1 %1059  ;;  %v7575_v59 = vpop.xlane.xlu0 %1123 }
 0x23e   : > { %11887 = vst [vmem:[#allocation79_spill] sm:$0xff] %v7575_v59 }
 0x244   : > { %v7581_v28 = vpop.xlane.xlu2 %1061 }
 0x245   : > { %v7577_v51 = vpop.xlane.xlu1 %1251  ;;  %v7579_v38 = vpop.xlane.xlu0 %1189 }
 0x246   : > { %11888 = vst [vmem:[#allocation80_spill] sm:$0xff] %v7577_v51 }
 0x247   : > { %11889 = vst [vmem:[#allocation81_spill] sm:$0xff] %v7579_v38 }
 0x24c   : > { %v7587_v15 = vpop.xlane.xlu2 %1253 }
 0x24d   : > { %v7583_v44 = vpop.xlane.xlu1 %1125  ;;  %v7585_v39 = vpop.xlane.xlu0 %1063  ;;  %11890 = vst [vmem:[#allocation82_spill] sm:$0xff] %v7587_v15 }
 0x254   : > { %v7593_v5 = vpop.xlane.xlu2 %1127 }
 0x255   : > { %v7589_v22 = vpop.xlane.xlu1 %1191  ;;  %v7591_v62 = vpop.xlane.xlu0 %1255  ;;  %11893 = vst [vmem:[#allocation85_spill] sm:$0xff] %v7593_v5 }
 0x256   : > { %11891 = vst [vmem:[#allocation83_spill] sm:$0xff] %v7589_v22 }
 0x257   : > { %11892 = vst [vmem:[#allocation84_spill] sm:$0xff] %v7591_v62 }
 0x25c   : > { %v7599_v36 = vpop.xlane.xlu2 %1193 }
 0x25d   : > { %v7595_v9 = vpop.xlane.xlu1 %1065  ;;  %v7597_v37 = vpop.xlane.xlu0 %1129  ;;  %11895 = vst [vmem:[#allocation87_spill] sm:$0xff] %v7599_v36 }
 0x25e   : > { %11894 = vst [vmem:[#allocation86_spill] sm:$0xff] %v7597_v37 }
 0x264   : > { %v7609_v50 = vpop.xlane.xlu2 %1067 }
 0x265   : > { %v7601_v6 = vpop.xlane.xlu1 %1257  ;;  %v7603_v45 = vpop.xlane.xlu0 %1195  ;;  %11899 = vst [vmem:[#allocation91_spill] sm:$0xff] %v7609_v50 }
 0x266   : > { %11896 = vst [vmem:[#allocation88_spill] sm:$0xff] %v7601_v6  ;;  %v1428_v6 = vperm.slane %v7319_v30, %v7276_v46 }
 0x267   : > { %11897 = vst [vmem:[#allocation89_spill] sm:$0xff] %v7603_v45 }
 0x26c   : > { %v7615_v2 = vpop.xlane.xlu2 %1259 }
 0x26d   : > { %v7605_v1 = vpop.xlane.xlu1 %1131  ;;  %v7607_v4 = vpop.xlane.xlu0 %1069  ;;  %11902 = vst [vmem:[#allocation94_spill] sm:$0xff] %v7615_v2 }
 0x26e   : > { %11898 = vst [vmem:[#allocation90_spill] sm:$0xff] %v7605_v1 }
 0x274   : > { %v7621_v22 = vpop.xlane.xlu2 %1133 }
 0x275   : > { %v7611_v17 = vpop.xlane.xlu1 %1197  ;;  %v7613_v24 = vpop.xlane.xlu0 %1261  ;;  %11903 = vst [vmem:[#allocation95_spill] sm:$0xff] %v7621_v22 }
 0x276   : > { %11900 = vst [vmem:[#allocation92_spill] sm:$0xff] %v7611_v17 }
 0x277   : > { %11901 = vst [vmem:[#allocation93_spill] sm:$0xff] %v7613_v24 }
 0x27c   : > { %v7627_v33 = vpop.xlane.xlu2 %1199 }
 0x27d   : > { %v7617_v25 = vpop.xlane.xlu1 %1071  ;;  %v7619_v20 = vpop.xlane.xlu0 %1135  ;;  %11906 = vst [vmem:[#allocation98_spill] sm:$0xff] %v7627_v33  ;;  %v1479_v33 = vperm.slane %v7474_v10, %v7276_v46  ;;  %v1433_v10 = vperm.slane %v7512_v53, %v7273_v29  ;;  %v1481_v53 = vperm.slane %v7555_v14, %v7273_v29 }
 0x284   : > { %v7633_v17 = vpop.xlane.xlu2 %1073 }
 0x285   : > { %v7623_v36 = vpop.xlane.xlu1 %1263  ;;  %v7625_v45 = vpop.xlane.xlu0 %1201  ;;  %11909 = vst [vmem:[#allocation101_spill] sm:$0xff] %v7633_v17 }
 0x286   : > { %11904 = vst [vmem:[#allocation96_spill] sm:$0xff] %v7623_v36  ;;  %v1434_v36 = vperm.slane %v7557_v12, %v7276_v46  ;;  %v11914_v12 = vld [vmem:[#allocation63_spill] sm:$0xff] }
 0x287   : > { %11905 = vst [vmem:[#allocation97_spill] sm:$0xff] %v7625_v45  ;;  %v1431_v45 = vperm.slane %v7472_v58, %v7276_v46  ;;  %v11913_v58 = vld [vmem:[#allocation62_spill] sm:$0xff]  ;;  %v1475_v57 = vperm.slane %v11914_v12, %v7273_v29 }
 0x288   : > { %v1427_v15 = vperm.slane %v11913_v58, %v7273_v29 }
 0x28a   : > { %v1429_v58 = vsel %vm1404_vm0, %v1428_v6, %v1427_v15 }
 0x28c   : > { %v7639_v62 = vpop.xlane.xlu2 %1265 }
 0x28d   : > { %v7629_v52 = vpop.xlane.xlu1 %1137  ;;  %v7631_v38 = vpop.xlane.xlu0 %1075  ;;  %11911 = vst [vmem:[#allocation103_spill] sm:$0xff] %v7639_v62  ;;  %v1478_v62 = vperm.slane %v7417_v34, %v7273_v29  ;;  %v1437_v34 = vperm.slane %v7581_v28, %v7276_v46 }
 0x28e   : > { %11907 = vst [vmem:[#allocation99_spill] sm:$0xff] %v7629_v52 }
 0x28f   : > { %11908 = vst [vmem:[#allocation100_spill] sm:$0xff] %v7631_v38  ;;  %v1480_v0 = vsel %vm1404_vm0, %v1479_v33, %v1478_v62 }
 0x294   : > { %v7688_v15 = vpop.xlane.xlu2 %1139 }
 0x295   : > { %v7635_v40 = vpop.xlane.xlu1 %1674  ;;  %v7637_v2 = vpop.xlane.xlu0 %1267 }
 0x296   : > { %11910 = vst [vmem:[#allocation102_spill] sm:$0xff] %v7637_v2  ;;  %v1476_v2 = vperm.slane %v7372_v16, %v7276_v46  ;;  %v1482_v16 = vperm.slane %v7563_v63, %v7276_v46  ;;  %v1448_v63 = vperm.slane %v7631_v38, %v7273_v29 }
 0x298   : > { %v1477_v55 = vsel %vm1404_vm0, %v1476_v2, %v1475_v57  ;;  %v1484_v2 = vperm.slane %v7575_v59, %v7273_v29  ;;  %v1440_v57 = vperm.slane %v7595_v9, %v7276_v46 }
 0x299   : > { %v1623_v62 = vsel %vm1595_vm1, %v1480_v0, %v1477_v55  ;;  %v1487_v0 = vperm.slane %v7593_v5, %v7273_v29  ;;  %v1445_v5 = vperm.slane %v7617_v25, %v7273_v29 }
 0x29d   : > { %v7641_v24 = vpop.xlane.xlu1 %1203  ;;  %v7643_v51 = vpop.xlane.xlu0 %1680 }
 0x29e   : > { %11912 = vst [vmem:[#allocation104_spill] sm:$0xff] %v7641_v24  ;;  %v1430_v24 = vperm.slane %v7374_v49, %v7273_v29  ;;  %v1435_v49 = vsel %vm1404_vm0, %v1434_v36, %v1433_v10  ;;  %v1436_v10 = vperm.slane %v7573_v18, %v7273_v29 }
 0x2a0   : > { %v1432_v30 = vsel %vm1404_vm0, %v1431_v45, %v1430_v24  ;;  %v1485_v24 = vperm.slane %v7583_v44, %v7276_v46  ;;  %v1483_v45 = vsel %vm1404_vm0, %v1482_v16, %v1481_v53  ;;  %v1443_v16 = vperm.slane %v7607_v4, %v7276_v46 }
 0x2a1   : > { %v1609_v33 = vsel %vm1595_vm1, %v1432_v30, %v1429_v58  ;;  %v1438_v30 = vsel %vm1404_vm0, %v1437_v34, %v1436_v10  ;;  %v1439_v58 = vperm.slane %v7585_v39, %v7273_v29  ;;  %v1446_v34 = vperm.slane %v7633_v17, %v7276_v46 }
 0x2a2   : > { %v1610_v36 = vsel %vm1597_vm2, %v1435_v49, %v1609_v33  ;;  %v1488_v49 = vperm.slane %v7597_v37, %v7276_v46  ;;  %v1486_v55 = vsel %vm1404_vm0, %v1485_v24, %v1484_v2  ;;  %v1491_v33 = vperm.slane %v7621_v22, %v7276_v46 }
 0x2a3   : > { %v1442_v10 = vperm.slane %v7609_v50, %v7273_v29  ;;  %v1494_v37 = vperm.slane %v7629_v52, %v7276_v46  ;;  %v1441_v2 = vsel %vm1404_vm0, %v1440_v57, %v1439_v58  ;;  %v1490_v22 = vperm.slane %v7605_v1, %v7273_v29 }
 0x2a4   : > { %v1624_v17 = vsel %vm1597_vm2, %v1483_v45, %v1623_v62  ;;  %v1489_v52 = vsel %vm1404_vm0, %v1488_v49, %v1487_v0  ;;  %v1493_v50 = vperm.slane %v7619_v20, %v7273_v29  ;;  %v1611_v57 = vsel %vm1599_vm3, %v1438_v30, %v1610_v36 }
 0x2a5   : > { %v7690_v6 = vpop.xlane.xlu1 %1077  ;;  %v7699_v53 = vpop.xlane.xlu0 %1141  ;;  %v1444_v12 = vsel %vm1404_vm0, %v1443_v16, %v1442_v10  ;;  %v1492_v58 = vsel %vm1404_vm0, %v1491_v33, %v1490_v22  ;;  %v1496_v1 = vperm.slane %v7688_v15, %v7273_v29  ;;  %v1447_v38 = vsel %vm1404_vm0, %v1446_v34, %v1445_v5  ;;  %v11917_v10 = vld [vmem:[#allocation19_spill] sm:$0xff] }
 0x2a6   : > { %11915 = vst [vmem:[#allocation105_spill] sm:$0xff] %v7699_v53  ;;  %v1449_v24 = vperm.slane %v7690_v6, %v7276_v46  ;;  %v1497_v59 = vperm.slane %v7699_v53, %v7276_v46  ;;  %v1625_v53 = vsel %vm1599_vm3, %v1486_v55, %v1624_v17  ;;  %v1612_v45 = vsel %vm1601_vm4, %v1441_v2, %v1611_v57  ;;  %v7742_v33 = vpop.xlane.xlu2 %1668 }
 0x2a7   : > { %v1495_v49 = vsel %vm1404_vm0, %v1494_v37, %v1493_v50  ;;  %v1613_v16 = vsel %vm1603_vm5, %v1444_v12, %v1612_v45  ;;  %v1626_v36 = vsel %vm1601_vm4, %v1489_v52, %v1625_v53  ;;  %v1699_v50 = vperm.slane %v7742_v33, 0  ;;  %v11918_v45 = vld [vmem:[#allocation17_spill] sm:$0xff] }
 0x2a8   : > { %v1450_v62 = vsel %vm1404_vm0, %v1449_v24, %v1448_v63  ;;  %v1498_v0 = vsel %vm1404_vm0, %v1497_v59, %v1496_v1  ;;  %v1614_v22 = vsel %vm1605_vm6, %v1447_v38, %v1613_v16  ;;  %v1627_v30 = vsel %vm1603_vm5, %v1492_v58, %v1626_v36  ;;  %v11916_v38 = vld [vmem:[#allocation11_spill] sm:$0xff] }
 0x2a9   : > { %v1615_v17 = vsel %vm11705_vm7, %v1450_v62, %v1614_v22  ;;  %v1628_v63 = vsel %vm1605_vm6, %v1495_v49, %v1627_v30  ;;  %v6650_v37 = vmov 0   ;;  %v1701_v59 = vperm.slane %v7742_v33, 2 }
 0x2aa   : > { %v1629_v5 = vsel %vm11705_vm7, %v1498_v0, %v1628_v63  ;;  %v1670_v12 = vsel %vm1666_vm8, %v1615_v17, -inf  ;;  %5744 = vset.pattern.permute.xlu1 %v6650_v37  ;;  %v1827_v1 = vsub.f32 %v11916_v38, %v1699_v50  ;;  %5746 = vset.pattern.permute.xlu0 %v6650_v37  ;;  %v1700_v53 = vperm.slane %v7742_v33, 1 }
 0x2ab   : > { %1671 = vmax.xlane.f32.xlu0 %v1670_v12  ;;  %v1676_v52 = vsel %vm1666_vm8, %v1629_v5, -inf  ;;  %5745 = vset.pattern.permute.xlu2 %v6650_v37  ;;  %v1831_v34 = vsub.f32 %v7063_v32, %v1701_v59  ;;  %v1702_v57 = vperm.slane %v7742_v33, 3  ;;  %v1703_v62 = vperm.slane %v7742_v33, 4  ;;  %v11921_v5 = vld [vmem:[#allocation24_spill] sm:$0xff] }
 0x2ac   : > { %1677 = vmax.xlane.f32.xlu2 %v1676_v52  ;;  %v1955_v55 = vmul.f32 1.442695, %v1827_v1  ;;  %v1829_v24 = vsub.f32 %v11917_v10, %v1700_v53  ;;  %v1828_v49 = vsub.f32 %v11918_v45, %v1699_v50  ;;  %v1705_v17 = vperm.slane %v7742_v33, 6 }
 0x2ad   : > { %v1963_v2 = vmul.f32 1.442695, %v1831_v34  ;;  %v1833_v0 = vsub.f32 %v7109_v43, %v1702_v57  ;;  %v1836_v32 = vsub.f32 %v7157_v23, %v1703_v62  ;;  %v1830_v50 = vsub.f32 %v11921_v5, %v1700_v53 }
 0x2ae   : > { %6003 = vpow2.f32 %v1955_v55  ;;  %v1959_v58 = vmul.f32 1.442695, %v1829_v24  ;;  %v1957_v36 = vmul.f32 1.442695, %v1828_v49  ;;  %v1835_v43 = vsub.f32 %v7141_v48, %v1703_v62 }
 0x2af   : > { %6005 = vpow2.f32 %v1963_v2  ;;  %v1967_v22 = vmul.f32 1.442695, %v1833_v0  ;;  %v1973_v30 = vmul.f32 1.442695, %v1836_v32  ;;  %v1839_v23 = vsub.f32 %v11865_v35, %v1705_v17 }
 0x2b0   : > { %6007 = vpow2.f32 %v1959_v58  ;;  %v1961_v37 = vmul.f32 1.442695, %v1830_v50  ;;  %v1971_v38 = vmul.f32 1.442695, %v1835_v43  ;;  %v1704_v1 = vperm.slane %v7742_v33, 5  ;;  %v11933_v43 = vld [vmem:[#allocation12_spill] sm:$0xff] }
 0x2b1   : > { %6009 = vpow2.f32 %v1957_v36  ;;  %v1706_v53 = vperm.slane %v7742_v33, 7  ;;  %v1979_v55 = vmul.f32 1.442695, %v1839_v23  ;;  %v1832_v48 = vsub.f32 %v7089_v7, %v1701_v59 }
 0x2b2   : > { %6011 = vpow2.f32 %v1967_v22  ;;  %v1838_v35 = vsub.f32 %v11856_v19, %v1704_v1  ;;  %v1715_v45 = vperm.slane %v7635_v40, 0  ;;  %v1834_v49 = vsub.f32 %v7131_v26, %v1702_v57 }
 0x2b3   : > { %6013 = vpow2.f32 %v1973_v30  ;;  %v1842_v24 = vsub.f32 %v11864_v13, %v1706_v53  ;;  %v1965_v2 = vmul.f32 1.442695, %v1832_v48  ;;  %v1841_v19 = vsub.f32 %v11868_v54, %v1706_v53  ;;  %v11929_v13 = vld [vmem:[#allocation20_spill] sm:$0xff] }
 0x2b4   : > { %v7758_v16 = vpop.eup %6003  ;;  %6015 = vpow2.f32 %v1961_v37  ;;  %v1977_v62 = vmul.f32 1.442695, %v1838_v35  ;;  %v1860_v32 = vsub.f32 %v11929_v13, %v1715_v45  ;;  %v1969_v36 = vmul.f32 1.442695, %v1834_v49 }
 0x2b5   : > { %11919 = vst [vmem:[#allocation11_spill] sm:$0xff] %v7758_v16  ;;  %2340 = vperm.xlu1 %5744, %v7758_v16   ;;  %v7764_v63 = vpop.eup %6005  ;;  %6017 = vpow2.f32 %v1971_v38  ;;  %v1985_v7 = vmul.f32 1.442695, %v1842_v24  ;;  %v1983_v30 = vmul.f32 1.442695, %v1841_v19  ;;  %v1717_v5 = vperm.slane %v7635_v40, 2 }
 0x2b6   : > { %11920 = vst [vmem:[#allocation19_spill] sm:$0xff] %v7764_v63  ;;  %v7767_v12 = vpop.eup %6007  ;;  %6019 = vpow2.f32 %v1979_v55  ;;  %v2021_v50 = vmul.f32 1.442695, %v1860_v32  ;;  %v1837_v54 = vsub.f32 %v11858_v8, %v1704_v1  ;;  %v1859_v23 = vsub.f32 %v11933_v43, %v1715_v45  ;;  %v11993_v16 = vld [vmem:[#allocation97_spill] sm:$0xff] }
 0x2b7   : > { %11922 = vst [vmem:[#allocation17_spill] sm:$0xff] %v7767_v12  ;;  %v7775_v52 = vpop.eup %6009  ;;  %6021 = vpow2.f32 %v1965_v2  ;;  %v1863_v37 = vsub.f32 %v7081_v56, %v1717_v5  ;;  %v1716_v55 = vperm.slane %v7635_v40, 1  ;;  %v1718_v8 = vperm.slane %v7635_v40, 3  ;;  %v11937_v2 = vld [vmem:[#allocation21_spill] sm:$0xff] }
 0x2b8   : > { %11923 = vst [vmem:[#allocation24_spill] sm:$0xff] %v7775_v52  ;;  %v7780_v34 = vpop.eup %6011  ;;  %6023 = vpow2.f32 %v1977_v62  ;;  %v1975_v38 = vmul.f32 1.442695, %v1837_v54  ;;  %v2019_v48 = vmul.f32 1.442695, %v1859_v23  ;;  %v1840_v24 = vsub.f32 %v11860_v11, %v1705_v17  ;;  %v11940_v17 = vld [vmem:[#allocation22_spill] sm:$0xff] }
 0x2b9   : > { %11924 = vst [vmem:[#allocation106_spill] sm:$0xff] %v7780_v34  ;;  %v7783_v10 = vpop.eup %6013  ;;  %6025 = vpow2.f32 %v1985_v7  ;;  %v2027_v1 = vmul.f32 1.442695, %v1863_v37  ;;  %v1862_v62 = vsub.f32 %v11937_v2, %v1716_v55  ;;  %v1866_v45 = vsub.f32 %v7133_v27, %v1718_v8 }
 0x2ba   : > { %11925 = vst [vmem:[#allocation107_spill] sm:$0xff] %v7783_v10  ;;  %v7789_v58 = vpop.eup %6015  ;;  %6027 = vpow2.f32 %v1969_v36  ;;  %v1981_v7 = vmul.f32 1.442695, %v1840_v24  ;;  %v1720_v33 = vperm.slane %v7635_v40, 5  ;;  %v1861_v32 = vsub.f32 %v11940_v17, %v1716_v55 }
 0x2bb   : > { %11926 = vst [vmem:[#allocation108_spill] sm:$0xff] %v7789_v58  ;;  %v7793_v59 = vpop.eup %6017  ;;  %6029 = vpow2.f32 %v1983_v30  ;;  %v2025_v19 = vmul.f32 1.442695, %v1862_v62  ;;  %v2033_v13 = vmul.f32 1.442695, %v1866_v45  ;;  %v1865_v30 = vsub.f32 %v7117_v61, %v1718_v8 }
 0x2bc   : > { %11927 = vst [vmem:[#allocation109_spill] sm:$0xff] %v7793_v59  ;;  %v7796_v0 = vpop.eup %6019  ;;  %6031 = vpow2.f32 %v2021_v50  ;;  %v1869_v27 = vsub.f32 %v7181_v31, %v1720_v33  ;;  %v2023_v50 = vmul.f32 1.442695, %v1861_v32  ;;  %v1719_v43 = vperm.slane %v7635_v40, 4 }
 0x2bd   : > { %2352 = vperm.xlu1 %5744, %v7764_v63   ;;  %11928 = vst [vmem:[#allocation110_spill] sm:$0xff] %v7796_v0  ;;  %v7802_v22 = vpop.eup %6021  ;;  %6033 = vpow2.f32 %v1975_v38  ;;  %v2031_v23 = vmul.f32 1.442695, %v1865_v30  ;;  %v1721_v37 = vperm.slane %v7635_v40, 6  ;;  %v1864_v55 = vsub.f32 %v7107_v42, %v1717_v5  ;;  %v11992_v63 = vld [vmem:[#allocation83_spill] sm:$0xff] }
 0x2be   : > { %11930 = vst [vmem:[#allocation20_spill] sm:$0xff] %v7802_v22  ;;  %v7806_v26 = vpop.eup %6023  ;;  %6035 = vpow2.f32 %v2019_v48  ;;  %v2039_v38 = vmul.f32 1.442695, %v1869_v27  ;;  %v1868_v31 = vsub.f32 %v7165_v47, %v1719_v43  ;;  %v1867_v5 = vsub.f32 %v7155_v21, %v1719_v43  ;;  %v11953_v43 = vld [vmem:[#allocation54_spill] sm:$0xff] }
 0x2bf   : > { %2346 = vperm.xlu0 %5746, %v7767_v12   ;;  %11931 = vst [vmem:[#allocation111_spill] sm:$0xff] %v7806_v26  ;;  %v7809_v57 = vpop.eup %6025  ;;  %6037 = vpow2.f32 %v2027_v1  ;;  %v1872_v8 = vsub.f32 %v7229_v60, %v1721_v37  ;;  %v2029_v1 = vmul.f32 1.442695, %v1864_v55  ;;  %v1871_v60 = vsub.f32 %v7213_v41, %v1721_v37  ;;  %v11951_v41 = vld [vmem:[#allocation56_spill] sm:$0xff]  ;;  %v11956_v55 = vld [vmem:[#allocation13_spill] sm:$0xff] }
 0x2c0   : > { %11932 = vst [vmem:[#allocation112_spill] sm:$0xff] %v7809_v57  ;;  %v7815_v53 = vpop.eup %6027  ;;  %6039 = vpow2.f32 %v1981_v7  ;;  %v2037_v2 = vmul.f32 1.442695, %v1868_v31  ;;  %v2035_v45 = vmul.f32 1.442695, %v1867_v5  ;;  %v1870_v17 = vsub.f32 %v7203_v3, %v1720_v33 }
 0x2c1   : > { %11934 = vst [vmem:[#allocation12_spill] sm:$0xff] %v7815_v53  ;;  %v7820_v35 = vpop.eup %6029  ;;  %6041 = vpow2.f32 %v2025_v19  ;;  %v2045_v62 = vmul.f32 1.442695, %v1872_v8  ;;  %v1722_v19 = vperm.slane %v7635_v40, 7  ;;  %v11549_v37 = vperm.slane %v7643_v51, 0  ;;  %v7895_v8 = vpop.xlane.xlu2 %1686 }
 0x2c2   : > { %11935 = vst [vmem:[#allocation113_spill] sm:$0xff] %v7820_v35  ;;  %v7825_v56 = vpop.eup %6031  ;;  %6043 = vpow2.f32 %v2033_v13  ;;  %v2043_v13 = vmul.f32 1.442695, %v1871_v60  ;;  %v2041_v27 = vmul.f32 1.442695, %v1870_v17  ;;  %v11959_v60 = vld [vmem:[#allocation27_spill] sm:$0xff]  ;;  %v1535_v12 = vperm.slane %v11992_v63, %v7273_v29 }
 0x2c3   : > { %11936 = vst [vmem:[#allocation114_spill] sm:$0xff] %v7825_v56  ;;  %v7831_v49 = vpop.eup %6033  ;;  %6045 = vpow2.f32 %v2023_v50  ;;  %v1874_v30 = vsub.f32 %v11951_v41, %v1722_v19  ;;  %v1891_v31 = vsub.f32 %v11956_v55, %v11549_v37  ;;  %v11961_v41 = vld [vmem:[#allocation45_spill] sm:$0xff] }
 0x2c4   : > { %2343 = vperm.xlu2 %5745, %v7775_v52   ;;  %11938 = vst [vmem:[#allocation21_spill] sm:$0xff] %v7831_v49  ;;  %v7835_v11 = vpop.eup %6035  ;;  %6047 = vpow2.f32 %v2031_v23  ;;  %v1873_v23 = vsub.f32 %v11953_v43, %v1722_v19  ;;  %v11960_v19 = vld [vmem:[#allocation67_spill] sm:$0xff]  ;;  %v11963_v43 = vld [vmem:[#allocation65_spill] sm:$0xff]  ;;  %v11995_v52 = vld [vmem:[#allocation46_spill] sm:$0xff] }
 0x2c5   : > { %2358 = vperm.xlu1 %5744, %v7780_v34   ;;  %11939 = vst [vmem:[#allocation115_spill] sm:$0xff] %v7835_v11  ;;  %v7838_v36 = vpop.eup %6037  ;;  %6049 = vpow2.f32 %v2039_v38  ;;  %v2049_v40 = vmul.f32 1.442695, %v1874_v30  ;;  %v1575_v30 = vperm.slane %v11961_v41, %v7276_v46  ;;  %v11991_v34 = vld [vmem:[#allocation92_spill] sm:$0xff] }
 0x2c6   : > { %11941 = vst [vmem:[#allocation22_spill] sm:$0xff] %v7838_v36  ;;  %v7844_v54 = vpop.eup %6039  ;;  %6051 = vpow2.f32 %v2029_v1  ;;  %v2047_v33 = vmul.f32 1.442695, %v1873_v23  ;;  %v1571_v23 = vperm.slane %v11963_v43, %v7273_v29 }
 0x2c7   : > { %2367 = vperm.xlu0 %5746, %v7783_v10   ;;  %11942 = vst [vmem:[#allocation116_spill] sm:$0xff] %v7844_v54  ;;  %v7849_v61 = vpop.eup %6041  ;;  %6053 = vpow2.f32 %v2037_v2  ;;  %v11550_v2 = vperm.slane %v7643_v51, 1 }
 0x2c8   : > { %11943 = vst [vmem:[#allocation117_spill] sm:$0xff] %v7849_v61  ;;  %v7852_v48 = vpop.eup %6043  ;;  %6055 = vpow2.f32 %v2045_v62  ;;  %v2083_v62 = vmul.f32 1.442695, %v1891_v31  ;;  %v11964_v31 = vld [vmem:[#allocation72_spill] sm:$0xff] }
 0x2c9   : > { %11944 = vst [vmem:[#allocation118_spill] sm:$0xff] %v7852_v48  ;;  %v7858_v24 = vpop.eup %6045  ;;  %6057 = vpow2.f32 %v2035_v45  ;;  %v1894_v45 = vsub.f32 %v11959_v60, %v11550_v2  ;;  %v7909_v17 = vpop.xlane.xlu2 %1205  ;;  %v11965_v60 = vld [vmem:[#allocation73_spill] sm:$0xff]  ;;  %v11966_v2 = vld [vmem:[#allocation82_spill] sm:$0xff] }
 0x2ca   : > { %11945 = vst [vmem:[#allocation119_spill] sm:$0xff] %v7858_v24  ;;  %v7861_v42 = vpop.eup %6047  ;;  %6059 = vpow2.f32 %v2043_v13  ;;  %v1572_v13 = vperm.slane %v11960_v19, %v7276_v46  ;;  %v1577_v37 = vperm.slane %v11965_v60, %v7273_v29 }
 0x2cb   : > { %11946 = vst [vmem:[#allocation120_spill] sm:$0xff] %v7861_v42  ;;  %v7864_v47 = vpop.eup %6049  ;;  %6061 = vpow2.f32 %v2041_v27  ;;  %v11962_v27 = vld [vmem:[#allocation77_spill] sm:$0xff]  ;;  %v2089_v55 = vmul.f32 1.442695, %v1894_v45 }
 0x2cc   : > { %2349 = vperm.xlu2 %5745, %v7789_v58   ;;  %11947 = vst [vmem:[#allocation121_spill] sm:$0xff] %v7864_v47  ;;  %v7869_v7 = vpop.eup %6051  ;;  %6063 = vpow2.f32 %v2049_v40  ;;  %v1578_v40 = vperm.slane %v11962_v27, %v7276_v46  ;;  %v1539_v58 = vperm.slane %v11991_v34, %v7276_v46 }
 0x2cd   : > { %2364 = vperm.xlu1 %5744, %v7793_v59   ;;  %11948 = vst [vmem:[#allocation122_spill] sm:$0xff] %v7869_v7  ;;  %v7873_v21 = vpop.eup %6053  ;;  %6065 = vpow2.f32 %v2047_v33 }
 0x2ce   : > { %11949 = vst [vmem:[#allocation123_spill] sm:$0xff] %v7873_v21  ;;  %v7876_v32 = vpop.eup %6055  ;;  %6067 = vpow2.f32 %v2083_v62  ;;  %v1574_v62 = vperm.slane %v11964_v31, %v7273_v29  ;;  %v1579_v33 = vsel %vm1404_vm0, %v1578_v40, %v1577_v37  ;;  %v11975_v40 = vld [vmem:[#allocation94_spill] sm:$0xff] }
 0x2cf   : > { %2376 = vperm.xlu0 %5746, %v7796_v0   ;;  %11950 = vst [vmem:[#allocation124_spill] sm:$0xff] %v7876_v32  ;;  %v7881_v50 = vpop.eup %6057  ;;  %6069 = vpow2.f32 %v2089_v55  ;;  %v11574_v55 = vperm.slane %v7643_v51, 4 }
 0x2d0   : > { %11952 = vst [vmem:[#allocation56_spill] sm:$0xff] %v7881_v50  ;;  %v7885_v3 = vpop.eup %6059  ;;  %v1576_v45 = vsel %vm1404_vm0, %v1575_v30, %v1574_v62  ;;  %v1586_v62 = vperm.slane %v11975_v40, %v7273_v29 }
 0x2d1   : > { %11954 = vst [vmem:[#allocation54_spill] sm:$0xff] %v7885_v3  ;;  %v7889_v38 = vpop.eup %6061 }
 0x2d2   : > { %11955 = vst [vmem:[#allocation125_spill] sm:$0xff] %v7889_v38  ;;  %v7897_v1 = vpop.eup %6063 }
 0x2d3   : > { %11957 = vst [vmem:[#allocation13_spill] sm:$0xff] %v7897_v1  ;;  %v7901_v5 = vpop.eup %6065 }
 0x2d4   : > { %2355 = vperm.xlu2 %5745, %v7802_v22   ;;  %11958 = vst [vmem:[#allocation126_spill] sm:$0xff] %v7901_v5 }
 0x2d5   : > { %2373 = vperm.xlu1 %5744, %v7806_v26   ;;  %v11977_v26 = vld [vmem:[#allocation96_spill] sm:$0xff] }
 0x2d7   : > { %2385 = vperm.xlu0 %5746, %v7809_v57  }
 0x2dc   : > { %2361 = vperm.xlu2 %5745, %v7815_v53   ;;  %v11990_v53 = vld [vmem:[#allocation87_spill] sm:$0xff] }
 0x2dd   : > { %2382 = vperm.xlu1 %5744, %v7820_v35   ;;  %v1536_v22 = vperm.slane %v11990_v53, %v7276_v46 }
 0x2df   : > { %2439 = vperm.xlu0 %5746, %v7825_v56   ;;  %v11976_v56 = vld [vmem:[#allocation102_spill] sm:$0xff] }
 0x2e0   : > { %v1592_v35 = vperm.slane %v11976_v56, %v7273_v29  ;;  %v1537_v56 = vsel %vm1404_vm0, %v1536_v22, %v1535_v12 }
 0x2e4   : > { %2370 = vperm.xlu2 %5745, %v7831_v49  }
 0x2e5   : > { %2436 = vperm.xlu1 %5744, %v7835_v11   ;;  %v11973_v11 = vperm.slane %v7643_v51, 3 }
 0x2e7   : > { %2448 = vperm.xlu0 %5746, %v7838_v36  }
 0x2ec   : > { %2379 = vperm.xlu2 %5745, %v7844_v54   ;;  %v1589_v54 = vperm.slane %v11977_v26, %v7273_v29 }
 0x2ed   : > { %2445 = vperm.xlu1 %5744, %v7849_v61  }
 0x2ef   : > { %2457 = vperm.xlu0 %5746, %v7852_v48   ;;  %v11970_v48 = vld [vmem:[#allocation93_spill] sm:$0xff] }
 0x2f0   : > { %v1587_v61 = vperm.slane %v11970_v48, %v7276_v46 }
 0x2f4   : > { %2442 = vperm.xlu2 %5745, %v7858_v24  }
 0x2f5   : > { %2454 = vperm.xlu1 %5744, %v7861_v42  }
 0x2f7   : > { %2466 = vperm.xlu0 %5746, %v7864_v47   ;;  %v7929_v47 = vpop.xlane.xlu1 %1269 }
 0x2fc   : > { %2451 = vperm.xlu2 %5745, %v7869_v7   ;;  %v11974_v7 = vld [vmem:[#allocation31_spill] sm:$0xff] }
 0x2fd   : > { %2463 = vperm.xlu1 %5744, %v7873_v21   ;;  %v11968_v21 = vld [vmem:[#allocation88_spill] sm:$0xff]  ;;  %v1897_v30 = vsub.f32 %v11974_v7, %v11973_v11  ;;  %v1588_v7 = vsel %vm1404_vm0, %v1587_v61, %v1586_v62  ;;  %v11979_v61 = vld [vmem:[#allocation37_spill] sm:$0xff] }
 0x2ff   : > { %2475 = vperm.xlu0 %5746, %v7876_v32   ;;  %v1573_v32 = vsel %vm1404_vm0, %v1572_v13, %v1571_v23  ;;  %v11972_v23 = vld [vmem:[#allocation103_spill] sm:$0xff]  ;;  %v2095_v0 = vmul.f32 1.442695, %v1897_v30 }
 0x300   : > { %v1590_v36 = vperm.slane %v11972_v23, %v7276_v46  ;;  %v1651_v24 = vsel %vm1595_vm1, %v1576_v45, %v1573_v32  ;;  %v1545_v23 = vperm.slane %v7909_v17, %v7276_v46 }
 0x301   : > { %6071 = vpow2.f32 %v2095_v0 }
 0x302   : > { %v1591_v59 = vsel %vm1404_vm0, %v1590_v36, %v1589_v54  ;;  %v11980_v36 = vld [vmem:[#allocation66_spill] sm:$0xff] }
 0x304   : > { %2460 = vperm.xlu2 %5745, %v7881_v50   ;;  %v11971_v50 = vld [vmem:[#allocation84_spill] sm:$0xff] }
 0x305   : > { %2472 = vperm.xlu1 %5744, %v7885_v3   ;;  %v7924_v3 = vpop.eup %6067  ;;  %v1583_v13 = vperm.slane %v11971_v50, %v7273_v29 }
 0x306   : > { %11967 = vst [vmem:[#allocation27_spill] sm:$0xff] %v7924_v3  ;;  %v7965_v45 = vpop.eup %6069 }
 0x307   : > { %11978 = vst [vmem:[#allocation67_spill] sm:$0xff] %v7965_v45  ;;  %v7994_v10 = vpop.eup %6071 }
 0x308   : > { %11989 = vst [vmem:[#allocation77_spill] sm:$0xff] %v7994_v10 }
 0x30c   : > { %2469 = vperm.xlu2 %5745, %v7889_v38   ;;  %v11969_v38 = vld [vmem:[#allocation80_spill] sm:$0xff] }
 0x30d   : > { %2481 = vperm.xlu1 %5744, %v7897_v1   ;;  %v1581_v1 = vperm.slane %v11966_v2, %v7276_v46  ;;  %v1580_v42 = vperm.slane %v11969_v38, %v7273_v29 }
 0x30f   : > { %v1582_v37 = vsel %vm1404_vm0, %v1581_v1, %v1580_v42  ;;  %v1652_v42 = vsel %vm1597_vm2, %v1579_v33, %v1651_v24  ;;  %v1900_v33 = vsub.f32 %v11979_v61, %v11574_v55  ;;  %v11987_v61 = vld [vmem:[#allocation50_spill] sm:$0xff] }
 0x310   : > { %v1653_v1 = vsel %vm1599_vm3, %v1582_v37, %v1652_v42  ;;  %v11983_v37 = vld [vmem:[#allocation76_spill] sm:$0xff]  ;;  %v1529_v55 = vperm.slane %v11987_v61, %v7273_v29 }
 0x311   : > { %v1530_v62 = vperm.slane %v11983_v37, %v7276_v46 }
 0x314   : > { %2478 = vperm.xlu2 %5745, %v7901_v5   ;;  %v1584_v5 = vperm.slane %v11968_v21, %v7276_v46 }
 0x316   : > { %v1585_v57 = vsel %vm1404_vm0, %v1584_v5, %v1583_v13 }
 0x317   : > { %v1654_v5 = vsel %vm1601_vm4, %v1585_v57, %v1653_v1  ;;  %v11982_v57 = vld [vmem:[#allocation41_spill] sm:$0xff] }
 0x318   : > { %v1655_v13 = vsel %vm1603_vm5, %v1588_v7, %v1654_v5  ;;  %v11985_v1 = vld [vmem:[#allocation61_spill] sm:$0xff]  ;;  %v2101_v5 = vmul.f32 1.442695, %v1900_v33  ;;  %v1531_v33 = vsel %vm1404_vm0, %v1530_v62, %v1529_v55 }
 0x319   : > { %v1656_v24 = vsel %vm1605_vm6, %v1591_v59, %v1655_v13  ;;  %v11984_v59 = vld [vmem:[#allocation81_spill] sm:$0xff]  ;;  %v11986_v13 = vld [vmem:[#allocation71_spill] sm:$0xff] }
 0x31a   : > { %v1533_v42 = vperm.slane %v11984_v59, %v7276_v46  ;;  %6073 = vpow2.f32 %v2101_v5  ;;  %v11996_v55 = vld [vmem:[#allocation89_spill] sm:$0xff] }
 0x31c   : > { %2532 = vperm.xlu2 %5745, %v7924_v3   ;;  %v1593_v3 = vperm.slane %v7929_v47, %v7276_v46 }
 0x31e   : > { %v1594_v32 = vsel %vm1404_vm0, %v1593_v3, %v1592_v35  ;;  %v1524_v35 = vperm.slane %v11980_v36, %v7276_v46  ;;  %v1527_v3 = vperm.slane %v11982_v57, %v7276_v46 }
 0x31f   : > { %v7956_v11 = vpop.xlane.xlu2 %1677  ;;  %v1657_v30 = vsel %vm11705_vm7, %v1594_v32, %v1656_v24  ;;  %v1523_v32 = vperm.slane %v11985_v1, %v7273_v29  ;;  %v1526_v24 = vperm.slane %v11986_v13, %v7273_v29 }
 0x320   : > { %v1688_v7 = vsel %vm1666_vm8, %v1657_v30, -inf }
 0x321   : > { %v1525_v30 = vsel %vm1404_vm0, %v1524_v35, %v1523_v32  ;;  %v1528_v0 = vsel %vm1404_vm0, %v1527_v3, %v1526_v24  ;;  %v1542_v35 = vperm.slane %v11993_v16, %v7276_v46  ;;  %v11994_v32 = vperm.slane %v7643_v51, 6  ;;  %v11999_v24 = vld [vmem:[#allocation23_spill] sm:$0xff] }
 0x322   : > { %v1538_v3 = vperm.slane %v11996_v55, %v7273_v29  ;;  %v1637_v40 = vsel %vm1595_vm1, %v1528_v0, %v1525_v30  ;;  %v1733_v0 = vperm.slane %v7643_v51, 2 }
 0x323   : > { %v1638_v2 = vsel %vm1597_vm2, %v1531_v33, %v1637_v40 }
 0x324   : > { %2541 = vperm.xlu2 %5745, %v7965_v45   ;;  %v11988_v45 = vld [vmem:[#allocation78_spill] sm:$0xff]  ;;  %v1540_v48 = vsel %vm1404_vm0, %v1539_v58, %v1538_v3 }
 0x325   : > { %v1532_v49 = vperm.slane %v11988_v45, %v7273_v29 }
 0x327   : > { %v7976_v54 = vpop.permute.xlu2 %2343 }
 0x328   : > { %11981 = vst [vmem:[#allocation45_spill] sm:$0xff] %v7976_v54  ;;  %v1903_v54 = vsub.f32 %v11995_v52, %v11994_v32  ;;  %v12000_v52 = vld [vmem:[#allocation98_spill] sm:$0xff] }
 0x329   : > { %1689 = vmax.xlane.f32.xlu0 %v1688_v7  ;;  %v1534_v7 = vsel %vm1404_vm0, %v1533_v42, %v1532_v49  ;;  %v11997_v49 = vld [vmem:[#allocation104_spill] sm:$0xff]  ;;  %v11998_v42 = vperm.slane %v7643_v51, 1  ;;  %v1541_v5 = vperm.slane %v12000_v52, %v7273_v29 }
 0x32a   : > { %v1544_v62 = vperm.slane %v11997_v49, %v7273_v29  ;;  %v1639_v60 = vsel %vm1599_vm3, %v1534_v7, %v1638_v2  ;;  %v8035_v29 = vpop.eup %6073  ;;  %v12003_v2 = vld [vmem:[#allocation57_spill] sm:$0xff] }
 0x32b   : > { %v1543_v46 = vsel %vm1404_vm0, %v1542_v35, %v1541_v5  ;;  %v1640_v22 = vsel %vm1601_vm4, %v1537_v56, %v1639_v60  ;;  %12002 = vst [vmem:[#allocation72_spill] sm:$0xff] %v8035_v29  ;;  %v12004_v7 = vld [vmem:[#allocation29_spill] sm:$0xff] }
 0x32c   : > { %2550 = vperm.xlu2 %5745, %v7994_v10   ;;  %v1893_v10 = vsub.f32 %v11999_v24, %v11998_v42  ;;  %v1738_v42 = vperm.slane %v7643_v51, 7  ;;  %v2107_v24 = vmul.f32 1.442695, %v1903_v54  ;;  %v1546_v12 = vsel %vm1404_vm0, %v1545_v23, %v1544_v62  ;;  %v12008_v62 = vld [vmem:[#allocation16_spill] sm:$0xff] }
 0x32d   : > { %v1641_v40 = vsel %vm1603_vm5, %v1540_v48, %v1640_v22  ;;  %v1896_v35 = vsub.f32 %v12004_v7, %v1733_v0  ;;  %v1747_v23 = vperm.slane %v7895_v8, 0 }
 0x32e   : > { %v2087_v30 = vmul.f32 1.442695, %v1893_v10  ;;  %v1642_v58 = vsel %vm1605_vm6, %v1543_v46, %v1641_v40  ;;  %v1906_v33 = vsub.f32 %v12003_v2, %v1738_v42  ;;  %6075 = vpow2.f32 %v2107_v24  ;;  %v8059_v40 = vpop.permute.xlu1 %2340 }
 0x32f   : > { %v8025_v32 = vpop.permute.xlu2 %2349  ;;  %v1643_v54 = vsel %vm11705_vm7, %v1546_v12, %v1642_v58  ;;  %v2093_v48 = vmul.f32 1.442695, %v1896_v35  ;;  %v1924_v5 = vsub.f32 %v12008_v62, %v1747_v23  ;;  %v12009_v24 = vperm.slane %v7643_v51, 4  ;;  %12012 = vst [vmem:[#allocation96_spill] sm:$0xff] %v8059_v40 }
 0x330   : > { %12001 = vst [vmem:[#allocation65_spill] sm:$0xff] %v8025_v32  ;;  %6077 = vpow2.f32 %v2087_v30  ;;  %v1682_v56 = vsel %vm1666_vm8, %v1643_v54, -inf  ;;  %v2113_v60 = vmul.f32 1.442695, %v1906_v33  ;;  %v12010_v30 = vld [vmem:[#allocation35_spill] sm:$0xff]  ;;  %v11595_v58 = vperm.slane %v7895_v8, 2 }
 0x331   : > { %v1899_v12 = vsub.f32 %v12010_v30, %v12009_v24  ;;  %v2149_v2 = vmul.f32 1.442695, %v1924_v5  ;;  %v1736_v33 = vperm.slane %v7643_v51, 5  ;;  %v12014_v35 = vperm.slane %v7643_v51, 0  ;;  %v12018_v5 = vld [vmem:[#allocation43_spill] sm:$0xff] }
 0x332   : > { %6079 = vpow2.f32 %v2113_v60 }
 0x333   : > { %6081 = vpow2.f32 %v2093_v48  ;;  %v2099_v54 = vmul.f32 1.442695, %v1899_v12  ;;  %v12017_v48 = vld [vmem:[#allocation28_spill] sm:$0xff]  ;;  %v1902_v30 = vsub.f32 %v12018_v5, %v1736_v33 }
 0x334   : > { %2559 = vperm.xlu2 %5745, %v8035_v29   ;;  %v8047_v46 = vpop.eup %6075  ;;  %v1927_v24 = vsub.f32 %v12017_v48, %v11595_v58  ;;  %6083 = vpow2.f32 %v2149_v2  ;;  %v12022_v48 = vld [vmem:[#allocation26_spill] sm:$0xff] }
 0x335   : > { %12006 = vst [vmem:[#allocation80_spill] sm:$0xff] %v8047_v46  ;;  %6085 = vpow2.f32 %v2099_v54  ;;  %v1895_v58 = vsub.f32 %v12022_v48, %v1733_v0  ;;  %v12024_v54 = vld [vmem:[#allocation34_spill] sm:$0xff] }
 0x336   : > { %v8049_v3 = vpop.eup %6077 }
 0x337   : > { %v8043_v10 = vpop.permute.xlu2 %2355  ;;  %1683 = vmax.xlane.f32.xlu1 %v1682_v56  ;;  %12007 = vst [vmem:[#allocation84_spill] sm:$0xff] %v8049_v3  ;;  %v12015_v56 = vld [vmem:[#allocation15_spill] sm:$0xff] }
 0x338   : > { %12005 = vst [vmem:[#allocation88_spill] sm:$0xff] %v8043_v10  ;;  %v8063_v7 = vpop.eup %6079  ;;  %v1892_v60 = vsub.f32 %v12015_v56, %v12014_v35  ;;  %v11598_v35 = vperm.slane %v7895_v8, 3  ;;  %v2155_v56 = vmul.f32 1.442695, %v1927_v24  ;;  %v12025_v24 = vld [vmem:[#allocation52_spill] sm:$0xff] }
 0x339   : > { %12013 = vst [vmem:[#allocation37_spill] sm:$0xff] %v8063_v7  ;;  %v8068_v62 = vpop.eup %6081  ;;  %v1905_v5 = vsub.f32 %v12025_v24, %v1738_v42  ;;  %v12034_v24 = vld [vmem:[#allocation42_spill] sm:$0xff] }
 0x33a   : > { %12016 = vst [vmem:[#allocation66_spill] sm:$0xff] %v8068_v62  ;;  %v2085_v12 = vmul.f32 1.442695, %v1892_v60  ;;  %v8083_v40 = vpop.eup %6083  ;;  %v1930_v60 = vsub.f32 %v12024_v54, %v11598_v35  ;;  %v12031_v35 = vld [vmem:[#allocation33_spill] sm:$0xff] }
 0x33b   : > { %12021 = vst [vmem:[#allocation81_spill] sm:$0xff] %v8083_v40  ;;  %v8086_v2 = vpop.eup %6085 }
 0x33c   : > { %2568 = vperm.xlu2 %5745, %v8047_v46   ;;  %v8076_v46 = vpop.xlane.xlu0 %1671  ;;  %6087 = vpow2.f32 %v2085_v12  ;;  %12023 = vst [vmem:[#allocation61_spill] sm:$0xff] %v8086_v2  ;;  %v11602_v12 = vperm.slane %v7895_v8, 5  ;;  %v2161_v48 = vmul.f32 1.442695, %v1930_v60 }
 0x33d   : > { %2538 = vperm.xlu0 %5746, %v8049_v3   ;;  %v2105_v3 = vmul.f32 1.442695, %v1902_v30  ;;  %6089 = vpow2.f32 %v2155_v56  ;;  %v2091_v30 = vmul.f32 1.442695, %v1895_v58  ;;  %v12030_v56 = vperm.slane %v7643_v51, 3 }
 0x33e   : > { %v1933_v60 = vsub.f32 %v12034_v24, %v11602_v12 }
 0x33f   : > { %v8057_v22 = vpop.permute.xlu2 %2361  ;;  %6091 = vpow2.f32 %v2105_v3  ;;  %v1898_v42 = vsub.f32 %v12031_v35, %v12030_v56 }
 0x340   : > { %12011 = vst [vmem:[#allocation31_spill] sm:$0xff] %v8057_v22  ;;  %6093 = vpow2.f32 %v2091_v30  ;;  %v11606_v30 = vperm.slane %v7895_v8, 6  ;;  %v2167_v56 = vmul.f32 1.442695, %v1933_v60 }
 0x341   : > { %6095 = vpow2.f32 %v2161_v48  ;;  %v12039_v48 = vld [vmem:[#allocation39_spill] sm:$0xff] }
 0x342   : > { %v8098_v0 = vpop.eup %6087 }
 0x343   : > { %12028 = vst [vmem:[#allocation78_spill] sm:$0xff] %v8098_v0  ;;  %v8102_v54 = vpop.eup %6089 }
 0x344   : > { %2577 = vperm.xlu2 %5745, %v8063_v7   ;;  %v8081_v7 = vpop.permute.xlu1 %2352  ;;  %12029 = vst [vmem:[#allocation87_spill] sm:$0xff] %v8102_v54 }
 0x345   : > { %2547 = vperm.xlu0 %5746, %v8068_v62   ;;  %12020 = vst [vmem:[#allocation76_spill] sm:$0xff] %v8081_v7  ;;  %v8094_v62 = vpop.permute.xlu0 %2346  ;;  %v8107_v3 = vpop.eup %6091 }
 0x346   : > { %12026 = vst [vmem:[#allocation71_spill] sm:$0xff] %v8094_v62  ;;  %v8119_v35 = vpop.eup %6093 }
 0x347   : > { %v8078_v29 = vpop.permute.xlu2 %2370  ;;  %12032 = vst [vmem:[#allocation92_spill] sm:$0xff] %v8107_v3  ;;  %v8126_v24 = vpop.eup %6095 }
 0x348   : > { %12019 = vst [vmem:[#allocation41_spill] sm:$0xff] %v8078_v29 }
 0x349   : > { %12036 = vst [vmem:[#allocation97_spill] sm:$0xff] %v8119_v35 }
 0x34a   : > { %12038 = vst [vmem:[#allocation89_spill] sm:$0xff] %v8126_v24 }
 0x34c   : > { %2631 = vperm.xlu2 %5745, %v8083_v40   ;;  %v2111_v40 = vmul.f32 1.442695, %v1905_v5  ;;  %v8109_v58 = vpop.permute.xlu1 %2358  ;;  %v12035_v5 = vld [vmem:[#allocation14_spill] sm:$0xff] }
 0x34d   : > { %2556 = vperm.xlu0 %5746, %v8086_v2   ;;  %12033 = vst [vmem:[#allocation83_spill] sm:$0xff] %v8109_v58  ;;  %v1923_v2 = vsub.f32 %v12035_v5, %v1747_v23  ;;  %v8122_v58 = vpop.permute.xlu0 %2367  ;;  %v1901_v23 = vsub.f32 %v12039_v48, %v1736_v33  ;;  %v12042_v5 = vld [vmem:[#allocation25_spill] sm:$0xff]  ;;  %v11610_v48 = vperm.slane %v8076_v46, 0 }
 0x34e   : > { %6097 = vpow2.f32 %v2111_v40  ;;  %12037 = vst [vmem:[#allocation46_spill] sm:$0xff] %v8122_v58 }
 0x34f   : > { %v8096_v29 = vpop.permute.xlu2 %2379  ;;  %v2147_v7 = vmul.f32 1.442695, %v1923_v2 }
 0x350   : > { %12027 = vst [vmem:[#allocation50_spill] sm:$0xff] %v8096_v29  ;;  %2535 = vperm.xlu1 %5744, %v8098_v0   ;;  %v2097_v0 = vmul.f32 1.442695, %v1898_v42  ;;  %v12041_v42 = vld [vmem:[#allocation51_spill] sm:$0xff] }
 0x351   : > { %v1936_v60 = vsub.f32 %v12041_v42, %v11606_v30  ;;  %v12047_v30 = vld [vmem:[#allocation48_spill] sm:$0xff] }
 0x352   : > { %6099 = vpow2.f32 %v2097_v0 }
 0x353   : > { %6101 = vpow2.f32 %v2167_v56  ;;  %v2173_v0 = vmul.f32 1.442695, %v1936_v60  ;;  %v12046_v56 = vperm.slane %v7643_v51, 6 }
 0x354   : > { %2640 = vperm.xlu2 %5745, %v8102_v54   ;;  %v1748_v54 = vperm.slane %v7895_v8, 1  ;;  %v8129_v40 = vpop.eup %6097  ;;  %v8137_v12 = vpop.permute.xlu1 %2364  ;;  %6103 = vpow2.f32 %v2147_v7 }
 0x355   : > { %2565 = vperm.xlu0 %5746, %v8107_v3   ;;  %12040 = vst [vmem:[#allocation104_spill] sm:$0xff] %v8129_v40  ;;  %v2103_v3 = vmul.f32 1.442695, %v1901_v23  ;;  %v12050_v23 = vld [vmem:[#allocation62_spill] sm:$0xff] }
 0x356   : > { %v1926_v2 = vsub.f32 %v12042_v5, %v1748_v54  ;;  %12043 = vst [vmem:[#allocation23_spill] sm:$0xff] %v8137_v12  ;;  %v1904_v5 = vsub.f32 %v12047_v30, %v12046_v56  ;;  %v1843_v60 = vsub.f32 %v12050_v23, %v11610_v48  ;;  %v1751_v23 = vperm.slane %v7895_v8, 4 }
 0x357   : > { %v8117_v29 = vpop.permute.xlu2 %2442  ;;  %6105 = vpow2.f32 %v2103_v3 }
 0x358   : > { %2544 = vperm.xlu1 %5744, %v8119_v35   ;;  %v8141_v33 = vpop.eup %6099  ;;  %6107 = vpow2.f32 %v2173_v0  ;;  %v2109_v30 = vmul.f32 1.442695, %v1904_v5  ;;  %v1987_v12 = vmul.f32 1.442695, %v1843_v60  ;;  %v12058_v5 = vld [vmem:[#allocation40_spill] sm:$0xff]  ;;  %v12060_v60 = vld [vmem:[#allocation38_spill] sm:$0xff] }
 0x359   : > { %12044 = vst [vmem:[#allocation98_spill] sm:$0xff] %v8141_v33  ;;  %v8145_v42 = vpop.eup %6101 }
 0x35a   : > { %12045 = vst [vmem:[#allocation57_spill] sm:$0xff] %v8145_v42  ;;  %v8152_v7 = vpop.eup %6103 }
 0x35b   : > { %12049 = vst [vmem:[#allocation16_spill] sm:$0xff] %v8152_v7 }
 0x35c   : > { %2649 = vperm.xlu2 %5745, %v8126_v24   ;;  %v2153_v24 = vmul.f32 1.442695, %v1926_v2  ;;  %v12051_v2 = vperm.slane %v7895_v8, 3  ;;  %v8164_v3 = vpop.permute.xlu1 %2373 }
 0x35d   : > { %2574 = vperm.xlu0 %5746, %v8129_v40   ;;  %v8150_v40 = vpop.permute.xlu0 %2376  ;;  %12053 = vst [vmem:[#allocation35_spill] sm:$0xff] %v8164_v3 }
 0x35e   : > { %12048 = vst [vmem:[#allocation29_spill] sm:$0xff] %v8150_v40  ;;  %6109 = vpow2.f32 %v2153_v24  ;;  %v8166_v40 = vpop.eup %6105 }
 0x35f   : > { %v8139_v35 = vpop.permute.xlu2 %2451  ;;  %12054 = vst [vmem:[#allocation15_spill] sm:$0xff] %v8166_v40  ;;  %v8171_v0 = vpop.eup %6107  ;;  %6111 = vpow2.f32 %v2109_v30 }
 0x360   : > { %2553 = vperm.xlu1 %5744, %v8141_v33   ;;  %v12052_v33 = vld [vmem:[#allocation32_spill] sm:$0xff]  ;;  %12055 = vst [vmem:[#allocation28_spill] sm:$0xff] %v8171_v0  ;;  %6113 = vpow2.f32 %v1987_v12  ;;  %v12064_v12 = vperm.slane %v7895_v8, 2 }
 0x361   : > { %v1929_v51 = vsub.f32 %v12052_v33, %v12051_v2 }
 0x363   : > { %v2159_v48 = vmul.f32 1.442695, %v1929_v51  ;;  %v1932_v51 = vsub.f32 %v12060_v60, %v1751_v23 }
 0x364   : > { %2658 = vperm.xlu2 %5745, %v8145_v42   ;;  %v11614_v42 = vperm.slane %v8076_v46, 1  ;;  %v8174_v24 = vpop.eup %6109  ;;  %v8189_v22 = vpop.permute.xlu1 %2382 }
 0x365   : > { %2628 = vperm.xlu0 %5746, %v8152_v7   ;;  %v12056_v7 = vld [vmem:[#allocation18_spill] sm:$0xff]  ;;  %12057 = vst [vmem:[#allocation43_spill] sm:$0xff] %v8174_v24  ;;  %v8180_v3 = vpop.permute.xlu0 %2385  ;;  %6115 = vpow2.f32 %v2159_v48 }
 0x366   : > { %v1925_v33 = vsub.f32 %v12056_v7, %v1748_v54  ;;  %v1846_v2 = vsub.f32 %v12058_v5, %v11614_v42  ;;  %12059 = vst [vmem:[#allocation26_spill] sm:$0xff] %v8180_v3  ;;  %v8186_v54 = vpop.eup %6111  ;;  %v11618_v7 = vperm.slane %v8076_v46, 3  ;;  %v12065_v42 = vld [vmem:[#allocation30_spill] sm:$0xff] }
 0x367   : > { %v8162_v56 = vpop.permute.xlu2 %2460  ;;  %12061 = vst [vmem:[#allocation34_spill] sm:$0xff] %v8186_v54  ;;  %v8192_v5 = vpop.eup %6113  ;;  %v1928_v60 = vsub.f32 %v12065_v42, %v12064_v12  ;;  %v11622_v12 = vperm.slane %v8076_v46, 4 }
 0x368   : > { %2562 = vperm.xlu1 %5744, %v8166_v40   ;;  %v2151_v40 = vmul.f32 1.442695, %v1925_v33  ;;  %v1993_v30 = vmul.f32 1.442695, %v1846_v2  ;;  %12062 = vst [vmem:[#allocation52_spill] sm:$0xff] %v8189_v22  ;;  %v1849_v33 = vsub.f32 %v7573_v18, %v11618_v7  ;;  %v12067_v2 = vperm.slane %v7895_v8, 6 }
 0x369   : > { %12063 = vst [vmem:[#allocation33_spill] sm:$0xff] %v8192_v5  ;;  %v1754_v18 = vperm.slane %v7895_v8, 7 }
 0x36a   : > { %6117 = vpow2.f32 %v2151_v40 }
 0x36b   : > { %v8197_v48 = vpop.eup %6115  ;;  %6119 = vpow2.f32 %v1993_v30 }
 0x36c   : > { %2667 = vperm.xlu2 %5745, %v8171_v0   ;;  %v2165_v0 = vmul.f32 1.442695, %v1932_v51  ;;  %12066 = vst [vmem:[#allocation42_spill] sm:$0xff] %v8197_v48  ;;  %v12068_v51 = vld [vmem:[#allocation47_spill] sm:$0xff] }
 0x36d   : > { %2637 = vperm.xlu0 %5746, %v8174_v24   ;;  %v1935_v24 = vsub.f32 %v12068_v51, %v12067_v2  ;;  %v8207_v22 = vpop.permute.xlu0 %2439 }
 0x36e   : > { %6121 = vpow2.f32 %v2165_v0 }
 0x36f   : > { %v8184_v58 = vpop.permute.xlu2 %2469  ;;  %v2171_v7 = vmul.f32 1.442695, %v1935_v24  ;;  %v12073_v24 = vld [vmem:[#allocation58_spill] sm:$0xff] }
 0x370   : > { %2571 = vperm.xlu1 %5744, %v8186_v54   ;;  %v2157_v54 = vmul.f32 1.442695, %v1928_v60  ;;  %v8211_v42 = vpop.eup %6117  ;;  %v8221_v60 = vpop.permute.xlu1 %2436  ;;  %v1938_v51 = vsub.f32 %v12073_v24, %v1754_v18 }
 0x371   : > { %12069 = vst [vmem:[#allocation14_spill] sm:$0xff] %v8211_v42  ;;  %v8216_v30 = vpop.eup %6119 }
 0x372   : > { %12070 = vst [vmem:[#allocation39_spill] sm:$0xff] %v8216_v30  ;;  %6123 = vpow2.f32 %v2157_v54  ;;  %v11626_v54 = vperm.slane %v8076_v46, 6 }
 0x374   : > { %2388 = vperm.xlu2 %5745, %v8192_v5   ;;  %v1999_v5 = vmul.f32 1.442695, %v1849_v33  ;;  %v8219_v0 = vpop.eup %6121  ;;  %v1852_v33 = vsub.f32 %v7595_v9, %v11622_v12  ;;  %v12077_v12 = vld [vmem:[#allocation44_spill] sm:$0xff] }
 0x375   : > { %2646 = vperm.xlu0 %5746, %v8197_v48   ;;  %v12071_v48 = vld [vmem:[#allocation36_spill] sm:$0xff]  ;;  %12072 = vst [vmem:[#allocation51_spill] sm:$0xff] %v8219_v0  ;;  %v8234_v10 = vpop.permute.xlu0 %2448 }
 0x376   : > { %v1931_v2 = vsub.f32 %v12071_v48, %v1751_v23  ;;  %6125 = vpow2.f32 %v1999_v5  ;;  %v2005_v48 = vmul.f32 1.442695, %v1852_v33  ;;  %v12076_v5 = vperm.slane %v7895_v8, 5 }
 0x377   : > { %v8209_v40 = vpop.permute.xlu2 %2478  ;;  %6127 = vpow2.f32 %v2171_v7  ;;  %v12079_v33 = vperm.slane %v8076_v46, 1 }
 0x378   : > { %2634 = vperm.xlu1 %5744, %v8211_v42   ;;  %v2163_v42 = vmul.f32 1.442695, %v1931_v2  ;;  %v8231_v23 = vpop.eup %6123  ;;  %v1934_v24 = vsub.f32 %v12077_v12, %v12076_v5  ;;  %v1855_v2 = vsub.f32 %v7617_v25, %v11626_v54  ;;  %v11630_v5 = vperm.slane %v8076_v46, 7 }
 0x379   : > { %12074 = vst [vmem:[#allocation25_spill] sm:$0xff] %v8231_v23  ;;  %v1709_v25 = vperm.slane %v8076_v46, 2 }
 0x37a   : > { %6129 = vpow2.f32 %v2163_v42  ;;  %v2169_v8 = vmul.f32 1.442695, %v1934_v24  ;;  %v1858_v24 = vsub.f32 %v7690_v6, %v11630_v5  ;;  %v12091_v5 = vld [vmem:[#allocation64_spill] sm:$0xff] }
 0x37b   : > { %6131 = vpow2.f32 %v2005_v48 }
 0x37c   : > { %2397 = vperm.xlu2 %5745, %v8216_v30   ;;  %v2177_v30 = vmul.f32 1.442695, %v1938_v51  ;;  %v8237_v9 = vpop.eup %6125  ;;  %v12080_v51 = vld [vmem:[#allocation69_spill] sm:$0xff] }
 0x37d   : > { %2655 = vperm.xlu0 %5746, %v8219_v0   ;;  %12075 = vst [vmem:[#allocation48_spill] sm:$0xff] %v8237_v9  ;;  %v8242_v7 = vpop.eup %6127  ;;  %v1845_v0 = vsub.f32 %v12080_v51, %v12079_v33  ;;  %v8264_v51 = vpop.permute.xlu0 %2457 }
 0x37e   : > { %12078 = vst [vmem:[#allocation62_spill] sm:$0xff] %v8242_v7  ;;  %6133 = vpow2.f32 %v2177_v30 }
 0x37f   : > { %v8229_v3 = vpop.permute.xlu2 %2532  ;;  %v1991_v54 = vmul.f32 1.442695, %v1845_v0  ;;  %6135 = vpow2.f32 %v2169_v8  ;;  %v12086_v0 = vld [vmem:[#allocation74_spill] sm:$0xff]  ;;  %v2017_v8 = vmul.f32 1.442695, %v1858_v24 }
 0x380   : > { %2643 = vperm.xlu1 %5744, %v8231_v23   ;;  %v8252_v23 = vpop.permute.xlu1 %2445  ;;  %v8256_v12 = vpop.eup %6129 }
 0x381   : > { %12082 = vst [vmem:[#allocation18_spill] sm:$0xff] %v8256_v12  ;;  %v8261_v48 = vpop.eup %6131 }
 0x382   : > { %12083 = vst [vmem:[#allocation40_spill] sm:$0xff] %v8261_v48 }
 0x384   : > { %2406 = vperm.xlu2 %5745, %v8237_v9   ;;  %v2011_v9 = vmul.f32 1.442695, %v1855_v2  ;;  %v8266_v30 = vpop.eup %6133  ;;  %v1848_v2 = vsub.f32 %v12086_v0, %v1709_v25 }
 0x385   : > { %2664 = vperm.xlu0 %5746, %v8242_v7   ;;  %v12084_v7 = vld [vmem:[#allocation53_spill] sm:$0xff]  ;;  %12085 = vst [vmem:[#allocation38_spill] sm:$0xff] %v8266_v30 }
 0x386   : > { %v1937_v33 = vsub.f32 %v12084_v7, %v1754_v18  ;;  %6137 = vpow2.f32 %v2011_v9  ;;  %v8278_v7 = vpop.eup %6135  ;;  %v1997_v32 = vmul.f32 1.442695, %v1848_v2  ;;  %v12090_v9 = vperm.slane %v8076_v46, 0 }
 0x387   : > { %v8254_v42 = vpop.permute.xlu2 %2541  ;;  %6139 = vpow2.f32 %v1991_v54  ;;  %12088 = vst [vmem:[#allocation47_spill] sm:$0xff] %v8278_v7  ;;  %v12094_v2 = vperm.slane %v8076_v46, 4 }
 0x388   : > { %12081 = vst [vmem:[#allocation32_spill] sm:$0xff] %v8254_v42  ;;  %2652 = vperm.xlu1 %5744, %v8256_v12   ;;  %v2175_v12 = vmul.f32 1.442695, %v1937_v33  ;;  %v8276_v18 = vpop.permute.xlu1 %2454  ;;  %v1844_v0 = vsub.f32 %v12091_v5, %v12090_v9  ;;  %v12093_v33 = vld [vmem:[#allocation68_spill] sm:$0xff] }
 0x38a   : > { %6141 = vpow2.f32 %v2175_v12  ;;  %v1989_v5 = vmul.f32 1.442695, %v1844_v0 }
 0x38b   : > { %6143 = vpow2.f32 %v2017_v8 }
 0x38c   : > { %2415 = vperm.xlu2 %5745, %v8261_v48   ;;  %v11634_v48 = vperm.slane %v7956_v11, 0  ;;  %v8282_v6 = vpop.eup %6137  ;;  %6145 = vpow2.f32 %v1997_v32 }
 0x38d   : > { %2673 = vperm.xlu0 %5746, %v8266_v30   ;;  %12089 = vst [vmem:[#allocation36_spill] sm:$0xff] %v8282_v6  ;;  %v8287_v54 = vpop.eup %6139  ;;  %v8293_v30 = vpop.permute.xlu0 %2466  ;;  %6147 = vpow2.f32 %v1989_v5 }
 0x38e   : > { %12092 = vst [vmem:[#allocation58_spill] sm:$0xff] %v8287_v54  ;;  %v1876_v24 = vsub.f32 %v12093_v33, %v11634_v48  ;;  %v1712_v33 = vperm.slane %v8076_v46, 5 }
 0x38f   : > { %v8274_v62 = vpop.permute.xlu2 %2550 }
 0x390   : > { %12087 = vst [vmem:[#allocation30_spill] sm:$0xff] %v8274_v62  ;;  %2661 = vperm.xlu1 %5744, %v8278_v7   ;;  %v1851_v7 = vsub.f32 %v7585_v39, %v12094_v2  ;;  %v8301_v9 = vpop.eup %6141  ;;  %v2053_v62 = vmul.f32 1.442695, %v1876_v24  ;;  %v8305_v42 = vpop.permute.xlu1 %2463 }
 0x391   : > { %12096 = vst [vmem:[#allocation69_spill] sm:$0xff] %v8301_v9  ;;  %v8308_v8 = vpop.eup %6143 }
 0x392   : > { %v2003_v48 = vmul.f32 1.442695, %v1851_v7  ;;  %12097 = vst [vmem:[#allocation53_spill] sm:$0xff] %v8308_v8  ;;  %v8311_v32 = vpop.eup %6145  ;;  %6149 = vpow2.f32 %v2053_v62  ;;  %v1854_v7 = vsub.f32 %v7607_v4, %v1712_v33  ;;  %v12103_v62 = vperm.slane %v8076_v46, 3 }
 0x393   : > { %12099 = vst [vmem:[#allocation74_spill] sm:$0xff] %v8311_v32 }
 0x394   : > { %2424 = vperm.xlu2 %5745, %v8282_v6   ;;  %v11638_v6 = vperm.slane %v7956_v11, 2  ;;  %6151 = vpow2.f32 %v2003_v48  ;;  %v1850_v4 = vsub.f32 %v7581_v28, %v12103_v62 }
 0x395   : > { %2394 = vperm.xlu0 %5746, %v8287_v54   ;;  %v12098_v54 = vld [vmem:[#allocation55_spill] sm:$0xff]  ;;  %v8319_v2 = vpop.permute.xlu0 %2475 }
 0x396   : > { %v1847_v39 = vsub.f32 %v12098_v54, %v1709_v25  ;;  %v1879_v0 = vsub.f32 %v7555_v14, %v11638_v6  ;;  %v8323_v25 = vpop.eup %6147  ;;  %v11642_v54 = vperm.slane %v7956_v11, 3  ;;  %v12107_v6 = vld [vmem:[#allocation100_spill] sm:$0xff]  ;;  %v2001_v28 = vmul.f32 1.442695, %v1850_v4 }
 0x397   : > { %v8299_v12 = vpop.permute.xlu2 %2559  ;;  %12101 = vst [vmem:[#allocation68_spill] sm:$0xff] %v8323_v25 }
 0x398   : > { %12095 = vst [vmem:[#allocation44_spill] sm:$0xff] %v8299_v12  ;;  %2670 = vperm.xlu1 %5744, %v8301_v9   ;;  %v1995_v24 = vmul.f32 1.442695, %v1847_v39  ;;  %v2059_v5 = vmul.f32 1.442695, %v1879_v0  ;;  %v8327_v14 = vpop.eup %6149  ;;  %v8334_v39 = vpop.permute.xlu1 %2472  ;;  %v1882_v0 = vsub.f32 %v7583_v44, %v11642_v54 }
 0x399   : > { %12102 = vst [vmem:[#allocation55_spill] sm:$0xff] %v8327_v14 }
 0x39a   : > { %6153 = vpow2.f32 %v1995_v24  ;;  %v8332_v48 = vpop.eup %6151  ;;  %12105 = vst [vmem:[#allocation128_spill] sm:$0xff] %v8334_v39 }
 0x39b   : > { %12104 = vst [vmem:[#allocation127_spill] sm:$0xff] %v8332_v48  ;;  %6155 = vpow2.f32 %v2059_v5  ;;  %v12111_v5 = vld [vmem:[#allocation91_spill] sm:$0xff] }
 0x39c   : > { %2433 = vperm.xlu2 %5745, %v8308_v8   ;;  %v2009_v8 = vmul.f32 1.442695, %v1854_v7  ;;  %v12106_v7 = vperm.slane %v8076_v46, 7  ;;  %v1853_v54 = vsub.f32 %v12111_v5, %v1712_v33 }
 0x39d   : > { %2403 = vperm.xlu0 %5746, %v8311_v32   ;;  %v8344_v24 = vpop.xlane.xlu0 %1689 }
 0x39e   : > { %6157 = vpow2.f32 %v2009_v8  ;;  %v12113_v8 = vld [vmem:[#allocation90_spill] sm:$0xff]  ;;  %v2007_v33 = vmul.f32 1.442695, %v1853_v54 }
 0x39f   : > { %v8321_v9 = vpop.permute.xlu2 %2568  ;;  %6159 = vpow2.f32 %v2001_v28 }
 0x3a0   : > { %12100 = vst [vmem:[#allocation64_spill] sm:$0xff] %v8321_v9  ;;  %2391 = vperm.xlu1 %5744, %v8323_v25   ;;  %v1857_v25 = vsub.f32 %v12107_v6, %v12106_v7  ;;  %v8348_v32 = vpop.eup %6153  ;;  %v2065_v9 = vmul.f32 1.442695, %v1882_v0  ;;  %v12115_v0 = vld [vmem:[#allocation63_spill] sm:$0xff] }
 0x3a1   : > { %12109 = vst [vmem:[#allocation129_spill] sm:$0xff] %v8348_v32  ;;  %v8352_v44 = vpop.eup %6155 }
 0x3a2   : > { %v2015_v12 = vmul.f32 1.442695, %v1857_v25  ;;  %12110 = vst [vmem:[#allocation130_spill] sm:$0xff] %v8352_v44  ;;  %6161 = vpow2.f32 %v2065_v9  ;;  %v12114_v25 = vperm.slane %v7956_v11, 0 }
 0x3a4   : > { %2487 = vperm.xlu2 %5745, %v8327_v14   ;;  %v11646_v14 = vperm.slane %v7956_v11, 5  ;;  %v8355_v6 = vpop.eup %6157  ;;  %v1875_v7 = vsub.f32 %v12115_v0, %v12114_v25  ;;  %6163 = vpow2.f32 %v2015_v12  ;;  %v12120_v25 = vperm.slane %v8076_v46, 6  ;;  %v12121_v12 = vld [vmem:[#allocation101_spill] sm:$0xff] }
 0x3a5   : > { %2412 = vperm.xlu0 %5746, %v8332_v48   ;;  %12112 = vst [vmem:[#allocation91_spill] sm:$0xff] %v8355_v6  ;;  %v11650_v48 = vperm.slane %v7956_v11, 6  ;;  %6165 = vpow2.f32 %v2007_v33 }
 0x3a6   : > { %v1885_v4 = vsub.f32 %v12113_v8, %v11646_v14  ;;  %v1724_v14 = vperm.slane %v7956_v11, 1  ;;  %v2051_v9 = vmul.f32 1.442695, %v1875_v7  ;;  %v1856_v54 = vsub.f32 %v12121_v12, %v12120_v25  ;;  %v12124_v7 = vld [vmem:[#allocation49_spill] sm:$0xff] }
 0x3a7   : > { %v8346_v62 = vpop.permute.xlu2 %2577 }
 0x3a8   : > { %12108 = vst [vmem:[#allocation100_spill] sm:$0xff] %v8346_v62  ;;  %2400 = vperm.xlu1 %5744, %v8348_v32   ;;  %v8365_v32 = vpop.permute.xlu1 %2481  ;;  %v2071_v8 = vmul.f32 1.442695, %v1885_v4  ;;  %v2013_v46 = vmul.f32 1.442695, %v1856_v54  ;;  %v12131_v54 = vld [vmem:[#allocation79_spill] sm:$0xff] }
 0x3a9   : > { %12116 = vst [vmem:[#allocation90_spill] sm:$0xff] %v8365_v32 }
 0x3aa   : > { %6167 = vpow2.f32 %v2071_v8  ;;  %v12128_v8 = vld [vmem:[#allocation70_spill] sm:$0xff] }
 0x3ab   : > { %6169 = vpow2.f32 %v2051_v9 }
 0x3ac   : > { %2496 = vperm.xlu2 %5745, %v8352_v44   ;;  %v8371_v44 = vpop.eup %6159  ;;  %6171 = vpow2.f32 %v2013_v46 }
 0x3ad   : > { %2421 = vperm.xlu0 %5746, %v8355_v6   ;;  %12118 = vst [vmem:[#allocation131_spill] sm:$0xff] %v8371_v44  ;;  %v8376_v6 = vpop.eup %6161 }
 0x3ae   : > { %12119 = vst [vmem:[#allocation132_spill] sm:$0xff] %v8376_v6  ;;  %v8381_v0 = vpop.eup %6163 }
 0x3af   : > { %v8367_v28 = vpop.permute.xlu0 %2538  ;;  %v8369_v5 = vpop.permute.xlu2 %2631  ;;  %12122 = vst [vmem:[#allocation101_spill] sm:$0xff] %v8381_v0 }
 0x3b0   : > { %12117 = vst [vmem:[#allocation63_spill] sm:$0xff] %v8369_v5  ;;  %2409 = vperm.xlu1 %5744, %v8371_v44   ;;  %v12123_v5 = vld [vmem:[#allocation99_spill] sm:$0xff]  ;;  %v1878_v44 = vsub.f32 %v12124_v7, %v1724_v14  ;;  %v8389_v62 = vpop.xlane.xlu1 %1683  ;;  %v8393_v33 = vpop.eup %6165  ;;  %v1877_v7 = vsub.f32 %v12128_v8, %v1724_v14 }
 0x3b1   : > { %v1888_v4 = vsub.f32 %v12123_v5, %v11650_v48  ;;  %12125 = vst [vmem:[#allocation99_spill] sm:$0xff] %v8393_v33  ;;  %v11654_v12 = vperm.slane %v8389_v62, 1  ;;  %v8399_v5 = vpop.eup %6167  ;;  %v11658_v46 = vperm.slane %v8389_v62, 2 }
 0x3b2   : > { %v2057_v39 = vmul.f32 1.442695, %v1878_v44  ;;  %12127 = vst [vmem:[#allocation133_spill] sm:$0xff] %v8399_v5  ;;  %v8402_v48 = vpop.eup %6169  ;;  %v12130_v44 = vperm.slane %v7956_v11, 3 }
 0x3b3   : > { %v2077_v25 = vmul.f32 1.442695, %v1888_v4  ;;  %12129 = vst [vmem:[#allocation70_spill] sm:$0xff] %v8402_v48  ;;  %v1909_v9 = vsub.f32 %v11986_v13, %v11654_v12  ;;  %v8414_v14 = vpop.eup %6171  ;;  %v12136_v12 = vld [vmem:[#allocation75_spill] sm:$0xff] }
 0x3b4   : > { %2505 = vperm.xlu2 %5745, %v8376_v6   ;;  %v1881_v4 = vsub.f32 %v12131_v54, %v12130_v44  ;;  %12133 = vst [vmem:[#allocation134_spill] sm:$0xff] %v8414_v14 }
 0x3b5   : > { %2430 = vperm.xlu0 %5746, %v8381_v0   ;;  %6173 = vpow2.f32 %v2077_v25  ;;  %v2119_v8 = vmul.f32 1.442695, %v1909_v9  ;;  %v12135_v25 = vperm.slane %v7956_v11, 2  ;;  %v1912_v9 = vsub.f32 %v11983_v37, %v11658_v46  ;;  %v12142_v37 = vld [vmem:[#allocation85_spill] sm:$0xff] }
 0x3b6   : > { %6175 = vpow2.f32 %v2057_v39 }
 0x3b7   : > { %v8391_v32 = vpop.permute.xlu0 %2547  ;;  %v8396_v6 = vpop.permute.xlu2 %2640  ;;  %v1880_v44 = vsub.f32 %v12136_v12, %v12135_v25 }
 0x3b8   : > { %12126 = vst [vmem:[#allocation49_spill] sm:$0xff] %v8396_v6  ;;  %2418 = vperm.xlu1 %5744, %v8393_v33   ;;  %v2055_v33 = vmul.f32 1.442695, %v1877_v7  ;;  %v2063_v6 = vmul.f32 1.442695, %v1881_v4  ;;  %v12139_v4 = vld [vmem:[#allocation86_spill] sm:$0xff] }
 0x3b9   : > { %v2061_v12 = vmul.f32 1.442695, %v1880_v44 }
 0x3ba   : > { %6177 = vpow2.f32 %v2055_v33 }
 0x3bb   : > { %v8419_v13 = vpop.eup %6173  ;;  %6179 = vpow2.f32 %v2119_v8 }
 0x3bc   : > { %2514 = vperm.xlu2 %5745, %v8399_v5   ;;  %v1727_v5 = vperm.slane %v7956_v11, 4  ;;  %12134 = vst [vmem:[#allocation135_spill] sm:$0xff] %v8419_v13  ;;  %v8426_v7 = vpop.eup %6175  ;;  %6181 = vpow2.f32 %v2063_v6 }
 0x3bd   : > { %2484 = vperm.xlu0 %5746, %v8402_v48   ;;  %12138 = vst [vmem:[#allocation136_spill] sm:$0xff] %v8426_v7  ;;  %6183 = vpow2.f32 %v2061_v12 }
 0x3be   : > { %v1884_v48 = vsub.f32 %v12139_v4, %v1727_v5  ;;  %v1883_v46 = vsub.f32 %v12142_v37, %v1727_v5 }
 0x3bf   : > { %v8412_v0 = vpop.permute.xlu0 %2556  ;;  %v8424_v39 = vpop.permute.xlu2 %2649 }
 0x3c0   : > { %12132 = vst [vmem:[#allocation79_spill] sm:$0xff] %v8412_v0  ;;  %2427 = vperm.xlu1 %5744, %v8414_v14   ;;  %v8438_v25 = vpop.eup %6177  ;;  %v11661_v14 = vperm.slane %v8389_v62, 4  ;;  %v2069_v0 = vmul.f32 1.442695, %v1884_v48  ;;  %v12145_v48 = vperm.slane %v7956_v11, 6 }
 0x3c1   : > { %12137 = vst [vmem:[#allocation75_spill] sm:$0xff] %v8424_v39  ;;  %v2125_v39 = vmul.f32 1.442695, %v1912_v9  ;;  %v2067_v9 = vmul.f32 1.442695, %v1883_v46 }
 0x3c2   : > { %v8428_v54 = vpop.permute.xlu1 %2535  ;;  %12140 = vst [vmem:[#allocation86_spill] sm:$0xff] %v8438_v25  ;;  %v1915_v6 = vsub.f32 %v11992_v63, %v11661_v14  ;;  %v1887_v5 = vsub.f32 %v7619_v20, %v12145_v48  ;;  %v1730_v63 = vperm.slane %v7956_v11, 7  ;;  %v12152_v48 = vld [vmem:[#allocation105_spill] sm:$0xff] }
 0x3c3   : > { %6185 = vpow2.f32 %v2125_v39  ;;  %v12149_v39 = vperm.slane %v7956_v11, 5 }
 0x3c4   : > { %2523 = vperm.xlu2 %5745, %v8419_v13   ;;  %v8442_v13 = vpop.eup %6179  ;;  %6187 = vpow2.f32 %v2069_v0  ;;  %v2075_v14 = vmul.f32 1.442695, %v1887_v5  ;;  %v1890_v5 = vsub.f32 %v12152_v48, %v1730_v63 }
 0x3c5   : > { %2493 = vperm.xlu0 %5746, %v8426_v7   ;;  %12141 = vst [vmem:[#allocation137_spill] sm:$0xff] %v8442_v13  ;;  %v8445_v8 = vpop.eup %6181  ;;  %v12150_v7 = vld [vmem:[#allocation95_spill] sm:$0xff]  ;;  %6189 = vpow2.f32 %v2067_v9 }
 0x3c6   : > { %12143 = vst [vmem:[#allocation85_spill] sm:$0xff] %v8445_v8  ;;  %v8461_v37 = vpop.eup %6183  ;;  %v1886_v20 = vsub.f32 %v12150_v7, %v12149_v39  ;;  %v11669_v39 = vperm.slane %v8389_v62, 7 }
 0x3c7   : > { %v8436_v33 = vpop.permute.xlu0 %2565  ;;  %v8453_v44 = vpop.permute.xlu2 %2658  ;;  %12147 = vst [vmem:[#allocation140_spill] sm:$0xff] %v8461_v37 }
 0x3c8   : > { %2490 = vperm.xlu1 %5744, %v8438_v25   ;;  %12144 = vst [vmem:[#allocation138_spill] sm:$0xff] %v8453_v44  ;;  %v2131_v25 = vmul.f32 1.442695, %v1915_v6  ;;  %v2073_v11 = vmul.f32 1.442695, %v1886_v20 }
 0x3c9   : > { %v2081_v44 = vmul.f32 1.442695, %v1890_v5 }
 0x3ca   : > { %v8447_v4 = vpop.permute.xlu1 %2544  ;;  %6191 = vpow2.f32 %v2131_v25  ;;  %v1889_v25 = vsub.f32 %v7688_v15, %v1730_v63  ;;  %v11673_v63 = vperm.slane %v8344_v24, 0 }
 0x3cb   : > { %6193 = vpow2.f32 %v2075_v14 }
 0x3cc   : > { %2586 = vperm.xlu2 %5745, %v8442_v13   ;;  %v11666_v13 = vperm.slane %v8389_v62, 5  ;;  %6195 = vpow2.f32 %v2073_v11  ;;  %v2079_v5 = vmul.f32 1.442695, %v1889_v25  ;;  %v1939_v25 = vsub.f32 %v11963_v43, %v11673_v63 }
 0x3cd   : > { %2502 = vperm.xlu0 %5746, %v8445_v8   ;;  %v8466_v8 = vpop.eup %6185  ;;  %v11679_v63 = vperm.slane %v8344_v24, 3 }
 0x3ce   : > { %12148 = vst [vmem:[#allocation141_spill] sm:$0xff] %v8466_v8  ;;  %v8471_v0 = vpop.eup %6187  ;;  %v1918_v6 = vsub.f32 %v11991_v34, %v11666_v13 }
 0x3cf   : > { %v8459_v12 = vpop.permute.xlu0 %2574  ;;  %12151 = vst [vmem:[#allocation95_spill] sm:$0xff] %v8471_v0  ;;  %v8485_v9 = vpop.eup %6189 }
 0x3d0   : > { %12146 = vst [vmem:[#allocation139_spill] sm:$0xff] %v8459_v12  ;;  %2499 = vperm.xlu1 %5744, %v8461_v37   ;;  %v8481_v37 = vpop.permute.xlu2 %2667  ;;  %v1739_v12 = vperm.slane %v8389_v62, 0  ;;  %v8490_v34 = vpop.eup %6191 }
 0x3d1   : > { %12153 = vst [vmem:[#allocation105_spill] sm:$0xff] %v8481_v37  ;;  %v8493_v14 = vpop.eup %6193 }
 0x3d2   : > { %v8473_v46 = vpop.permute.xlu1 %2553  ;;  %12154 = vst [vmem:[#allocation142_spill] sm:$0xff] %v8485_v9  ;;  %v1908_v48 = vsub.f32 %v11980_v36, %v1739_v12  ;;  %v8505_v15 = vpop.eup %6195 }
 0x3d3   : > { %12155 = vst [vmem:[#allocation143_spill] sm:$0xff] %v8490_v34 }
 0x3d4   : > { %2595 = vperm.xlu2 %5745, %v8466_v8   ;;  %v2137_v8 = vmul.f32 1.442695, %v1918_v6  ;;  %12156 = vst [vmem:[#allocation144_spill] sm:$0xff] %v8493_v14  ;;  %v1921_v6 = vsub.f32 %v11997_v49, %v11669_v39  ;;  %v11677_v39 = vperm.slane %v8344_v24, 1 }
 0x3d5   : > { %2511 = vperm.xlu0 %5746, %v8471_v0   ;;  %12157 = vst [vmem:[#allocation145_spill] sm:$0xff] %v8505_v15 }
 0x3d6   : > { %6197 = vpow2.f32 %v2137_v8  ;;  %v2143_v11 = vmul.f32 1.442695, %v1921_v6  ;;  %v1907_v8 = vsub.f32 %v11985_v1, %v1739_v12  ;;  %v12160_v6 = vperm.slane %v8389_v62, 2 }
 0x3d7   : > { %v8483_v7 = vpop.permute.xlu0 %2628  ;;  %6199 = vpow2.f32 %v2081_v44 }
 0x3d8   : > { %2508 = vperm.xlu1 %5744, %v8485_v9   ;;  %v8508_v9 = vpop.permute.xlu2 %2388  ;;  %6201 = vpow2.f32 %v2079_v5  ;;  %v2115_v1 = vmul.f32 1.442695, %v1907_v8 }
 0x3d9   : > { %6203 = vpow2.f32 %v2143_v11  ;;  %v12163_v11 = vperm.slane %v8389_v62, 1 }
 0x3da   : > { %v8495_v20 = vpop.permute.xlu1 %2562 }
 0x3dc   : > { %2604 = vperm.xlu2 %5745, %v8490_v34   ;;  %v2117_v34 = vmul.f32 1.442695, %v1908_v48  ;;  %v8511_v49 = vpop.eup %6197  ;;  %v1911_v48 = vsub.f32 %v11987_v61, %v12160_v6  ;;  %v1910_v61 = vsub.f32 %v11982_v57, %v12163_v11 }
 0x3dd   : > { %2520 = vperm.xlu0 %5746, %v8493_v14   ;;  %12158 = vst [vmem:[#allocation146_spill] sm:$0xff] %v8511_v49  ;;  %v8514_v36 = vpop.eup %6199 }
 0x3de   : > { %12159 = vst [vmem:[#allocation147_spill] sm:$0xff] %v8514_v36  ;;  %6205 = vpow2.f32 %v2117_v34  ;;  %v8528_v5 = vpop.eup %6201  ;;  %v2123_v14 = vmul.f32 1.442695, %v1911_v48  ;;  %v2121_v57 = vmul.f32 1.442695, %v1910_v61 }
 0x3df   : > { %v8503_v13 = vpop.permute.xlu0 %2637  ;;  %12161 = vst [vmem:[#allocation148_spill] sm:$0xff] %v8528_v5  ;;  %v8533_v43 = vpop.eup %6203  ;;  %6207 = vpow2.f32 %v2115_v1 }
 0x3e0   : > { %2517 = vperm.xlu1 %5744, %v8505_v15   ;;  %v1742_v15 = vperm.slane %v8389_v62, 3  ;;  %12162 = vst [vmem:[#allocation149_spill] sm:$0xff] %v8533_v43  ;;  %v8538_v34 = vpop.permute.xlu2 %2397 }
 0x3e2   : > { %v8516_v44 = vpop.permute.xlu1 %2571  ;;  %v1914_v48 = vsub.f32 %v11984_v59, %v1742_v15 }
 0x3e4   : > { %2613 = vperm.xlu2 %5745, %v8511_v49   ;;  %v2179_v49 = vmul.f32 1.442695, %v1939_v25  ;;  %v8540_v8 = vpop.eup %6205  ;;  %v1942_v25 = vsub.f32 %v11961_v41, %v11677_v39  ;;  %v1913_v41 = vsub.f32 %v11988_v45, %v1742_v15  ;;  %v11684_v39 = vperm.slane %v8344_v24, 4 }
 0x3e5   : > { %2529 = vperm.xlu0 %5746, %v8514_v36   ;;  %12164 = vst [vmem:[#allocation150_spill] sm:$0xff] %v8540_v8  ;;  %v8552_v1 = vpop.eup %6207  ;;  %v2129_v36 = vmul.f32 1.442695, %v1914_v48 }
 0x3e6   : > { %6209 = vpow2.f32 %v2179_v49  ;;  %12165 = vst [vmem:[#allocation151_spill] sm:$0xff] %v8552_v1  ;;  %v2127_v15 = vmul.f32 1.442695, %v1913_v41 }
 0x3e7   : > { %v8526_v12 = vpop.permute.xlu0 %2646  ;;  %6211 = vpow2.f32 %v2123_v14  ;;  %v1945_v14 = vsub.f32 %v11969_v38, %v11679_v63  ;;  %v1745_v38 = vperm.slane %v8389_v62, 6 }
 0x3e8   : > { %2526 = vperm.xlu1 %5744, %v8528_v5   ;;  %v2185_v5 = vmul.f32 1.442695, %v1942_v25  ;;  %6213 = vpow2.f32 %v2121_v57  ;;  %v8567_v61 = vpop.permute.xlu2 %2406  ;;  %v12168_v25 = vperm.slane %v8389_v62, 5 }
 0x3ea   : > { %v8542_v6 = vpop.permute.xlu1 %2634  ;;  %6215 = vpow2.f32 %v2185_v5  ;;  %v1917_v45 = vsub.f32 %v11996_v55, %v12168_v25  ;;  %v12171_v5 = vperm.slane %v8389_v62, 4  ;;  %v1920_v25 = vsub.f32 %v11993_v16, %v1745_v38 }
 0x3eb   : > { %6217 = vpow2.f32 %v2129_v36 }
 0x3ec   : > { %2622 = vperm.xlu2 %5745, %v8533_v43   ;;  %v8556_v43 = vpop.eup %6209  ;;  %v2135_v63 = vmul.f32 1.442695, %v1917_v45  ;;  %v1916_v55 = vsub.f32 %v11990_v53, %v12171_v5  ;;  %6219 = vpow2.f32 %v2127_v15  ;;  %v11687_v5 = vperm.slane %v8344_v24, 6 }
 0x3ed   : > { %2583 = vperm.xlu0 %5746, %v8540_v8   ;;  %12166 = vst [vmem:[#allocation152_spill] sm:$0xff] %v8556_v43  ;;  %v8559_v49 = vpop.eup %6211 }
 0x3ee   : > { %12167 = vst [vmem:[#allocation153_spill] sm:$0xff] %v8559_v49  ;;  %v8575_v57 = vpop.eup %6213  ;;  %v2133_v45 = vmul.f32 1.442695, %v1916_v55  ;;  %v1951_v55 = vsub.f32 %v11977_v26, %v11687_v5  ;;  %v1757_v26 = vperm.slane %v8344_v24, 2 }
 0x3ef   : > { %v8550_v11 = vpop.permute.xlu0 %2655  ;;  %12169 = vst [vmem:[#allocation154_spill] sm:$0xff] %v8575_v57 }
 0x3f0   : > { %2580 = vperm.xlu1 %5744, %v8552_v1   ;;  %v2141_v1 = vmul.f32 1.442695, %v1920_v25 }
 0x3f2   : > { %v8561_v59 = vpop.permute.xlu1 %2643 }
 0x3f4   : > { %2676 = vperm.xlu2 %5745, %v8556_v43   ;;  %v2191_v43 = vmul.f32 1.442695, %v1945_v14  ;;  %v1948_v14 = vsub.f32 %v11968_v21, %v11684_v39  ;;  %v1762_v39 = vperm.slane %v8344_v24, 7 }
 0x3f5   : > { %2592 = vperm.xlu0 %5746, %v8559_v49   ;;  %v8580_v49 = vpop.eup %6215 }
 0x3f6   : > { %12170 = vst [vmem:[#allocation155_spill] sm:$0xff] %v8580_v49  ;;  %v8585_v36 = vpop.eup %6217  ;;  %6221 = vpow2.f32 %v2191_v43  ;;  %v1919_v43 = vsub.f32 %v12000_v52, %v1745_v38 }
 0x3f7   : > { %v8573_v48 = vpop.permute.xlu0 %2664  ;;  %12172 = vst [vmem:[#allocation156_spill] sm:$0xff] %v8585_v36  ;;  %6223 = vpow2.f32 %v2135_v63  ;;  %v8599_v15 = vpop.eup %6219 }
 0x3f8   : > { %2589 = vperm.xlu1 %5744, %v8575_v57   ;;  %v8595_v57 = vpop.permute.xlu2 %2415  ;;  %12173 = vst [vmem:[#allocation157_spill] sm:$0xff] %v8599_v15  ;;  %6225 = vpow2.f32 %v2133_v45  ;;  %v2139_v52 = vmul.f32 1.442695, %v1919_v43 }
 0x3fa   : > { %v8587_v41 = vpop.permute.xlu1 %2652 }
 0x3fc   : > { %2685 = vperm.xlu2 %5745, %v8580_v49   ;;  %v2197_v49 = vmul.f32 1.442695, %v1948_v14  ;;  %v8603_v21 = vpop.eup %6221  ;;  %v12176_v14 = vperm.slane %v8344_v24, 1 }
 0x3fd   : > { %2601 = vperm.xlu0 %5746, %v8585_v36   ;;  %12174 = vst [vmem:[#allocation158_spill] sm:$0xff] %v8603_v21  ;;  %v8606_v16 = vpop.eup %6223 }
 0x3fe   : > { %12175 = vst [vmem:[#allocation159_spill] sm:$0xff] %v8606_v16  ;;  %6227 = vpow2.f32 %v2197_v49  ;;  %v1941_v25 = vsub.f32 %v11964_v31, %v12176_v14  ;;  %v8620_v45 = vpop.eup %6225  ;;  %v12179_v31 = vperm.slane %v8389_v62, 7 }
 0x3ff   : > { %v8597_v53 = vpop.permute.xlu0 %2673  ;;  %6229 = vpow2.f32 %v2141_v1  ;;  %12177 = vst [vmem:[#allocation160_spill] sm:$0xff] %v8620_v45 }
 0x400   : > { %2598 = vperm.xlu1 %5744, %v8599_v15   ;;  %v8623_v15 = vpop.permute.xlu2 %2424  ;;  %v2183_v5 = vmul.f32 1.442695, %v1941_v25  ;;  %v1922_v1 = vsub.f32 %v7909_v17, %v12179_v31  ;;  %6231 = vpow2.f32 %v2139_v52  ;;  %v1944_v25 = vsub.f32 %v11962_v27, %v1757_v26 }
 0x402   : > { %v8608_v63 = vpop.permute.xlu1 %2661  ;;  %v2189_v52 = vmul.f32 1.442695, %v1944_v25 }
 0x404   : > { %2694 = vperm.xlu2 %5745, %v8603_v21   ;;  %v2203_v21 = vmul.f32 1.442695, %v1951_v55  ;;  %v8627_v49 = vpop.eup %6227  ;;  %v1954_v55 = vsub.f32 %v7929_v47, %v1762_v39 }
 0x405   : > { %2610 = vperm.xlu0 %5746, %v8606_v16   ;;  %12178 = vst [vmem:[#allocation161_spill] sm:$0xff] %v8627_v49  ;;  %v8632_v43 = vpop.eup %6229 }
 0x406   : > { %12180 = vst [vmem:[#allocation162_spill] sm:$0xff] %v8632_v43  ;;  %6233 = vpow2.f32 %v2203_v21  ;;  %v8642_v62 = vpop.eup %6231  ;;  %v2209_v17 = vmul.f32 1.442695, %v1954_v55  ;;  %v12185_v21 = vperm.slane %v8344_v24, 4 }
 0x407   : > { %v8618_v38 = vpop.permute.xlu0 %2394  ;;  %6235 = vpow2.f32 %v2183_v5  ;;  %12181 = vst [vmem:[#allocation163_spill] sm:$0xff] %v8642_v62 }
 0x408   : > { %2607 = vperm.xlu1 %5744, %v8620_v45   ;;  %v2145_v45 = vmul.f32 1.442695, %v1922_v1  ;;  %v1947_v1 = vsub.f32 %v11971_v50, %v12185_v21 }
 0x40a   : > { %v8634_v14 = vpop.permute.xlu1 %2670  ;;  %6237 = vpow2.f32 %v2145_v45  ;;  %v1760_v45 = vperm.slane %v8344_v24, 5 }
 0x40b   : > { %6239 = vpow2.f32 %v2209_v17 }
 0x40c   : > { %2703 = vperm.xlu2 %5745, %v8627_v49   ;;  %v8645_v31 = vpop.eup %6233  ;;  %v12183_v49 = vperm.slane %v8344_v24, 0  ;;  %6241 = vpow2.f32 %v2189_v52  ;;  %v12191_v52 = vld [vmem:[#allocation93_spill] sm:$0xff] }
 0x40d   : > { %2619 = vperm.xlu0 %5746, %v8632_v43   ;;  %12182 = vst [vmem:[#allocation164_spill] sm:$0xff] %v8645_v31  ;;  %v8650_v43 = vpop.permute.xlu2 %2433  ;;  %v8652_v27 = vpop.eup %6235 }
 0x40e   : > { %v1940_v47 = vsub.f32 %v11960_v19, %v12183_v49  ;;  %12184 = vst [vmem:[#allocation165_spill] sm:$0xff] %v8652_v27  ;;  %v2195_v49 = vmul.f32 1.442695, %v1947_v1 }
 0x40f   : > { %v8640_v16 = vpop.permute.xlu0 %2403 }
 0x410   : > { %2616 = vperm.xlu1 %5744, %v8642_v62   ;;  %v2181_v55 = vmul.f32 1.442695, %v1940_v47  ;;  %v8663_v19 = vpop.eup %6237  ;;  %v1950_v47 = vsub.f32 %v12191_v52, %v1760_v45 }
 0x411   : > { %12186 = vst [vmem:[#allocation166_spill] sm:$0xff] %v8663_v19  ;;  %v8667_v62 = vpop.eup %6239 }
 0x412   : > { %v8654_v5 = vpop.permute.xlu1 %2391  ;;  %12187 = vst [vmem:[#allocation167_spill] sm:$0xff] %v8667_v62  ;;  %6243 = vpow2.f32 %v2181_v55  ;;  %v8670_v17 = vpop.eup %6241  ;;  %v12194_v55 = vld [vmem:[#allocation82_spill] sm:$0xff] }
 0x413   : > { %6245 = vpow2.f32 %v2195_v49  ;;  %v12196_v49 = vld [vmem:[#allocation102_spill] sm:$0xff] }
 0x414   : > { %2712 = vperm.xlu2 %5745, %v8645_v31   ;;  %v12188_v31 = vld [vmem:[#allocation73_spill] sm:$0xff] }
 0x415   : > { %2682 = vperm.xlu0 %5746, %v8652_v27   ;;  %v1943_v27 = vsub.f32 %v12188_v31, %v1757_v26  ;;  %12189 = vst [vmem:[#allocation73_spill] sm:$0xff] %v8670_v17  ;;  %v8675_v50 = vpop.permute.xlu2 %2487  ;;  %v2201_v26 = vmul.f32 1.442695, %v1950_v47  ;;  %v12193_v31 = vperm.slane %v8344_v24, 3 }
 0x416   : > { %12190 = vst [vmem:[#allocation168_spill] sm:$0xff] %v8675_v50 }
 0x417   : > { %v8661_v25 = vpop.permute.xlu0 %2412  ;;  %v2187_v21 = vmul.f32 1.442695, %v1943_v27  ;;  %v1946_v8 = vsub.f32 %v12194_v55, %v12193_v31  ;;  %v1953_v27 = vsub.f32 %v12196_v49, %v1762_v39  ;;  %v12201_v39 = vld [vmem:[#allocation59_spill] sm:$0xff] }
 0x418   : > { %2625 = vperm.xlu1 %5744, %v8663_v19   ;;  %v8681_v19 = vpop.eup %6243 }
 0x419   : > { %12192 = vst [vmem:[#allocation93_spill] sm:$0xff] %v8681_v19  ;;  %6247 = vpow2.f32 %v2187_v21  ;;  %v2193_v52 = vmul.f32 1.442695, %v1946_v8  ;;  %v2207_v37 = vmul.f32 1.442695, %v1953_v27  ;;  %v12199_v21 = vld [vmem:[#allocation94_spill] sm:$0xff]  ;;  %v2774_v8 = vperm.slane %v8117_v29, %v12201_v39 }
 0x41a   : > { %v8672_v36 = vpop.permute.xlu1 %2400  ;;  %6249 = vpow2.f32 %v2201_v26  ;;  %v1949_v31 = vsub.f32 %v12199_v21, %v1760_v45  ;;  %v12202_v26 = vld [vmem:[#allocation60_spill] sm:$0xff]  ;;  %v2771_v29 = vperm.slane %v8221_v60, %v12201_v39  ;;  %v2780_v60 = vperm.slane %v8276_v18, %v12201_v39 }
 0x41b   : > { %6251 = vpow2.f32 %v2193_v52  ;;  %v2778_v49 = vperm.slane %v8139_v35, %v12202_v26  ;;  %v2772_v45 = vperm.slane %v8207_v22, %v12202_v26  ;;  %v2775_v52 = vperm.slane %v8252_v23, %v12202_v26 }
 0x41c   : > { %2721 = vperm.xlu2 %5745, %v8667_v62   ;;  %v8687_v62 = vpop.eup %6245  ;;  %6253 = vpow2.f32 %v2207_v37  ;;  %v2781_v37 = vperm.slane %v8264_v51, %v12202_v26  ;;  %v12205_v23 = vperm.slane %v8344_v24, 6  ;;  %v2787_v24 = vperm.slane %v8184_v58, %v12202_v26 }
 0x41d   : > { %2691 = vperm.xlu0 %5746, %v8670_v17   ;;  %12195 = vst [vmem:[#allocation82_spill] sm:$0xff] %v8687_v62  ;;  %v8693_v17 = vpop.permute.xlu2 %2496  ;;  %v2776_v35 = vsel %vm1404_vm0, %v2775_v52, %v2774_v8  ;;  %v2783_v8 = vperm.slane %v8162_v56, %v12201_v39  ;;  %v2786_v18 = vperm.slane %v8293_v30, %v12201_v39 }
 0x41e   : > { %12197 = vst [vmem:[#allocation102_spill] sm:$0xff] %v8693_v17  ;;  %v2820_v58 = vperm.slane %v8428_v54, %v12202_v26  ;;  %v2825_v30 = vperm.slane %v8447_v4, %v12201_v39  ;;  %v2822_v54 = vperm.slane %v8367_v28, %v12201_v39  ;;  %v2826_v4 = vperm.slane %v8391_v32, %v12202_v26  ;;  %v12211_v28 = vld [vmem:[#allocation32_spill] sm:$0xff] }
 0x41f   : > { %v8679_v1 = vpop.permute.xlu0 %2421 }
 0x420   : > { %2679 = vperm.xlu1 %5744, %v8681_v19   ;;  %v8697_v19 = vpop.eup %6247  ;;  %v2827_v32 = vsel %vm1404_vm0, %v2826_v4, %v2825_v30 }
 0x421   : > { %12198 = vst [vmem:[#allocation169_spill] sm:$0xff] %v8697_v19  ;;  %v8701_v55 = vpop.eup %6249 }
 0x422   : > { %v8689_v0 = vpop.permute.xlu1 %2409  ;;  %12200 = vst [vmem:[#allocation94_spill] sm:$0xff] %v8701_v55  ;;  %v8716_v21 = vpop.eup %6251 }
 0x423   : > { %12203 = vst [vmem:[#allocation59_spill] sm:$0xff] %v8716_v21 }
 0x425   : > { %2700 = vperm.xlu0 %5746, %v8687_v62   ;;  %v2199_v62 = vmul.f32 1.442695, %v1949_v31  ;;  %v12206_v31 = vld [vmem:[#allocation103_spill] sm:$0xff] }
 0x426   : > { %v1952_v17 = vsub.f32 %v12206_v31, %v12205_v23  ;;  %v2829_v23 = vperm.slane %v8473_v46, %v12202_v26  ;;  %v12212_v46 = vld [vmem:[#allocation30_spill] sm:$0xff] }
 0x427   : > { %v8695_v47 = vpop.permute.xlu0 %2430  ;;  %6255 = vpow2.f32 %v2199_v62 }
 0x428   : > { %2688 = vperm.xlu1 %5744, %v8697_v19   ;;  %v8720_v19 = vpop.permute.xlu2 %2505  ;;  %v2205_v56 = vmul.f32 1.442695, %v1952_v17  ;;  %v2792_v17 = vperm.slane %v8209_v40, %v12201_v39 }
 0x429   : > { %12204 = vst [vmem:[#allocation60_spill] sm:$0xff] %v8720_v19  ;;  %v2773_v19 = vsel %vm1404_vm0, %v2772_v45, %v2771_v29 }
 0x42a   : > { %v8703_v50 = vpop.permute.xlu1 %2418  ;;  %v2929_v52 = vsel %vm1595_vm1, %v2776_v35, %v2773_v19  ;;  %6257 = vpow2.f32 %v2205_v56 }
 0x42d   : > { %2709 = vperm.xlu0 %5746, %v8701_v55   ;;  %v2777_v55 = vperm.slane %v8234_v10, %v12201_v39  ;;  %v8732_v10 = vpop.eup %6253 }
 0x42e   : > { %12207 = vst [vmem:[#allocation103_spill] sm:$0xff] %v8732_v10  ;;  %v8756_v29 = vpop.eup %6255 }
 0x42f   : > { %v8710_v27 = vpop.permute.xlu0 %2484  ;;  %v2779_v22 = vsel %vm1404_vm0, %v2778_v49, %v2777_v55  ;;  %v2782_v55 = vsel %vm1404_vm0, %v2781_v37, %v2780_v60  ;;  %v2784_v49 = vperm.slane %v8305_v42, %v12202_v26  ;;  %12208 = vst [vmem:[#allocation170_spill] sm:$0xff] %v8756_v29  ;;  %v2788_v37 = vsel %vm1404_vm0, %v2787_v24, %v2786_v18 }
 0x430   : > { %2697 = vperm.xlu1 %5744, %v8716_v21   ;;  %v2930_v62 = vsel %vm1597_vm2, %v2779_v22, %v2929_v52  ;;  %v2790_v42 = vperm.slane %v8319_v2, %v12202_v26  ;;  %v2819_v22 = vperm.slane %v8229_v3, %v12201_v39  ;;  %v12209_v2 = vld [vmem:[#allocation128_spill] sm:$0xff]  ;;  %v8778_v40 = vpop.permute.xlu2 %2514  ;;  %v12210_v3 = vld [vmem:[#allocation90_spill] sm:$0xff]  ;;  %v2823_v52 = vperm.slane %v12211_v28, %v12202_v26 }
 0x431   : > { %v2785_v19 = vsel %vm1404_vm0, %v2784_v49, %v2783_v8  ;;  %v2931_v35 = vsel %vm1599_vm3, %v2782_v55, %v2930_v62  ;;  %v2789_v60 = vperm.slane %v12209_v2, %v12201_v39  ;;  %v2793_v8 = vperm.slane %v12210_v3, %v12202_v26 }
 0x432   : > { %v8739_v51 = vpop.permute.xlu1 %2427  ;;  %v2932_v31 = vsel %vm1601_vm4, %v2785_v19, %v2931_v35  ;;  %v2828_v24 = vperm.slane %v12212_v46, %v12201_v39  ;;  %v2821_v62 = vsel %vm1404_vm0, %v2820_v58, %v2819_v22  ;;  %v2824_v56 = vsel %vm1404_vm0, %v2823_v52, %v2822_v54  ;;  %v12213_v58 = vld [vmem:[#allocation79_spill] sm:$0xff] }
 0x433   : > { %v2791_v49 = vsel %vm1404_vm0, %v2790_v42, %v2789_v60  ;;  %v2933_v18 = vsel %vm1603_vm5, %v2788_v37, %v2932_v31  ;;  %v2834_v35 = vperm.slane %v8495_v20, %v12201_v39  ;;  %v2794_v2 = vsel %vm1404_vm0, %v2793_v8, %v2792_v17  ;;  %v8808_v20 = vpop.eup %6257  ;;  %v12215_v17 = vld [vmem:[#allocation44_spill] sm:$0xff]  ;;  %v12217_v46 = vld [vmem:[#allocation139_spill] sm:$0xff] }
 0x434   : > { %v2830_v19 = vsel %vm1404_vm0, %v2829_v23, %v2828_v24  ;;  %v2943_v3 = vsel %vm1595_vm1, %v2824_v56, %v2821_v62  ;;  %v2831_v22 = vperm.slane %v12213_v58, %v12201_v39  ;;  %v2838_v42 = vperm.slane %v8516_v44, %v12202_v26  ;;  %12214 = vst [vmem:[#allocation128_spill] sm:$0xff] %v8808_v20  ;;  %v12216_v60 = vld [vmem:[#allocation64_spill] sm:$0xff] }
 0x435   : > { %2718 = vperm.xlu0 %5746, %v8732_v10   ;;  %v2944_v37 = vsel %vm1597_vm2, %v2827_v32, %v2943_v3  ;;  %v2835_v54 = vperm.slane %v8436_v33, %v12202_v26  ;;  %v2934_v23 = vsel %vm1605_vm6, %v2791_v49, %v2933_v18  ;;  %v2832_v31 = vperm.slane %v12215_v17, %v12202_v26  ;;  %v12261_v10 = vld [vmem:[#allocation17_spill] sm:$0xff] }
 0x436   : > { %v2837_v4 = vperm.slane %v12216_v60, %v12201_v39  ;;  %v2945_v8 = vsel %vm1599_vm3, %v2830_v19, %v2944_v37  ;;  %v2935_v44 = vsel %vm11705_vm7, %v2794_v2, %v2934_v23  ;;  %v2840_v24 = vperm.slane %v12217_v46, %v12201_v39  ;;  %v12218_v19 = vld [vmem:[#allocation100_spill] sm:$0xff] }
 0x437   : > { %v8751_v45 = vpop.permute.xlu0 %2493  ;;  %v2836_v28 = vsel %vm1404_vm0, %v2835_v54, %v2834_v35  ;;  %v2833_v33 = vsel %vm1404_vm0, %v2832_v31, %v2831_v22  ;;  %v2985_v49 = vsel %vm1666_vm8, %v2935_v44, 0.0  ;;  %v2841_v35 = vperm.slane %v12218_v19, %v12202_v26  ;;  %v12220_v19 = vld [vmem:[#allocation71_spill] sm:$0xff] }
 0x438   : > { %2706 = vperm.xlu1 %5744, %v8756_v29   ;;  %v2839_v52 = vsel %vm1404_vm0, %v2838_v42, %v2837_v4  ;;  %v2946_v32 = vsel %vm1601_vm4, %v2833_v33, %v2945_v8  ;;  %v8826_v18 = vpop.permute.xlu2 %2523  ;;  %v2750_v42 = vperm.slane %v8618_v38, %v12201_v39  ;;  %v2748_v37 = vperm.slane %v8654_v5, %v12202_v26 }
 0x439   : > { %v2947_v56 = vsel %vm1603_vm5, %v2836_v28, %v2946_v32  ;;  %v2842_v58 = vsel %vm1404_vm0, %v2841_v35, %v2840_v24  ;;  %v2754_v54 = vperm.slane %v8640_v16, %v12202_v26  ;;  %v2753_v23 = vperm.slane %v8672_v36, %v12201_v39 }
 0x43a   : > { %v8787_v55 = vpop.permute.xlu1 %2490  ;;  %v2948_v2 = vsel %vm1605_vm6, %v2839_v52, %v2947_v56  ;;  %v2747_v17 = vperm.slane %v8508_v9, %v12201_v39  ;;  %v2751_v31 = vperm.slane %v8538_v34, %v12202_v26  ;;  %v2757_v60 = vperm.slane %v8689_v0, %v12202_v26  ;;  %v12219_v56 = vld [vmem:[#allocation65_spill] sm:$0xff] }
 0x43b   : > { %v2949_v22 = vsel %vm11705_vm7, %v2842_v58, %v2948_v2  ;;  %v2756_v16 = vperm.slane %v8567_v61, %v12201_v39  ;;  %v2755_v9 = vsel %vm1404_vm0, %v2754_v54, %v2753_v23  ;;  %v2763_v44 = vperm.slane %v8679_v1, %v12202_v26  ;;  %v12223_v54 = vld [vmem:[#allocation31_spill] sm:$0xff] }
 0x43c   : > { %v2991_v38 = vsel %vm1666_vm8, %v2949_v22, 0.0  ;;  %v2752_v5 = vsel %vm1404_vm0, %v2751_v31, %v2750_v42  ;;  %v2749_v36 = vsel %vm1404_vm0, %v2748_v37, %v2747_v17  ;;  %v2762_v28 = vperm.slane %v8703_v50, %v12201_v39  ;;  %v12222_v42 = vld [vmem:[#allocation45_spill] sm:$0xff] }
 0x43d   : > { %v2758_v0 = vsel %vm1404_vm0, %v2757_v60, %v2756_v16  ;;  %v2922_v61 = vsel %vm1595_vm1, %v2752_v5, %v2749_v36  ;;  %v2759_v33 = vperm.slane %v8661_v25, %v12201_v39  ;;  %v2766_v52 = vperm.slane %v8739_v51, %v12202_v26  ;;  %v12224_v60 = vld [vmem:[#allocation76_spill] sm:$0xff] }
 0x43e   : > { %v2923_v46 = vsel %vm1597_vm2, %v2755_v9, %v2922_v61  ;;  %v2760_v24 = vperm.slane %v8595_v57, %v12202_v26  ;;  %v2764_v50 = vsel %vm1404_vm0, %v2763_v44, %v2762_v28  ;;  %v2727_v25 = vperm.slane %v12219_v56, %v12202_v26  ;;  %v12221_v57 = vld [vmem:[#allocation88_spill] sm:$0xff]  ;;  %v12226_v9 = vld [vmem:[#allocation83_spill] sm:$0xff] }
 0x43f   : > { %v8802_v30 = vpop.permute.xlu0 %2502  ;;  %v2924_v1 = vsel %vm1599_vm3, %v2758_v0, %v2923_v46  ;;  %v2726_v51 = vperm.slane %v12220_v19, %v12201_v39  ;;  %v2730_v58 = vperm.slane %v12221_v57, %v12202_v26  ;;  %v2724_v37 = vperm.slane %v12222_v42, %v12202_v26  ;;  %v12225_v5 = vld [vmem:[#allocation96_spill] sm:$0xff]  ;;  %v12227_v46 = vld [vmem:[#allocation41_spill] sm:$0xff] }
 0x440   : > { %2715 = vperm.xlu1 %5744, %v8808_v20   ;;  %v8858_v8 = vpop.permute.xlu2 %2586  ;;  %v2761_v35 = vsel %vm1404_vm0, %v2760_v24, %v2759_v33  ;;  %v2733_v23 = vperm.slane %v12223_v54, %v12202_v26  ;;  %v2769_v16 = vperm.slane %v8650_v43, %v12202_v26  ;;  %v2723_v36 = vperm.slane %v12225_v5, %v12201_v39  ;;  %v12232_v42 = vld [vmem:[#allocation29_spill] sm:$0xff] }
 0x441   : > { %v2925_v22 = vsel %vm1601_vm4, %v2761_v35, %v2924_v1  ;;  %v2732_v0 = vperm.slane %v12226_v9, %v12201_v39  ;;  %v2728_v44 = vsel %vm1404_vm0, %v2727_v25, %v2726_v51  ;;  %v2738_v24 = vperm.slane %v12227_v46, %v12201_v39  ;;  %v12229_v25 = vld [vmem:[#allocation50_spill] sm:$0xff] }
 0x442   : > { %v8822_v62 = vpop.permute.xlu1 %2499  ;;  %v2926_v31 = vsel %vm1603_vm5, %v2764_v50, %v2925_v22  ;;  %v12228_v50 = vld [vmem:[#allocation46_spill] sm:$0xff]  ;;  %v2742_v19 = vperm.slane %v12229_v25, %v12202_v26  ;;  %v2874_v5 = vperm.slane %v8561_v59, %v12202_v26 }
 0x443   : > { %v2734_v43 = vsel %vm1404_vm0, %v2733_v23, %v2732_v0  ;;  %v2736_v56 = vperm.slane %v12228_v50, %v12202_v26  ;;  %v2880_v50 = vperm.slane %v8550_v11, %v12202_v26 }
 0x445   : > { %2986 = vadd.xlane.f32.xlu2 %v2985_v49  ;;  %v2765_v49 = vperm.slane %v8623_v15, %v12201_v39  ;;  %v2768_v15 = vperm.slane %v8695_v47, %v12201_v39 }
 0x447   : > { %v8832_v3 = vpop.permute.xlu0 %2511  ;;  %v2767_v2 = vsel %vm1404_vm0, %v2766_v52, %v2765_v49  ;;  %v2770_v33 = vsel %vm1404_vm0, %v2769_v16, %v2768_v15  ;;  %v2725_v52 = vsel %vm1404_vm0, %v2724_v37, %v2723_v36  ;;  %v2741_v37 = vperm.slane %v12232_v42, %v12201_v39 }
 0x448   : > { %v2927_v47 = vsel %vm1605_vm6, %v2767_v2, %v2926_v31  ;;  %v8909_v28 = vpop.permute.xlu2 %2595  ;;  %v2915_v1 = vsel %vm1595_vm1, %v2728_v44, %v2725_v52  ;;  %v12230_v2 = vld [vmem:[#allocation35_spill] sm:$0xff]  ;;  %v2871_v31 = vperm.slane %v8503_v13, %v12202_v26  ;;  %v2867_v36 = vperm.slane %v8483_v7, %v12201_v39  ;;  %v12233_v13 = vld [vmem:[#allocation26_spill] sm:$0xff] }
 0x449   : > { %v2928_v49 = vsel %vm11705_vm7, %v2770_v33, %v2927_v47  ;;  %v2739_v57 = vperm.slane %v12230_v2, %v12202_v26  ;;  %v2743_v47 = vsel %vm1404_vm0, %v2742_v19, %v2741_v37  ;;  %v2745_v0 = vperm.slane %v12233_v13, %v12202_v26  ;;  %v12235_v33 = vld [vmem:[#allocation52_spill] sm:$0xff]  ;;  %v12237_v2 = vld [vmem:[#allocation75_spill] sm:$0xff] }
 0x44a   : > { %v8850_v4 = vpop.permute.xlu1 %2508  ;;  %v2982_v54 = vsel %vm1666_vm8, %v2928_v49, 0.0  ;;  %v2744_v52 = vperm.slane %v12235_v33, %v12201_v39  ;;  %v2876_v49 = vperm.slane %v8526_v12, %v12201_v39 }
 0x44b   : > { %v2740_v23 = vsel %vm1404_vm0, %v2739_v57, %v2738_v24  ;;  %v2877_v57 = vperm.slane %v12237_v2, %v12202_v26 }
 0x44d   : > { %2992 = vadd.xlane.f32.xlu2 %v2991_v38  ;;  %v2729_v38 = vperm.slane %v12224_v60, %v12201_v39  ;;  %v2870_v60 = vperm.slane %v8542_v6, %v12201_v39  ;;  %v12234_v6 = vld [vmem:[#allocation49_spill] sm:$0xff] }
 0x44e   : > { %v2873_v44 = vperm.slane %v12234_v6, %v12201_v39 }
 0x44f   : > { %v8860_v34 = vpop.permute.xlu0 %2520  ;;  %v2731_v61 = vsel %vm1404_vm0, %v2730_v58, %v2729_v38  ;;  %v12231_v58 = vld [vmem:[#allocation23_spill] sm:$0xff]  ;;  %v2872_v59 = vsel %vm1404_vm0, %v2871_v31, %v2870_v60  ;;  %v2888_v60 = vperm.slane %v8634_v14, %v12201_v39  ;;  %v12239_v14 = vld [vmem:[#allocation168_spill] sm:$0xff] }
 0x450   : > { %v2916_v35 = vsel %vm1597_vm2, %v2731_v61, %v2915_v1  ;;  %v2735_v15 = vperm.slane %v12231_v58, %v12201_v39  ;;  %v8958_v24 = vpop.permute.xlu2 %2604  ;;  %v2875_v1 = vsel %vm1404_vm0, %v2874_v5, %v2873_v44  ;;  %v2746_v58 = vsel %vm1404_vm0, %v2745_v0, %v2744_v52  ;;  %v12240_v0 = vld [vmem:[#allocation105_spill] sm:$0xff]  ;;  %v12242_v52 = vld [vmem:[#allocation60_spill] sm:$0xff] }
 0x451   : > { %v2917_v22 = vsel %vm1599_vm3, %v2734_v43, %v2916_v35  ;;  %v12236_v43 = vld [vmem:[#allocation63_spill] sm:$0xff]  ;;  %v2883_v35 = vperm.slane %v8608_v63, %v12202_v26  ;;  %v2878_v63 = vsel %vm1404_vm0, %v2877_v57, %v2876_v49  ;;  %v2885_v5 = vperm.slane %v8573_v48, %v12201_v39  ;;  %v12241_v48 = vld [vmem:[#allocation102_spill] sm:$0xff] }
 0x452   : > { %v8879_v32 = vpop.permute.xlu1 %2517  ;;  %v2737_v16 = vsel %vm1404_vm0, %v2736_v56, %v2735_v15  ;;  %v2868_v46 = vperm.slane %v12236_v43, %v12202_v26  ;;  %v2879_v56 = vperm.slane %v8587_v41, %v12201_v39  ;;  %v12238_v15 = vld [vmem:[#allocation138_spill] sm:$0xff]  ;;  %v2799_v41 = vperm.slane %v8751_v45, %v12202_v26 }
 0x453   : > { %v2918_v9 = vsel %vm1601_vm4, %v2737_v16, %v2917_v22  ;;  %v2882_v11 = vperm.slane %v12238_v15, %v12201_v39  ;;  %v2795_v16 = vperm.slane %v8710_v27, %v12201_v39  ;;  %v2798_v45 = vperm.slane %v8787_v55, %v12201_v39 }
 0x454   : > { %v2919_v61 = vsel %vm1603_vm5, %v2740_v23, %v2918_v9  ;;  %v2869_v19 = vsel %vm1404_vm0, %v2868_v46, %v2867_v36  ;;  %v2889_v23 = vperm.slane %v8597_v53, %v12202_v26  ;;  %v2802_v36 = vperm.slane %v8822_v62, %v12202_v26 }
 0x455   : > { %v2920_v7 = vsel %vm1605_vm6, %v2743_v47, %v2919_v61  ;;  %v2957_v12 = vsel %vm1595_vm1, %v2872_v59, %v2869_v19  ;;  %v2884_v31 = vsel %vm1404_vm0, %v2883_v35, %v2882_v11  ;;  %v2796_v13 = vperm.slane %v12239_v14, %v12202_v26 }
 0x456   : > { %v2958_v22 = vsel %vm1597_vm2, %v2875_v1, %v2957_v12  ;;  %v2921_v42 = vsel %vm11705_vm7, %v2746_v58, %v2920_v7  ;;  %v2800_v27 = vsel %vm1404_vm0, %v2799_v41, %v2798_v45  ;;  %v2804_v55 = vperm.slane %v8802_v30, %v12201_v39 }
 0x457   : > { %v8896_v17 = vpop.permute.xlu0 %2529  ;;  %v2959_v47 = vsel %vm1599_vm3, %v2878_v63, %v2958_v22  ;;  %v2979_v53 = vsel %vm1666_vm8, %v2921_v42, 0.0  ;;  %v2886_v6 = vperm.slane %v12240_v0, %v12202_v26  ;;  %v2801_v44 = vperm.slane %v12241_v48, %v12201_v39 }
 0x458   : > { %v2808_v62 = vperm.slane %v8832_v3, %v12202_v26  ;;  %v2805_v43 = vperm.slane %v12242_v52, %v12202_v26  ;;  %v2797_v46 = vsel %vm1404_vm0, %v2796_v13, %v2795_v16  ;;  %v2614_v59 = vpop.permute.xlu2 %2613  ;;  %v2890_v30 = vsel %vm1404_vm0, %v2889_v23, %v2888_v60 }
 0x459   : > { %v2887_v7 = vsel %vm1404_vm0, %v2886_v6, %v2885_v5  ;;  %v2936_v49 = vsel %vm1595_vm1, %v2800_v27, %v2797_v46  ;;  %v2803_v1 = vsel %vm1404_vm0, %v2802_v36, %v2801_v44  ;;  %v2807_v3 = vperm.slane %v8850_v4, %v12201_v39 }
 0x45a   : > { %v8923_v51 = vpop.permute.xlu1 %2526  ;;  %v2813_v57 = vperm.slane %v8860_v34, %v12201_v39  ;;  %v2810_v58 = vperm.slane %v8778_v40, %v12201_v39  ;;  %v2937_v4 = vsel %vm1597_vm2, %v2803_v1, %v2936_v49  ;;  %v2817_v15 = vperm.slane %v8896_v17, %v12202_v26 }
 0x45b   : > { %v2809_v2 = vsel %vm1404_vm0, %v2808_v62, %v2807_v3  ;;  %v2816_v34 = vperm.slane %v8923_v51, %v12201_v39  ;;  %v2850_v27 = vperm.slane %v8909_v28, %v12202_v26  ;;  %v2855_v44 = vperm.slane %v8958_v24, %v12201_v39 }
 0x45d   : > { %v2818_v17 = vsel %vm1404_vm0, %v2817_v15, %v2816_v34 }
 0x45f   : > { %2983 = vadd.xlane.f32.xlu0 %v2982_v54  ;;  %v8939_v38 = vpop.permute.xlu0 %2583  ;;  %v2881_v54 = vsel %vm1404_vm0, %v2880_v50, %v2879_v56  ;;  %v2806_v50 = vsel %vm1404_vm0, %v2805_v43, %v2804_v55  ;;  %v2811_v56 = vperm.slane %v8879_v32, %v12202_v26  ;;  %v2814_v32 = vperm.slane %v8826_v18, %v12202_v26 }
 0x460   : > { %v2960_v9 = vsel %vm1601_vm4, %v2881_v54, %v2959_v47  ;;  %v2938_v11 = vsel %vm1599_vm3, %v2806_v50, %v2937_v4  ;;  %v2623_v18 = vpop.permute.xlu2 %2622  ;;  %v2844_v51 = vperm.slane %v8939_v38, %v12202_v26 }
 0x461   : > { %v2961_v33 = vsel %vm1603_vm5, %v2884_v31, %v2960_v9  ;;  %v2939_v22 = vsel %vm1601_vm4, %v2809_v2, %v2938_v11  ;;  %v2812_v41 = vsel %vm1404_vm0, %v2811_v56, %v2810_v58  ;;  %v2815_v40 = vsel %vm1404_vm0, %v2814_v32, %v2813_v57 }
 0x462   : > { %v8968_v25 = vpop.permute.xlu1 %2580  ;;  %v2962_v19 = vsel %vm1605_vm6, %v2887_v7, %v2961_v33  ;;  %v2940_v54 = vsel %vm1603_vm5, %v2812_v41, %v2939_v22 }
 0x463   : > { %v2963_v12 = vsel %vm11705_vm7, %v2890_v30, %v2962_v19  ;;  %v2941_v23 = vsel %vm1605_vm6, %v2815_v40, %v2940_v54  ;;  %v2843_v9 = vperm.slane %v8968_v25, %v12201_v39 }
 0x464   : > { %v2997_v42 = vsel %vm1666_vm8, %v2963_v12, 0.0  ;;  %v2942_v60 = vsel %vm11705_vm7, %v2818_v17, %v2941_v23 }
 0x465   : > { %v2988_v16 = vsel %vm1666_vm8, %v2942_v60, 0.0  ;;  %v2845_v38 = vsel %vm1404_vm0, %v2844_v51, %v2843_v9 }
 0x467   : > { %v8983_v37 = vpop.permute.xlu0 %2592 }
 0x468   : > { %v2849_v36 = vperm.slane %v8983_v37, %v12201_v39  ;;  %v2677_v14 = vpop.permute.xlu2 %2676 }
 0x469   : > { %v2891_v54 = vperm.slane %v2677_v14, %v12201_v39 }
 0x46a   : > { %v2590_v61 = vpop.permute.xlu1 %2589  ;;  %2980 = vadd.xlane.f32.xlu1 %v2979_v53  ;;  %v2846_v53 = vperm.slane %v8858_v8, %v12201_v39  ;;  %v2851_v37 = vsel %vm1404_vm0, %v2850_v27, %v2849_v36 }
 0x46b   : > { %v2847_v47 = vperm.slane %v2590_v61, %v12202_v26  ;;  %v2859_v61 = vperm.slane %v2614_v59, %v12202_v26  ;;  %v2864_v59 = vperm.slane %v2623_v18, %v12201_v39 }
 0x46d   : > { %v2848_v55 = vsel %vm1404_vm0, %v2847_v47, %v2846_v53 }
 0x46e   : > { %v2950_v28 = vsel %vm1595_vm1, %v2848_v55, %v2845_v38 }
 0x46f   : > { %v2602_v35 = vpop.permute.xlu0 %2601  ;;  %v2951_v33 = vsel %vm1597_vm2, %v2851_v37, %v2950_v28 }
 0x470   : > { %v2853_v13 = vperm.slane %v2602_v35, %v12202_v26  ;;  %v2686_v24 = vpop.permute.xlu2 %2685 }
 0x471   : > { %v2895_v18 = vperm.slane %v2686_v24, %v12202_v26 }
 0x472   : > { %v2599_v63 = vpop.permute.xlu1 %2598  ;;  %2998 = vadd.xlane.f32.xlu1 %v2997_v42 }
 0x473   : > { %v2852_v0 = vperm.slane %v2599_v63, %v12201_v39 }
 0x475   : > { %v2854_v48 = vsel %vm1404_vm0, %v2853_v13, %v2852_v0 }
 0x476   : > { %v2952_v52 = vsel %vm1599_vm3, %v2854_v48, %v2951_v33 }
 0x477   : > { %v2611_v31 = vpop.permute.xlu0 %2610 }
 0x478   : > { %v2858_v25 = vperm.slane %v2611_v31, %v12201_v39  ;;  %v2695_v4 = vpop.permute.xlu2 %2694 }
 0x479   : > { %v2900_v60 = vperm.slane %v2695_v4, %v12201_v39 }
 0x47a   : > { %v2608_v45 = vpop.permute.xlu1 %2607  ;;  %2989 = vadd.xlane.f32.xlu1 %v2988_v16  ;;  %v2860_v30 = vsel %vm1404_vm0, %v2859_v61, %v2858_v25 }
 0x47b   : > { %v2856_v6 = vperm.slane %v2608_v45, %v12202_v26 }
 0x47d   : > { %v2857_v43 = vsel %vm1404_vm0, %v2856_v6, %v2855_v44 }
 0x47e   : > { %v2953_v1 = vsel %vm1601_vm4, %v2857_v43, %v2952_v52 }
 0x47f   : > { %v2620_v5 = vpop.permute.xlu0 %2619  ;;  %v2954_v50 = vsel %vm1603_vm5, %v2860_v30, %v2953_v1 }
 0x480   : > { %v2862_v62 = vperm.slane %v2620_v5, %v12202_v26  ;;  %v2704_v11 = vpop.permute.xlu2 %2703 }
 0x481   : > { %v2904_v27 = vperm.slane %v2704_v11, %v12202_v26 }
 0x482   : > { %v2617_v8 = vpop.permute.xlu1 %2616 }
 0x483   : > { %v2861_v46 = vperm.slane %v2617_v8, %v12201_v39 }
 0x485   : > { %v2863_v49 = vsel %vm1404_vm0, %v2862_v62, %v2861_v46 }
 0x486   : > { %v2955_v19 = vsel %vm1605_vm6, %v2863_v49, %v2954_v50 }
 0x487   : > { %v2683_v7 = vpop.permute.xlu0 %2682 }
 0x488   : > { %v2713_v34 = vpop.permute.xlu2 %2712  ;;  %v2894_v42 = vperm.slane %v2683_v7, %v12201_v39 }
 0x489   : > { %v2909_v8 = vperm.slane %v2713_v34, %v12201_v39 }
 0x48a   : > { %v2626_v3 = vpop.permute.xlu1 %2625  ;;  %v2896_v16 = vsel %vm1404_vm0, %v2895_v18, %v2894_v42 }
 0x48b   : > { %v2865_v56 = vperm.slane %v2626_v3, %v12202_v26 }
 0x48d   : > { %v2866_v35 = vsel %vm1404_vm0, %v2865_v56, %v2864_v59 }
 0x48e   : > { %v2956_v2 = vsel %vm11705_vm7, %v2866_v35, %v2955_v19 }
 0x48f   : > { %v2994_v57 = vsel %vm1666_vm8, %v2956_v2, 0.0  ;;  %v2692_v12 = vpop.permute.xlu0 %2691 }
 0x490   : > { %2995 = vadd.xlane.f32.xlu0 %v2994_v57  ;;  %v2898_v63 = vperm.slane %v2692_v12, %v12202_v26  ;;  %v2722_v38 = vpop.permute.xlu2 %2721 }
 0x491   : > { %v2913_v44 = vperm.slane %v2722_v38, %v12202_v26 }
 0x492   : > { %v2680_v58 = vpop.permute.xlu1 %2679 }
 0x493   : > { %v2892_v40 = vperm.slane %v2680_v58, %v12202_v26 }
 0x495   : > { %v2893_v45 = vsel %vm1404_vm0, %v2892_v40, %v2891_v54 }
 0x496   : > { %v2964_v53 = vsel %vm1595_vm1, %v2896_v16, %v2893_v45 }
 0x497   : > { %v2701_v32 = vpop.permute.xlu0 %2700 }
 0x498   : > { %v2903_v9 = vperm.slane %v2701_v32, %v12201_v39 }
 0x49a   : > { %v2689_v15 = vpop.permute.xlu1 %2688  ;;  %v2905_v48 = vsel %vm1404_vm0, %v2904_v27, %v2903_v9 }
 0x49b   : > { %v2897_v17 = vperm.slane %v2689_v15, %v12201_v39 }
 0x49d   : > { %v2899_v51 = vsel %vm1404_vm0, %v2898_v63, %v2897_v17 }
 0x49e   : > { %v2965_v13 = vsel %vm1597_vm2, %v2899_v51, %v2964_v53 }
 0x49f   : > { %v2710_v41 = vpop.permute.xlu0 %2709 }
 0x4a0   : > { %v2907_v5 = vperm.slane %v2710_v41, %v12202_v26 }
 0x4a2   : > { %v2698_v22 = vpop.permute.xlu1 %2697 }
 0x4a3   : > { %v2901_v23 = vperm.slane %v2698_v22, %v12202_v26 }
 0x4a5   : > { %v2902_v47 = vsel %vm1404_vm0, %v2901_v23, %v2900_v60 }
 0x4a6   : > { %v2966_v55 = vsel %vm1599_vm3, %v2902_v47, %v2965_v13 }
 0x4a7   : > { %v2719_v14 = vpop.permute.xlu0 %2718  ;;  %v2967_v28 = vsel %vm1601_vm4, %v2905_v48, %v2966_v55 }
 0x4a8   : > { %v2912_v37 = vperm.slane %v2719_v14, %v12201_v39 }
 0x4aa   : > { %v2707_v31 = vpop.permute.xlu1 %2706  ;;  %v2914_v33 = vsel %vm1404_vm0, %v2913_v44, %v2912_v37 }
 0x4ab   : > { %v2906_v36 = vperm.slane %v2707_v31, %v12201_v39 }
 0x4ad   : > { %v2908_v0 = vsel %vm1404_vm0, %v2907_v5, %v2906_v36 }
 0x4ae   : > { %v2968_v61 = vsel %vm1603_vm5, %v2908_v0, %v2967_v28 }
 0x4b2   : > { %v2716_v6 = vpop.permute.xlu1 %2715 }
 0x4b3   : > { %v2910_v25 = vperm.slane %v2716_v6, %v12202_v26 }
 0x4b5   : > { %v2911_v62 = vsel %vm1404_vm0, %v2910_v25, %v2909_v8 }
 0x4b6   : > { %v2969_v52 = vsel %vm1605_vm6, %v2911_v62, %v2968_v61 }
 0x4b7   : > { %v2970_v43 = vsel %vm11705_vm7, %v2914_v33, %v2969_v52 }
 0x4b8   : > { %v3000_v39 = vsel %vm1666_vm8, %v2970_v43, 0.0  ;;  %v2987_v46 = vpop.xlane.xlu2 %2986 }
 0x4b9   : > { %3001 = vadd.xlane.f32.xlu2 %v3000_v39  ;;  %v9121_v30 = vperm.slane %v2987_v46, 0  ;;  %v9123_v7 = vperm.slane %v2987_v46, 1  ;;  %v9125_v26 = vperm.slane %v2987_v46, 2  ;;  %v9127_v49 = vperm.slane %v2987_v46, 3 }
 0x4ba   : > { %v9129_v24 = vperm.slane %v2987_v46, 4  ;;  %v9132_v1 = vperm.slane %v2987_v46, 5  ;;  %v9135_v3 = vperm.slane %v2987_v46, 6  ;;  %v9138_v50 = vperm.slane %v2987_v46, 7 }
 0x4bb   : > { %6259 = vrcp.f32 %v9121_v30 }
 0x4bc   : > { %6261 = vrcp.f32 %v9123_v7 }
 0x4bd   : > { %6263 = vrcp.f32 %v9125_v26 }
 0x4be   : > { %6265 = vrcp.f32 %v9127_v49 }
 0x4bf   : > { %6267 = vrcp.f32 %v9129_v24 }
 0x4c0   : > { %6269 = vrcp.f32 %v9132_v1  ;;  %v2993_v59 = vpop.xlane.xlu2 %2992 }
 0x4c1   : > { %v9143_v19 = vpop.eup %6259  ;;  %6271 = vrcp.f32 %v9135_v3  ;;  %v9159_v15 = vperm.slane %v2993_v59, 0  ;;  %v9164_v11 = vperm.slane %v2993_v59, 1  ;;  %v9169_v41 = vperm.slane %v2993_v59, 2 }
 0x4c2   : > { %v9152_v12 = vpop.eup %6261  ;;  %6273 = vrcp.f32 %v9138_v50  ;;  %v9174_v42 = vperm.slane %v2993_v59, 3  ;;  %v9179_v63 = vperm.slane %v2993_v59, 4  ;;  %v9187_v23 = vperm.slane %v2993_v59, 5 }
 0x4c3   : > { %v9157_v4 = vpop.eup %6263  ;;  %12243 = vst [vmem:[#allocation90_spill] sm:$0xff] %v9159_v15  ;;  %v9199_v51 = vperm.slane %v2993_v59, 6  ;;  %v9201_v47 = vperm.slane %v2993_v59, 7 }
 0x4c4   : > { %v9162_v32 = vpop.eup %6265  ;;  %12244 = vst [vmem:[#allocation32_spill] sm:$0xff] %v9169_v41 }
 0x4c5   : > { %v9167_v22 = vpop.eup %6267  ;;  %12245 = vst [vmem:[#allocation30_spill] sm:$0xff] %v9174_v42 }
 0x4c6   : > { %v9172_v34 = vpop.eup %6269  ;;  %12246 = vst [vmem:[#allocation79_spill] sm:$0xff] %v9179_v63 }
 0x4c7   : > { %v9177_v40 = vpop.eup %6271  ;;  %12247 = vst [vmem:[#allocation44_spill] sm:$0xff] %v9187_v23 }
 0x4c8   : > { %v9182_v17 = vpop.eup %6273  ;;  %12248 = vst [vmem:[#allocation64_spill] sm:$0xff] %v9199_v51 }
 0x4c9   : > { %12249 = vst [vmem:[#allocation139_spill] sm:$0xff] %v9201_v47 }
 0x4dd   : > { %v2981_v56 = vpop.xlane.xlu1 %2980 }
 0x4de   : > { %v9146_v35 = vperm.slane %v2981_v56, 0  ;;  %v9148_v2 = vperm.slane %v2981_v56, 1  ;;  %v9150_v57 = vperm.slane %v2981_v56, 2  ;;  %v9155_v58 = vperm.slane %v2981_v56, 3 }
 0x4df   : > { %v9185_v54 = vperm.slane %v2981_v56, 4  ;;  %v9220_v6 = vperm.slane %v2981_v56, 5  ;;  %v9222_v8 = vperm.slane %v2981_v56, 6  ;;  %v9227_v28 = vperm.slane %v2981_v56, 7 }
 0x4e0   : > { %6275 = vrcp.f32 %v9146_v35  ;;  %v3148_v9 = vand.u32 2147483647, %v9146_v35  ;;  %v3150_v27 = vand.u32 2147483648, %v9146_v35  ;;  %v3164_v55 = vand.u32 2147483647, %v9148_v2 }
 0x4e1   : > { %6277 = vrcp.f32 %v9148_v2  ;;  %v3166_v25 = vand.u32 2147483648, %v9148_v2  ;;  %vm3144_vm9 = vweird.f32 %v9146_v35  ;;  %vm3160_vm12 = vweird.f32 %v9148_v2 }
 0x4e2   : > { %6279 = vrcp.f32 %v9150_v57  ;;  %vm9233_vm11 = vcmp.eq.f32.partialorder %v3148_v9, 8.507059e+37  ;;  %v3151_v46 = vor.u32 1.1754944e-38, %v3150_v27  ;;  %vm9241_vm14 = vcmp.eq.f32.partialorder %v3164_v55, 8.507059e+37 }
 0x4e3   : > { %6281 = vrcp.f32 %v9155_v58  ;;  %vm3176_vm15 = vweird.f32 %v9150_v57  ;;  %v3182_v27 = vand.u32 2147483648, %v9150_v57  ;;  %v3230_v29 = vand.u32 2147483648, %v9220_v6 }
 0x4e4   : > { %6283 = vrcp.f32 %v9159_v15 }
 0x4e5   : > { %6285 = vrcp.f32 %v9164_v11 }
 0x4e6   : > { %v6276_v18 = vpop.eup %6275  ;;  %6287 = vrcp.f32 %v9169_v41 }
 0x4e7   : > { %v9190_v31 = vpop.eup %6277  ;;  %6289 = vrcp.f32 %v9174_v42  ;;  %v3140_v16 = vmul.f32 %v6276_v18, %v9146_v35  ;;  %vm3145_vm10 = vweird.f32 %v6276_v18 }
 0x4e8   : > { %v9193_v60 = vpop.eup %6279  ;;  %6291 = vrcp.f32 %v9179_v63  ;;  %v3156_v5 = vmul.f32 %v9190_v31, %v9148_v2  ;;  %vm3161_vm13 = vweird.f32 %v9190_v31  ;;  %vm3146_vm0 = vmor %vm3144_vm9, %vm3145_vm10  ;;  %v12259_v2 = vld [vmem:[#allocation24_spill] sm:$0xff]  ;;  %v12315_v63 = vld [vmem:[#allocation22_spill] sm:$0xff] }
 0x4e9   : > { %v9197_v45 = vpop.eup %6281  ;;  %6293 = vrcp.f32 %v9185_v54  ;;  %v3141_v53 = vsub.f32 1.0, %v3140_v16  ;;  %v3172_v14 = vmul.f32 %v9193_v60, %v9150_v57  ;;  %vm3162_vm8 = vmor %vm3160_vm12, %vm3161_vm13  ;;  %vm3177_vm7 = vweird.f32 %v9193_v60 }
 0x4ea   : > { %v9206_v36 = vpop.eup %6283  ;;  %6295 = vrcp.f32 %v9187_v23  ;;  %v3157_v38 = vsub.f32 1.0, %v3156_v5  ;;  %v3188_v0 = vmul.f32 %v9197_v45, %v9155_v58  ;;  %v3167_v5 = vor.u32 1.1754944e-38, %v3166_v25  ;;  %vm9278_vm10 = vmor %vm3176_vm15, %vm3177_vm7 }
 0x4eb   : > { %12250 = vst [vmem:[#allocation100_spill] sm:$0xff] %v9206_v36  ;;  %v9212_v13 = vpop.eup %6285  ;;  %v3142_v48 = vmul.f32 %v6276_v18, %v3141_v53  ;;  %v3173_v61 = vsub.f32 1.0, %v3172_v14  ;;  %6297 = vrcp.f32 %v9220_v6  ;;  %v3180_v53 = vand.u32 2147483647, %v9150_v57 }
 0x4ec   : > { %v9218_v37 = vpop.eup %6287  ;;  %v3158_v62 = vmul.f32 %v9190_v31, %v3157_v38  ;;  %v3189_v43 = vsub.f32 1.0, %v3188_v0  ;;  %v3198_v38 = vand.u32 2147483648, %v9155_v58  ;;  %6299 = vrcp.f32 %v9222_v8 }
 0x4ed   : > { %12251 = vst [vmem:[#allocation65_spill] sm:$0xff] %v9218_v37  ;;  %v9225_v44 = vpop.eup %6289  ;;  %v3143_v16 = vadd.f32 %v6276_v18, %v3142_v48  ;;  %v3174_v14 = vmul.f32 %v9193_v60, %v3173_v61  ;;  %vm3193_vm9 = vweird.f32 %v9197_v45  ;;  %6301 = vrcp.f32 %v9199_v51 }
 0x4ee   : > { %12252 = vst [vmem:[#allocation71_spill] sm:$0xff] %v9225_v44  ;;  %v9231_v33 = vpop.eup %6291  ;;  %v3159_v9 = vadd.f32 %v9190_v31, %v3158_v62  ;;  %v3190_v0 = vmul.f32 %v9197_v45, %v3189_v43  ;;  %6303 = vrcp.f32 %v9227_v28  ;;  %vm3181_vm12 = vcmp.eq.f32.partialorder %v3180_v53, 8.507059e+37 }
 0x4ef   : > { %12253 = vst [vmem:[#allocation88_spill] sm:$0xff] %v9231_v33  ;;  %v9238_v39 = vpop.eup %6293  ;;  %v3147_v55 = vsel %vm3146_vm0, %v6276_v18, %v3143_v16  ;;  %v3175_v62 = vadd.f32 %v9193_v60, %v3174_v14  ;;  %v9267_v18 = vpop.xlane.xlu0 %2983  ;;  %v12260_v16 = vld [vmem:[#allocation11_spill] sm:$0xff]  ;;  %6305 = vrcp.f32 %v9201_v47  ;;  %v3183_v14 = vor.u32 1.1754944e-38, %v3182_v27 }
 0x4f0   : > { %v9246_v56 = vpop.eup %6295  ;;  %v3204_v35 = vmul.f32 %v9238_v39, %v9185_v54  ;;  %v3152_v48 = vsel %vm9233_vm11, %v3151_v46, %v3147_v55  ;;  %v3163_v25 = vsel %vm3162_vm8, %v9190_v31, %v3159_v9  ;;  %vm3192_vm11 = vweird.f32 %v9155_v58 }
 0x4f1   : > { %12258 = vst [vmem:[#allocation45_spill] sm:$0xff] %v9246_v56  ;;  %v3154_v61 = vmul.f32 %v12259_v2, %v3152_v48  ;;  %v3153_v20 = vmul.f32 %v12260_v16, %v3152_v48  ;;  %v3168_v43 = vsel %vm9241_vm14, %v3167_v5, %v3163_v25  ;;  %v3196_v46 = vand.u32 2147483647, %v9155_v58  ;;  %v9284_v9 = vpop.eup %6297  ;;  %vm3194_vm7 = vmor %vm3192_vm11, %vm3193_vm9 }
 0x4f2   : > { %v3169_v52 = vmul.f32 %v12261_v10, %v3168_v43  ;;  %v3179_v10 = vsel %vm9278_vm10, %v9193_v60, %v3175_v62  ;;  %v3191_v57 = vadd.f32 %v9197_v45, %v3190_v0  ;;  %v3205_v59 = vsub.f32 1.0, %v3204_v35  ;;  %v9302_v0 = vpop.eup %6299 }
 0x4f3   : > { %4170 = vperm.xlu1 %5744, %v3154_v61   ;;  %4165 = vperm.xlu0 %5746, %v3153_v20   ;;  %v9293_v5 = vperm.slane %v9267_v18, 0  ;;  %v9296_v58 = vperm.slane %v9267_v18, 1  ;;  %v3199_v60 = vor.u32 1.1754944e-38, %v3198_v38  ;;  %v9305_v35 = vperm.slane %v9267_v18, 2  ;;  %v9318_v62 = vpop.eup %6301 }
 0x4f4   : > { %4175 = vperm.xlu2 %5745, %v3169_v52   ;;  %v3195_v20 = vsel %vm3194_vm7, %v9197_v45, %v3191_v57  ;;  %v3206_v55 = vmul.f32 %v9238_v39, %v3205_v59  ;;  %v3184_v48 = vsel %vm3181_vm12, %v3183_v14, %v3179_v10  ;;  %vm3197_vm13 = vcmp.eq.f32.partialorder %v3196_v46, 8.507059e+37  ;;  %12264 = vst [vmem:[#allocation31_spill] sm:$0xff] %v9318_v62  ;;  %v9323_v16 = vpop.eup %6303  ;;  %v12265_v52 = vld [vmem:[#allocation19_spill] sm:$0xff]  ;;  %v12266_v46 = vld [vmem:[#allocation108_spill] sm:$0xff] }
 0x4f5   : > { %v3220_v25 = vmul.f32 %v9284_v9, %v9220_v6  ;;  %v9310_v27 = vperm.slane %v9267_v18, 3  ;;  %v9313_v53 = vperm.slane %v9267_v18, 4  ;;  %v9316_v45 = vperm.slane %v9267_v18, 5  ;;  %v9330_v14 = vpop.eup %6305 }
 0x4f6   : > { %v3200_v38 = vsel %vm3197_vm13, %v3199_v60, %v3195_v20  ;;  %6307 = vrcp.f32 %v9293_v5  ;;  %v3207_v2 = vadd.f32 %v9238_v39, %v3206_v55  ;;  %vm3209_vm14 = vweird.f32 %v9238_v39  ;;  %12267 = vst [vmem:[#allocation76_spill] sm:$0xff] %v9330_v14  ;;  %v12268_v20 = vld [vmem:[#allocation106_spill] sm:$0xff] }
 0x4f7   : > { %v3221_v61 = vsub.f32 1.0, %v3220_v25  ;;  %v3185_v31 = vmul.f32 %v12265_v52, %v3184_v48  ;;  %v3170_v10 = vmul.f32 %v12266_v46, %v3168_v43  ;;  %v3214_v57 = vand.u32 2147483648, %v9185_v54 }
 0x4f8   : > { %v3236_v59 = vmul.f32 %v9302_v0, %v9222_v8  ;;  %6309 = vrcp.f32 %v9296_v58  ;;  %v3201_v60 = vmul.f32 %v12268_v20, %v3200_v38  ;;  %vm3208_vm15 = vweird.f32 %v9185_v54 }
 0x4f9   : > { %v3212_v55 = vand.u32 2147483647, %v9185_v54  ;;  %6311 = vrcp.f32 %v9305_v35  ;;  %vm9339_vm0 = vmor %vm3208_vm15, %vm3209_vm14  ;;  %v3222_v25 = vmul.f32 %v9284_v9, %v3221_v61  ;;  %v3215_v46 = vor.u32 1.1754944e-38, %v3214_v57 }
 0x4fa   : > { %v3237_v52 = vsub.f32 1.0, %v3236_v59  ;;  %6313 = vrcp.f32 %v9310_v27  ;;  %v3211_v54 = vsel %vm9339_vm0, %v9238_v39, %v3207_v2  ;;  %v9355_v61 = vperm.slane %v9267_v18, 6  ;;  %v12271_v39 = vld [vmem:[#allocation20_spill] sm:$0xff] }
 0x4fb   : > { %4185 = vperm.xlu1 %5744, %v3185_v31   ;;  %4180 = vperm.xlu0 %5746, %v3170_v10   ;;  %v3252_v31 = vmul.f32 %v9323_v16, %v9227_v28  ;;  %6315 = vrcp.f32 %v9313_v53  ;;  %v9358_v59 = vperm.slane %v9267_v18, 7  ;;  %vm3213_vm8 = vcmp.eq.f32.partialorder %v3212_v55, 8.507059e+37  ;;  %v12272_v55 = vld [vmem:[#allocation12_spill] sm:$0xff] }
 0x4fc   : > { %4195 = vperm.xlu2 %5745, %v3201_v60   ;;  %v3238_v10 = vmul.f32 %v9302_v0, %v3237_v52  ;;  %v9352_v20 = vpop.eup %6307  ;;  %6317 = vrcp.f32 %v9316_v45  ;;  %v3186_v2 = vmul.f32 %v12271_v39, %v3184_v48  ;;  %v3216_v60 = vsel %vm3213_vm8, %v3215_v46, %v3211_v54  ;;  %v9366_v52 = vpop.xlane.xlu1 %2998  ;;  %v12273_v39 = vld [vmem:[#allocation107_spill] sm:$0xff] }
 0x4fd   : > { %v3223_v43 = vadd.f32 %v9284_v9, %v3222_v25  ;;  %vm3225_vm9 = vweird.f32 %v9284_v9  ;;  %vm3241_vm10 = vweird.f32 %v9302_v0  ;;  %v3253_v18 = vsub.f32 1.0, %v3252_v31 }
 0x4fe   : > { %v9364_v57 = vpop.eup %6309  ;;  %v3239_v21 = vadd.f32 %v9302_v0, %v3238_v10  ;;  %v3202_v48 = vmul.f32 %v12272_v55, %v3200_v38  ;;  %vm3224_vm11 = vweird.f32 %v9220_v6  ;;  %v3228_v25 = vand.u32 2147483647, %v9220_v6 }
 0x4ff   : > { %v9371_v62 = vpop.eup %6311  ;;  %v3246_v54 = vand.u32 2147483648, %v9222_v8  ;;  %6319 = vrcp.f32 %v9355_v61  ;;  %v3218_v51 = vmul.f32 %v12273_v39, %v3216_v60  ;;  %vm9383_vm7 = vmor %vm3224_vm11, %vm3225_vm9  ;;  %vm3240_vm12 = vweird.f32 %v9222_v8 }
 0x500   : > { %v9377_v46 = vpop.eup %6313  ;;  %v3244_v38 = vand.u32 2147483647, %v9222_v8  ;;  %6321 = vrcp.f32 %v9358_v59  ;;  %v9393_v6 = vperm.slane %v9366_v52, 0  ;;  %v3227_v55 = vsel %vm9383_vm7, %v9284_v9, %v3223_v43  ;;  %vm9400_vm13 = vmor %vm3240_vm12, %vm3241_vm10 }
 0x501   : > { %v9389_v10 = vpop.eup %6315  ;;  %v3412_v8 = vmul.f32 %v9152_v12, %v9123_v7  ;;  %v9409_v47 = vperm.slane %v9366_v52, 1  ;;  %v3243_v9 = vsel %vm9400_vm13, %v9302_v0, %v3239_v21  ;;  %v3254_v43 = vmul.f32 %v9323_v16, %v3253_v18 }
 0x502   : > { %12276 = vst [vmem:[#allocation96_spill] sm:$0xff] %v9393_v6  ;;  %v9406_v14 = vpop.eup %6317  ;;  %v9419_v31 = vperm.slane %v9366_v52, 3  ;;  %vm3229_vm14 = vcmp.eq.f32.partialorder %v3228_v25, 8.507059e+37  ;;  %v3247_v56 = vor.u32 1.1754944e-38, %v3246_v54  ;;  %v9422_v23 = vperm.slane %v9366_v52, 4 }
 0x503   : > { %4200 = vperm.xlu1 %5744, %v3202_v48   ;;  %4190 = vperm.xlu0 %5746, %v3186_v2   ;;  %12279 = vst [vmem:[#allocation83_spill] sm:$0xff] %v9409_v47  ;;  %v3231_v2 = vor.u32 1.1754944e-38, %v3230_v29  ;;  %v9416_v48 = vperm.slane %v9366_v52, 2  ;;  %vm3245_vm15 = vcmp.eq.f32.partialorder %v3244_v38, 8.507059e+37  ;;  %v9428_v21 = vperm.slane %v9366_v52, 6  ;;  %v12285_v38 = vld [vmem:[#allocation21_spill] sm:$0xff] }
 0x504   : > { %4210 = vperm.xlu2 %5745, %v3218_v51   ;;  %12281 = vst [vmem:[#allocation46_spill] sm:$0xff] %v9419_v31  ;;  %v9425_v51 = vperm.slane %v9366_v52, 5  ;;  %6323 = vrcp.f32 %v9393_v6  ;;  %v3248_v0 = vsel %vm3245_vm15, %v3247_v56, %v3243_v9  ;;  %v3413_v18 = vsub.f32 1.0, %v3412_v8  ;;  %v12286_v6 = vld [vmem:[#allocation109_spill] sm:$0xff]  ;;  %v12287_v9 = vld [vmem:[#allocation110_spill] sm:$0xff]  ;;  %v9448_v42 = vpop.xlane.xlu1 %2989 }
 0x505   : > { %12280 = vst [vmem:[#allocation41_spill] sm:$0xff] %v9416_v48  ;;  %v3232_v29 = vsel %vm3229_vm14, %v3231_v2, %v3227_v55  ;;  %v9431_v39 = vpop.eup %6319  ;;  %6325 = vrcp.f32 %v9409_v47  ;;  %v3255_v25 = vadd.f32 %v9323_v16, %v3254_v43  ;;  %vm3257_vm0 = vweird.f32 %v9323_v16 }
 0x506   : > { %12282 = vst [vmem:[#allocation50_spill] sm:$0xff] %v9422_v23  ;;  %v3396_v54 = vmul.f32 %v9143_v19, %v9121_v30  ;;  %v9438_v55 = vpop.eup %6321  ;;  %6327 = vrcp.f32 %v9416_v48  ;;  %v3233_v2 = vmul.f32 %v12285_v38, %v3232_v29  ;;  %v3217_v56 = vmul.f32 %v12286_v6, %v3216_v60  ;;  %v12298_v48 = vld [vmem:[#allocation112_spill] sm:$0xff] }
 0x507   : > { %12283 = vst [vmem:[#allocation35_spill] sm:$0xff] %v9425_v51  ;;  %v3262_v8 = vand.u32 2147483648, %v9227_v28  ;;  %v3249_v44 = vmul.f32 %v12287_v9, %v3248_v0  ;;  %vm3256_vm8 = vweird.f32 %v9227_v28  ;;  %v3260_v43 = vand.u32 2147483647, %v9227_v28 }
 0x508   : > { %12284 = vst [vmem:[#allocation23_spill] sm:$0xff] %v9428_v21  ;;  %v3397_v47 = vsub.f32 1.0, %v3396_v54  ;;  %6329 = vrcp.f32 %v9419_v31  ;;  %vm9452_vm9 = vmor %vm3256_vm8, %vm3257_vm0  ;;  %v3414_v60 = vmul.f32 %v9152_v12, %v3413_v18  ;;  %v3428_v6 = vmul.f32 %v9157_v4, %v9125_v26  ;;  %v12296_v31 = vld [vmem:[#allocation111_spill] sm:$0xff] }
 0x509   : > { %6331 = vrcp.f32 %v9422_v23  ;;  %v3259_v28 = vsel %vm9452_vm9, %v9323_v16, %v3255_v25  ;;  %vm3416_vm10 = vweird.f32 %v9123_v7  ;;  %v9471_v9 = vperm.slane %v9366_v52, 7 }
 0x50a   : > { %v3398_v54 = vmul.f32 %v9143_v19, %v3397_v47  ;;  %6333 = vrcp.f32 %v9425_v51  ;;  %vm3261_vm11 = vcmp.eq.f32.partialorder %v3260_v43, 8.507059e+37  ;;  %v3415_v25 = vadd.f32 %v9152_v12, %v3414_v60  ;;  %v12295_v43 = vld [vmem:[#allocation116_spill] sm:$0xff] }
 0x50b   : > { %4215 = vperm.xlu1 %5744, %v3233_v2   ;;  %4205 = vperm.xlu0 %5746, %v3217_v56   ;;  %v9464_v2 = vpop.eup %6323  ;;  %v3263_v56 = vor.u32 1.1754944e-38, %v3262_v8  ;;  %12292 = vst [vmem:[#allocation49_spill] sm:$0xff] %v9471_v9  ;;  %6335 = vrcp.f32 %v9428_v21  ;;  %vm3417_vm7 = vweird.f32 %v9152_v12  ;;  %v3429_v8 = vsub.f32 1.0, %v3428_v6 }
 0x50c   : > { %4225 = vperm.xlu2 %5745, %v3249_v44   ;;  %12290 = vst [vmem:[#allocation29_spill] sm:$0xff] %v9464_v2  ;;  %v9468_v18 = vpop.eup %6325  ;;  %v9475_v44 = vperm.slane %v9448_v42, 0  ;;  %v9482_v38 = vperm.slane %v9448_v42, 1  ;;  %v3422_v52 = vand.u32 2147483648, %v9123_v7  ;;  %v3399_v51 = vadd.f32 %v9143_v19, %v3398_v54  ;;  %vm9501_vm13 = vmor %vm3416_vm10, %vm3417_vm7 }
 0x50d   : > { %12291 = vst [vmem:[#allocation26_spill] sm:$0xff] %v9468_v18  ;;  %v9477_v16 = vpop.eup %6327  ;;  %v3264_v47 = vsel %vm3261_vm11, %v3263_v56, %v3259_v28  ;;  %vm3401_vm12 = vweird.f32 %v9143_v19  ;;  %v3250_v23 = vmul.f32 %v12295_v43, %v3248_v0  ;;  %v3234_v28 = vmul.f32 %v12296_v31, %v3232_v29 }
 0x50e   : > { %12293 = vst [vmem:[#allocation52_spill] sm:$0xff] %v9477_v16  ;;  %v9487_v21 = vpop.eup %6329  ;;  %v3420_v60 = vand.u32 2147483647, %v9123_v7  ;;  %v3406_v56 = vand.u32 2147483648, %v9121_v30  ;;  %v9496_v16 = vperm.slane %v9448_v42, 2  ;;  %v3266_v18 = vmul.f32 %v12298_v48, %v3264_v47 }
 0x50f   : > { %12294 = vst [vmem:[#allocation63_spill] sm:$0xff] %v9487_v21  ;;  %v9493_v6 = vpop.eup %6331  ;;  %vm3400_vm14 = vweird.f32 %v9121_v30  ;;  %v3404_v31 = vand.u32 2147483647, %v9121_v30  ;;  %6337 = vrcp.f32 %v9471_v9  ;;  %v3419_v48 = vsel %vm9501_vm13, %v9152_v12, %v3415_v25  ;;  %v12314_v21 = vld [vmem:[#allocation115_spill] sm:$0xff] }
 0x510   : > { %12297 = vst [vmem:[#allocation75_spill] sm:$0xff] %v9493_v6  ;;  %v9507_v29 = vpop.eup %6333  ;;  %vm9515_vm15 = vmor %vm3400_vm14, %vm3401_vm12  ;;  %v3430_v0 = vmul.f32 %v9157_v4, %v3429_v8  ;;  %v3460_v30 = vmul.f32 %v9167_v22, %v9129_v24  ;;  %v3444_v25 = vmul.f32 %v9162_v32, %v9127_v49  ;;  %v9533_v54 = vperm.slane %v9448_v42, 4 }
 0x511   : > { %12301 = vst [vmem:[#allocation138_spill] sm:$0xff] %v9507_v29  ;;  %v9522_v43 = vpop.eup %6335  ;;  %v3403_v12 = vsel %vm9515_vm15, %v9143_v19, %v3399_v51  ;;  %6339 = vrcp.f32 %v9475_v44  ;;  %vm3421_vm0 = vcmp.eq.f32.partialorder %v3420_v60, 8.507059e+37  ;;  %v3407_v8 = vor.u32 1.1754944e-38, %v3406_v56 }
 0x512   : > { %12304 = vst [vmem:[#allocation168_spill] sm:$0xff] %v9522_v43  ;;  %v9537_v9 = vperm.slane %v9448_v42, 5  ;;  %6341 = vrcp.f32 %v9482_v38  ;;  %vm3405_vm8 = vcmp.eq.f32.partialorder %v3404_v31, 8.507059e+37  ;;  %v3431_v19 = vadd.f32 %v9157_v4, %v3430_v0  ;;  %v12307_v31 = vld [vmem:[#allocation113_spill] sm:$0xff] }
 0x513   : > { %4230 = vperm.xlu1 %5744, %v3250_v23   ;;  %4220 = vperm.xlu0 %5746, %v3234_v28   ;;  %v9525_v23 = vperm.slane %v9448_v42, 3  ;;  %v3423_v28 = vor.u32 1.1754944e-38, %v3422_v52  ;;  %v3408_v52 = vsel %vm3405_vm8, %v3407_v8, %v3403_v12  ;;  %vm3433_vm9 = vweird.f32 %v9157_v4  ;;  %v12308_v8 = vld [vmem:[#allocation114_spill] sm:$0xff] }
 0x514   : > { %4240 = vperm.xlu2 %5745, %v3266_v18   ;;  %v3461_v51 = vsub.f32 1.0, %v3460_v30  ;;  %v9545_v7 = vperm.slane %v9448_v42, 6  ;;  %6343 = vrcp.f32 %v9496_v16  ;;  %v3438_v60 = vand.u32 2147483648, %v9125_v26 }
 0x515   : > { %v9540_v18 = vsel %vm3421_vm0, %v3423_v28, %v3419_v48  ;;  %v3445_v56 = vsub.f32 1.0, %v3444_v25  ;;  %v9549_v43 = vpop.eup %6337  ;;  %v12306_v48 = vld [vmem:[#allocation119_spill] sm:$0xff]  ;;  %v3265_v12 = vmul.f32 %v12307_v31, %v3264_v47  ;;  %vm3432_vm10 = vweird.f32 %v9125_v26  ;;  %v9568_v47 = vpop.xlane.xlu0 %2995 }
 0x516   : > { %12305 = vst [vmem:[#allocation105_spill] sm:$0xff] %v9549_v43  ;;  %v3425_v28 = vmul.f32 %v12306_v48, %v9540_v18  ;;  %v3436_v0 = vand.u32 2147483647, %v9125_v26  ;;  %v9557_v30 = vperm.slane %v9448_v42, 7  ;;  %6345 = vrcp.f32 %v9525_v23  ;;  %vm9561_vm11 = vmor %vm3432_vm10, %vm3433_vm9 }
 0x517   : > { %v3410_v29 = vmul.f32 %v12308_v8, %v3408_v52  ;;  %v9565_v43 = vpop.eup %6339  ;;  %6347 = vrcp.f32 %v9533_v54  ;;  %v3435_v26 = vsel %vm9561_vm11, %v9157_v4, %v3431_v19  ;;  %v3462_v42 = vmul.f32 %v9167_v22, %v3461_v51 }
 0x518   : > { %v3476_v48 = vmul.f32 %v9172_v34, %v9132_v1  ;;  %v9576_v31 = vpop.eup %6341  ;;  %6349 = vrcp.f32 %v9537_v9  ;;  %v3439_v8 = vor.u32 1.1754944e-38, %v3438_v60  ;;  %v3446_v6 = vmul.f32 %v9162_v32, %v3445_v56 }
 0x519   : > { %6351 = vrcp.f32 %v9545_v7  ;;  %vm3437_vm7 = vcmp.eq.f32.partialorder %v3436_v0, 8.507059e+37  ;;  %v9585_v4 = vperm.slane %v9568_v47, 0  ;;  %v9588_v51 = vperm.slane %v9568_v47, 1 }
 0x51a   : > { %6353 = vrcp.f32 %v9557_v30  ;;  %v3440_v19 = vsel %vm3437_vm7, %v3439_v8, %v3435_v26  ;;  %vm3465_vm12 = vweird.f32 %v9167_v22  ;;  %vm3464_vm13 = vweird.f32 %v9129_v24  ;;  %v12313_v26 = vld [vmem:[#allocation122_spill] sm:$0xff] }
 0x51b   : > { %4335 = vperm.xlu1 %5744, %v3425_v28   ;;  %4235 = vperm.xlu0 %5746, %v3265_v12   ;;  %v9581_v28 = vpop.eup %6343  ;;  %12311 = vst [vmem:[#allocation102_spill] sm:$0xff] %v9585_v4  ;;  %v3463_v12 = vadd.f32 %v9167_v22, %v3462_v42  ;;  %v3470_v56 = vand.u32 2147483648, %v9129_v24  ;;  %v3447_v0 = vadd.f32 %v9162_v32, %v3446_v6  ;;  %vm3449_vm14 = vweird.f32 %v9162_v32  ;;  %vm9607_vm15 = vmor %vm3464_vm13, %vm3465_vm12 }
 0x51c   : > { %4330 = vperm.xlu2 %5745, %v3410_v29   ;;  %12312 = vst [vmem:[#allocation60_spill] sm:$0xff] %v9588_v51  ;;  %v3477_v29 = vsub.f32 1.0, %v3476_v48  ;;  %v9592_v60 = vpop.eup %6345  ;;  %v3442_v8 = vmul.f32 %v12313_v26, %v3440_v19  ;;  %v3409_v2 = vmul.f32 %v12314_v21, %v3408_v52  ;;  %v3468_v42 = vand.u32 2147483647, %v9129_v24 }
 0x51d   : > { %v9598_v25 = vpop.eup %6347  ;;  %v3454_v48 = vand.u32 2147483648, %v9127_v49  ;;  %v3441_v37 = vmul.f32 %v12315_v63, %v3440_v19  ;;  %vm3448_vm0 = vweird.f32 %v9127_v49  ;;  %v3452_v6 = vand.u32 2147483647, %v9127_v49 }
 0x51e   : > { %v9604_v33 = vpop.eup %6349  ;;  %v3508_v26 = vmul.f32 %v9182_v17, %v9138_v50  ;;  %v9618_v24 = vperm.slane %v9568_v47, 2  ;;  %v3467_v63 = vsel %vm9607_vm15, %v9167_v22, %v3463_v12  ;;  %vm9625_vm8 = vmor %vm3448_vm0, %vm3449_vm14  ;;  %v3478_v49 = vmul.f32 %v9172_v34, %v3477_v29 }
 0x51f   : > { %v9615_v21 = vpop.eup %6351  ;;  %v3492_v19 = vmul.f32 %v9177_v40, %v9135_v3  ;;  %6355 = vrcp.f32 %v9585_v4  ;;  %v3471_v22 = vor.u32 1.1754944e-38, %v3470_v56  ;;  %v3451_v41 = vsel %vm9625_vm8, %v9162_v32, %v3447_v0 }
 0x520   : > { %12318 = vst [vmem:[#allocation24_spill] sm:$0xff] %v9618_v24  ;;  %v9632_v36 = vpop.eup %6353  ;;  %6357 = vrcp.f32 %v9588_v51  ;;  %vm3469_vm9 = vcmp.eq.f32.partialorder %v3468_v42, 8.507059e+37  ;;  %v3455_v12 = vor.u32 1.1754944e-38, %v3454_v48  ;;  %vm3453_vm10 = vcmp.eq.f32.partialorder %v3452_v6, 8.507059e+37  ;;  %v12324_v48 = vld [vmem:[#allocation56_spill] sm:$0xff] }
 0x521   : > { %v9645_v29 = vsel %vm3469_vm9, %v3471_v22, %v3467_v63  ;;  %v3509_v15 = vsub.f32 1.0, %v3508_v26  ;;  %v3284_v4 = vmul.f32 %v9364_v57, %v9296_v58  ;;  %v3479_v56 = vadd.f32 %v9172_v34, %v3478_v49  ;;  %v12325_v26 = vld [vmem:[#allocation117_spill] sm:$0xff]  ;;  %v12326_v22 = vld [vmem:[#allocation118_spill] sm:$0xff] }
 0x522   : > { %vm3481_vm11 = vweird.f32 %v9172_v34  ;;  %v3493_v32 = vsub.f32 1.0, %v3492_v19  ;;  %v9652_v0 = vperm.slane %v9568_v47, 5  ;;  %v9655_v52 = vperm.slane %v9568_v47, 6 }
 0x523   : > { %4350 = vperm.xlu1 %5744, %v3442_v8   ;;  %4325 = vperm.xlu0 %5746, %v3409_v2   ;;  %v9635_v8 = vperm.slane %v9568_v47, 3  ;;  %v9642_v2 = vperm.slane %v9568_v47, 4  ;;  %6359 = vrcp.f32 %v9618_v24  ;;  %v3486_v42 = vand.u32 2147483648, %v9132_v1 }
 0x524   : > { %4345 = vperm.xlu2 %5745, %v3441_v37   ;;  %v3456_v37 = vsel %vm3453_vm10, %v3455_v12, %v3451_v41  ;;  %12322 = vst [vmem:[#allocation17_spill] sm:$0xff] %v9652_v0  ;;  %v3473_v6 = vmul.f32 %v12324_v48, %v9645_v29  ;;  %v3426_v63 = vmul.f32 %v12325_v26, %v9540_v18  ;;  %vm3480_vm7 = vweird.f32 %v9132_v1 }
 0x525   : > { %12321 = vst [vmem:[#allocation11_spill] sm:$0xff] %v9642_v2  ;;  %v3484_v49 = vand.u32 2147483647, %v9132_v1  ;;  %v9665_v19 = vpop.eup %6355  ;;  %6361 = vrcp.f32 %v9635_v8  ;;  %v3458_v41 = vmul.f32 %v12326_v22, %v3456_v37  ;;  %vm9669_vm12 = vmor %vm3480_vm7, %vm3481_vm11  ;;  %v3510_v24 = vmul.f32 %v9182_v17, %v3509_v15 }
 0x526   : > { %12323 = vst [vmem:[#allocation19_spill] sm:$0xff] %v9655_v52  ;;  %v3285_v48 = vsub.f32 1.0, %v3284_v4  ;;  %v9674_v51 = vpop.eup %6357  ;;  %6363 = vrcp.f32 %v9642_v2  ;;  %v3483_v1 = vsel %vm9669_vm12, %v9172_v34, %v3479_v56  ;;  %v3494_v18 = vmul.f32 %v9177_v40, %v3493_v32 }
 0x527   : > { %v3268_v26 = vmul.f32 %v9352_v20, %v9293_v5  ;;  %6365 = vrcp.f32 %v9652_v0  ;;  %v3487_v15 = vor.u32 1.1754944e-38, %v3486_v42  ;;  %v9685_v4 = vperm.slane %v9568_v47, 7 }
 0x528   : > { %6367 = vrcp.f32 %v9655_v52  ;;  %vm3485_vm13 = vcmp.eq.f32.partialorder %v3484_v49, 8.507059e+37  ;;  %v3511_v34 = vadd.f32 %v9182_v17, %v3510_v24  ;;  %vm3513_vm14 = vweird.f32 %v9182_v17  ;;  %v12333_v52 = vld [vmem:[#allocation121_spill] sm:$0xff] }
 0x529   : > { %12329 = vst [vmem:[#allocation108_spill] sm:$0xff] %v9685_v4  ;;  %v3286_v56 = vmul.f32 %v9364_v57, %v3285_v48  ;;  %v3518_v32 = vand.u32 2147483648, %v9138_v50  ;;  %v3495_v22 = vadd.f32 %v9177_v40, %v3494_v18  ;;  %vm3497_vm15 = vweird.f32 %v9177_v40  ;;  %v12332_v48 = vld [vmem:[#allocation125_spill] sm:$0xff] }
 0x52a   : > { %v3269_v47 = vsub.f32 1.0, %v3268_v26  ;;  %vm3512_vm0 = vweird.f32 %v9138_v50  ;;  %v3516_v12 = vand.u32 2147483647, %v9138_v50  ;;  %v3502_v24 = vand.u32 2147483648, %v9135_v3 }
 0x52b   : > { %4365 = vperm.xlu1 %5744, %v3473_v6   ;;  %4340 = vperm.xlu0 %5746, %v3426_v63   ;;  %v9688_v6 = vpop.eup %6359  ;;  %v3488_v63 = vsel %vm3485_vm13, %v3487_v15, %v3483_v1  ;;  %vm9706_vm8 = vmor %vm3512_vm0, %vm3513_vm14  ;;  %vm3496_vm9 = vweird.f32 %v9135_v3  ;;  %vm3289_vm11 = vweird.f32 %v9364_v57  ;;  %vm3288_vm12 = vweird.f32 %v9296_v58 }
 0x52c   : > { %4360 = vperm.xlu2 %5745, %v3458_v41   ;;  %v9696_v42 = vpop.eup %6361  ;;  %v12330_v41 = vld [vmem:[#allocation120_spill] sm:$0xff]  ;;  %v3490_v15 = vmul.f32 %v12332_v48, %v3488_v63  ;;  %v3489_v0 = vmul.f32 %v12333_v52, %v3488_v63  ;;  %v3515_v50 = vsel %vm9706_vm8, %v9182_v17, %v3511_v34  ;;  %vm9719_vm10 = vmor %vm3496_vm9, %vm3497_vm15  ;;  %v3287_v52 = vadd.f32 %v9364_v57, %v3286_v56 }
 0x52d   : > { %v3457_v49 = vmul.f32 %v12330_v41, %v3456_v37  ;;  %v9702_v1 = vpop.eup %6363  ;;  %v3500_v37 = vand.u32 2147483647, %v9135_v3  ;;  %v3300_v63 = vmul.f32 %v9371_v62, %v9305_v35  ;;  %v3519_v48 = vor.u32 1.1754944e-38, %v3518_v32  ;;  %vm9739_vm14 = vmor %vm3288_vm12, %vm3289_vm11  ;;  %v12343_v41 = vld [vmem:[#allocation123_spill] sm:$0xff] }
 0x52e   : > { %12331 = vst [vmem:[#allocation106_spill] sm:$0xff] %v9702_v1  ;;  %v9712_v26 = vpop.eup %6365  ;;  %v3499_v17 = vsel %vm9719_vm10, %v9177_v40, %v3495_v22  ;;  %v3294_v34 = vand.u32 2147483648, %v9296_v58  ;;  %v3270_v18 = vmul.f32 %v9352_v20, %v3269_v47  ;;  %vm3517_vm7 = vcmp.eq.f32.partialorder %v3516_v12, 8.507059e+37 }
 0x52f   : > { %12336 = vst [vmem:[#allocation20_spill] sm:$0xff] %v9712_v26  ;;  %v9727_v3 = vpop.eup %6367  ;;  %v3503_v56 = vor.u32 1.1754944e-38, %v3502_v24  ;;  %v3292_v26 = vand.u32 2147483647, %v9296_v58  ;;  %6369 = vrcp.f32 %v9685_v4  ;;  %vm3501_vm13 = vcmp.eq.f32.partialorder %v3500_v37, 8.507059e+37  ;;  %v12342_v37 = vld [vmem:[#allocation126_spill] sm:$0xff] }
 0x530   : > { %12339 = vst [vmem:[#allocation12_spill] sm:$0xff] %v9727_v3  ;;  %v3276_v40 = vand.u32 2147483647, %v9293_v5  ;;  %v3278_v47 = vand.u32 2147483648, %v9293_v5  ;;  %v3301_v58 = vsub.f32 1.0, %v3300_v63  ;;  %v3271_v12 = vadd.f32 %v9352_v20, %v3270_v18  ;;  %v12345_v63 = vld [vmem:[#allocation54_spill] sm:$0xff] }
 0x531   : > { %v3504_v22 = vsel %vm3501_vm13, %v3503_v56, %v3499_v17  ;;  %vm3273_vm15 = vweird.f32 %v9352_v20  ;;  %v3332_v24 = vmul.f32 %v9389_v10, %v9313_v53  ;;  %vm3293_vm0 = vcmp.eq.f32.partialorder %v3292_v26, 8.507059e+37  ;;  %v12350_v4 = vld [vmem:[#allocation13_spill] sm:$0xff] }
 0x532   : > { %vm3272_vm8 = vweird.f32 %v9293_v5  ;;  %vm9758_vm9 = vcmp.eq.f32.partialorder %v3276_v40, 8.507059e+37  ;;  %v3302_v5 = vmul.f32 %v9371_v62, %v3301_v58  ;;  %vm3304_vm11 = vweird.f32 %v9305_v35  ;;  %v12361_v18 = vld [vmem:[#allocation33_spill] sm:$0xff] }
 0x533   : > { %4380 = vperm.xlu1 %5744, %v3490_v15   ;;  %4355 = vperm.xlu0 %5746, %v3457_v49   ;;  %v3520_v15 = vsel %vm3517_vm7, %v3519_v48, %v3515_v50  ;;  %v3295_v49 = vor.u32 1.1754944e-38, %v3294_v34  ;;  %v3474_v48 = vmul.f32 %v12343_v41, %v9645_v29  ;;  %v3505_v34 = vmul.f32 %v12345_v63, %v3504_v22  ;;  %vm9762_vm10 = vmor %vm3272_vm8, %vm3273_vm15 }
 0x534   : > { %4375 = vperm.xlu2 %5745, %v3489_v0   ;;  %v3291_v0 = vsel %vm9739_vm14, %v9364_v57, %v3287_v52  ;;  %v3521_v50 = vmul.f32 %v12342_v37, %v3520_v15  ;;  %v3002_v57 = vpop.xlane.xlu2 %3001  ;;  %v12344_v52 = vld [vmem:[#allocation124_spill] sm:$0xff]  ;;  %v3279_v37 = vor.u32 1.1754944e-38, %v3278_v47  ;;  %v9767_v29 = vmul.f32 %v12350_v4, %v3520_v15  ;;  %v12352_v47 = vld [vmem:[#allocation58_spill] sm:$0xff] }
 0x535   : > { %v3506_v17 = vmul.f32 %v12344_v52, %v3504_v22  ;;  %v3296_v56 = vsel %vm3293_vm0, %v3295_v49, %v3291_v0  ;;  %v9771_v26 = vpop.eup %6369  ;;  %v3275_v40 = vsel %vm9762_vm10, %v9352_v20, %v3271_v12  ;;  %v3333_v22 = vsub.f32 1.0, %v3332_v24 }
 0x536   : > { %12351 = vst [vmem:[#allocation107_spill] sm:$0xff] %v9771_v26  ;;  %v3316_v0 = vmul.f32 %v9377_v46, %v9310_v27  ;;  %v3348_v4 = vmul.f32 %v9406_v14, %v9316_v45  ;;  %v9780_v15 = vperm.slane %v3002_v57, 0  ;;  %v3297_v58 = vmul.f32 %v12352_v47, %v3296_v56 }
 0x537   : > { %vm3305_vm7 = vweird.f32 %v9371_v62  ;;  %v3308_v49 = vand.u32 2147483647, %v9305_v35  ;;  %v9787_v41 = vperm.slane %v3002_v57, 2  ;;  %v9789_v20 = vperm.slane %v3002_v57, 3 }
 0x538   : > { %v3310_v12 = vand.u32 2147483648, %v9305_v35  ;;  %v9792_v24 = vperm.slane %v3002_v57, 4  ;;  %v3280_v52 = vsel %vm9758_vm9, %v3279_v37, %v3275_v40  ;;  %v3334_v63 = vmul.f32 %v9389_v10, %v3333_v22  ;;  %vm9817_vm13 = vmor %vm3304_vm11, %vm3305_vm7 }
 0x539   : > { %12354 = vst [vmem:[#allocation109_spill] sm:$0xff] %v9787_v41  ;;  %v3317_v32 = vsub.f32 1.0, %v3316_v0  ;;  %v3349_v47 = vsub.f32 1.0, %v3348_v4  ;;  %v3380_v26 = vmul.f32 %v9438_v55, %v9358_v59  ;;  %v9802_v3 = vperm.slane %v3002_v57, 6  ;;  %v12364_v0 = vld [vmem:[#allocation39_spill] sm:$0xff] }
 0x53a   : > { %12355 = vst [vmem:[#allocation110_spill] sm:$0xff] %v9789_v20  ;;  %v9804_v1 = vperm.slane %v3002_v57, 7  ;;  %6371 = vrcp.f32 %v9780_v15  ;;  %vm9807_vm12 = vcmp.eq.f32.partialorder %v3308_v49, 8.507059e+37  ;;  %v3281_v37 = vmul.f32 %v12361_v18, %v3280_v52 }
 0x53b   : > { %4395 = vperm.xlu1 %5744, %v3521_v50   ;;  %4370 = vperm.xlu0 %5746, %v3474_v48   ;;  %v9785_v50 = vperm.slane %v3002_v57, 1  ;;  %12356 = vst [vmem:[#allocation116_spill] sm:$0xff] %v9792_v24  ;;  %v9794_v48 = vperm.slane %v3002_v57, 5  ;;  %v3311_v57 = vor.u32 1.1754944e-38, %v3310_v12  ;;  %v3340_v40 = vand.u32 2147483647, %v9313_v53 }
 0x53c   : > { %4390 = vperm.xlu2 %5745, %v3506_v17   ;;  %v3303_v17 = vadd.f32 %v9371_v62, %v3302_v5  ;;  %12357 = vst [vmem:[#allocation111_spill] sm:$0xff] %v9802_v3  ;;  %v3298_v4 = vmul.f32 %v12364_v0, %v3296_v56  ;;  %vm3337_vm14 = vweird.f32 %v9389_v10  ;;  %v3335_v35 = vadd.f32 %v9389_v10, %v3334_v63  ;;  %v12371_v3 = vld [vmem:[#allocation74_spill] sm:$0xff] }
 0x53d   : > { %12353 = vst [vmem:[#allocation21_spill] sm:$0xff] %v9785_v50  ;;  %6373 = vrcp.f32 %v9785_v50  ;;  %v3318_v49 = vmul.f32 %v9377_v46, %v3317_v32  ;;  %v3350_v12 = vmul.f32 %v9406_v14, %v3349_v47  ;;  %v3381_v18 = vsub.f32 1.0, %v3380_v26 }
 0x53e   : > { %12358 = vst [vmem:[#allocation112_spill] sm:$0xff] %v9804_v1  ;;  %6375 = vrcp.f32 %v9787_v41  ;;  %v3307_v22 = vsel %vm9817_vm13, %v9371_v62, %v3303_v17  ;;  %vm3336_vm15 = vweird.f32 %v9313_v53  ;;  %v3342_v62 = vand.u32 2147483648, %v9313_v53 }
 0x53f   : > { %6377 = vrcp.f32 %v9789_v20  ;;  %v3364_v56 = vmul.f32 %v9431_v39, %v9355_v61  ;;  %vm9839_vm0 = vcmp.eq.f32.partialorder %v3340_v40, 8.507059e+37  ;;  %vm3321_vm8 = vweird.f32 %v9377_v46  ;;  %vm9848_vm9 = vmor %vm3336_vm15, %vm3337_vm14  ;;  %v12372_v20 = vld [vmem:[#allocation68_spill] sm:$0xff] }
 0x540   : > { %6379 = vrcp.f32 %v9792_v24  ;;  %v9844_v26 = vpop.eup %6371  ;;  %v3326_v63 = vand.u32 2147483648, %v9310_v27  ;;  %vm3353_vm10 = vweird.f32 %v9406_v14  ;;  %v3356_v2 = vand.u32 2147483647, %v9316_v45 }
 0x541   : > { %v3339_v47 = vsel %vm9848_vm9, %v9389_v10, %v3335_v35  ;;  %v3351_v5 = vadd.f32 %v9406_v14, %v3350_v12  ;;  %vm3320_vm11 = vweird.f32 %v9310_v27  ;;  %v3365_v0 = vsub.f32 1.0, %v3364_v56 }
 0x542   : > { %v3524_v1 = vmul.f32 %v9565_v43, %v9475_v44  ;;  %v3282_v53 = vmul.f32 %v12372_v20, %v3280_v52  ;;  %vm9873_vm7 = vmor %vm3320_vm11, %vm3321_vm8  ;;  %v3358_v35 = vand.u32 2147483648, %v9316_v45  ;;  %vm9893_vm15 = vcmp.eq.f32.partialorder %v3356_v2, 8.507059e+37  ;;  %v12388_v20 = vld [vmem:[#allocation48_spill] sm:$0xff] }
 0x543   : > { %4385 = vperm.xlu0 %5746, %v3505_v34   ;;  %4245 = vperm.xlu1 %5744, %v3281_v37   ;;  %v3312_v34 = vsel %vm9807_vm12, %v3311_v57, %v3307_v22  ;;  %v9856_v32 = vpop.eup %6373  ;;  %v3319_v37 = vadd.f32 %v9377_v46, %v3318_v49  ;;  %v3382_v57 = vmul.f32 %v9438_v55, %v3381_v18  ;;  %v3343_v22 = vor.u32 1.1754944e-38, %v3342_v62 }
 0x544   : > { %4255 = vperm.xlu2 %5745, %v3297_v58   ;;  %v3324_v58 = vand.u32 2147483647, %v9310_v27  ;;  %12369 = vst [vmem:[#allocation119_spill] sm:$0xff] %v9856_v32  ;;  %v9864_v40 = vpop.eup %6375  ;;  %v3314_v24 = vmul.f32 %v12371_v3, %v3312_v34  ;;  %vm3352_vm12 = vweird.f32 %v9316_v45  ;;  %v3327_v3 = vor.u32 1.1754944e-38, %v3326_v63  ;;  %v12383_v63 = vld [vmem:[#allocation127_spill] sm:$0xff] }
 0x545   : > { %12370 = vst [vmem:[#allocation113_spill] sm:$0xff] %v9864_v40  ;;  %v9879_v49 = vpop.eup %6377  ;;  %v3344_v27 = vsel %vm9839_vm0, %v3343_v22, %v3339_v47  ;;  %vm9889_vm14 = vmor %vm3352_vm12, %vm3353_vm10  ;;  %v3323_v18 = vsel %vm9873_vm7, %v9377_v46, %v3319_v37  ;;  %v3383_v56 = vadd.f32 %v9438_v55, %v3382_v57  ;;  %vm3385_vm0 = vweird.f32 %v9438_v55  ;;  %v12384_v37 = vld [vmem:[#allocation129_spill] sm:$0xff] }
 0x546   : > { %12375 = vst [vmem:[#allocation114_spill] sm:$0xff] %v9879_v49  ;;  %vm9883_vm13 = vcmp.eq.f32.partialorder %v3324_v58, 8.507059e+37  ;;  %v9897_v45 = vpop.eup %6379  ;;  %v3355_v62 = vsel %vm9889_vm14, %v9406_v14, %v3351_v5  ;;  %v3366_v17 = vmul.f32 %v9431_v39, %v3365_v0  ;;  %v3525_v58 = vsub.f32 1.0, %v3524_v1  ;;  %v12385_v5 = vld [vmem:[#allocation40_spill] sm:$0xff] }
 0x547   : > { %12382 = vst [vmem:[#allocation122_spill] sm:$0xff] %v9897_v45  ;;  %v3345_v46 = vmul.f32 %v12383_v63, %v3344_v27  ;;  %v3359_v2 = vor.u32 1.1754944e-38, %v3358_v35  ;;  %vm3384_vm8 = vweird.f32 %v9358_v59  ;;  %v3390_v14 = vand.u32 2147483648, %v9358_v59 }
 0x548   : > { %v3313_v1 = vmul.f32 %v12384_v37, %v3312_v34  ;;  %v3346_v57 = vmul.f32 %v12385_v5, %v3344_v27  ;;  %vm9922_vm9 = vmor %vm3384_vm8, %vm3385_vm0  ;;  %v3388_v0 = vand.u32 2147483647, %v9358_v59  ;;  %vm3368_vm10 = vweird.f32 %v9355_v61 }
 0x549   : > { %v3360_v10 = vsel %vm9893_vm15, %v3359_v2, %v3355_v62  ;;  %v3387_v35 = vsel %vm9922_vm9, %v9438_v55, %v3383_v56  ;;  %vm3369_vm11 = vweird.f32 %v9431_v39  ;;  %v3367_v34 = vadd.f32 %v9431_v39, %v3366_v17  ;;  %v12389_v55 = vld [vmem:[#allocation131_spill] sm:$0xff] }
 0x54a   : > { %v3526_v27 = vmul.f32 %v9565_v43, %v3525_v58  ;;  %v3391_v59 = vor.u32 1.1754944e-38, %v3390_v14  ;;  %v3374_v52 = vand.u32 2147483648, %v9355_v61  ;;  %v3556_v62 = vmul.f32 %v9581_v28, %v9496_v16  ;;  %v12390_v58 = vld [vmem:[#allocation91_spill] sm:$0xff]  ;;  %vm9950_vm12 = vmor %vm3368_vm10, %vm3369_vm11 }
 0x54b   : > { %4400 = vperm.xlu0 %5746, %v9767_v29   ;;  %4260 = vperm.xlu1 %5744, %v3298_v4   ;;  %v3540_v29 = vmul.f32 %v9576_v31, %v9482_v38  ;;  %v3572_v4 = vmul.f32 %v9592_v60, %v9525_v23  ;;  %vm3389_vm7 = vcmp.eq.f32.partialorder %v3388_v0, 8.507059e+37  ;;  %v3372_v63 = vand.u32 2147483647, %v9355_v61 }
 0x54c   : > { %4270 = vperm.xlu2 %5745, %v3314_v24   ;;  %v3328_v24 = vsel %vm9883_vm13, %v3327_v3, %v3323_v18  ;;  %v3532_v17 = vand.u32 2147483647, %v9475_v44  ;;  %vm3529_vm13 = vweird.f32 %v9565_v43  ;;  %v3534_v14 = vand.u32 2147483648, %v9475_v44 }
 0x54d   : > { %v3541_v12 = vsub.f32 1.0, %v3540_v29  ;;  %v3573_v3 = vsub.f32 1.0, %v3572_v4  ;;  %v3329_v18 = vmul.f32 %v12388_v20, %v3328_v24  ;;  %v9941_v56 = vmul.f32 %v12389_v55, %v3328_v24 }
 0x54e   : > { %v9916_v47 = vpop.permute.xlu2 %4175  ;;  %v3362_v29 = vmul.f32 %v12390_v58, %v3360_v10  ;;  %v3392_v4 = vsel %vm3389_vm7, %v3391_v59, %v3387_v35  ;;  %v3527_v24 = vadd.f32 %v9565_v43, %v3526_v27  ;;  %v3375_v61 = vor.u32 1.1754944e-38, %v3374_v52 }
 0x54f   : > { %v3542_v37 = vmul.f32 %v9576_v31, %v3541_v12  ;;  %v3574_v5 = vmul.f32 %v9592_v60, %v3573_v3  ;;  %vm3528_vm14 = vweird.f32 %v9475_v44  ;;  %v3557_v22 = vsub.f32 1.0, %v3556_v62 }
 0x550   : > { %v3588_v0 = vmul.f32 %v9598_v25, %v9533_v54  ;;  %vm3373_vm15 = vcmp.eq.f32.partialorder %v3372_v63, 8.507059e+37  ;;  %vm9970_vm0 = vcmp.eq.f32.partialorder %v3532_v17, 8.507059e+37  ;;  %vm9979_vm8 = vmor %vm3528_vm14, %vm3529_vm13  ;;  %v3535_v3 = vor.u32 1.1754944e-38, %v3534_v14  ;;  %v12402_v14 = vld [vmem:[#allocation36_spill] sm:$0xff] }
 0x551   : > { %vm3545_vm9 = vweird.f32 %v9576_v31  ;;  %v3531_v52 = vsel %vm9979_vm8, %v9565_v43, %v3527_v24  ;;  %v3575_v62 = vadd.f32 %v9592_v60, %v3574_v5  ;;  %vm3577_vm10 = vweird.f32 %v9592_v60 }
 0x552   : > { %vm3544_vm11 = vweird.f32 %v9482_v38  ;;  %v3558_v55 = vmul.f32 %v9581_v28, %v3557_v22  ;;  %v3589_v63 = vsub.f32 1.0, %v3588_v0  ;;  %v3620_v17 = vmul.f32 %v9615_v21, %v9545_v7 }
 0x553   : > { %4250 = vperm.xlu0 %5746, %v3282_v53   ;;  %4275 = vperm.xlu1 %5744, %v3329_v18   ;;  %v3371_v53 = vsel %vm9950_vm12, %v9431_v39, %v3367_v34  ;;  %v12396_v34 = vld [vmem:[#allocation99_spill] sm:$0xff]  ;;  %v12399_v18 = vld [vmem:[#allocation53_spill] sm:$0xff]  ;;  %vm9997_vm7 = vmor %vm3544_vm11, %vm3545_vm9  ;;  %v3548_v43 = vand.u32 2147483647, %v9482_v38  ;;  %vm3576_vm12 = vweird.f32 %v9525_v23  ;;  %v3582_v2 = vand.u32 2147483648, %v9525_v23 }
 0x554   : > { %4285 = vperm.xlu2 %5745, %v3345_v46   ;;  %v12393_v46 = vld [vmem:[#allocation101_spill] sm:$0xff]  ;;  %v9975_v27 = vmul.f32 %v12396_v34, %v3360_v10  ;;  %v3376_v12 = vsel %vm3373_vm15, %v3375_v61, %v3371_v53  ;;  %v9984_v59 = vmul.f32 %v12399_v18, %v3392_v4  ;;  %v3543_v10 = vadd.f32 %v9576_v31, %v3542_v37  ;;  %v12403_v37 = vld [vmem:[#allocation134_spill] sm:$0xff]  ;;  %vm10013_vm13 = vmor %vm3576_vm12, %vm3577_vm10 }
 0x555   : > { %v9968_v20 = vmul.f32 %v12393_v46, %v3392_v4  ;;  %v3550_v4 = vand.u32 2147483648, %v9482_v38  ;;  %v3377_v53 = vmul.f32 %v12402_v14, %v3376_v12  ;;  %v3536_v24 = vsel %vm9970_vm0, %v3535_v3, %v3531_v52  ;;  %v12407_v3 = vld [vmem:[#allocation55_spill] sm:$0xff]  ;;  %v6387_v14 = vld [vmem:[%s6776_s25 + $0x10] sm:$0xff]  ;;  %v12413_v61 = vld [vmem:[#allocation86_spill] sm:$0xff] }
 0x556   : > { %v9965_v35 = vpop.permute.xlu2 %4195  ;;  %v10009_v5 = vmul.f32 %v12403_v37, %v3376_v12  ;;  %v3580_v38 = vand.u32 2147483647, %v9525_v23  ;;  %vm3561_vm14 = vweird.f32 %v9581_v28  ;;  %v3564_v22 = vand.u32 2147483647, %v9496_v16 }
 0x557   : > { %v3559_v0 = vadd.f32 %v9581_v28, %v3558_v55  ;;  %v3590_v46 = vmul.f32 %v9598_v25, %v3589_v63  ;;  %v3621_v39 = vsub.f32 1.0, %v3620_v17  ;;  %v3604_v23 = vmul.f32 %v9604_v33, %v9537_v9 }
 0x558   : > { %vm3549_vm15 = vcmp.eq.f32.partialorder %v3548_v43, 8.507059e+37  ;;  %v3583_v34 = vor.u32 1.1754944e-38, %v3582_v2  ;;  %v3566_v12 = vand.u32 2147483648, %v9496_v16  ;;  %v10037_v18 = vmul.f32 %v12407_v3, %v3536_v24 }
 0x559   : > { %vm3581_vm0 = vcmp.eq.f32.partialorder %v3580_v38, 8.507059e+37  ;;  %vm3560_vm8 = vweird.f32 %v9496_v16  ;;  %vm10046_vm10 = vcmp.eq.f32.partialorder %v3564_v22, 8.507059e+37  ;;  %vm3593_vm11 = vweird.f32 %v9598_v25 }
 0x55a   : > { %vm10042_vm9 = vmor %vm3560_vm8, %vm3561_vm14  ;;  %v3591_v16 = vadd.f32 %v9598_v25, %v3590_v46  ;;  %v3622_v17 = vmul.f32 %v9615_v21, %v3621_v39  ;;  %v3605_v58 = vsub.f32 1.0, %v3604_v23  ;;  %v3567_v43 = vor.u32 1.1754944e-38, %v3566_v12 }
 0x55b   : > { %4265 = vperm.xlu0 %5746, %v3313_v1   ;;  %4290 = vperm.xlu1 %5744, %v3346_v57   ;;  %v3547_v1 = vsel %vm9997_vm7, %v9576_v31, %v3543_v10  ;;  %v3579_v57 = vsel %vm10013_vm13, %v9592_v60, %v3575_v62  ;;  %v3551_v31 = vor.u32 1.1754944e-38, %v3550_v4  ;;  %v12406_v60 = vld [vmem:[#allocation70_spill] sm:$0xff]  ;;  %v3563_v63 = vsel %vm10042_vm9, %v9581_v28, %v3559_v0  ;;  %v12412_v28 = vld [vmem:[#allocation136_spill] sm:$0xff] }
 0x55c   : > { %4300 = vperm.xlu2 %5745, %v3362_v29   ;;  %v10034_v44 = vmul.f32 %v12406_v60, %v3536_v24  ;;  %v3584_v10 = vsel %vm3581_vm0, %v3583_v34, %v3579_v57  ;;  %vm3592_vm7 = vweird.f32 %v9533_v54  ;;  %v3598_v4 = vand.u32 2147483648, %v9533_v54  ;;  %v12414_v57 = vld [vmem:[#allocation85_spill] sm:$0xff] }
 0x55d   : > { %v3552_v52 = vsel %vm3549_vm15, %v3551_v31, %v3547_v1  ;;  %v3636_v2 = vmul.f32 %v9632_v36, %v9557_v30  ;;  %v10062_v24 = vmul.f32 %v6387_v14, %v9916_v47  ;;  %v3596_v1 = vand.u32 2147483647, %v9533_v54  ;;  %vm10080_vm12 = vmor %vm3592_vm7, %vm3593_vm11 }
 0x55e   : > { %v10030_v29 = vpop.permute.xlu2 %4210  ;;  %v10066_v37 = vmul.f32 %v12412_v28, %v3552_v52  ;;  %v10069_v38 = vmul.f32 %v12413_v61, %v3552_v52  ;;  %v10074_v22 = vmul.f32 %v12414_v57, %v3584_v10  ;;  %v3568_v47 = vsel %vm10046_vm10, %v3567_v43, %v3563_v63  ;;  %v6388_v28 = vld [vmem:[%s6776_s25 + $0x30] sm:$0xff] }
 0x55f   : > { %vm3625_vm13 = vweird.f32 %v9615_v21  ;;  %v3623_v39 = vadd.f32 %v9615_v21, %v3622_v17  ;;  %v3606_v23 = vmul.f32 %v9604_v33, %v3605_v58  ;;  %v3668_v31 = vmul.f32 %v9212_v13, %v9164_v11 }
 0x560   : > { %v3599_v12 = vor.u32 1.1754944e-38, %v3598_v4  ;;  %v3628_v60 = vand.u32 2147483647, %v9545_v7  ;;  %v3630_v3 = vand.u32 2147483648, %v9545_v7  ;;  %v3637_v52 = vsub.f32 1.0, %v3636_v2  ;;  %v12422_v4 = vld [vmem:[#allocation90_spill] sm:$0xff] }
 0x561   : > { %vm3597_vm14 = vcmp.eq.f32.partialorder %v3596_v1, 8.507059e+37  ;;  %vm3624_vm15 = vweird.f32 %v9545_v7  ;;  %vm3608_vm8 = vweird.f32 %v9537_v9  ;;  %vm3609_vm9 = vweird.f32 %v9604_v33  ;;  %v12423_v2 = vld [vmem:[#allocation100_spill] sm:$0xff] }
 0x562   : > { %vm10108_vm0 = vmor %vm3624_vm15, %vm3625_vm13  ;;  %v3614_v17 = vand.u32 2147483648, %v9537_v9  ;;  %v3607_v43 = vadd.f32 %v9604_v33, %v3606_v23  ;;  %v3669_v7 = vsub.f32 1.0, %v3668_v31  ;;  %v3652_v14 = vmul.f32 %v12423_v2, %v12422_v4  ;;  %v12429_v23 = vld [vmem:[#allocation65_spill] sm:$0xff] }
 0x563   : > { %4280 = vperm.xlu0 %5746, %v9941_v56   ;;  %4305 = vperm.xlu1 %5744, %v3377_v53   ;;  %v12417_v53 = vld [vmem:[#allocation132_spill] sm:$0xff]  ;;  %v3627_v58 = vsel %vm10108_vm0, %v9615_v21, %v3623_v39  ;;  %v10123_v61 = vmul.f32 %v6388_v28, %v9965_v35  ;;  %vm3629_vm10 = vcmp.eq.f32.partialorder %v3628_v60, 8.507059e+37  ;;  %v3631_v1 = vor.u32 1.1754944e-38, %v3630_v3  ;;  %v12425_v56 = vld [vmem:[#allocation142_spill] sm:$0xff]  ;;  %vm10141_vm11 = vmor %vm3608_vm8, %vm3609_vm9 }
 0x564   : > { %4315 = vperm.xlu2 %5745, %v9968_v20   ;;  %v10085_v0 = vmul.f32 %v12417_v53, %v3584_v10  ;;  %v3595_v20 = vsel %vm10080_vm12, %v9598_v25, %v3591_v16  ;;  %v12418_v10 = vld [vmem:[#allocation130_spill] sm:$0xff]  ;;  %v12419_v25 = vld [vmem:[#allocation140_spill] sm:$0xff]  ;;  %v3638_v57 = vmul.f32 %v9632_v36, %v3637_v52  ;;  %v3644_v35 = vand.u32 2147483647, %v9557_v30 }
 0x565   : > { %v4171_v54 = vpop.permute.xlu1 %4170  ;;  %v4166_v46 = vpop.permute.xlu0 %4165  ;;  %v10100_v62 = vmul.f32 %v12418_v10, %v3568_v47  ;;  %v10103_v55 = vmul.f32 %v12419_v25, %v3568_v47  ;;  %v3600_v63 = vsel %vm3597_vm14, %v3599_v12, %v3595_v20  ;;  %v12424_v47 = vld [vmem:[#allocation95_spill] sm:$0xff]  ;;  %v3612_v20 = vand.u32 2147483647, %v9537_v9  ;;  %v6389_v10 = vld [vmem:[%s6776_s25 + $0x8] sm:$0xff] }
 0x566   : > { %v10095_v34 = vpop.permute.xlu2 %4225  ;;  %v10129_v21 = vmul.f32 %v12424_v47, %v3600_v63  ;;  %v10132_v53 = vmul.f32 %v12425_v56, %v3600_v63  ;;  %v3632_v39 = vsel %vm3629_vm10, %v3631_v1, %v3627_v58  ;;  %vm3640_vm7 = vweird.f32 %v9557_v30  ;;  %v6390_v63 = vld [vmem:[%s6776_s25] sm:$0xff]  ;;  %v12430_v47 = vld [vmem:[#allocation144_spill] sm:$0xff] }
 0x567   : > { %vm3641_vm12 = vweird.f32 %v9632_v36  ;;  %v3615_v3 = vor.u32 1.1754944e-38, %v3614_v17  ;;  %v3670_v9 = vmul.f32 %v9212_v13, %v3669_v7  ;;  %v3653_v52 = vsub.f32 1.0, %v3652_v14 }
 0x568   : > { %v4804_v25 = vmul.f32 %v6389_v10, %v4171_v54  ;;  %v4803_v16 = vmul.f32 %v6390_v63, %v4166_v46  ;;  %v3639_v28 = vadd.f32 %v9632_v36, %v3638_v57  ;;  %v3646_v1 = vand.u32 2147483648, %v9557_v30  ;;  %v12433_v46 = vld [vmem:[#allocation135_spill] sm:$0xff]  ;;  %vm10175_vm15 = vmor %vm3640_vm7, %vm3641_vm12 }
 0x569   : > { %v10160_v56 = vmul.f32 %v12430_v47, %v3632_v39  ;;  %vm3613_vm13 = vcmp.eq.f32.partialorder %v3612_v20, 8.507059e+37  ;;  %vm10162_vm14 = vcmp.eq.f32.partialorder %v3644_v35, 8.507059e+37  ;;  %v3676_v54 = vand.u32 2147483647, %v9164_v11 }
 0x56a   : > { %v3678_v7 = vand.u32 2147483648, %v9164_v11  ;;  %v3671_v20 = vadd.f32 %v9212_v13, %v3670_v9  ;;  %vm3672_vm0 = vweird.f32 %v9164_v11  ;;  %vm3673_vm8 = vweird.f32 %v9212_v13  ;;  %v12436_v9 = vld [vmem:[#allocation133_spill] sm:$0xff] }
 0x56b   : > { %4295 = vperm.xlu0 %5746, %v9975_v27   ;;  %4320 = vperm.xlu1 %5744, %v9984_v59   ;;  %v12428_v59 = vld [vmem:[#allocation32_spill] sm:$0xff]  ;;  %v3654_v35 = vmul.f32 %v12423_v2, %v3653_v52  ;;  %v3643_v30 = vsel %vm10175_vm15, %v9632_v36, %v3639_v28  ;;  %vm10196_vm9 = vcmp.eq.f32.partialorder %v3676_v54, 8.507059e+37  ;;  %v12441_v36 = vld [vmem:[#allocation145_spill] sm:$0xff]  ;;  %vm10210_vm10 = vmor %vm3672_vm0, %vm3673_vm8  ;;  %vm3657_vm7 = vweird.f32 %v12423_v2 }
 0x56c   : > { %4405 = vperm.xlu2 %5745, %v10034_v44   ;;  %v3684_v31 = vmul.f32 %v12429_v23, %v12428_v59  ;;  %v3611_v44 = vsel %vm10141_vm11, %v9604_v33, %v3607_v43  ;;  %v10168_v43 = vmul.f32 %v12433_v46, %v3632_v39  ;;  %v6391_v39 = vld [vmem:[%s6776_s25 + $0x48] sm:$0xff]  ;;  %vm3656_vm11 = vweird.f32 %v12422_v4 }
 0x56d   : > { %v4186_v12 = vpop.permute.xlu1 %4185  ;;  %v4181_v60 = vpop.permute.xlu0 %4180  ;;  %v3616_v17 = vsel %vm3613_vm13, %v3615_v3, %v3611_v44  ;;  %v10185_v27 = vmul.f32 %v6391_v39, %v10030_v29  ;;  %v3647_v44 = vor.u32 1.1754944e-38, %v3646_v1  ;;  %v6392_v3 = vld [vmem:[%s6776_s25 + $0x18] sm:$0xff]  ;;  %v12439_v29 = vld [vmem:[#allocation79_spill] sm:$0xff]  ;;  %v3675_v11 = vsel %vm10210_vm10, %v9212_v13, %v3671_v20  ;;  %vm10240_vm13 = vmor %vm3656_vm11, %vm3657_vm7 }
 0x56e   : > { %v10155_v58 = vpop.permute.xlu2 %4240  ;;  %v3685_v14 = vsub.f32 1.0, %v3684_v31  ;;  %v4931_v31 = vadd.f32 %v4804_v25, %v4803_v16  ;;  %v4806_v10 = vmul.f32 %v6392_v3, %v4181_v60  ;;  %v10194_v63 = vmul.f32 %v12436_v9, %v3616_v17  ;;  %v12440_v25 = vld [vmem:[#allocation88_spill] sm:$0xff]  ;;  %v6394_v39 = vld [vmem:[%s6776_s25 + $0x20] sm:$0xff]  ;;  %v6395_v20 = vld [vmem:[%s6776_s25 + $0x38] sm:$0xff] }
 0x56f   : > { %v3716_v16 = vmul.f32 %v12440_v25, %v12439_v29  ;;  %v10204_v28 = vmul.f32 %v12441_v36, %v3616_v17  ;;  %v3655_v54 = vadd.f32 %v12423_v2, %v3654_v35  ;;  %v3660_v57 = vand.u32 2147483647, %v12422_v4  ;;  %v6397_v9 = vld [vmem:[%s6776_s25 + $0x40] sm:$0xff] }
 0x570   : > { %v3686_v60 = vmul.f32 %v12429_v23, %v3685_v14  ;;  %v4932_v17 = vrot.slane %v4931_v31, 4  ;;  %v3662_v33 = vand.u32 2147483648, %v12422_v4  ;;  %vm3689_vm12 = vweird.f32 %v12429_v23 }
 0x571   : > { %v3717_v13 = vsub.f32 1.0, %v3716_v16  ;;  %v12446_v16 = vld [vmem:[#allocation147_spill] sm:$0xff]  ;;  %v3659_v52 = vsel %vm10240_vm13, %v12423_v2, %v3655_v54  ;;  %vm3688_vm15 = vweird.f32 %v12428_v59  ;;  %vm3720_vm10 = vweird.f32 %v12439_v29 }
 0x572   : > { %v4933_v4 = vadd.f32 %v4932_v17, %v4931_v31  ;;  %vm10266_vm0 = vmor %vm3688_vm15, %vm3689_vm12  ;;  %6381 = vrcp.f32 %v9794_v48 }
 0x573   : > { %4310 = vperm.xlu0 %5746, %v10009_v5   ;;  %4410 = vperm.xlu1 %5744, %v10037_v18   ;;  %v3679_v18 = vor.u32 1.1754944e-38, %v3678_v7  ;;  %v6393_v7 = vld [vmem:[%s6776_s25 + $0x28] sm:$0xff]  ;;  %v3694_v5 = vand.u32 2147483648, %v12428_v59 }
 0x574   : > { %4420 = vperm.xlu2 %5745, %v10066_v37   ;;  %v10218_v37 = vsel %vm10162_vm14, %v3647_v44, %v3643_v30  ;;  %v4807_v30 = vmul.f32 %v6394_v39, %v4186_v12  ;;  %v4938_v44 = vadd.f32 %v4806_v10, %v10062_v24  ;;  %v3687_v12 = vadd.f32 %v12429_v23, %v3686_v60  ;;  %v12451_v39 = vld [vmem:[#allocation71_spill] sm:$0xff] }
 0x575   : > { %v4201_v1 = vpop.permute.xlu1 %4200  ;;  %v4191_v47 = vpop.permute.xlu0 %4190  ;;  %v3680_v3 = vsel %vm10196_vm9, %v3679_v18, %v3675_v11  ;;  %v3692_v24 = vand.u32 2147483647, %v12428_v59  ;;  %v10248_v36 = vmul.f32 %v12446_v16, %v10218_v37  ;;  %vm3661_vm14 = vcmp.eq.f32.partialorder %v3660_v57, 8.507059e+37  ;;  %v12447_v11 = vld [vmem:[#allocation84_spill] sm:$0xff] }
 0x576   : > { %v10225_v46 = vpop.permute.xlu2 %4330  ;;  %v4808_v14 = vmul.f32 %v6393_v7, %v4191_v47  ;;  %v4810_v35 = vmul.f32 %v6395_v20, %v4201_v1  ;;  %v3663_v18 = vor.u32 1.1754944e-38, %v3662_v33  ;;  %v6396_v1 = vld [vmem:[%s6776_s25 + $0x60] sm:$0xff]  ;;  %v4939_v47 = vrot.slane %v4938_v44, 4  ;;  %v12450_v33 = vld [vmem:[#allocation30_spill] sm:$0xff] }
 0x577   : > { %v10257_v60 = vmul.f32 %v6396_v1, %v10095_v34  ;;  %v10262_v7 = vmul.f32 %v12447_v11, %v3680_v3  ;;  %v3718_v59 = vmul.f32 %v12440_v25, %v3717_v13  ;;  %vm3693_vm8 = vcmp.eq.f32.partialorder %v3692_v24, 8.507059e+37  ;;  %v12454_v1 = vld [vmem:[#allocation78_spill] sm:$0xff] }
 0x578   : > { %v4945_v10 = vadd.f32 %v4808_v14, %v4807_v30  ;;  %v4952_v31 = vadd.f32 %v4810_v35, %v10123_v61  ;;  %v3664_v34 = vsel %vm3661_vm14, %v3663_v18, %v3659_v52  ;;  %v3695_v14 = vor.u32 1.1754944e-38, %v3694_v5  ;;  %v12453_v5 = vld [vmem:[#allocation27_spill] sm:$0xff] }
 0x579   : > { %v3724_v57 = vand.u32 2147483647, %v12439_v29  ;;  %v3700_v30 = vmul.f32 %v12451_v39, %v12450_v33  ;;  %v4934_v13 = vrot.slane %v4933_v4, 2  ;;  %vm3721_vm9 = vweird.f32 %v12440_v25 }
 0x57a   : > { %v4940_v35 = vadd.f32 %v4939_v47, %v4938_v44  ;;  %v3719_v16 = vadd.f32 %v12440_v25, %v3718_v59  ;;  %v4953_v52 = vrot.slane %v4952_v31, 4  ;;  %v10289_v18 = vmul.f32 %v12453_v5, %v3664_v34  ;;  %v12457_v59 = vld [vmem:[#allocation66_spill] sm:$0xff]  ;;  %vm10305_vm7 = vmor %vm3720_vm10, %vm3721_vm9  ;;  %v12466_v44 = vld [vmem:[#allocation61_spill] sm:$0xff] }
 0x57b   : > { %4415 = vperm.xlu0 %5746, %v10069_v38   ;;  %4425 = vperm.xlu1 %5744, %v10100_v62   ;;  %v3691_v38 = vsel %vm10266_vm0, %v12429_v23, %v3687_v12  ;;  %v4946_v62 = vrot.slane %v4945_v10, 4  ;;  %v3726_v23 = vand.u32 2147483648, %v12439_v29  ;;  %v10292_v11 = vmul.f32 %v12454_v1, %v3664_v34  ;;  %v6399_v1 = vld [vmem:[%s6776_s25 + $0x50] sm:$0xff] }
 0x57c   : > { %4435 = vperm.xlu2 %5745, %v10074_v22   ;;  %v12452_v22 = vld [vmem:[#allocation67_spill] sm:$0xff]  ;;  %v3696_v24 = vsel %vm3693_vm8, %v3695_v14, %v3691_v38  ;;  %vm10296_vm11 = vcmp.eq.f32.partialorder %v3724_v57, 8.507059e+37  ;;  %v3701_v47 = vsub.f32 1.0, %v3700_v30  ;;  %v4935_v38 = vadd.f32 %v4934_v13, %v4933_v4  ;;  %v12461_v57 = vld [vmem:[#allocation44_spill] sm:$0xff]  ;;  %v12462_v30 = vld [vmem:[#allocation45_spill] sm:$0xff] }
 0x57d   : > { %v4216_v54 = vpop.permute.xlu1 %4215  ;;  %v4206_v17 = vpop.permute.xlu0 %4205  ;;  %v10282_v20 = vmul.f32 %v12452_v22, %v3680_v3  ;;  %v4947_v3 = vadd.f32 %v4946_v62, %v4945_v10  ;;  %v3727_v29 = vor.u32 1.1754944e-38, %v3726_v23  ;;  %v12460_v10 = vld [vmem:[#allocation97_spill] sm:$0xff]  ;;  %v3723_v4 = vsel %vm10305_vm7, %v12440_v25, %v3719_v16  ;;  %v6398_v22 = vld [vmem:[%s6776_s25 + $0x78] sm:$0xff] }
 0x57e   : > { %v10279_v61 = vpop.permute.xlu2 %4345  ;;  %v4811_v12 = vmul.f32 %v6397_v9, %v4206_v17  ;;  %v10301_v17 = vmul.f32 %v12457_v59, %v3696_v24  ;;  %v10310_v62 = vmul.f32 %v12460_v10, %v3696_v24  ;;  %vm3704_vm12 = vweird.f32 %v12450_v33 }
 0x57f   : > { %v3732_v13 = vmul.f32 %v12462_v30, %v12461_v57  ;;  %v10322_v23 = vmul.f32 %v6398_v22, %v10155_v58  ;;  %v4954_v9 = vadd.f32 %v4953_v52, %v4952_v31  ;;  %vm3705_vm13 = vweird.f32 %v12451_v39  ;;  %v6400_v58 = vld [vmem:[%s6776_s25 + $0x68] sm:$0xff]  ;;  %v6401_v31 = vld [vmem:[%s6776_s25 + $0x58] sm:$0xff] }
 0x580   : > { %v4959_v2 = vadd.f32 %v10185_v27, %v4811_v12  ;;  %v4941_v27 = vrot.slane %v4940_v35, 2  ;;  %v3702_v16 = vmul.f32 %v12451_v39, %v3701_v47  ;;  %v3710_v5 = vand.u32 2147483648, %v12450_v33  ;;  %vm10363_vm0 = vmor %vm3704_vm12, %vm3705_vm13 }
 0x581   : > { %v4813_v59 = vmul.f32 %v6399_v1, %v4216_v54  ;;  %v10336_v52 = vsel %vm10296_vm11, %v3727_v29, %v3723_v4  ;;  %v4936_v22 = vrot.slane %v4935_v38, 1  ;;  %v3733_v47 = vsub.f32 1.0, %v3732_v13 }
 0x582   : > { %v4960_v14 = vrot.slane %v4959_v2, 4  ;;  %v4955_v49 = vrot.slane %v4954_v9, 2  ;;  %v10349_v29 = vmul.f32 %v12466_v44, %v10336_v52  ;;  %v3711_v4 = vor.u32 1.1754944e-38, %v3710_v5 }
 0x583   : > { %4430 = vperm.xlu0 %5746, %v10103_v55   ;;  %4440 = vperm.xlu1 %5744, %v10085_v0   ;;  %v3708_v0 = vand.u32 2147483647, %v12450_v33  ;;  %v4948_v55 = vrot.slane %v4947_v3, 2  ;;  %vm3736_vm15 = vweird.f32 %v12461_v57  ;;  %v4937_v13 = vadd.f32 %v4936_v22, %v4935_v38 }
 0x584   : > { %4450 = vperm.xlu2 %5745, %v10129_v21   ;;  %v4961_v25 = vadd.f32 %v4960_v14, %v4959_v2  ;;  %v4942_v2 = vadd.f32 %v4941_v27, %v4940_v35  ;;  %v12463_v14 = vld [vmem:[#allocation148_spill] sm:$0xff]  ;;  %v3703_v35 = vadd.f32 %v12451_v39, %v3702_v16  ;;  %vm3737_vm8 = vweird.f32 %v12462_v30 }
 0x585   : > { %v4231_v12 = vpop.permute.xlu1 %4230  ;;  %v4221_v24 = vpop.permute.xlu0 %4220  ;;  %v10340_v45 = vmul.f32 %v12463_v14, %v10218_v37  ;;  %vm10343_vm14 = vcmp.eq.f32.partialorder %v3708_v0, 8.507059e+37  ;;  %v12467_v0 = vld [vmem:[#allocation139_spill] sm:$0xff]  ;;  %v3740_v44 = vand.u32 2147483647, %v12461_v57  ;;  %vm10394_vm9 = vmor %vm3736_vm15, %vm3737_vm8  ;;  %vm12483_vm8 = vcmask 1047559  }
 0x586   : > { %v4816_v34 = vmul.f32 %v6400_v58, %v4231_v12  ;;  %v10331_v10 = vpop.permute.xlu2 %4360  ;;  %v4814_v21 = vmul.f32 %v6401_v31, %v4221_v24  ;;  %v4949_v24 = vadd.f32 %v4948_v55, %v4947_v3  ;;  %v4962_v58 = vrot.slane %v4961_v25, 2  ;;  %v12468_v55 = vld [vmem:[#allocation76_spill] sm:$0xff] }
 0x587   : > { %v3734_v3 = vmul.f32 %v12462_v30, %v3733_v47  ;;  %vm10398_vm10 = vcmp.eq.f32.partialorder %v3740_v44, 8.507059e+37  ;;  %vm3768_vm11 = vweird.f32 %v12467_v0  ;;  %vm3769_vm7 = vweird.f32 %v12468_v55 }
 0x588   : > { %v4973_v54 = vadd.f32 %v4816_v34, %v10257_v60  ;;  %v4966_v1 = vadd.f32 %v4814_v21, %v4813_v59  ;;  %v4943_v60 = vrot.slane %v4942_v2, 1  ;;  %v3764_v59 = vmul.f32 %v12468_v55, %v12467_v0  ;;  %vm10437_vm13 = vmor %vm3768_vm11, %vm3769_vm7 }
 0x589   : > { %v4956_v34 = vadd.f32 %v4955_v49, %v4954_v9  ;;  %v4950_v21 = vrot.slane %v4949_v24, 1  ;;  %v4963_v22 = vadd.f32 %v4962_v58, %v4961_v25  ;;  %v10380_v25 = vadd.f32 %v12462_v30, %v3734_v3 }
 0x58a   : > { %v4974_v27 = vrot.slane %v4973_v54, 4  ;;  %v4967_v37 = vrot.slane %v4966_v1, 4  ;;  %v3742_v58 = vand.u32 2147483648, %v12461_v57 }
 0x58b   : > { %4445 = vperm.xlu0 %5746, %v10132_v53   ;;  %4455 = vperm.xlu1 %5744, %v10194_v63   ;;  %v12471_v53 = vld [vmem:[#allocation64_spill] sm:$0xff]  ;;  %v12472_v63 = vld [vmem:[#allocation31_spill] sm:$0xff]  ;;  %v4957_v38 = vrot.slane %v4956_v34, 1  ;;  %v4951_v41 = vadd.f32 %v4950_v21, %v4949_v24  ;;  %v4964_v32 = vrot.slane %v4963_v22, 1 }
 0x58c   : > { %v4975_v31 = vadd.f32 %v4974_v27, %v4973_v54  ;;  %v4968_v16 = vadd.f32 %v4967_v37, %v4966_v1  ;;  %4465 = vperm.xlu2 %5745, %v10160_v56   ;;  %v3748_v5 = vmul.f32 %v12472_v63, %v12471_v53  ;;  %v3707_v56 = vsel %vm10363_vm0, %v12451_v39, %v3703_v35  ;;  %v6402_v54 = vld [vmem:[%s6776_s25 + $0x70] sm:$0xff] }
 0x58d   : > { %v10369_v14 = vpop.permute.xlu1 %4335  ;;  %v4236_v49 = vpop.permute.xlu0 %4235  ;;  %v4944_v27 = vadd.f32 %v4943_v60, %v4942_v2  ;;  %v3765_v37 = vsub.f32 1.0, %v3764_v59  ;;  %v3743_v12 = vor.u32 1.1754944e-38, %v3742_v58  ;;  %vm3753_vm12 = vweird.f32 %v12472_v63  ;;  %v12492_v59 = vld [vmem:[#allocation102_spill] sm:$0xff] }
 0x58e   : > { %v4976_v9 = vrot.slane %v4975_v31, 2  ;;  %v4969_v33 = vrot.slane %v4968_v16, 2  ;;  %v10375_v47 = vpop.permute.xlu2 %4375  ;;  %v4817_v1 = vmul.f32 %v6402_v54, %v4236_v49  ;;  %v3749_v40 = vsub.f32 1.0, %v3748_v5  ;;  %v6403_v54 = vld [vmem:[%s6776_s25 + $0x108] sm:$0xff] }
 0x58f   : > { %v10386_v49 = vsel %vm10343_vm14, %v3711_v4, %v3707_v56  ;;  %v4836_v2 = vmul.f32 %v6403_v54, %v10225_v46  ;;  %v3739_v46 = vsel %vm10394_vm9, %v12462_v30, %v10380_v25  ;;  %v3766_v57 = vmul.f32 %v12468_v55, %v3765_v37 }
 0x590   : > { %v4970_v39 = vadd.f32 %v4969_v33, %v4968_v16  ;;  %v4980_v35 = vadd.f32 %v10322_v23, %v4817_v1  ;;  %v4977_v50 = vadd.f32 %v4976_v9, %v4975_v31  ;;  %v5443_v24 = vsel %vm1595_vm1, %v4944_v27, %v4937_v13  ;;  %v6404_v33 = vld [vmem:[%s6776_s25 + $0x120] sm:$0xff] }
 0x591   : > { %v4958_v4 = vadd.f32 %v4957_v38, %v4956_v34  ;;  %v4965_v16 = vadd.f32 %v4964_v32, %v4963_v22  ;;  %v3772_v34 = vand.u32 2147483647, %v12467_v0  ;;  %v3767_v22 = vadd.f32 %v12468_v55, %v3766_v57  ;;  %v6406_v38 = vld [vmem:[%s6776_s25 + $0x100] sm:$0xff] }
 0x592   : > { %v4971_v60 = vrot.slane %v4970_v39, 1  ;;  %v4981_v3 = vrot.slane %v4980_v35, 4  ;;  %v4978_v5 = vrot.slane %v4977_v50, 1  ;;  %v3758_v25 = vand.u32 2147483648, %v12471_v53 }
 0x593   : > { %4460 = vperm.xlu0 %5746, %v10204_v28   ;;  %4470 = vperm.xlu1 %5744, %v10168_v43   ;;  %v3750_v43 = vmul.f32 %v12472_v63, %v3749_v40  ;;  %v5444_v28 = vsel %vm1597_vm2, %v4951_v41, %v5443_v24  ;;  %v4839_v40 = vmul.f32 %v6404_v33, %v10279_v61  ;;  %v6405_v41 = vld [vmem:[%s6776_s25 + $0x128] sm:$0xff]  ;;  %vm3752_vm14 = vweird.f32 %v12471_v53 }
 0x594   : > { %v4982_v31 = vadd.f32 %v4981_v3, %v4980_v35  ;;  %4480 = vperm.xlu2 %5745, %v10248_v36   ;;  %v4972_v56 = vadd.f32 %v4971_v60, %v4970_v39  ;;  %v3774_v36 = vand.u32 2147483648, %v12467_v0  ;;  %v5445_v1 = vsel %vm1599_vm3, %v4958_v4, %v5444_v28  ;;  %v12477_v61 = vld [vmem:[#allocation96_spill] sm:$0xff]  ;;  %v12478_v35 = vld [vmem:[#allocation29_spill] sm:$0xff]  ;;  %vm10453_vm15 = vmor %vm3752_vm14, %vm3753_vm12 }
 0x595   : > { %v4351_v30 = vpop.permute.xlu1 %4350  ;;  %v4326_v21 = vpop.permute.xlu0 %4325  ;;  %v3751_v27 = vadd.f32 %v12472_v63, %v3750_v43  ;;  %v5446_v58 = vsel %vm1601_vm4, %v4965_v16, %v5445_v1  ;;  %v4979_v37 = vadd.f32 %v4978_v5, %v4977_v50  ;;  %v3908_v54 = vmul.f32 %v12478_v35, %v12477_v61  ;;  %v12493_v4 = vld [vmem:[#allocation60_spill] sm:$0xff] }
 0x596   : > { %v4983_v9 = vrot.slane %v4982_v31, 2  ;;  %v10415_v13 = vpop.permute.xlu2 %4390  ;;  %v4840_v32 = vmul.f32 %v6405_v41, %v4351_v30  ;;  %v4835_v39 = vmul.f32 %v6406_v38, %v4326_v21  ;;  %v5447_v60 = vsel %vm1603_vm5, %v4972_v56, %v5446_v58  ;;  %v6408_v56 = vld [vmem:[%s6776_s25 + $0x118] sm:$0xff]  ;;  %v12489_v58 = vld [vmem:[#allocation104_spill] sm:$0xff] }
 0x597   : > { %v3756_v50 = vand.u32 2147483647, %v12471_v53  ;;  %v3744_v24 = vsel %vm10398_vm10, %v3743_v12, %v3739_v46  ;;  %v3771_v0 = vsel %vm10437_vm13, %v12468_v55, %v3767_v22  ;;  %vm3773_vm0 = vcmp.eq.f32.partialorder %v3772_v34, 8.507059e+37  ;;  %v12488_v22 = vld [vmem:[#allocation15_spill] sm:$0xff] }
 0x598   : > { %v4984_v44 = vadd.f32 %v4983_v9, %v4982_v31  ;;  %v5057_v57 = vadd.f32 %v4840_v32, %v4839_v40  ;;  %v5448_v23 = vsel %vm1605_vm6, %v4979_v37, %v5447_v60  ;;  %v5043_v55 = vadd.f32 %v4836_v2, %v4835_v39  ;;  %v12486_v40 = vld [vmem:[#allocation98_spill] sm:$0xff]  ;;  %v12487_v32 = vld [vmem:[#allocation72_spill] sm:$0xff]  ;;  %v12491_v60 = vld [vmem:[#allocation37_spill] sm:$0xff] }
 0x599   : > { %v3759_v31 = vor.u32 1.1754944e-38, %v3758_v25  ;;  %v3909_v43 = vsub.f32 1.0, %v3908_v54  ;;  %vm3757_vm9 = vcmp.eq.f32.partialorder %v3756_v50, 8.507059e+37  ;;  %v10484_v41 = vmul.f32 %v12486_v40, %v10386_v49  ;;  %v12490_v54 = vld [vmem:[#allocation80_spill] sm:$0xff] }
 0x59a   : > { %v4985_v3 = vrot.slane %v4984_v44, 1  ;;  %v5058_v2 = vrot.slane %v5057_v57, 4  ;;  %v10491_v1 = vmul.f32 %v12488_v22, %v3744_v24  ;;  %v3780_v50 = vmul.f32 %v9665_v19, %v12492_v59 }
 0x59b   : > { %4475 = vperm.xlu0 %5746, %v10340_v45   ;;  %4485 = vperm.xlu1 %5744, %v10289_v18   ;;  %v3775_v45 = vor.u32 1.1754944e-38, %v3774_v36  ;;  %v3755_v18 = vsel %vm10453_vm15, %v12472_v63, %v3751_v27  ;;  %v6407_v63 = vld [vmem:[%s6776_s25 + $0x110] sm:$0xff]  ;;  %v12485_v36 = vld [vmem:[#allocation92_spill] sm:$0xff]  ;;  %v5044_v27 = vrot.slane %v5043_v55, 4  ;;  %v3910_v38 = vmul.f32 %v12478_v35, %v3909_v43 }
 0x59c   : > { %v4986_v53 = vadd.f32 %v4985_v3, %v4984_v44  ;;  %4495 = vperm.xlu2 %5745, %v10262_v7   ;;  %v12484_v7 = vld [vmem:[#allocation77_spill] sm:$0xff]  ;;  %v4837_v21 = vmul.f32 %v6407_v63, %v10369_v14  ;;  %v3760_v34 = vsel %vm3757_vm9, %v3759_v31, %v3755_v18  ;;  %v10480_v33 = vmul.f32 %v12485_v36, %v3744_v24  ;;  %v10493_v44 = vpop.eup %6381 }
 0x59d   : > { %v10462_v46 = vpop.permute.xlu1 %4365  ;;  %v4341_v12 = vpop.permute.xlu0 %4340  ;;  %v10469_v5 = vmul.f32 %v12484_v7, %v10386_v49  ;;  %v3776_v30 = vsel %vm3773_vm0, %v3775_v45, %v3771_v0  ;;  %v10488_v14 = vmul.f32 %v12487_v32, %v10336_v52  ;;  %v6409_v49 = vld [vmem:[%s6776_s25 + $0x138] sm:$0xff]  ;;  %v10502_v52 = vmul.f32 %v12490_v54, %v3760_v34  ;;  %v6410_v18 = vld [vmem:[%s6776_s25 + $0x150] sm:$0xff] }
 0x59e   : > { %v5449_v28 = vsel %vm12483_vm8, %v4986_v53, %v5448_v23  ;;  %v10465_v16 = vpop.permute.xlu2 %4255  ;;  %v4838_v9 = vmul.f32 %v6408_v56, %v4341_v12  ;;  %v10496_v37 = vmul.f32 %v12489_v58, %v3776_v30  ;;  %v4842_v39 = vmul.f32 %v6409_v49, %v10331_v10  ;;  %v12494_v10 = vld [vmem:[#allocation24_spill] sm:$0xff] }
 0x59f   : > { %5507 = vst [vmem:[%s10475_s28] sm:$0xff] %v5449_v28  ;;  %v10505_v3 = vmul.f32 %v12491_v60, %v3776_v30  ;;  %v5059_v24 = vadd.f32 %v5058_v2, %v5057_v57  ;;  %v3796_v53 = vmul.f32 %v9674_v51, %v12493_v4  ;;  %v3812_v45 = vmul.f32 %v9688_v6, %v12494_v10  ;;  %v6411_v12 = vld [vmem:[%s6776_s25 + $0x168] sm:$0xff]  ;;  %v6412_v2 = vld [vmem:[%s6776_s25 + $0x158] sm:$0xff] }
 0x5a0   : > { %v5050_v25 = vadd.f32 %v4838_v9, %v4837_v21  ;;  %v4845_v23 = vmul.f32 %v6410_v18, %v10375_v47  ;;  %v10519_v31 = vmul.f32 %v6411_v12, %v10415_v13  ;;  %v5045_v43 = vadd.f32 %v5044_v27, %v5043_v55  ;;  %v6413_v13 = vld [vmem:[%s6776_s25 + $0x130] sm:$0xff] }
 0x5a1   : > { %v3797_v63 = vsub.f32 1.0, %v3796_v53  ;;  %v10526_v21 = vadd.f32 %v12478_v35, %v3910_v38  ;;  %v5060_v36 = vrot.slane %v5059_v24, 2  ;;  %vm3784_vm10 = vweird.f32 %v12492_v59  ;;  %v6414_v53 = vld [vmem:[%s6776_s25 + $0x140] sm:$0xff] }
 0x5a2   : > { %v5051_v0 = vrot.slane %v5050_v25, 4  ;;  %v3813_v55 = vsub.f32 1.0, %v3812_v45  ;;  %v3916_v40 = vand.u32 2147483647, %v12477_v61  ;;  %vm3800_vm11 = vweird.f32 %v12493_v4 }
 0x5a3   : > { %4490 = vperm.xlu0 %5746, %v10292_v11   ;;  %4500 = vperm.xlu1 %5744, %v10282_v20   ;;  %v12495_v11 = vld [vmem:[#allocation34_spill] sm:$0xff]  ;;  %v3781_v20 = vsub.f32 1.0, %v3780_v50  ;;  %v3798_v38 = vmul.f32 %v9674_v51, %v3797_v63  ;;  %v3804_v49 = vand.u32 2147483647, %v12493_v4  ;;  %v4843_v45 = vmul.f32 %v6414_v53, %v10462_v46 }
 0x5a4   : > { %4510 = vperm.xlu2 %5745, %v10301_v17   ;;  %v10523_v57 = vmul.f32 %v12495_v11, %v3760_v34  ;;  %v5052_v28 = vadd.f32 %v5051_v0, %v5050_v25  ;;  %v3788_v17 = vand.u32 2147483647, %v12492_v59  ;;  %v3790_v34 = vand.u32 2147483648, %v12492_v59  ;;  %v12510_v59 = vld [vmem:[#allocation151_spill] sm:$0xff] }
 0x5a5   : > { %v4381_v7 = vpop.permute.xlu1 %4380  ;;  %v4356_v30 = vpop.permute.xlu0 %4355  ;;  %v3782_v27 = vmul.f32 %v9665_v19, %v3781_v20  ;;  %v5046_v25 = vrot.slane %v5045_v43, 2  ;;  %v3806_v0 = vand.u32 2147483648, %v12493_v4  ;;  %v3814_v18 = vmul.f32 %v9688_v6, %v3813_v55 }
 0x5a6   : > { %v4846_v47 = vmul.f32 %v6412_v2, %v4381_v7  ;;  %v10529_v56 = vpop.permute.xlu2 %4270  ;;  %v4841_v9 = vmul.f32 %v6413_v13, %v4356_v30  ;;  %v5053_v32 = vrot.slane %v5052_v28, 2  ;;  %vm10540_vm7 = vcmp.eq.f32.partialorder %v3788_v17, 8.507059e+37 }
 0x5a7   : > { %v3791_v50 = vor.u32 1.1754944e-38, %v3790_v34  ;;  %vm3816_vm12 = vweird.f32 %v12494_v10  ;;  %vm3785_vm13 = vweird.f32 %v9665_v19  ;;  %v5047_v46 = vadd.f32 %v5046_v25, %v5045_v43 }
 0x5a8   : > { %v5064_v22 = vadd.f32 %v4842_v39, %v4841_v9  ;;  %v5078_v58 = vadd.f32 %v4846_v47, %v4845_v23  ;;  %v5061_v39 = vadd.f32 %v5060_v36, %v5059_v24  ;;  %v6415_v23 = vld [vmem:[%s6776_s25 + $0x90] sm:$0xff]  ;;  %v5054_v11 = vadd.f32 %v5053_v32, %v5052_v28  ;;  %vm10571_vm0 = vmor %vm3784_vm10, %vm3785_vm13 }
 0x5a9   : > { %v10553_v12 = vmul.f32 %v6415_v23, %v10465_v16  ;;  %v3783_v24 = vadd.f32 %v9665_v19, %v3782_v27  ;;  %v3799_v7 = vadd.f32 %v9674_v51, %v3798_v38  ;;  %vm3801_vm14 = vweird.f32 %v9674_v51  ;;  %v6416_v16 = vld [vmem:[%s6776_s25 + $0x148] sm:$0xff] }
 0x5aa   : > { %v5065_v54 = vrot.slane %v5064_v22, 4  ;;  %vm10565_vm15 = vcmp.eq.f32.partialorder %v3804_v49, 8.507059e+37  ;;  %v3807_v2 = vor.u32 1.1754944e-38, %v3806_v0  ;;  %v5062_v47 = vrot.slane %v5061_v39, 1  ;;  %vm10586_vm9 = vmor %vm3800_vm11, %vm3801_vm14 }
 0x5ab   : > { %4505 = vperm.xlu0 %5746, %v10310_v62   ;;  %4515 = vperm.xlu1 %5744, %v10469_v5   ;;  %v5079_v62 = vrot.slane %v5078_v58, 4  ;;  %v3815_v13 = vadd.f32 %v9688_v6, %v3814_v18  ;;  %vm3817_vm8 = vweird.f32 %v9688_v6  ;;  %v3828_v9 = vmul.f32 %v9696_v42, %v9635_v8  ;;  %v12507_v18 = vld [vmem:[#allocation106_spill] sm:$0xff] }
 0x5ac   : > { %4525 = vperm.xlu2 %5745, %v10349_v29   ;;  %v5066_v30 = vadd.f32 %v5065_v54, %v5064_v22  ;;  %v5055_v17 = vrot.slane %v5054_v11, 1  ;;  %v3787_v36 = vsel %vm10571_vm0, %v9665_v19, %v3783_v24  ;;  %v3820_v55 = vand.u32 2147483647, %v12494_v10  ;;  %vm10597_vm10 = vmor %vm3816_vm12, %vm3817_vm8  ;;  %v12509_v29 = vld [vmem:[#allocation137_spill] sm:$0xff] }
 0x5ad   : > { %v10558_v20 = vpop.permute.xlu1 %4395  ;;  %v4371_v5 = vpop.permute.xlu0 %4370  ;;  %v5048_v32 = vrot.slane %v5047_v46, 1  ;;  %v5080_v22 = vadd.f32 %v5079_v62, %v5078_v58  ;;  %v3803_v27 = vsel %vm10586_vm9, %v9674_v51, %v3799_v7  ;;  %v3822_v25 = vand.u32 2147483648, %v12494_v10  ;;  %v6418_v7 = vld [vmem:[%s6776_s25 + $0x160] sm:$0xff] }
 0x5ae   : > { %v10562_v63 = vpop.permute.xlu2 %4285  ;;  %v4844_v28 = vmul.f32 %v6416_v16, %v4371_v5  ;;  %v5067_v38 = vrot.slane %v5066_v30, 2  ;;  %v3836_v49 = vand.u32 2147483647, %v9635_v8  ;;  %v3838_v54 = vand.u32 2147483648, %v9635_v8 }
 0x5af   : > { %v5063_v0 = vadd.f32 %v5062_v47, %v5061_v39  ;;  %v3792_v51 = vsel %vm10540_vm7, %v3791_v50, %v3787_v36  ;;  %v3819_v10 = vsel %vm10597_vm10, %v9688_v6, %v3815_v13  ;;  %v3829_v58 = vsub.f32 1.0, %v3828_v9  ;;  %v6417_v6 = vld [vmem:[%s6776_s25 + $0xa8] sm:$0xff] }
 0x5b0   : > { %v5071_v34 = vadd.f32 %v4844_v28, %v4843_v45  ;;  %v5056_v53 = vadd.f32 %v5055_v17, %v5054_v11  ;;  %v3808_v39 = vsel %vm10565_vm15, %v3807_v2, %v3803_v27  ;;  %v5049_v23 = vadd.f32 %v5048_v32, %v5047_v46  ;;  %v12508_v46 = vld [vmem:[#allocation150_spill] sm:$0xff]  ;;  %v12511_v32 = vld [vmem:[#allocation17_spill] sm:$0xff]  ;;  %v12512_v27 = vld [vmem:[#allocation20_spill] sm:$0xff] }
 0x5b1   : > { %v5081_v60 = vrot.slane %v5080_v22, 2  ;;  %vm3821_vm11 = vcmp.eq.f32.partialorder %v3820_v55, 8.507059e+37  ;;  %v3823_v62 = vor.u32 1.1754944e-38, %v3822_v25  ;;  %vm3832_vm7 = vweird.f32 %v9635_v8 }
 0x5b2   : > { %v5072_v19 = vrot.slane %v5071_v34, 4  ;;  %v10620_v11 = vmul.f32 %v6417_v6, %v10529_v56  ;;  %vm3833_vm12 = vweird.f32 %v9696_v42  ;;  %v10627_v28 = vmul.f32 %v12508_v46, %v3792_v51 }
 0x5b3   : > { %4520 = vperm.xlu0 %5746, %v10484_v41   ;;  %4530 = vperm.xlu1 %5744, %v10488_v14   ;;  %v12506_v41 = vld [vmem:[#allocation11_spill] sm:$0xff]  ;;  %v10630_v2 = vmul.f32 %v12509_v29, %v3808_v39  ;;  %v3824_v47 = vsel %vm3821_vm11, %v3823_v62, %v3819_v10  ;;  %v3830_v43 = vmul.f32 %v9696_v42, %v3829_v58  ;;  %v12513_v58 = vld [vmem:[#allocation153_spill] sm:$0xff]  ;;  %vm10656_vm13 = vcmp.eq.f32.partialorder %v3836_v49, 8.507059e+37  ;;  %v12517_v62 = vld [vmem:[#allocation154_spill] sm:$0xff] }
 0x5b4   : > { %v5073_v45 = vadd.f32 %v5072_v19, %v5071_v34  ;;  %4540 = vperm.xlu2 %5745, %v10480_v33   ;;  %v3844_v14 = vmul.f32 %v12507_v18, %v12506_v41  ;;  %v5068_v33 = vadd.f32 %v5067_v38, %v5066_v30  ;;  %v5457_v56 = vsel %vm1595_vm1, %v5056_v53, %v5049_v23  ;;  %v6419_v34 = vld [vmem:[%s6776_s25 + $0x170] sm:$0xff]  ;;  %v6420_v19 = vld [vmem:[%s6776_s25 + $0xc0] sm:$0xff]  ;;  %vm10674_vm14 = vmor %vm3832_vm7, %vm3833_vm12 }
 0x5b5   : > { %v10615_v24 = vpop.permute.xlu1 %4245  ;;  %v4386_v50 = vpop.permute.xlu0 %4385  ;;  %v5082_v17 = vadd.f32 %v5081_v60, %v5080_v22  ;;  %v4849_v36 = vmul.f32 %v6419_v34, %v10558_v20  ;;  %v10638_v55 = vmul.f32 %v12510_v59, %v3792_v51  ;;  %v3860_v25 = vmul.f32 %v12512_v27, %v12511_v32  ;;  %v12514_v20 = vld [vmem:[#allocation141_spill] sm:$0xff] }
 0x5b6   : > { %v10622_v5 = vpop.permute.xlu2 %4300  ;;  %v4847_v16 = vmul.f32 %v6418_v7, %v4386_v50  ;;  %v5074_v13 = vrot.slane %v5073_v45, 2  ;;  %v3845_v9 = vsub.f32 1.0, %v3844_v14  ;;  %v5069_v38 = vrot.slane %v5068_v33, 1 }
 0x5b7   : > { %v10644_v4 = vmul.f32 %v6420_v19, %v10562_v63  ;;  %v10647_v53 = vmul.f32 %v12513_v58, %v3824_v47  ;;  %v10653_v22 = vmul.f32 %v12514_v20, %v3824_v47  ;;  %v3831_v51 = vadd.f32 %v9696_v42, %v3830_v43  ;;  %v6422_v43 = vld [vmem:[%s6776_s25 + $0x178] sm:$0xff] }
 0x5b8   : > { %v5085_v30 = vadd.f32 %v10519_v31, %v4847_v16  ;;  %v5458_v31 = vsel %vm1597_vm2, %v5063_v0, %v5457_v56  ;;  %v5075_v63 = vadd.f32 %v5074_v13, %v5073_v45  ;;  %v3839_v0 = vor.u32 1.1754944e-38, %v3838_v54  ;;  %v6421_v45 = vld [vmem:[%s6776_s25 + $0x98] sm:$0xff]  ;;  %v12520_v56 = vld [vmem:[#allocation19_spill] sm:$0xff]  ;;  %v12521_v13 = vld [vmem:[#allocation12_spill] sm:$0xff] }
 0x5b9   : > { %v5083_v60 = vrot.slane %v5082_v17, 1  ;;  %v10663_v6 = vmul.f32 %v12517_v62, %v3808_v39  ;;  %v3852_v7 = vand.u32 2147483647, %v12506_v41  ;;  %v3861_v49 = vsub.f32 1.0, %v3860_v25  ;;  %v6424_v62 = vld [vmem:[%s6776_s25 + $0xd8] sm:$0xff] }
 0x5ba   : > { %v5086_v10 = vrot.slane %v5085_v30, 4  ;;  %v5070_v16 = vadd.f32 %v5069_v38, %v5068_v33  ;;  %v3835_v39 = vsel %vm10674_vm14, %v9696_v42, %v3831_v51  ;;  %vm3849_vm15 = vweird.f32 %v12507_v18 }
 0x5bb   : > { %4535 = vperm.xlu0 %5746, %v10491_v1   ;;  %4545 = vperm.xlu1 %5744, %v10502_v52   ;;  %v3846_v1 = vmul.f32 %v12507_v18, %v3845_v9  ;;  %v3854_v33 = vand.u32 2147483648, %v12506_v41  ;;  %v5076_v9 = vrot.slane %v5075_v63, 1  ;;  %v5084_v25 = vadd.f32 %v5083_v60, %v5082_v17 }
 0x5bc   : > { %v5087_v23 = vadd.f32 %v5086_v10, %v5085_v30  ;;  %4555 = vperm.xlu2 %5745, %v10496_v37   ;;  %v3876_v30 = vmul.f32 %v12521_v13, %v12520_v56  ;;  %vm3848_vm0 = vweird.f32 %v12506_v41  ;;  %v3862_v19 = vmul.f32 %v12512_v27, %v3861_v49  ;;  %v6423_v10 = vld [vmem:[%s6776_s25 + $0x80] sm:$0xff] }
 0x5bd   : > { %v4261_v52 = vpop.permute.xlu1 %4260  ;;  %v4401_v50 = vpop.permute.xlu0 %4400  ;;  %v3847_v8 = vadd.f32 %v12507_v18, %v3846_v1  ;;  %v5459_v42 = vsel %vm1599_vm3, %v5070_v16, %v5458_v31  ;;  %v4819_v58 = vmul.f32 %v6423_v10, %v10615_v24  ;;  %vm10692_vm8 = vcmp.eq.f32.partialorder %v3852_v7, 8.507059e+37  ;;  %vm10702_vm9 = vmor %vm3848_vm0, %vm3849_vm15  ;;  %v12528_v16 = vld [vmem:[#allocation156_spill] sm:$0xff] }
 0x5be   : > { %v5088_v46 = vrot.slane %v5087_v23, 2  ;;  %v10666_v29 = vpop.permute.xlu2 %4315  ;;  %v4822_v47 = vmul.f32 %v6421_v45, %v4261_v52  ;;  %v4850_v37 = vmul.f32 %v6422_v43, %v4401_v50  ;;  %v3855_v24 = vor.u32 1.1754944e-38, %v3854_v33  ;;  %v12526_v52 = vld [vmem:[#allocation108_spill] sm:$0xff]  ;;  %v12527_v50 = vld [vmem:[#allocation107_spill] sm:$0xff] }
 0x5bf   : > { %v3868_v17 = vand.u32 2147483647, %v12511_v32  ;;  %v5077_v31 = vadd.f32 %v5076_v9, %v5075_v63  ;;  %v3863_v60 = vadd.f32 %v12512_v27, %v3862_v19  ;;  %vm3865_vm10 = vweird.f32 %v12512_v27  ;;  %v6425_v45 = vld [vmem:[%s6776_s25 + $0x88] sm:$0xff]  ;;  %v12533_v19 = vld [vmem:[#allocation143_spill] sm:$0xff] }
 0x5c0   : > { %v4994_v34 = vadd.f32 %v4822_v47, %v10553_v12  ;;  %v5092_v59 = vadd.f32 %v4850_v37, %v4849_v36  ;;  %v5089_v38 = vadd.f32 %v5088_v46, %v5087_v23  ;;  %v3840_v12 = vsel %vm10656_vm13, %v3839_v0, %v3835_v39 }
 0x5c1   : > { %v3877_v36 = vsub.f32 1.0, %v3876_v30  ;;  %v3892_v63 = vmul.f32 %v12527_v50, %v12526_v52  ;;  %v10719_v7 = vmul.f32 %v6424_v62, %v10622_v5  ;;  %v3870_v46 = vand.u32 2147483648, %v12511_v32 }
 0x5c2   : > { %v5093_v20 = vrot.slane %v5092_v59, 4  ;;  %v4995_v23 = vrot.slane %v4994_v34, 4  ;;  %v5090_v14 = vrot.slane %v5089_v38, 1  ;;  %vm3864_vm11 = vweird.f32 %v12511_v32 }
 0x5c3   : > { %4550 = vperm.xlu0 %5746, %v10523_v57   ;;  %4560 = vperm.xlu1 %5744, %v10505_v3   ;;  %v3851_v3 = vsel %vm10702_vm9, %v12507_v18, %v3847_v8  ;;  %v10724_v18 = vmul.f32 %v12528_v16, %v3840_v12  ;;  %v3878_v37 = vmul.f32 %v12521_v13, %v3877_v36  ;;  %vm10737_vm7 = vmor %vm3864_vm11, %vm3865_vm10  ;;  %vm10741_vm12 = vcmp.eq.f32.partialorder %v3868_v17, 8.507059e+37 }
 0x5c4   : > { %v5094_v57 = vadd.f32 %v5093_v20, %v5092_v59  ;;  %4570 = vperm.xlu2 %5745, %v10627_v28   ;;  %v10730_v43 = vsel %vm10692_vm8, %v3855_v24, %v3851_v3  ;;  %v5460_v5 = vsel %vm1601_vm4, %v5077_v31, %v5459_v42  ;;  %v4996_v54 = vadd.f32 %v4995_v23, %v4994_v34  ;;  %v12534_v20 = vld [vmem:[#allocation157_spill] sm:$0xff] }
 0x5c5   : > { %v10711_v0 = vpop.permute.xlu1 %4275  ;;  %v4251_v1 = vpop.permute.xlu0 %4250  ;;  %vm3913_vm13 = vweird.f32 %v12478_v35  ;;  %v5091_v9 = vadd.f32 %v5090_v14, %v5089_v38  ;;  %v3867_v59 = vsel %vm10737_vm7, %v12512_v27, %v3863_v60  ;;  %v3893_v34 = vsub.f32 1.0, %v3892_v63  ;;  %v6426_v23 = vld [vmem:[%s6776_s25 + $0xf0] sm:$0xff]  ;;  %v6427_v14 = vld [vmem:[%s6776_s25 + $0xc8] sm:$0xff]  ;;  %v6428_v60 = vld [vmem:[%s6776_s25 + $0xa0] sm:$0xff] }
 0x5c6   : > { %v5095_v28 = vrot.slane %v5094_v57, 2  ;;  %v10721_v49 = vpop.permute.xlu2 %4405  ;;  %v4820_v47 = vmul.f32 %v6425_v45, %v4251_v1  ;;  %v10751_v42 = vmul.f32 %v12533_v19, %v10730_v43  ;;  %v3871_v10 = vor.u32 1.1754944e-38, %v3870_v46  ;;  %v12539_v46 = vld [vmem:[#allocation83_spill] sm:$0xff]  ;;  %v12540_v45 = vld [vmem:[#allocation26_spill] sm:$0xff]  ;;  %v12544_v19 = vld [vmem:[#allocation41_spill] sm:$0xff] }
 0x5c7   : > { %v10754_v51 = vmul.f32 %v12534_v20, %v3840_v12  ;;  %vm3912_vm14 = vweird.f32 %v12477_v61  ;;  %v5461_v41 = vsel %vm1603_vm5, %v5084_v25, %v5460_v5  ;;  %v3879_v27 = vadd.f32 %v12521_v13, %v3878_v37 }
 0x5c8   : > { %v5096_v39 = vadd.f32 %v5095_v28, %v5094_v57  ;;  %v4987_v32 = vadd.f32 %v4820_v47, %v4819_v58  ;;  %vm3881_vm15 = vweird.f32 %v12521_v13  ;;  %v4997_v58 = vrot.slane %v4996_v54, 2  ;;  %v12538_v28 = vld [vmem:[#allocation159_spill] sm:$0xff] }
 0x5c9   : > { %v3872_v12 = vsel %vm10741_vm12, %v3871_v10, %v3867_v59  ;;  %v3886_v25 = vand.u32 2147483648, %v12520_v56  ;;  %vm3880_vm0 = vweird.f32 %v12520_v56  ;;  %v3884_v36 = vand.u32 2147483647, %v12520_v56  ;;  %vm10812_vm12 = vmor %vm3912_vm14, %vm3913_vm13  ;;  %v12545_v10 = vld [vmem:[#allocation52_spill] sm:$0xff] }
 0x5ca   : > { %v5097_v8 = vrot.slane %v5096_v39, 1  ;;  %v4988_v38 = vrot.slane %v4987_v32, 4  ;;  %v3894_v31 = vmul.f32 %v12527_v50, %v3893_v34  ;;  %v10772_v57 = vmul.f32 %v6426_v23, %v10666_v29  ;;  %vm10781_vm9 = vmor %vm3880_vm0, %vm3881_vm15 }
 0x5cb   : > { %4575 = vperm.xlu1 %5744, %v10630_v2   ;;  %4565 = vperm.xlu0 %5746, %v10638_v55   ;;  %v5462_v2 = vsel %vm1605_vm6, %v5091_v9, %v5461_v41  ;;  %vm12535_vm8 = vcmask 1047559   ;;  %v10787_v16 = vmul.f32 %v12538_v28, %v3872_v12  ;;  %v3883_v29 = vsel %vm10781_vm9, %v12521_v13, %v3879_v27 }
 0x5cc   : > { %v5098_v24 = vadd.f32 %v5097_v8, %v5096_v39  ;;  %4585 = vperm.xlu2 %5745, %v10647_v53   ;;  %v4989_v56 = vadd.f32 %v4988_v38, %v4987_v32  ;;  %v3924_v47 = vmul.f32 %v12540_v45, %v12539_v46  ;;  %v4998_v37 = vadd.f32 %v4997_v58, %v4996_v54  ;;  %v12541_v39 = vld [vmem:[#allocation146_spill] sm:$0xff]  ;;  %v6429_v38 = vld [vmem:[%s6776_s25 + $0xb0] sm:$0xff] }
 0x5cd   : > { %v4291_v17 = vpop.permute.xlu1 %4290  ;;  %v4266_v55 = vpop.permute.xlu0 %4265  ;;  %v10796_v33 = vmul.f32 %v12541_v39, %v3872_v12  ;;  %v3887_v30 = vor.u32 1.1754944e-38, %v3886_v25  ;;  %vm3885_vm10 = vcmp.eq.f32.partialorder %v3884_v36, 8.507059e+37  ;;  %v3895_v9 = vadd.f32 %v12527_v50, %v3894_v31  ;;  %v6430_v12 = vld [vmem:[%s6776_s25 + $0x180] sm:$0xff]  ;;  %v6432_v39 = vld [vmem:[%s6776_s25 + $0x198] sm:$0xff] }
 0x5ce   : > { %v5463_v53 = vsel %vm12535_vm8, %v5098_v24, %v5462_v2  ;;  %v10775_v3 = vpop.permute.xlu2 %4420  ;;  %v4828_v1 = vmul.f32 %v6427_v14, %v4291_v17  ;;  %v4823_v63 = vmul.f32 %v6428_v60, %v4266_v55  ;;  %vm3896_vm11 = vweird.f32 %v12526_v52  ;;  %v12549_v2 = vld [vmem:[#allocation162_spill] sm:$0xff] }
 0x5cf   : > { %5509 = vst [vmem:[%s10475_s28 + $0x10] sm:$0xff] %v5463_v53  ;;  %vm3897_vm7 = vweird.f32 %v12527_v50  ;;  %v10802_v32 = vsel %vm3885_vm10, %v3887_v30, %v3883_v29  ;;  %v3902_v54 = vand.u32 2147483648, %v12526_v52  ;;  %v4990_v59 = vrot.slane %v4989_v56, 2 }
 0x5d0   : > { %v5001_v5 = vadd.f32 %v10620_v11, %v4823_v63  ;;  %v5015_v13 = vadd.f32 %v4828_v1, %v10644_v4  ;;  %v3918_v11 = vand.u32 2147483648, %v12477_v61  ;;  %v3925_v4 = vsub.f32 1.0, %v3924_v47  ;;  %vm10829_vm13 = vmor %vm3896_vm11, %vm3897_vm7 }
 0x5d1   : > { %v3940_v20 = vmul.f32 %v12545_v10, %v12544_v19  ;;  %v4999_v41 = vrot.slane %v4998_v37, 1  ;;  %v4825_v27 = vmul.f32 %v6429_v38, %v10711_v0  ;;  %v3900_v24 = vand.u32 2147483647, %v12526_v52 }
 0x5d2   : > { %v5002_v34 = vrot.slane %v5001_v5, 4  ;;  %v10836_v25 = vmul.f32 %v6430_v12, %v10721_v49  ;;  %v3899_v17 = vsel %vm10829_vm13, %v12527_v50, %v3895_v9  ;;  %v3915_v55 = vsel %vm10812_vm12, %v12478_v35, %v10526_v21  ;;  %v6431_v49 = vld [vmem:[%s6776_s25 + $0xb8] sm:$0xff] }
 0x5d3   : > { %4590 = vperm.xlu1 %5744, %v10653_v22   ;;  %4580 = vperm.xlu0 %5746, %v10663_v6   ;;  %v12546_v22 = vld [vmem:[#allocation160_spill] sm:$0xff]  ;;  %v5016_v52 = vrot.slane %v5015_v13, 4  ;;  %v3903_v23 = vor.u32 1.1754944e-38, %v3902_v54  ;;  %v3919_v53 = vor.u32 1.1754944e-38, %v3918_v11  ;;  %v4991_v14 = vadd.f32 %v4990_v59, %v4989_v56 }
 0x5d4   : > { %4600 = vperm.xlu2 %5745, %v10724_v18   ;;  %v10823_v6 = vmul.f32 %v12546_v22, %v10730_v43  ;;  %v10840_v43 = vmul.f32 %v12549_v2, %v10802_v32  ;;  %v5003_v1 = vadd.f32 %v5002_v34, %v5001_v5  ;;  %v3926_v60 = vmul.f32 %v12540_v45, %v3925_v4  ;;  %v12552_v34 = vld [vmem:[#allocation81_spill] sm:$0xff] }
 0x5d5   : > { %v4306_v0 = vpop.permute.xlu1 %4305  ;;  %v4281_v18 = vpop.permute.xlu0 %4280  ;;  %v3941_v63 = vsub.f32 1.0, %v3940_v20  ;;  %v5000_v62 = vadd.f32 %v4999_v41, %v4998_v37  ;;  %vm3901_vm14 = vcmp.eq.f32.partialorder %v3900_v24, 8.507059e+37  ;;  %vm3917_vm15 = vcmp.eq.f32.partialorder %v3916_v40, 8.507059e+37  ;;  %v6433_v41 = vld [vmem:[%s6776_s25 + $0xf8] sm:$0xff] }
 0x5d6   : > { %v10849_v36 = vpop.permute.xlu2 %4435  ;;  %v4826_v31 = vmul.f32 %v6431_v49, %v4281_v18  ;;  %v10855_v35 = vsel %vm3901_vm14, %v3903_v23, %v3899_v17  ;;  %v3920_v21 = vsel %vm3917_vm15, %v3919_v53, %v3915_v55  ;;  %v3932_v50 = vand.u32 2147483647, %v12539_v46  ;;  %v12558_v49 = vld [vmem:[#allocation63_spill] sm:$0xff] }
 0x5d7   : > { %v3934_v29 = vand.u32 2147483648, %v12539_v46  ;;  %v5017_v47 = vadd.f32 %v5016_v52, %v5015_v13  ;;  %vm3928_vm0 = vweird.f32 %v12539_v46  ;;  %vm3929_vm8 = vweird.f32 %v12540_v45  ;;  %v12550_v13 = vld [vmem:[#allocation149_spill] sm:$0xff]  ;;  %v12557_v52 = vld [vmem:[#allocation46_spill] sm:$0xff]  ;;  %v6435_v23 = vld [vmem:[%s6776_s25 + $0xe0] sm:$0xff] }
 0x5d8   : > { %v5008_v28 = vadd.f32 %v4826_v31, %v4825_v27  ;;  %v4992_v37 = vrot.slane %v4991_v14, 1  ;;  %v5004_v5 = vrot.slane %v5003_v1, 2  ;;  %v3927_v61 = vadd.f32 %v12540_v45, %v3926_v60  ;;  %v6434_v27 = vld [vmem:[%s6776_s25 + $0xd0] sm:$0xff]  ;;  %vm10893_vm11 = vmor %vm3928_vm0, %vm3929_vm8  ;;  %v12559_v60 = vld [vmem:[#allocation50_spill] sm:$0xff] }
 0x5d9   : > { %v3942_v40 = vmul.f32 %v12545_v10, %v3941_v63  ;;  %v10867_v30 = vmul.f32 %v6432_v39, %v10775_v3  ;;  %v10872_v54 = vmul.f32 %v12550_v13, %v10855_v35  ;;  %v10878_v8 = vmul.f32 %v12552_v34, %v3920_v21  ;;  %v12560_v63 = vld [vmem:[#allocation75_spill] sm:$0xff]  ;;  %v6437_v34 = vld [vmem:[%s6776_s25 + $0x188] sm:$0xff] }
 0x5da   : > { %v5009_v56 = vrot.slane %v5008_v28, 4  ;;  %vm10880_vm9 = vcmp.eq.f32.partialorder %v3932_v50, 8.507059e+37  ;;  %v3935_v3 = vor.u32 1.1754944e-38, %v3934_v29  ;;  %vm3944_vm10 = vweird.f32 %v12544_v19 }
 0x5db   : > { %4605 = vperm.xlu1 %5744, %v10751_v42   ;;  %4595 = vperm.xlu0 %5746, %v10754_v51   ;;  %v12551_v42 = vld [vmem:[#allocation16_spill] sm:$0xff]  ;;  %vm3945_vm7 = vweird.f32 %v12545_v10  ;;  %v4993_v24 = vadd.f32 %v4992_v37, %v4991_v14  ;;  %v5005_v12 = vadd.f32 %v5004_v5, %v5003_v1  ;;  %v3931_v18 = vsel %vm10893_vm11, %v12540_v45, %v3927_v61 }
 0x5dc   : > { %v5010_v9 = vadd.f32 %v5009_v56, %v5008_v28  ;;  %4615 = vperm.xlu2 %5745, %v10787_v16   ;;  %v10875_v11 = vmul.f32 %v12551_v42, %v3920_v21  ;;  %v5018_v16 = vrot.slane %v5017_v47, 2  ;;  %v3943_v2 = vadd.f32 %v12545_v10, %v3942_v40  ;;  %vm10919_vm12 = vmor %vm3944_vm10, %vm3945_vm7  ;;  %v6436_v56 = vld [vmem:[%s6776_s25 + $0x1b0] sm:$0xff] }
 0x5dd   : > { %v4321_v51 = vpop.permute.xlu1 %4320  ;;  %v4296_v59 = vpop.permute.xlu0 %4295  ;;  %v3956_v31 = vmul.f32 %v12558_v49, %v12557_v52  ;;  %v4831_v53 = vmul.f32 %v6435_v23, %v4306_v0  ;;  %v3948_v14 = vand.u32 2147483647, %v12544_v19  ;;  %v3950_v1 = vand.u32 2147483648, %v12544_v19  ;;  %v6439_v23 = vld [vmem:[%s6776_s25 + $0x1c8] sm:$0xff] }
 0x5de   : > { %v10885_v20 = vpop.permute.xlu2 %4450  ;;  %v4834_v38 = vmul.f32 %v6433_v41, %v4321_v51  ;;  %v4829_v22 = vmul.f32 %v6434_v27, %v4296_v59  ;;  %v5011_v17 = vrot.slane %v5010_v9, 2  ;;  %v3972_v45 = vmul.f32 %v12560_v63, %v12559_v60 }
 0x5df   : > { %v5019_v28 = vadd.f32 %v5018_v16, %v5017_v47  ;;  %v5450_v0 = vsel %vm1595_vm1, %v5000_v62, %v4993_v24  ;;  %v5006_v29 = vrot.slane %v5005_v12, 1  ;;  %v10926_v47 = vmul.f32 %v6436_v56, %v10849_v36  ;;  %v12563_v36 = vld [vmem:[#allocation163_spill] sm:$0xff] }
 0x5e0   : > { %v5036_v55 = vadd.f32 %v4834_v38, %v10772_v57  ;;  %v5022_v46 = vadd.f32 %v10719_v7, %v4829_v22  ;;  %v10913_v57 = vsel %vm10880_vm9, %v3935_v3, %v3931_v18  ;;  %v3947_v19 = vsel %vm10919_vm12, %v12545_v10, %v3943_v2  ;;  %v6438_v3 = vld [vmem:[%s6776_s25 + $0xe8] sm:$0xff]  ;;  %v12570_v7 = vld [vmem:[#allocation166_spill] sm:$0xff] }
 0x5e1   : > { %v5012_v37 = vadd.f32 %v5011_v17, %v5010_v9  ;;  %v3957_v62 = vsub.f32 1.0, %v3956_v31  ;;  %v3889_v13 = vmul.f32 %v12563_v36, %v10802_v32  ;;  %v3951_v42 = vor.u32 1.1754944e-38, %v3950_v1  ;;  %v12565_v17 = vld [vmem:[#allocation87_spill] sm:$0xff] }
 0x5e2   : > { %v5037_v21 = vrot.slane %v5036_v55, 4  ;;  %v5023_v50 = vrot.slane %v5022_v46, 4  ;;  %v3973_v51 = vsub.f32 1.0, %v3972_v45  ;;  %v5020_v59 = vrot.slane %v5019_v28, 1  ;;  %v12569_v45 = vld [vmem:[#allocation138_spill] sm:$0xff] }
 0x5e3   : > { %4620 = vperm.xlu1 %5744, %v10796_v33   ;;  %4610 = vperm.xlu0 %5746, %v10823_v6   ;;  %v12564_v33 = vld [vmem:[#allocation43_spill] sm:$0xff]  ;;  %vm3949_vm13 = vcmp.eq.f32.partialorder %v3948_v14, 8.507059e+37  ;;  %v3964_v32 = vand.u32 2147483647, %v12557_v52  ;;  %v5013_v38 = vrot.slane %v5012_v37, 1  ;;  %v3958_v22 = vmul.f32 %v12558_v49, %v3957_v62 }
 0x5e4   : > { %v5038_v5 = vadd.f32 %v5037_v21, %v5036_v55  ;;  %v5024_v61 = vadd.f32 %v5023_v50, %v5022_v46  ;;  %4630 = vperm.xlu2 %5745, %v10840_v43   ;;  %v10938_v6 = vmul.f32 %v12564_v33, %v10913_v57  ;;  %v5007_v43 = vadd.f32 %v5006_v29, %v5005_v12 }
 0x5e5   : > { %v4411_v40 = vpop.permute.xlu1 %4410  ;;  %v4311_v39 = vpop.permute.xlu0 %4310  ;;  %v3952_v41 = vsel %vm3949_vm13, %v3951_v42, %v3947_v19  ;;  %vm3960_vm14 = vweird.f32 %v12557_v52  ;;  %vm3961_vm15 = vweird.f32 %v12558_v49  ;;  %v3974_v18 = vmul.f32 %v12560_v63, %v3973_v51 }
 0x5e6   : > { %v5025_v10 = vrot.slane %v5024_v61, 2  ;;  %v10940_v9 = vpop.permute.xlu2 %4465  ;;  %v4852_v4 = vmul.f32 %v6437_v34, %v4411_v40  ;;  %v4832_v16 = vmul.f32 %v6438_v3, %v4311_v39  ;;  %v5039_v27 = vrot.slane %v5038_v5, 2  ;;  %vm10980_vm9 = vmor %vm3960_vm14, %vm3961_vm15  ;;  %v12576_v3 = vld [vmem:[#allocation168_spill] sm:$0xff] }
 0x5e7   : > { %v5021_v2 = vadd.f32 %v5020_v59, %v5019_v28  ;;  %v10951_v55 = vmul.f32 %v12565_v17, %v3952_v41  ;;  %v3966_v46 = vand.u32 2147483648, %v12557_v52  ;;  %v5451_v31 = vsel %vm1597_vm2, %v5007_v43, %v5450_v0  ;;  %v12575_v43 = vld [vmem:[#allocation23_spill] sm:$0xff]  ;;  %v12583_v52 = vld [vmem:[#allocation89_spill] sm:$0xff] }
 0x5e8   : > { %v5026_v58 = vadd.f32 %v5025_v10, %v5024_v61  ;;  %v5029_v24 = vadd.f32 %v4832_v16, %v4831_v53  ;;  %v5099_v12 = vadd.f32 %v4852_v4, %v10836_v25  ;;  %v10957_v14 = vmul.f32 %v6439_v23, %v10885_v20  ;;  %v12568_v25 = vld [vmem:[#allocation35_spill] sm:$0xff] }
 0x5e9   : > { %vm10960_vm0 = vcmp.eq.f32.partialorder %v3964_v32, 8.507059e+37  ;;  %v3988_v28 = vmul.f32 %v12569_v45, %v12568_v25  ;;  %v5014_v21 = vadd.f32 %v5013_v38, %v5012_v37  ;;  %v5040_v50 = vadd.f32 %v5039_v27, %v5038_v5  ;;  %v6440_v37 = vld [vmem:[%s6776_s25 + $0x190] sm:$0xff]  ;;  %v12577_v32 = vld [vmem:[#allocation14_spill] sm:$0xff] }
 0x5ea   : > { %v5030_v1 = vrot.slane %v5029_v24, 4  ;;  %v3906_v20 = vmul.f32 %v12570_v7, %v10855_v35  ;;  %v3959_v0 = vadd.f32 %v12558_v49, %v3958_v22  ;;  %v5027_v29 = vrot.slane %v5026_v58, 1  ;;  %v12578_v27 = vld [vmem:[#allocation25_spill] sm:$0xff] }
 0x5eb   : > { %4635 = vperm.xlu1 %5744, %v10872_v54   ;;  %4625 = vperm.xlu0 %5746, %v3889_v13   ;;  %v3975_v61 = vadd.f32 %v12560_v63, %v3974_v18  ;;  %vm3977_vm8 = vweird.f32 %v12560_v63  ;;  %v5100_v62 = vrot.slane %v5099_v12, 4  ;;  %v3967_v39 = vor.u32 1.1754944e-38, %v3966_v46 }
 0x5ec   : > { %4645 = vperm.xlu2 %5745, %v10875_v11   ;;  %v5031_v54 = vadd.f32 %v5030_v1, %v5029_v24  ;;  %v3982_v11 = vand.u32 2147483648, %v12559_v60  ;;  %vm3976_vm10 = vweird.f32 %v12559_v60  ;;  %v3980_v13 = vand.u32 2147483647, %v12559_v60  ;;  %v12579_v1 = vld [vmem:[#allocation49_spill] sm:$0xff] }
 0x5ed   : > { %v4426_v56 = vpop.permute.xlu1 %4425  ;;  %v4416_v19 = vpop.permute.xlu0 %4415  ;;  %v3989_v33 = vsub.f32 1.0, %v3988_v28  ;;  %v5452_v42 = vsel %vm1599_vm3, %v5014_v21, %v5451_v31  ;;  %v5041_v51 = vrot.slane %v5040_v50, 1  ;;  %v3963_v10 = vsel %vm10980_vm9, %v12558_v49, %v3959_v0  ;;  %vm10993_vm11 = vmor %vm3976_vm10, %vm3977_vm8  ;;  %v12580_v28 = vld [vmem:[#allocation105_spill] sm:$0xff]  ;;  %v6443_v0 = vld [vmem:[%s6776_s25 + $0x1a8] sm:$0xff] }
 0x5ee   : > { %v10972_v40 = vpop.permute.xlu2 %4480  ;;  %v4853_v5 = vmul.f32 %v6440_v37, %v4416_v19  ;;  %v5032_v36 = vrot.slane %v5031_v54, 2  ;;  %v5028_v34 = vadd.f32 %v5027_v29, %v5026_v58  ;;  %v3979_v60 = vsel %vm10993_vm11, %v12560_v63, %v3975_v61 }
 0x5ef   : > { %v4004_v16 = vmul.f32 %v12576_v3, %v12575_v43  ;;  %v3937_v38 = vmul.f32 %v12577_v32, %v10913_v57  ;;  %v3983_v49 = vor.u32 1.1754944e-38, %v3982_v11  ;;  %v11005_v22 = vmul.f32 %v12578_v27, %v3952_v41 }
 0x5f0   : > { %v5106_v59 = vadd.f32 %v10867_v30, %v4853_v5  ;;  %v5033_v4 = vadd.f32 %v5032_v36, %v5031_v54  ;;  %v5101_v30 = vadd.f32 %v5100_v62, %v5099_v12  ;;  %vm3981_vm7 = vcmp.eq.f32.partialorder %v3980_v13, 8.507059e+37 }
 0x5f1   : > { %v3990_v63 = vmul.f32 %v12569_v45, %v3989_v33  ;;  %v5042_v58 = vadd.f32 %v5041_v51, %v5040_v50  ;;  %v5453_v12 = vsel %vm1601_vm4, %v5021_v2, %v5452_v42  ;;  %v3968_v57 = vsel %vm10960_vm0, %v3967_v39, %v3963_v10  ;;  %v6441_v2 = vld [vmem:[%s6776_s25 + $0x1a0] sm:$0xff]  ;;  %v12582_v39 = vld [vmem:[#allocation42_spill] sm:$0xff] }
 0x5f2   : > { %v5034_v24 = vrot.slane %v5033_v4, 1  ;;  %v5107_v18 = vrot.slane %v5106_v59, 4  ;;  %v11013_v41 = vsel %vm3981_vm7, %v3983_v49, %v3979_v60  ;;  %v5454_v17 = vsel %vm1603_vm5, %v5028_v34, %v5453_v12  ;;  %v6445_v12 = vld [vmem:[%s6776_s25 + $0x1c0] sm:$0xff] }
 0x5f3   : > { %4650 = vperm.xlu1 %5744, %v10878_v8   ;;  %4640 = vperm.xlu0 %5746, %v3906_v20   ;;  %v4005_v23 = vsub.f32 1.0, %v4004_v16  ;;  %v4020_v21 = vmul.f32 %v12580_v28, %v12579_v1  ;;  %v5102_v50 = vrot.slane %v5101_v30, 2  ;;  %v4855_v7 = vmul.f32 %v6441_v2, %v4426_v56 }
 0x5f4   : > { %4660 = vperm.xlu2 %5745, %v10938_v6   ;;  %v5035_v8 = vadd.f32 %v5034_v24, %v5033_v4  ;;  %v6442_v6 = vld [vmem:[%s6776_s25 + $0x1b8] sm:$0xff]  ;;  %v5108_v19 = vadd.f32 %v5107_v18, %v5106_v59  ;;  %v3991_v61 = vadd.f32 %v12569_v45, %v3990_v63  ;;  %vm3993_vm12 = vweird.f32 %v12569_v45  ;;  %v6444_v59 = vld [vmem:[%s6776_s25 + $0x1e0] sm:$0xff] }
 0x5f5   : > { %v4441_v46 = vpop.permute.xlu1 %4440  ;;  %v4431_v31 = vpop.permute.xlu0 %4430  ;;  %vm12581_vm13 = vcmask 1047559   ;;  %v4021_v56 = vsub.f32 1.0, %v4020_v21  ;;  %v3969_v11 = vmul.f32 %v12582_v39, %v3968_v57  ;;  %v3996_v36 = vand.u32 2147483647, %v12568_v25  ;;  %v12584_v4 = vld [vmem:[#allocation51_spill] sm:$0xff] }
 0x5f6   : > { %v11019_v20 = vpop.permute.xlu2 %4495  ;;  %v4858_v53 = vmul.f32 %v6442_v6, %v4441_v46  ;;  %v4856_v29 = vmul.f32 %v6443_v0, %v4431_v31  ;;  %v5455_v54 = vsel %vm1605_vm6, %v5035_v8, %v5454_v17  ;;  %v3998_v35 = vand.u32 2147483648, %v12568_v25  ;;  %v6446_v46 = vld [vmem:[%s6776_s25 + $0x1f8] sm:$0xff] }
 0x5f7   : > { %v5456_v62 = vsel %vm12581_vm13, %v5042_v58, %v5455_v54  ;;  %v4006_v13 = vmul.f32 %v12576_v3, %v4005_v23  ;;  %v5103_v33 = vadd.f32 %v5102_v50, %v5101_v30  ;;  %vm3992_vm14 = vweird.f32 %v12568_v25 }
 0x5f8   : > { %v5120_v37 = vadd.f32 %v4858_v53, %v10926_v47  ;;  %v5113_v5 = vadd.f32 %v4856_v29, %v4855_v7  ;;  %5508 = vst [vmem:[%s10475_s28 + $0x8] sm:$0xff] %v5456_v62  ;;  %v11036_v10 = vmul.f32 %v6444_v59, %v10940_v9  ;;  %v5109_v47 = vrot.slane %v5108_v19, 2  ;;  %vm11044_vm15 = vmor %vm3992_vm14, %vm3993_vm12  ;;  %v12589_v53 = vld [vmem:[#allocation57_spill] sm:$0xff]  ;;  %v6449_v59 = vld [vmem:[%s6776_s25 + $0x1d8] sm:$0xff] }
 0x5f9   : > { %v3970_v34 = vmul.f32 %v12583_v52, %v3968_v57  ;;  %v3986_v60 = vmul.f32 %v12584_v4, %v11013_v41  ;;  %v3995_v9 = vsel %vm11044_vm15, %v12569_v45, %v3991_v61  ;;  %vm3997_vm0 = vcmp.eq.f32.partialorder %v3996_v36, 8.507059e+37 }
 0x5fa   : > { %v5121_v42 = vrot.slane %v5120_v37, 4  ;;  %v5114_v51 = vrot.slane %v5113_v5, 4  ;;  %v3999_v49 = vor.u32 1.1754944e-38, %v3998_v35  ;;  %v4007_v27 = vadd.f32 %v12576_v3, %v4006_v13 }
 0x5fb   : > { %4665 = vperm.xlu1 %5744, %v10951_v55   ;;  %4655 = vperm.xlu0 %5746, %v3937_v38   ;;  %v4022_v55 = vmul.f32 %v12580_v28, %v4021_v56  ;;  %vm4009_vm8 = vweird.f32 %v12576_v3  ;;  %v5104_v24 = vrot.slane %v5103_v33, 1  ;;  %vm4008_vm9 = vweird.f32 %v12575_v43 }
 0x5fc   : > { %v5122_v25 = vadd.f32 %v5121_v42, %v5120_v37  ;;  %v5115_v30 = vadd.f32 %v5114_v51, %v5113_v5  ;;  %4675 = vperm.xlu2 %5745, %v3969_v11   ;;  %v4014_v58 = vand.u32 2147483648, %v12575_v43  ;;  %v5110_v45 = vadd.f32 %v5109_v47, %v5108_v19  ;;  %vm11066_vm10 = vmor %vm4008_vm9, %vm4009_vm8  ;;  %v6448_v42 = vld [vmem:[%s6776_s25 + $0x1e8] sm:$0xff] }
 0x5fd   : > { %v4456_v32 = vpop.permute.xlu1 %4455  ;;  %v4446_v38 = vpop.permute.xlu0 %4445  ;;  %v11059_v17 = vsel %vm3997_vm0, %v3999_v49, %v3995_v9  ;;  %v4012_v8 = vand.u32 2147483647, %v12575_v43  ;;  %v11064_v31 = vmul.f32 %v6446_v46, %v10972_v40  ;;  %v4023_v50 = vadd.f32 %v12580_v28, %v4022_v55  ;;  %v12594_v49 = vld [vmem:[#allocation28_spill] sm:$0xff] }
 0x5fe   : > { %v5116_v18 = vrot.slane %v5115_v30, 2  ;;  %v11054_v63 = vpop.permute.xlu2 %4510  ;;  %v4859_v57 = vmul.f32 %v6445_v12, %v4446_v38  ;;  %v5123_v23 = vrot.slane %v5122_v25, 2  ;;  %vm4025_vm11 = vweird.f32 %v12580_v28 }
 0x5ff   : > { %v4011_v7 = vsel %vm11066_vm10, %v12576_v3, %v4007_v27  ;;  %v4028_v43 = vand.u32 2147483647, %v12579_v1  ;;  %v4030_v40 = vand.u32 2147483648, %v12579_v1  ;;  %v4001_v0 = vmul.f32 %v12589_v53, %v11059_v17 }
 0x600   : > { %v5127_v2 = vadd.f32 %v10957_v14, %v4859_v57  ;;  %v5117_v6 = vadd.f32 %v5116_v18, %v5115_v30  ;;  %v4015_v29 = vor.u32 1.1754944e-38, %v4014_v58  ;;  %vm4024_vm7 = vweird.f32 %v12579_v1  ;;  %v12592_v1 = vld [vmem:[#allocation18_spill] sm:$0xff]  ;;  %v12596_v18 = vld [vmem:[#allocation119_spill] sm:$0xff] }
 0x601   : > { %v5105_v54 = vadd.f32 %v5104_v24, %v5103_v33  ;;  %v5111_v19 = vrot.slane %v5110_v45, 1  ;;  %vm4013_vm12 = vcmp.eq.f32.partialorder %v4012_v8, 8.507059e+37  ;;  %vm11084_vm13 = vmor %vm4024_vm7, %vm4025_vm11  ;;  %v5124_v3 = vadd.f32 %v5123_v23, %v5122_v25  ;;  %v12595_v24 = vld [vmem:[#allocation21_spill] sm:$0xff]  ;;  %v12598_v23 = vld [vmem:[#allocation47_spill] sm:$0xff] }
 0x602   : > { %v5128_v61 = vrot.slane %v5127_v2, 4  ;;  %v4016_v62 = vsel %vm4013_vm12, %v4015_v29, %v4011_v7  ;;  %v3985_v37 = vmul.f32 %v12592_v1, %v11013_v41  ;;  %v4027_v5 = vsel %vm11084_vm13, %v12580_v28, %v4023_v50  ;;  %v6450_v28 = vld [vmem:[%s6776_s25 + $0x210] sm:$0xff] }
 0x603   : > { %4680 = vperm.xlu1 %5744, %v3970_v34   ;;  %4670 = vperm.xlu0 %5746, %v11005_v22   ;;  %v6447_v22 = vld [vmem:[%s6776_s25 + $0x1d0] sm:$0xff]  ;;  %vm4029_vm14 = vcmp.eq.f32.partialorder %v4028_v43, 8.507059e+37  ;;  %v4031_v35 = vor.u32 1.1754944e-38, %v4030_v40  ;;  %v5118_v13 = vrot.slane %v5117_v6, 1  ;;  %v4036_v41 = vmul.f32 %v9844_v26, %v9780_v15 }
 0x604   : > { %4690 = vperm.xlu2 %5745, %v3986_v60   ;;  %v4861_v56 = vmul.f32 %v6447_v22, %v4456_v32  ;;  %v5129_v39 = vadd.f32 %v5128_v61, %v5127_v2  ;;  %v5112_v52 = vadd.f32 %v5111_v19, %v5110_v45  ;;  %v11102_v34 = vmul.f32 %v6450_v28, %v11019_v20  ;;  %v12593_v32 = vld [vmem:[#allocation62_spill] sm:$0xff] }
 0x605   : > { %v4471_v11 = vpop.permute.xlu1 %4470  ;;  %v4461_v36 = vpop.permute.xlu0 %4460  ;;  %v4032_v60 = vsel %vm4029_vm14, %v4031_v35, %v4027_v5  ;;  %v5125_v16 = vrot.slane %v5124_v3, 1  ;;  %v4037_v9 = vsub.f32 1.0, %v4036_v41  ;;  %v4017_v38 = vmul.f32 %v12593_v32, %v4016_v62 }
 0x606   : > { %v11094_v33 = vpop.permute.xlu2 %4525  ;;  %v4864_v51 = vmul.f32 %v6448_v42, %v4471_v11  ;;  %v4862_v47 = vmul.f32 %v6449_v59, %v4461_v36  ;;  %v5130_v4 = vrot.slane %v5129_v39, 2  ;;  %v4018_v27 = vmul.f32 %v12594_v49, %v4016_v62  ;;  %v12602_v59 = vld [vmem:[#allocation113_spill] sm:$0xff] }
 0x607   : > { %v4052_v58 = vmul.f32 %v12596_v18, %v12595_v24  ;;  %v5119_v45 = vadd.f32 %v5118_v13, %v5117_v6  ;;  %v4038_v20 = vmul.f32 %v9844_v26, %v4037_v9  ;;  %v5464_v8 = vsel %vm1595_vm1, %v5112_v52, %v5105_v54  ;;  %v6452_v52 = vld [vmem:[%s6776_s25 + $0x200] sm:$0xff] }
 0x608   : > { %v5141_v25 = vadd.f32 %v4864_v51, %v11036_v10  ;;  %v5134_v30 = vadd.f32 %v4862_v47, %v4861_v56  ;;  %v5131_v55 = vadd.f32 %v5130_v4, %v5129_v39  ;;  %v12597_v10 = vld [vmem:[#allocation38_spill] sm:$0xff]  ;;  %v4002_v21 = vmul.f32 %v12598_v23, %v11059_v17  ;;  %v12601_v51 = vld [vmem:[#allocation109_spill] sm:$0xff] }
 0x609   : > { %v4034_v46 = vmul.f32 %v12597_v10, %v4032_v60  ;;  %v4053_v50 = vsub.f32 1.0, %v4052_v58  ;;  %v5126_v2 = vadd.f32 %v5125_v16, %v5124_v3  ;;  %vm4041_vm15 = vweird.f32 %v9844_v26  ;;  %v6451_v3 = vld [vmem:[%s6776_s25 + $0x1f0] sm:$0xff]  ;;  %v12606_v10 = vld [vmem:[#allocation152_spill] sm:$0xff] }
 0x60a   : > { %v5142_v12 = vrot.slane %v5141_v25, 4  ;;  %v5135_v57 = vrot.slane %v5134_v30, 4  ;;  %v5132_v40 = vrot.slane %v5131_v55, 1  ;;  %v4039_v29 = vadd.f32 %v9844_v26, %v4038_v20  ;;  %v12605_v4 = vld [vmem:[#allocation69_spill] sm:$0xff]  ;;  %v6454_v20 = vld [vmem:[%s6776_s25 + $0x208] sm:$0xff] }
 0x60b   : > { %4695 = vperm.xlu1 %5744, %v4001_v0   ;;  %4685 = vperm.xlu0 %5746, %v3985_v37   ;;  %v4046_v0 = vand.u32 2147483648, %v9780_v15  ;;  %v4054_v54 = vmul.f32 %v12596_v18, %v4053_v50  ;;  %v5465_v19 = vsel %vm1597_vm2, %v5119_v45, %v5464_v8  ;;  %vm4040_vm0 = vweird.f32 %v9780_v15 }
 0x60c   : > { %v5143_v7 = vadd.f32 %v5142_v12, %v5141_v25  ;;  %v5136_v43 = vadd.f32 %v5135_v57, %v5134_v30  ;;  %4705 = vperm.xlu2 %5745, %v4017_v38   ;;  %v4044_v1 = vand.u32 2147483647, %v9780_v15  ;;  %vm4056_vm8 = vweird.f32 %v12595_v24  ;;  %vm11129_vm10 = vmor %vm4040_vm0, %vm4041_vm15 }
 0x60d   : > { %v4486_v6 = vpop.permute.xlu1 %4485  ;;  %v4476_v53 = vpop.permute.xlu0 %4475  ;;  %vm4057_vm9 = vweird.f32 %v12596_v18  ;;  %v4055_v39 = vadd.f32 %v12596_v18, %v4054_v54  ;;  %v5133_v11 = vadd.f32 %v5132_v40, %v5131_v55  ;;  %v4043_v15 = vsel %vm11129_vm10, %v9844_v26, %v4039_v29  ;;  %v12608_v29 = vld [vmem:[#allocation114_spill] sm:$0xff] }
 0x60e   : > { %v5144_v17 = vrot.slane %v5143_v7, 2  ;;  %v5137_v61 = vrot.slane %v5136_v43, 2  ;;  %v11119_v14 = vpop.permute.xlu2 %4540  ;;  %v4865_v62 = vmul.f32 %v6451_v3, %v4476_v53  ;;  %v4047_v36 = vor.u32 1.1754944e-38, %v4046_v0  ;;  %vm11147_vm7 = vmor %vm4056_vm8, %vm4057_vm9  ;;  %v12607_v53 = vld [vmem:[#allocation110_spill] sm:$0xff]  ;;  %v6455_v3 = vld [vmem:[%s6776_s25 + $0x228] sm:$0xff] }
 0x60f   : > { %v4062_v35 = vand.u32 2147483648, %v12595_v24  ;;  %v4068_v47 = vmul.f32 %v12602_v59, %v12601_v51  ;;  %v5466_v41 = vsel %vm1599_vm3, %v5126_v2, %v5465_v19  ;;  %v4867_v28 = vmul.f32 %v6452_v52, %v4486_v6 }
 0x610   : > { %v5145_v37 = vadd.f32 %v5144_v17, %v5143_v7  ;;  %v5138_v5 = vadd.f32 %v5137_v61, %v5136_v43  ;;  %v5148_v22 = vadd.f32 %v11064_v31, %v4865_v62  ;;  %v4060_v31 = vand.u32 2147483647, %v12595_v24  ;;  %v12609_v17 = vld [vmem:[#allocation165_spill] sm:$0xff] }
 0x611   : > { %vm4045_vm11 = vcmp.eq.f32.partialorder %v4044_v1, 8.507059e+37  ;;  %v4033_v16 = vmul.f32 %v12605_v4, %v4032_v60  ;;  %v4059_v55 = vsel %vm11147_vm7, %v12596_v18, %v4055_v39  ;;  %v5467_v32 = vsel %vm1601_vm4, %v5133_v11, %v5466_v41  ;;  %v6453_v60 = vld [vmem:[%s6776_s25 + $0x218] sm:$0xff]  ;;  %v12625_v1 = vld [vmem:[#allocation112_spill] sm:$0xff] }
 0x612   : > { %v5139_v13 = vrot.slane %v5138_v5, 1  ;;  %v5149_v42 = vrot.slane %v5148_v22, 4  ;;  %v5146_v25 = vrot.slane %v5145_v37, 1  ;;  %v11152_v9 = vsel %vm4045_vm11, %v4047_v36, %v4043_v15 }
 0x613   : > { %4710 = vperm.xlu1 %5744, %v4018_v27   ;;  %4700 = vperm.xlu0 %5746, %v4002_v21   ;;  %v4063_v24 = vor.u32 1.1754944e-38, %v4062_v35  ;;  %v4069_v58 = vsub.f32 1.0, %v4068_v47  ;;  %vm4061_vm12 = vcmp.eq.f32.partialorder %v4060_v31, 8.507059e+37  ;;  %v4076_v21 = vand.u32 2147483647, %v12601_v51 }
 0x614   : > { %v5150_v30 = vadd.f32 %v5149_v42, %v5148_v22  ;;  %4720 = vperm.xlu2 %5745, %v4034_v46   ;;  %v5140_v38 = vadd.f32 %v5139_v13, %v5138_v5  ;;  %v4049_v46 = vmul.f32 %v12606_v10, %v11152_v9  ;;  %v5147_v50 = vadd.f32 %v5146_v25, %v5145_v37  ;;  %v12614_v5 = vld [vmem:[#allocation116_spill] sm:$0xff]  ;;  %v12615_v22 = vld [vmem:[#allocation122_spill] sm:$0xff]  ;;  %v12617_v25 = vld [vmem:[#allocation111_spill] sm:$0xff] }
 0x615   : > { %v4501_v49 = vpop.permute.xlu1 %4500  ;;  %v4491_v27 = vpop.permute.xlu0 %4490  ;;  %v4064_v18 = vsel %vm4061_vm12, %v4063_v24, %v4059_v55  ;;  %v4070_v23 = vmul.f32 %v12602_v59, %v4069_v58  ;;  %vm4073_vm13 = vweird.f32 %v12602_v59  ;;  %v4078_v7 = vand.u32 2147483648, %v12601_v51 }
 0x616   : > { %v5151_v45 = vrot.slane %v5150_v30, 2  ;;  %v11158_v12 = vpop.permute.xlu2 %4555  ;;  %v4870_v57 = vmul.f32 %v6453_v60, %v4501_v49  ;;  %v4868_v8 = vmul.f32 %v6454_v20, %v4491_v27  ;;  %v5468_v43 = vsel %vm1603_vm5, %v5140_v38, %v5467_v32  ;;  %v12619_v32 = vld [vmem:[#allocation93_spill] sm:$0xff] }
 0x617   : > { %v4071_v6 = vadd.f32 %v12602_v59, %v4070_v23  ;;  %v4084_v0 = vmul.f32 %v12608_v29, %v12607_v53  ;;  %v4065_v61 = vmul.f32 %v12609_v17, %v4064_v18  ;;  %vm4072_vm14 = vweird.f32 %v12601_v51  ;;  %v12622_v60 = vld [vmem:[#allocation73_spill] sm:$0xff] }
 0x618   : > { %v5152_v2 = vadd.f32 %v5151_v45, %v5150_v30  ;;  %v5162_v40 = vadd.f32 %v4870_v57, %v11102_v34  ;;  %v5155_v19 = vadd.f32 %v4868_v8, %v4867_v28  ;;  %v4872_v62 = vmul.f32 %v6455_v3, %v11054_v63  ;;  %vm11177_vm15 = vmor %vm4072_vm14, %vm4073_vm13  ;;  %v12618_v30 = vld [vmem:[#allocation155_spill] sm:$0xff] }
 0x619   : > { %vm11181_vm0 = vcmp.eq.f32.partialorder %v4076_v21, 8.507059e+37  ;;  %v4085_v37 = vsub.f32 1.0, %v4084_v0  ;;  %v4100_v56 = vmul.f32 %v12615_v22, %v12614_v5  ;;  %v5469_v39 = vsel %vm1605_vm6, %v5147_v50, %v5468_v43 }
 0x61a   : > { %v5153_v54 = vrot.slane %v5152_v2, 1  ;;  %v4075_v63 = vsel %vm11177_vm15, %v12602_v59, %v4071_v6  ;;  %v4079_v15 = vor.u32 1.1754944e-38, %v4078_v7  ;;  %v5163_v36 = vrot.slane %v5162_v40, 4  ;;  %v6456_v59 = vld [vmem:[%s6776_s25 + $0x220] sm:$0xff] }
 0x61b   : > { %4725 = vperm.xlu1 %5744, %v4049_v46   ;;  %4715 = vperm.xlu0 %5746, %v4033_v16   ;;  %v4086_v42 = vmul.f32 %v12608_v29, %v4085_v37  ;;  %vm4088_vm8 = vweird.f32 %v12607_v53  ;;  %vm4089_vm9 = vweird.f32 %v12608_v29  ;;  %vm12616_vm10 = vcmask 1047559  }
 0x61c   : > { %v5154_v11 = vadd.f32 %v5153_v54, %v5152_v2  ;;  %4735 = vperm.xlu2 %5745, %v4065_v61   ;;  %v5156_v51 = vrot.slane %v5155_v19, 4  ;;  %v4092_v41 = vand.u32 2147483647, %v12607_v53  ;;  %v4094_v52 = vand.u32 2147483648, %v12607_v53  ;;  %vm11212_vm11 = vmor %vm4088_vm8, %vm4089_vm9  ;;  %v6459_v54 = vld [vmem:[%s6776_s25 + $0x248] sm:$0xff]  ;;  %v6460_v61 = vld [vmem:[%s6776_s25 + $0x238] sm:$0xff] }
 0x61d   : > { %v4516_v35 = vpop.permute.xlu1 %4515  ;;  %v4506_v13 = vpop.permute.xlu0 %4505  ;;  %v4080_v26 = vsel %vm11181_vm0, %v4079_v15, %v4075_v63  ;;  %v4087_v4 = vadd.f32 %v12608_v29, %v4086_v42  ;;  %v4101_v16 = vsub.f32 1.0, %v4100_v56  ;;  %6383 = vrcp.f32 %v12617_v25 }
 0x61e   : > { %v5470_v31 = vsel %vm12616_vm10, %v5154_v11, %v5469_v39  ;;  %v11195_v47 = vpop.permute.xlu2 %4570  ;;  %v4871_v28 = vmul.f32 %v6456_v59, %v4506_v13  ;;  %v4066_v55 = vmul.f32 %v12618_v30, %v4064_v18  ;;  %v4050_v38 = vmul.f32 %v12619_v32, %v11152_v9  ;;  %v6457_v18 = vld [vmem:[%s6776_s25 + $0x240] sm:$0xff]  ;;  %v12627_v11 = vld [vmem:[#allocation169_spill] sm:$0xff] }
 0x61f   : > { %5510 = vst [vmem:[%s10475_s28 + $0x18] sm:$0xff] %v5470_v31  ;;  %vm4105_vm7 = vweird.f32 %v12615_v22  ;;  %v4091_v24 = vsel %vm11212_vm11, %v12608_v29, %v4087_v4  ;;  %v4102_v58 = vmul.f32 %v12615_v22, %v4101_v16  ;;  %v4108_v9 = vand.u32 2147483647, %v12614_v5  ;;  %v6458_v29 = vld [vmem:[%s6776_s25 + $0x230] sm:$0xff] }
 0x620   : > { %v5169_v27 = vadd.f32 %v4872_v62, %v4871_v28  ;;  %v5164_v45 = vadd.f32 %v5163_v36, %v5162_v40  ;;  %v4082_v57 = vmul.f32 %v12622_v60, %v4080_v26  ;;  %v4095_v20 = vor.u32 1.1754944e-38, %v4094_v52  ;;  %v6461_v28 = vld [vmem:[%s6776_s25 + $0x258] sm:$0xff]  ;;  %v6462_v60 = vld [vmem:[%s6776_s25 + $0x250] sm:$0xff] }
 0x621   : > { %v4110_v8 = vand.u32 2147483648, %v12614_v5  ;;  %v5157_v10 = vadd.f32 %v5156_v51, %v5155_v19  ;;  %vm4093_vm12 = vcmp.eq.f32.partialorder %v4092_v41, 8.507059e+37  ;;  %v4103_v46 = vadd.f32 %v12615_v22, %v4102_v58 }
 0x622   : > { %vm4104_vm13 = vweird.f32 %v12614_v5  ;;  %v4875_v23 = vmul.f32 %v6457_v18, %v11094_v33  ;;  %v11228_v21 = vsel %vm4093_vm12, %v4095_v20, %v4091_v24  ;;  %v5170_v7 = vrot.slane %v5169_v27, 4  ;;  %v12626_v5 = vld [vmem:[#allocation158_spill] sm:$0xff] }
 0x623   : > { %4740 = vperm.xlu1 %5744, %v4066_v55   ;;  %4730 = vperm.xlu0 %5746, %v4050_v38   ;;  %vm11232_vm14 = vmor %vm4104_vm13, %vm4105_vm7  ;;  %v4111_v2 = vor.u32 1.1754944e-38, %v4110_v8  ;;  %vm4109_vm15 = vcmp.eq.f32.partialorder %v4108_v9, 8.507059e+37  ;;  %v4116_v33 = vmul.f32 %v10493_v44, %v9794_v48  ;;  %v11241_v53 = vpop.eup %6383  ;;  %v4873_v0 = vmul.f32 %v6458_v29, %v4516_v35  ;;  %v12628_v35 = vld [vmem:[#allocation82_spill] sm:$0xff] }
 0x624   : > { %4750 = vperm.xlu2 %5745, %v4082_v57   ;;  %v4107_v6 = vsel %vm11232_vm14, %v12615_v22, %v4103_v46  ;;  %6385 = vrcp.f32 %v12625_v1  ;;  %v5165_v34 = vrot.slane %v5164_v45, 2  ;;  %v5158_v37 = vrot.slane %v5157_v10, 2  ;;  %v12631_v29 = vld [vmem:[#allocation94_spill] sm:$0xff] }
 0x625   : > { %v4531_v43 = vpop.permute.xlu1 %4530  ;;  %v4521_v40 = vpop.permute.xlu0 %4520  ;;  %v4112_v62 = vsel %vm4109_vm15, %v4111_v2, %v4107_v6  ;;  %v4097_v22 = vmul.f32 %v12626_v5, %v11228_v21  ;;  %v4081_v63 = vmul.f32 %v12627_v11, %v4080_v26  ;;  %v4117_v15 = vsub.f32 1.0, %v4116_v33  ;;  %v6464_v5 = vld [vmem:[%s6776_s25 + $0x260] sm:$0xff] }
 0x626   : > { %v4876_v19 = vmul.f32 %v6459_v54, %v4531_v43  ;;  %v11245_v17 = vpop.permute.xlu2 %4585  ;;  %v4874_v3 = vmul.f32 %v6460_v61, %v4521_v40  ;;  %v5171_v36 = vadd.f32 %v5170_v7, %v5169_v27  ;;  %v4113_v13 = vmul.f32 %v12628_v35, %v4112_v62  ;;  %v12630_v7 = vld [vmem:[#allocation59_spill] sm:$0xff] }
 0x627   : > { %v4124_v42 = vand.u32 2147483647, %v9794_v48  ;;  %v4126_v31 = vand.u32 2147483648, %v9794_v48  ;;  %v4118_v52 = vmul.f32 %v10493_v44, %v4117_v15  ;;  %v4132_v59 = vmul.f32 %v11241_v53, %v12617_v25  ;;  %v12637_v54 = vld [vmem:[#allocation167_spill] sm:$0xff] }
 0x628   : > { %v5183_v56 = vadd.f32 %v4876_v19, %v4875_v23  ;;  %v5176_v39 = vadd.f32 %v4874_v3, %v4873_v0  ;;  %v4878_v4 = vmul.f32 %v6461_v28, %v11119_v14  ;;  %vm4121_vm0 = vweird.f32 %v10493_v44  ;;  %v12629_v14 = vld [vmem:[#allocation161_spill] sm:$0xff] }
 0x629   : > { %v11261_v26 = vadd.f32 %v5165_v34, %v5164_v45  ;;  %v4119_v30 = vadd.f32 %v10493_v44, %v4118_v52  ;;  %v4133_v55 = vsub.f32 1.0, %v4132_v59  ;;  %v11266_v38 = vadd.f32 %v5158_v37, %v5157_v10 }
 0x62a   : > { %v5184_v51 = vrot.slane %v5183_v56, 4  ;;  %v5177_v41 = vrot.slane %v5176_v39, 4  ;;  %v11264_v32 = vpop.eup %6385  ;;  %v5172_v49 = vrot.slane %v5171_v36, 2  ;;  %v4114_v58 = vmul.f32 %v12629_v14, %v4112_v62 }
 0x62b   : > { %4755 = vperm.xlu1 %5744, %v4097_v22   ;;  %4745 = vperm.xlu0 %5746, %v4081_v63   ;;  %vm4120_vm8 = vweird.f32 %v9794_v48  ;;  %vm4125_vm10 = vcmp.eq.f32.partialorder %v4124_v42, 8.507059e+37  ;;  %v4127_v57 = vor.u32 1.1754944e-38, %v4126_v31  ;;  %v4134_v8 = vmul.f32 %v11241_v53, %v4133_v55 }
 0x62c   : > { %v5178_v16 = vadd.f32 %v5177_v41, %v5176_v39  ;;  %4765 = vperm.xlu2 %5745, %v4113_v13   ;;  %v5185_v9 = vadd.f32 %v5184_v51, %v5183_v56  ;;  %vm4122_vm9 = vmor %vm4120_vm8, %vm4121_vm0  ;;  %vm4137_vm11 = vweird.f32 %v11241_v53  ;;  %v4142_v10 = vand.u32 2147483648, %v12617_v25  ;;  %v6466_v13 = vld [vmem:[%s6776_s25 + $0x268] sm:$0xff] }
 0x62d   : > { %v4546_v27 = vpop.permute.xlu1 %4545  ;;  %v4536_v24 = vpop.permute.xlu0 %4535  ;;  %v4123_v20 = vsel %vm4122_vm9, %v10493_v44, %v4119_v30  ;;  %v4140_v50 = vand.u32 2147483647, %v12617_v25  ;;  %v5173_v2 = vadd.f32 %v5172_v49, %v5171_v36  ;;  %v4098_v43 = vmul.f32 %v12630_v7, %v11228_v21  ;;  %v6463_v44 = vld [vmem:[%s6776_s25 + $0x270] sm:$0xff]  ;;  %v6465_v36 = vld [vmem:[%s6776_s25 + $0x278] sm:$0xff] }
 0x62e   : > { %v4877_v45 = vmul.f32 %v6462_v60, %v4536_v24  ;;  %v5179_v46 = vrot.slane %v5178_v16, 2  ;;  %v11277_v18 = vpop.permute.xlu2 %4600  ;;  %v4128_v23 = vsel %vm4125_vm10, %v4127_v57, %v4123_v20  ;;  %v4135_v40 = vadd.f32 %v11241_v53, %v4134_v8  ;;  %v12635_v49 = vld [vmem:[#allocation170_spill] sm:$0xff] }
 0x62f   : > { %vm4136_vm7 = vweird.f32 %v12617_v25  ;;  %v4881_v6 = vmul.f32 %v6463_v44, %v11158_v12  ;;  %v4130_v0 = vmul.f32 %v12631_v29, %v4128_v23  ;;  %v4148_v21 = vmul.f32 %v11264_v32, %v12625_v1 }
 0x630   : > { %v5190_v48 = vadd.f32 %v4878_v4, %v4877_v45  ;;  %vm11289_vm12 = vmor %vm4136_vm7, %vm4137_vm11  ;;  %v5167_v19 = vrot.slane %v11261_v26, 1  ;;  %v5186_v61 = vrot.slane %v5185_v9, 2  ;;  %v4143_v25 = vor.u32 1.1754944e-38, %v4142_v10 }
 0x631   : > { %v4139_v12 = vsel %vm11289_vm12, %v11241_v53, %v4135_v40  ;;  %v5160_v3 = vrot.slane %v11266_v38, 1  ;;  %v5180_v62 = vadd.f32 %v5179_v46, %v5178_v16  ;;  %vm4141_vm13 = vcmp.eq.f32.partialorder %v4140_v50, 8.507059e+37  ;;  %v12634_v16 = vld [vmem:[#allocation164_spill] sm:$0xff] }
 0x632   : > { %v5191_v33 = vrot.slane %v5190_v48, 4  ;;  %v5174_v37 = vrot.slane %v5173_v2, 1  ;;  %v4879_v22 = vmul.f32 %v6464_v5, %v4546_v27  ;;  %v4144_v11 = vsel %vm4141_vm13, %v4143_v25, %v4139_v12 }
 0x633   : > { %4770 = vperm.xlu1 %5744, %v4114_v58   ;;  %4760 = vperm.xlu0 %5746, %v4098_v43   ;;  %v4149_v63 = vsub.f32 1.0, %v4148_v21  ;;  %v4158_v42 = vand.u32 2147483648, %v12625_v1  ;;  %v5187_v31 = vadd.f32 %v5186_v61, %v5185_v9  ;;  %vm4153_vm14 = vweird.f32 %v11264_v32 }
 0x634   : > { %v5192_v34 = vadd.f32 %v5191_v33, %v5190_v48  ;;  %4780 = vperm.xlu2 %5745, %v4130_v0   ;;  %v4156_v41 = vand.u32 2147483647, %v12625_v1  ;;  %v5181_v52 = vrot.slane %v5180_v62, 1  ;;  %vm4152_vm15 = vweird.f32 %v12625_v1 }
 0x635   : > { %v4561_v56 = vpop.permute.xlu1 %4560  ;;  %v4551_v39 = vpop.permute.xlu0 %4550  ;;  %v4150_v51 = vmul.f32 %v11264_v32, %v4149_v63  ;;  %v4145_v30 = vmul.f32 %v12634_v16, %v4144_v11  ;;  %v4129_v27 = vmul.f32 %v12635_v49, %v4128_v23  ;;  %v5168_v24 = vadd.f32 %v5167_v19, %v11261_v26  ;;  %vm4154_vm0 = vmor %vm4152_vm15, %vm4153_vm14  ;;  %v12636_v23 = vld [vmem:[#allocation103_spill] sm:$0xff]  ;;  %v12638_v19 = vld [vmem:[#allocation128_spill] sm:$0xff] }
 0x636   : > { %v5193_v15 = vrot.slane %v5192_v34, 2  ;;  %v4882_v35 = vmul.f32 %v6465_v36, %v4561_v56  ;;  %v4880_v53 = vmul.f32 %v6466_v13, %v4551_v39  ;;  %v11312_v58 = vpop.permute.xlu2 %4615  ;;  %v4159_v60 = vor.u32 1.1754944e-38, %v4158_v42  ;;  %v6467_v63 = vld [vmem:[%s6776_s25 + $0x298] sm:$0xff]  ;;  %v6468_v13 = vld [vmem:[%s6776_s25 + $0x290] sm:$0xff]  ;;  %v6469_v42 = vld [vmem:[%s6776_s25 + $0x280] sm:$0xff] }
 0x637   : > { %v4151_v55 = vadd.f32 %v11264_v32, %v4150_v51  ;;  %v5161_v45 = vadd.f32 %v5160_v3, %v11266_v38  ;;  %v5175_v57 = vadd.f32 %v5174_v37, %v5173_v2  ;;  %vm4157_vm8 = vcmp.eq.f32.partialorder %v4156_v41, 8.507059e+37  ;;  %v6470_v41 = vld [vmem:[%s6776_s25 + $0x2a8] sm:$0xff]  ;;  %v6472_v16 = vld [vmem:[%s6776_s25 + $0x2b0] sm:$0xff] }
 0x638   : > { %v5204_v59 = vadd.f32 %v4882_v35, %v4881_v6  ;;  %v5197_v28 = vadd.f32 %v4880_v53, %v4879_v22  ;;  %v5194_v4 = vadd.f32 %v5193_v15, %v5192_v34  ;;  %v5188_v20 = vrot.slane %v5187_v31, 1 }
 0x639   : > { %v4155_v1 = vsel %vm4154_vm0, %v11264_v32, %v4151_v55  ;;  %v5182_v48 = vadd.f32 %v5181_v52, %v5180_v62  ;;  %v5471_v38 = vsel %vm1595_vm1, %v5168_v24, %v5161_v45  ;;  %v4146_v61 = vmul.f32 %v12638_v19, %v4144_v11  ;;  %v6473_v55 = vld [vmem:[%s6776_s25 + $0x2a0] sm:$0xff]  ;;  %v6479_v19 = vld [vmem:[%s6776_s25 + $0x2e8] sm:$0xff] }
 0x63a   : > { %v5205_v14 = vrot.slane %v5204_v59, 4  ;;  %v5198_v9 = vrot.slane %v5197_v28, 4  ;;  %v4160_v46 = vsel %vm4157_vm8, %v4159_v60, %v4155_v1  ;;  %v5195_v26 = vrot.slane %v5194_v4, 1 }
 0x63b   : > { %4785 = vperm.xlu1 %5744, %v4145_v30   ;;  %4775 = vperm.xlu0 %5746, %v4129_v27   ;;  %v4161_v50 = vmul.f32 %v12636_v23, %v4160_v46  ;;  %v5472_v2 = vsel %vm1597_vm2, %v5175_v57, %v5471_v38  ;;  %v5189_v32 = vadd.f32 %v5188_v20, %v5187_v31  ;;  %vm12639_vm9 = vcmask 1047559   ;;  %v6474_v27 = vld [vmem:[%s6776_s25 + $0x2b8] sm:$0xff]  ;;  %v6475_v57 = vld [vmem:[%s6776_s25 + $0x2d0] sm:$0xff]  ;;  %v6478_v23 = vld [vmem:[%s6776_s25 + $0x2c8] sm:$0xff] }
 0x63c   : > { %v5206_v8 = vadd.f32 %v5205_v14, %v5204_v59  ;;  %v5199_v10 = vadd.f32 %v5198_v9, %v5197_v28  ;;  %v5473_v29 = vsel %vm1599_vm3, %v5182_v48, %v5472_v2  ;;  %v5196_v0 = vadd.f32 %v5195_v26, %v5194_v4  ;;  %v6471_v59 = vld [vmem:[%s6776_s25 + $0x288] sm:$0xff]  ;;  %v6477_v48 = vld [vmem:[%s6776_s25 + $0x2d8] sm:$0xff]  ;;  %vm12640_vm10 = vmmov %vm12639_vm9 }
 0x63d   : > { %v4576_v7 = vpop.permute.xlu1 %4575  ;;  %v4566_v43 = vpop.permute.xlu0 %4565  ;;  %4795 = vperm.xlu2 %5745, %v4161_v50   ;;  %v4162_v21 = vmul.f32 %v12637_v54, %v4160_v46  ;;  %v5474_v3 = vsel %vm1601_vm4, %v5189_v32, %v5473_v29  ;;  %v4884_v28 = vmul.f32 %v6471_v59, %v11195_v47  ;;  %v4887_v49 = vmul.f32 %v6473_v55, %v11245_v17  ;;  %vm12641_vm11 = vmmov %vm12639_vm9 }
 0x63e   : > { %v5207_v40 = vrot.slane %v5206_v8, 2  ;;  %v5200_v44 = vrot.slane %v5199_v10, 2  ;;  %v4631_v37 = vpop.permute.xlu2 %4630  ;;  %v5475_v5 = vsel %vm1603_vm5, %v5196_v0, %v5474_v3  ;;  %v4885_v53 = vmul.f32 %v6468_v13, %v4576_v7 }
 0x63f   : > { %v4883_v31 = vmul.f32 %v6469_v42, %v4566_v43  ;;  %v4890_v24 = vmul.f32 %v6474_v27, %v11277_v18  ;;  %v4893_v1 = vmul.f32 %v6475_v57, %v11312_v58 }
 0x640   : > { %v5208_v6 = vadd.f32 %v5207_v40, %v5206_v8  ;;  %v5201_v33 = vadd.f32 %v5200_v44, %v5199_v10  ;;  %v6476_v10 = vld [vmem:[%s6776_s25 + $0x2c0] sm:$0xff] }
 0x641   : > { %v5211_v14 = vadd.f32 %v4884_v28, %v4883_v31  ;;  %v6482_v28 = vld [vmem:[%s6776_s25 + $0x2f8] sm:$0xff] }
 0x642   : > { %v5209_v12 = vrot.slane %v5208_v6, 1  ;;  %v5202_v25 = vrot.slane %v5201_v33, 1 }
 0x643   : > { %4800 = vperm.xlu1 %5744, %v4162_v21   ;;  %4790 = vperm.xlu0 %5746, %v4146_v61   ;;  %v5212_v8 = vrot.slane %v5211_v14, 4  ;;  %v4896_v61 = vmul.f32 %v6479_v19, %v4631_v37 }
 0x644   : > { %v5210_v62 = vadd.f32 %v5209_v12, %v5208_v6  ;;  %v5203_v34 = vadd.f32 %v5202_v25, %v5201_v33  ;;  %v6480_v25 = vld [vmem:[%s6776_s25 + $0x2e0] sm:$0xff] }
 0x645   : > { %v4591_v22 = vpop.permute.xlu1 %4590  ;;  %v4581_v56 = vpop.permute.xlu0 %4580  ;;  %v5213_v38 = vadd.f32 %v5212_v8, %v5211_v14 }
 0x646   : > { %v5476_v39 = vsel %vm1605_vm6, %v5203_v34, %v5475_v5  ;;  %v4886_v15 = vmul.f32 %v6467_v63, %v4581_v56  ;;  %v11330_v51 = vpop.permute.xlu2 %4645  ;;  %v4888_v52 = vmul.f32 %v6470_v41, %v4591_v22 }
 0x647   : > { %v5477_v11 = vsel %vm12639_vm9, %v5210_v62, %v5476_v39  ;;  %v5214_v21 = vrot.slane %v5213_v38, 2 }
 0x648   : > { %5511 = vst [vmem:[%s10475_s28 + $0x20] sm:$0xff] %v5477_v11  ;;  %v5218_v4 = vadd.f32 %v4886_v15, %v4885_v53  ;;  %v5225_v9 = vadd.f32 %v4888_v52, %v4887_v49  ;;  %v6481_v52 = vld [vmem:[%s6776_s25 + $0x2f0] sm:$0xff] }
 0x649   : > { %v5215_v39 = vadd.f32 %v5214_v21, %v5213_v38  ;;  %v6484_v21 = vld [vmem:[%s6776_s25 + $0x318] sm:$0xff] }
 0x64a   : > { %v5219_v60 = vrot.slane %v5218_v4, 4  ;;  %v5226_v50 = vrot.slane %v5225_v9, 4 }
 0x64b   : > { %v5216_v41 = vrot.slane %v5215_v39, 1 }
 0x64c   : > { %v5220_v7 = vadd.f32 %v5219_v60, %v5218_v4  ;;  %v5227_v2 = vadd.f32 %v5226_v50, %v5225_v9 }
 0x64d   : > { %v4606_v36 = vpop.permute.xlu1 %4605  ;;  %v4596_v35 = vpop.permute.xlu0 %4595  ;;  %v5217_v60 = vadd.f32 %v5216_v41, %v5215_v39 }
 0x64e   : > { %v4889_v30 = vmul.f32 %v6472_v16, %v4596_v35  ;;  %v4891_v46 = vmul.f32 %v6476_v10, %v4606_v36  ;;  %v11345_v18 = vpop.permute.xlu2 %4660  ;;  %v5221_v32 = vrot.slane %v5220_v7, 2  ;;  %v5228_v12 = vrot.slane %v5227_v2, 2 }
 0x64f   : > { %v4902_v19 = vmul.f32 %v6484_v21, %v11345_v18 }
 0x650   : > { %v5232_v45 = vadd.f32 %v4890_v24, %v4889_v30  ;;  %v5222_v62 = vadd.f32 %v5221_v32, %v5220_v7  ;;  %v5229_v63 = vadd.f32 %v5228_v12, %v5227_v2 }
 0x652   : > { %v5233_v43 = vrot.slane %v5232_v45, 4  ;;  %v5223_v36 = vrot.slane %v5222_v62, 1  ;;  %v5230_v16 = vrot.slane %v5229_v63, 1 }
 0x654   : > { %v5234_v6 = vadd.f32 %v5233_v43, %v5232_v45  ;;  %v5224_v55 = vadd.f32 %v5223_v36, %v5222_v62  ;;  %v5231_v57 = vadd.f32 %v5230_v16, %v5229_v63  ;;  %v6486_v62 = vld [vmem:[%s6776_s25 + $0x328] sm:$0xff]  ;;  %v6492_v16 = vld [vmem:[%s6776_s25 + $0x340] sm:$0xff] }
 0x655   : > { %v4621_v47 = vpop.permute.xlu1 %4620  ;;  %v4611_v20 = vpop.permute.xlu0 %4610 }
 0x656   : > { %v4894_v26 = vmul.f32 %v6477_v48, %v4621_v47  ;;  %v4892_v17 = vmul.f32 %v6478_v23, %v4611_v20  ;;  %v5235_v34 = vrot.slane %v5234_v6, 2  ;;  %v11349_v11 = vpop.permute.xlu2 %4675 }
 0x658   : > { %v5246_v40 = vadd.f32 %v4894_v26, %v4893_v1  ;;  %v5239_v44 = vadd.f32 %v4892_v17, %v4891_v46  ;;  %v5236_v35 = vadd.f32 %v5235_v34, %v5234_v6  ;;  %v5478_v1 = vsel %vm1595_vm1, %v5224_v55, %v5217_v60  ;;  %v6483_v6 = vld [vmem:[%s6776_s25 + $0x310] sm:$0xff] }
 0x659   : > { %v5479_v50 = vsel %vm1597_vm2, %v5231_v57, %v5478_v1 }
 0x65a   : > { %v5240_v58 = vrot.slane %v5239_v44, 4  ;;  %v5247_v33 = vrot.slane %v5246_v40, 4  ;;  %v5237_v49 = vrot.slane %v5236_v35, 1 }
 0x65c   : > { %v5241_v29 = vadd.f32 %v5240_v58, %v5239_v44  ;;  %v5248_v5 = vadd.f32 %v5247_v33, %v5246_v40  ;;  %v5238_v47 = vadd.f32 %v5237_v49, %v5236_v35  ;;  %v6490_v35 = vld [vmem:[%s6776_s25 + $0x330] sm:$0xff] }
 0x65d   : > { %v4636_v0 = vpop.permute.xlu1 %4635  ;;  %v4626_v54 = vpop.permute.xlu0 %4625 }
 0x65e   : > { %v4895_v3 = vmul.f32 %v6480_v25, %v4626_v54  ;;  %v5242_v22 = vrot.slane %v5241_v29, 2  ;;  %v5249_v13 = vrot.slane %v5248_v5, 2  ;;  %v4897_v59 = vmul.f32 %v6481_v52, %v4636_v0  ;;  %v4691_v8 = vpop.permute.xlu2 %4690 }
 0x65f   : > { %v5480_v7 = vsel %vm1599_vm3, %v5238_v47, %v5479_v50 }
 0x660   : > { %v5253_v56 = vadd.f32 %v4896_v61, %v4895_v3  ;;  %v5243_v53 = vadd.f32 %v5242_v22, %v5241_v29  ;;  %v5250_v27 = vadd.f32 %v5249_v13, %v5248_v5  ;;  %v6485_v61 = vld [vmem:[%s6776_s25 + $0x308] sm:$0xff]  ;;  %v6487_v5 = vld [vmem:[%s6776_s25 + $0x320] sm:$0xff]  ;;  %v4905_v13 = vmul.f32 %v6490_v35, %v11349_v11 }
 0x662   : > { %v5254_v15 = vrot.slane %v5253_v56, 4  ;;  %v5244_v14 = vrot.slane %v5243_v53, 1  ;;  %v5251_v20 = vrot.slane %v5250_v27, 1 }
 0x664   : > { %v5255_v37 = vadd.f32 %v5254_v15, %v5253_v56  ;;  %v5245_v46 = vadd.f32 %v5244_v14, %v5243_v53  ;;  %v5252_v43 = vadd.f32 %v5251_v20, %v5250_v27  ;;  %v6488_v56 = vld [vmem:[%s6776_s25 + $0x300] sm:$0xff]  ;;  %v6489_v15 = vld [vmem:[%s6776_s25 + $0x338] sm:$0xff] }
 0x665   : > { %v4651_v42 = vpop.permute.xlu1 %4650  ;;  %v4641_v31 = vpop.permute.xlu0 %4640  ;;  %v4899_v39 = vmul.f32 %v6488_v56, %v11330_v51  ;;  %v6498_v56 = vld [vmem:[%s6776_s25 + $0x370] sm:$0xff] }
 0x666   : > { %v4898_v4 = vmul.f32 %v6482_v28, %v4641_v31  ;;  %v5256_v30 = vrot.slane %v5255_v37, 2  ;;  %v5481_v44 = vsel %vm1601_vm4, %v5245_v46, %v5480_v7  ;;  %v4900_v12 = vmul.f32 %v6485_v61, %v4651_v42  ;;  %v4706_v25 = vpop.permute.xlu2 %4705  ;;  %v6491_v28 = vld [vmem:[%s6776_s25 + $0x348] sm:$0xff]  ;;  %v6494_v46 = vld [vmem:[%s6776_s25 + $0x350] sm:$0xff] }
 0x667   : > { %v5482_v2 = vsel %vm1603_vm5, %v5252_v43, %v5481_v44 }
 0x668   : > { %v5260_v24 = vadd.f32 %v4898_v4, %v4897_v59  ;;  %v5257_v9 = vadd.f32 %v5256_v30, %v5255_v37  ;;  %v5267_v53 = vadd.f32 %v4900_v12, %v4899_v39  ;;  %v4908_v4 = vmul.f32 %v6491_v28, %v4691_v8 }
 0x66a   : > { %v5261_v45 = vrot.slane %v5260_v24, 4  ;;  %v5258_v48 = vrot.slane %v5257_v9, 1  ;;  %v5268_v59 = vrot.slane %v5267_v53, 4 }
 0x66c   : > { %v5262_v10 = vadd.f32 %v5261_v45, %v5260_v24  ;;  %v5259_v38 = vadd.f32 %v5258_v48, %v5257_v9  ;;  %v5269_v11 = vadd.f32 %v5268_v59, %v5267_v53  ;;  %v6493_v45 = vld [vmem:[%s6776_s25 + $0x360] sm:$0xff] }
 0x66d   : > { %v4666_v26 = vpop.permute.xlu1 %4665  ;;  %v4656_v23 = vpop.permute.xlu0 %4655  ;;  %v4911_v57 = vmul.f32 %v6493_v45, %v4706_v25 }
 0x66e   : > { %v5263_v17 = vrot.slane %v5262_v10, 2  ;;  %v4901_v33 = vmul.f32 %v6483_v6, %v4656_v23  ;;  %v5483_v29 = vsel %vm1605_vm6, %v5259_v38, %v5482_v2  ;;  %v4903_v22 = vmul.f32 %v6487_v5, %v4666_v26  ;;  %v4721_v30 = vpop.permute.xlu2 %4720  ;;  %v6495_v26 = vld [vmem:[%s6776_s25 + $0x368] sm:$0xff] }
 0x670   : > { %v5264_v40 = vadd.f32 %v5263_v17, %v5262_v10  ;;  %v5274_v63 = vadd.f32 %v4902_v19, %v4901_v33  ;;  %v5270_v10 = vrot.slane %v5269_v11, 2  ;;  %v6496_v17 = vld [vmem:[%s6776_s25 + $0x358] sm:$0xff] }
 0x671   : > { %v6497_v19 = vld [vmem:[%s6776_s25 + $0x378] sm:$0xff] }
 0x672   : > { %v5265_v58 = vrot.slane %v5264_v40, 1  ;;  %v5275_v37 = vrot.slane %v5274_v63, 4  ;;  %v5271_v2 = vadd.f32 %v5270_v10, %v5269_v11  ;;  %v4914_v61 = vmul.f32 %v6497_v19, %v4721_v30  ;;  %v6506_v19 = vld [vmem:[%s6776_s25 + $0x3b0] sm:$0xff] }
 0x674   : > { %v5266_v32 = vadd.f32 %v5265_v58, %v5264_v40  ;;  %v5276_v55 = vadd.f32 %v5275_v37, %v5274_v63 }
 0x675   : > { %v4681_v0 = vpop.permute.xlu1 %4680  ;;  %v4671_v54 = vpop.permute.xlu0 %4670 }
 0x676   : > { %v5484_v3 = vsel %vm12640_vm10, %v5266_v32, %v5483_v29  ;;  %v4904_v34 = vmul.f32 %v6486_v62, %v4671_v54  ;;  %v4906_v36 = vmul.f32 %v6489_v15, %v4681_v0  ;;  %v5277_v9 = vrot.slane %v5276_v55, 2  ;;  %v4736_v32 = vpop.permute.xlu2 %4735 }
 0x677   : > { %5512 = vst [vmem:[%s10475_s28 + $0x28] sm:$0xff] %v5484_v3 }
 0x678   : > { %v5281_v18 = vadd.f32 %v4904_v34, %v4903_v22  ;;  %v5288_v42 = vadd.f32 %v4906_v36, %v4905_v13  ;;  %v5278_v7 = vadd.f32 %v5277_v9, %v5276_v55  ;;  %v5272_v34 = vrot.slane %v5271_v2, 1 }
 0x67a   : > { %v5282_v31 = vrot.slane %v5281_v18, 4  ;;  %v5289_v49 = vrot.slane %v5288_v42, 4  ;;  %v5279_v29 = vrot.slane %v5278_v7, 1  ;;  %v5273_v37 = vadd.f32 %v5272_v34, %v5271_v2 }
 0x67c   : > { %v5283_v27 = vadd.f32 %v5282_v31, %v5281_v18  ;;  %v5290_v60 = vadd.f32 %v5289_v49, %v5288_v42  ;;  %v5280_v63 = vadd.f32 %v5279_v29, %v5278_v7  ;;  %v6502_v7 = vld [vmem:[%s6776_s25 + $0x390] sm:$0xff] }
 0x67d   : > { %v4696_v41 = vpop.permute.xlu1 %4695  ;;  %v4686_v52 = vpop.permute.xlu0 %4685 }
 0x67e   : > { %v4907_v51 = vmul.f32 %v6492_v16, %v4686_v52  ;;  %v5284_v1 = vrot.slane %v5283_v27, 2  ;;  %v4909_v48 = vmul.f32 %v6494_v46, %v4696_v41  ;;  %v5291_v43 = vrot.slane %v5290_v60, 2  ;;  %v4751_v59 = vpop.permute.xlu2 %4750  ;;  %v6499_v46 = vld [vmem:[%s6776_s25 + $0x398] sm:$0xff] }
 0x67f   : > { %v5485_v41 = vsel %vm1595_vm1, %v5280_v63, %v5273_v37 }
 0x680   : > { %v5295_v24 = vadd.f32 %v4908_v4, %v4907_v51  ;;  %v5285_v38 = vadd.f32 %v5284_v1, %v5283_v27  ;;  %v5292_v0 = vadd.f32 %v5291_v43, %v5290_v60  ;;  %v4917_v43 = vmul.f32 %v6502_v7, %v4736_v32 }
 0x682   : > { %v5296_v14 = vrot.slane %v5295_v24, 4  ;;  %v5286_v12 = vrot.slane %v5285_v38, 1  ;;  %v5293_v15 = vrot.slane %v5292_v0, 1 }
 0x684   : > { %v5297_v47 = vadd.f32 %v5296_v14, %v5295_v24  ;;  %v5287_v35 = vadd.f32 %v5286_v12, %v5285_v38  ;;  %v5294_v52 = vadd.f32 %v5293_v15, %v5292_v0  ;;  %v6504_v38 = vld [vmem:[%s6776_s25 + $0x3a8] sm:$0xff] }
 0x685   : > { %v4711_v20 = vpop.permute.xlu1 %4710  ;;  %v4701_v8 = vpop.permute.xlu0 %4700  ;;  %v6507_v12 = vld [vmem:[%s6776_s25 + $0x3c8] sm:$0xff] }
 0x686   : > { %v4912_v23 = vmul.f32 %v6495_v26, %v4711_v20  ;;  %v4910_v50 = vmul.f32 %v6496_v17, %v4701_v8  ;;  %v5298_v58 = vrot.slane %v5297_v47, 2  ;;  %v5486_v4 = vsel %vm1597_vm2, %v5287_v35, %v5485_v41  ;;  %v4766_v8 = vpop.permute.xlu2 %4765  ;;  %v6500_v26 = vld [vmem:[%s6776_s25 + $0x388] sm:$0xff]  ;;  %v6501_v17 = vld [vmem:[%s6776_s25 + $0x3a0] sm:$0xff]  ;;  %v6510_v41 = vld [vmem:[%s6776_s25 + $0x3d0] sm:$0xff] }
 0x687   : > { %v5487_v24 = vsel %vm1599_vm3, %v5294_v52, %v5486_v4 }
 0x688   : > { %v5309_v40 = vadd.f32 %v4912_v23, %v4911_v57  ;;  %v5302_v44 = vadd.f32 %v4910_v50, %v4909_v48  ;;  %v5299_v25 = vadd.f32 %v5298_v58, %v5297_v47  ;;  %v4920_v58 = vmul.f32 %v6504_v38, %v4751_v59 }
 0x68a   : > { %v5310_v6 = vrot.slane %v5309_v40, 4  ;;  %v5303_v33 = vrot.slane %v5302_v44, 4  ;;  %v5300_v13 = vrot.slane %v5299_v25, 1 }
 0x68c   : > { %v5311_v54 = vadd.f32 %v5310_v6, %v5309_v40  ;;  %v5304_v21 = vadd.f32 %v5303_v33, %v5302_v44  ;;  %v5301_v16 = vadd.f32 %v5300_v13, %v5299_v25  ;;  %v6503_v40 = vld [vmem:[%s6776_s25 + $0x380] sm:$0xff] }
 0x68d   : > { %v4726_v3 = vpop.permute.xlu1 %4725  ;;  %v4716_v62 = vpop.permute.xlu0 %4715 }
 0x68e   : > { %v5312_v5 = vrot.slane %v5311_v54, 2  ;;  %v5305_v22 = vrot.slane %v5304_v21, 2  ;;  %v4913_v39 = vmul.f32 %v6498_v56, %v4716_v62  ;;  %v5488_v14 = vsel %vm1601_vm4, %v5301_v16, %v5487_v24  ;;  %v6508_v62 = vld [vmem:[%s6776_s25 + $0x3b8] sm:$0xff] }
 0x68f   : > { %v4915_v44 = vmul.f32 %v6503_v40, %v4726_v3  ;;  %v4781_v3 = vpop.permute.xlu2 %4780 }
 0x690   : > { %v5306_v36 = vadd.f32 %v5305_v22, %v5304_v21  ;;  %v5316_v18 = vadd.f32 %v4914_v61, %v4913_v39  ;;  %v5313_v53 = vadd.f32 %v5312_v5, %v5311_v54  ;;  %v6505_v54 = vld [vmem:[%s6776_s25 + $0x3c0] sm:$0xff] }
 0x691   : > { %v4923_v21 = vmul.f32 %v6505_v54, %v4766_v8 }
 0x692   : > { %v5307_v42 = vrot.slane %v5306_v36, 1  ;;  %v5317_v31 = vrot.slane %v5316_v18, 4  ;;  %v5314_v51 = vrot.slane %v5313_v53, 1 }
 0x694   : > { %v5318_v28 = vadd.f32 %v5317_v31, %v5316_v18  ;;  %v5308_v49 = vadd.f32 %v5307_v42, %v5306_v36  ;;  %v5315_v9 = vadd.f32 %v5314_v51, %v5313_v53  ;;  %v6509_v42 = vld [vmem:[%s6776_s25 + $0x3d8] sm:$0xff] }
 0x695   : > { %v4741_v30 = vpop.permute.xlu1 %4740  ;;  %v4731_v55 = vpop.permute.xlu0 %4730  ;;  %v4926_v31 = vmul.f32 %v6509_v42, %v4781_v3 }
 0x696   : > { %v5319_v27 = vrot.slane %v5318_v28, 2  ;;  %v5489_v60 = vsel %vm1603_vm5, %v5308_v49, %v5488_v14  ;;  %v4918_v48 = vmul.f32 %v6499_v46, %v4741_v30  ;;  %v4916_v23 = vmul.f32 %v6500_v26, %v4731_v55  ;;  %v6513_v46 = vld [vmem:[%s6776_s25 + $0x3f8] sm:$0xff]  ;;  %v6514_v26 = vld [vmem:[%s6776_s25 + $0x3e8] sm:$0xff] }
 0x697   : > { %v5490_v1 = vsel %vm1605_vm6, %v5315_v9, %v5489_v60  ;;  %v4796_v55 = vpop.permute.xlu2 %4795  ;;  %v6511_v60 = vld [vmem:[%s6776_s25 + $0x3f0] sm:$0xff] }
 0x698   : > { %v5320_v11 = vadd.f32 %v5319_v27, %v5318_v28  ;;  %v5330_v2 = vadd.f32 %v4918_v48, %v4917_v43  ;;  %v5323_v6 = vadd.f32 %v4916_v23, %v4915_v44 }
 0x69a   : > { %v5321_v45 = vrot.slane %v5320_v11, 1  ;;  %v5331_v32 = vrot.slane %v5330_v2, 4  ;;  %v5324_v5 = vrot.slane %v5323_v6, 4 }
 0x69c   : > { %v5322_v57 = vadd.f32 %v5321_v45, %v5320_v11  ;;  %v5332_v15 = vadd.f32 %v5331_v32, %v5330_v2  ;;  %v5325_v36 = vadd.f32 %v5324_v5, %v5323_v6  ;;  %v4929_v45 = vmul.f32 %v6511_v60, %v4796_v55 }
 0x69d   : > { %v4756_v47 = vpop.permute.xlu1 %4755  ;;  %v4746_v20 = vpop.permute.xlu0 %4745 }
 0x69e   : > { %v5491_v10 = vsel %vm12641_vm11, %v5322_v57, %v5490_v1  ;;  %v4919_v50 = vmul.f32 %v6501_v17, %v4746_v20  ;;  %v4921_v61 = vmul.f32 %v6506_v19, %v4756_v47  ;;  %v5333_v59 = vrot.slane %v5332_v15, 2  ;;  %v6512_v20 = vld [vmem:[%s6776_s25 + $0x3e0] sm:$0xff] }
 0x69f   : > { %5513 = vst [vmem:[%s10475_s28 + $0x30] sm:$0xff] %v5491_v10  ;;  %v5326_v28 = vrot.slane %v5325_v36, 2 }
 0x6a0   : > { %v5337_v33 = vadd.f32 %v4920_v58, %v4919_v50  ;;  %v5334_v27 = vadd.f32 %v5333_v59, %v5332_v15 }
 0x6a1   : > { %v5327_v24 = vadd.f32 %v5326_v28, %v5325_v36 }
 0x6a2   : > { %v5338_v22 = vrot.slane %v5337_v33, 4  ;;  %v5335_v17 = vrot.slane %v5334_v27, 1 }
 0x6a3   : > { %v5328_v50 = vrot.slane %v5327_v24, 1 }
 0x6a4   : > { %v5339_v18 = vadd.f32 %v5338_v22, %v5337_v33  ;;  %v5336_v33 = vadd.f32 %v5335_v17, %v5334_v27 }
 0x6a5   : > { %v4771_v29 = vpop.permute.xlu1 %4770  ;;  %v4761_v0 = vpop.permute.xlu0 %4760 }
 0x6a6   : > { %v4924_v25 = vmul.f32 %v6507_v12, %v4771_v29  ;;  %v4922_v34 = vmul.f32 %v6508_v62, %v4761_v0  ;;  %v5340_v4 = vrot.slane %v5339_v18, 2  ;;  %v5329_v29 = vadd.f32 %v5328_v50, %v5327_v24 }
 0x6a8   : > { %v5351_v56 = vadd.f32 %v4924_v25, %v4923_v21  ;;  %v5344_v39 = vadd.f32 %v4922_v34, %v4921_v61  ;;  %v5341_v11 = vadd.f32 %v5340_v4, %v5339_v18  ;;  %v5492_v34 = vsel %vm1595_vm1, %v5336_v33, %v5329_v29  ;;  %vm12642_vm1 = vmmov %vm12639_vm9 }
 0x6aa   : > { %v5345_v63 = vrot.slane %v5344_v39, 4  ;;  %v5352_v35 = vrot.slane %v5351_v56, 4  ;;  %v5342_v7 = vrot.slane %v5341_v11, 1 }
 0x6ac   : > { %v5346_v13 = vadd.f32 %v5345_v63, %v5344_v39  ;;  %v5353_v16 = vadd.f32 %v5352_v35, %v5351_v56  ;;  %v5343_v0 = vadd.f32 %v5342_v7, %v5341_v11 }
 0x6ad   : > { %v4786_v53 = vpop.permute.xlu1 %4785  ;;  %v4776_v37 = vpop.permute.xlu0 %4775 }
 0x6ae   : > { %v4925_v52 = vmul.f32 %v6510_v41, %v4776_v37  ;;  %v5347_v30 = vrot.slane %v5346_v13, 2  ;;  %v5354_v14 = vrot.slane %v5353_v16, 2  ;;  %v4927_v8 = vmul.f32 %v6512_v20, %v4786_v53 }
 0x6af   : > { %v5493_v32 = vsel %vm1597_vm2, %v5343_v0, %v5492_v34 }
 0x6b0   : > { %v5358_v51 = vadd.f32 %v4926_v31, %v4925_v52  ;;  %v5348_v57 = vadd.f32 %v5347_v30, %v5346_v13  ;;  %v5355_v43 = vadd.f32 %v5354_v14, %v5353_v16 }
 0x6b2   : > { %v5359_v49 = vrot.slane %v5358_v51, 4  ;;  %v5349_v38 = vrot.slane %v5348_v57, 1  ;;  %v5356_v54 = vrot.slane %v5355_v43, 1 }
 0x6b4   : > { %v5360_v9 = vadd.f32 %v5359_v49, %v5358_v51  ;;  %v5350_v61 = vadd.f32 %v5349_v38, %v5348_v57  ;;  %v5357_v5 = vadd.f32 %v5356_v54, %v5355_v43 }
 0x6b5   : > { %v4801_v1 = vpop.permute.xlu1 %4800  ;;  %v4791_v47 = vpop.permute.xlu0 %4790 }
 0x6b6   : > { %v5361_v10 = vrot.slane %v5360_v9, 2  ;;  %v4930_v48 = vmul.f32 %v6513_v46, %v4801_v1  ;;  %v4928_v23 = vmul.f32 %v6514_v26, %v4791_v47  ;;  %v5494_v56 = vsel %vm1599_vm3, %v5350_v61, %v5493_v32 }
 0x6b7   : > { %v5495_v36 = vsel %vm1601_vm4, %v5357_v5, %v5494_v56 }
 0x6b8   : > { %v5372_v40 = vadd.f32 %v4930_v48, %v4929_v45  ;;  %v5365_v44 = vadd.f32 %v4928_v23, %v4927_v8  ;;  %v5362_v58 = vadd.f32 %v5361_v10, %v5360_v9 }
 0x6ba   : > { %v5373_v2 = vrot.slane %v5372_v40, 4  ;;  %v5366_v6 = vrot.slane %v5365_v44, 4  ;;  %v5363_v12 = vrot.slane %v5362_v58, 1 }
 0x6bc   : > { %v5374_v21 = vadd.f32 %v5373_v2, %v5372_v40  ;;  %v5367_v19 = vadd.f32 %v5366_v6, %v5365_v44  ;;  %v5364_v39 = vadd.f32 %v5363_v12, %v5362_v58 }
 0x6be   : > { %v5375_v25 = vrot.slane %v5374_v21, 2  ;;  %v5368_v62 = vrot.slane %v5367_v19, 2  ;;  %v5496_v13 = vsel %vm1603_vm5, %v5364_v39, %v5495_v36 }
 0x6c0   : > { %v5376_v3 = vadd.f32 %v5375_v25, %v5374_v21  ;;  %v5369_v22 = vadd.f32 %v5368_v62, %v5367_v19 }
 0x6c2   : > { %v5377_v63 = vrot.slane %v5376_v3, 1  ;;  %v5370_v15 = vrot.slane %v5369_v22, 1 }
 0x6c4   : > { %v5378_v18 = vadd.f32 %v5377_v63, %v5376_v3  ;;  %v5371_v35 = vadd.f32 %v5370_v15, %v5369_v22 }
 0x6c6   : > { %v5497_v53 = vsel %vm1605_vm6, %v5371_v35, %v5496_v13 }
 0x6c7   : > { %v5498_v37 = vsel %vm12642_vm1, %v5378_v18, %v5497_v53 }
 0x6c8   : > { %5514 = vst [vmem:[%s10475_s28 + $0x38] sm:$0xff] %v5498_v37 }
 0x6c9   : > { %6602 = shalt.err (!%p6599_p10)
}
 0x6ca   : > { %s6651_s6 = smov 128   ;;  %s6652_s18 = smov 8  }
 0x6cb   : > { %5688 = dma.vmem_to_hbm [thread:$0]  (%p6742_p3), %s5529_s16, 1024, %s5531_s29, %s5516_s30, %s6651_s6, %s6651_s6, %s6652_s18  }
 0x6cc PF: > { %s5545_s23 = sand.u32 1, %s6633_s12   ;;  %p12643_p12 = scmp.ge.s32.totalorder %s6645_s15, 2 }
 0x6cd   : > { %s5546_s27 = scalar_lea.sflag [#allocation4], %s5545_s23 }
 0x6ce   : > { %p5699_p13 = pnand %p12643_p12, %p6708_p6 }
 0x6d0   : > { %p5700_p0 = pneg %p5699_p13 }
 0x6d2   : > { %6628 = dma.done.wait (%p5700_p0), %s5546_s27, 1024  }
 0x6d3   : > { %6630 = vsyncadd (%p5700_p0), %s5546_s27, 4294966272  ;;  %p17_p5 = scmp.ge.s32.totalorder %s6726_s26, 4   ;;  %s12644_s12 = smov %s6637_s13 }
 0x6d4   : > { %s12645_s13 = smov %s6641_s14  ;;  %s12646_s14 = smov %s6738_s4 }
 0x6d5   : > { %s12647_s15 = smov %s6726_s26  ;;  %19 = sbr.rel (!%p17_p5) target bundleno = 6 (0x6), region = 81 }
 0x6da   :  { %5552 = vsyncpa [#allocation3], 1 }
 0x6db   :  { %5554 = vsyncpa [#allocation3 + $0x1], 1 }
 0x6dc   :  { %5555 = vsyncpa [#allocation6], 1 }
 0x6dd   :  { %5556 = vsyncpa [#allocation4], 1 }
 0x6de   :  { %5558 = vsyncpa [#allocation4 + $0x1], 1 }

</bundles_post_ra>
